<compile_context>
chip_gen: v5e
topology: v5e:2x2
jax: 0.10.0
libtpu: 0.0.40
codegen_flags: <defaults>
</compile_context>

<pallas_src>
import functools

import jax
import jax.numpy as jnp
from jax.experimental import pallas as pl
from jax.experimental.pallas import tpu as pltpu


# ---------------------------------------------------------------------------
# Helpers
# ---------------------------------------------------------------------------

def _pointwise(x2d, w, b=None):
    """1x1 conv as a channel matmul on a (M, cin) slab.

    cin > 8  -> MXU matmul (f32 accumulate; Mosaic pads cout to the MXU tile).
    cin <= 8 -> statically unrolled VPU broadcast-MAC (an MXU push for a
                4/8-deep contraction is pure latency).
    """
    cin, cout = w.shape
    if cin > 8:
        y = jnp.dot(x2d, w, preferred_element_type=jnp.float32)
    else:
        y = jnp.zeros((x2d.shape[0], cout), jnp.float32)
        for c in range(cin):                       # static unroll (cin small)
            y = y + x2d[:, c:c + 1] * w[c:c + 1, :]
    if b is not None:
        y = y + b
    return y


def _padded_bytes(shape, itemsize=4):
    """Physical VMEM bytes of an f32 array: last dim -> 128 lanes, 2nd-to-last
    -> 8 sublanes (what the hardware actually allocates when C is tiny)."""
    s = list(shape)
    if len(s) == 0:
        s = [1, 1]
    if len(s) == 1:
        s = [1] + s
    s[-1] = -(-s[-1] // 128) * 128
    s[-2] = -(-s[-2] // 8) * 8
    n = 1
    for d in s:
        n *= int(d)
    return itemsize * n


# ---------------------------------------------------------------------------
# Fused MBConv kernel (one grid step == Bt batch elements)
# ---------------------------------------------------------------------------

def _mbconv_kernel(*refs, k, s, bt, has_expand, se, use_res):
    it = iter(refs)
    x_ref = next(it)
    w_exp_ref = b_exp_ref = None
    if has_expand:
        w_exp_ref, b_exp_ref = next(it), next(it)
    w_dw_ref, b_dw_ref = next(it), next(it)
    w_se1_ref = w_se2_ref = None
    if se:
        w_se1_ref, w_se2_ref = next(it), next(it)
    w_proj_ref, b_proj_ref = next(it), next(it)
    o_ref = next(it)
    xp_ref = next(it)            # VMEM scratch: (Hp, Wp, hid) padded dw input

    _, H, W, cin = x_ref.shape
    _, Ho, Wo, cout = o_ref.shape
    Hp, Wp, hid = xp_ref.shape
    pad = k // 2

    # ---- zero only the halo ring (interior is fully overwritten per image) --
    if pad > 0:
        xp_ref[0:pad, :, :] = jnp.zeros((pad, Wp, hid), jnp.float32)
        xp_ref[Hp - pad:Hp, :, :] = jnp.zeros((pad, Wp, hid), jnp.float32)
        xp_ref[pad:pad + H, 0:pad, :] = jnp.zeros((H, pad, hid), jnp.float32)
        xp_ref[pad:pad + H, Wp - pad:Wp, :] = jnp.zeros((H, pad, hid),
                                                        jnp.float32)

    # Hoist (tiny) weights out of the per-image loop.
    w_dw = w_dw_ref[...]
    b_dw = b_dw_ref[...]
    if has_expand:
        w_exp, b_exp = w_exp_ref[...], b_exp_ref[...]
    if se:
        w_se1, w_se2 = w_se1_ref[...], w_se2_ref[...]
    w_proj, b_proj = w_proj_ref[...], b_proj_ref[...]

    for b in range(bt):                       # static unroll over the Bt block
        # ---- expand 1x1 conv + folded BN + ReLU6 ---------------------------
        x2d = x_ref[b].reshape(H * W, cin)
        if has_expand:
            h2d = jnp.clip(_pointwise(x2d, w_exp, b_exp), 0.0, 6.0)
        else:
            h2d = x2d

        # ---- depthwise k x k conv + folded BN + ReLU6 ----------------------
        # Drop the hidden activation into the scratch interior; read per-tap
        # REF windows so only the accumulator stays live in vregs.
        xp_ref[pad:pad + H, pad:pad + W, :] = h2d.reshape(H, W, hid)

        acc = jnp.zeros((Ho, Wo, hid), jnp.float32)
        for kh in range(k):                    # static unroll of k*k taps
            for kw in range(k):
                if s == 1:
                    win = xp_ref[kh:kh + Ho, kw:kw + Wo, :]
                else:
                    win = xp_ref[pl.ds(kh, Ho, s), pl.ds(kw, Wo, s), :]
                acc = acc + win * w_dw[kh, kw, :]
        h = jnp.clip(acc + b_dw, 0.0, 6.0)                    # (Ho, Wo, hid)

        # ---- squeeze-and-excite (fully fused) ------------------------------
        if se:
            pooled = jnp.mean(h.reshape(Ho * Wo, hid), axis=0, keepdims=True)
            z = jnp.maximum(_pointwise(pooled, w_se1), 0.0)
            gate = jax.nn.sigmoid(_pointwise(z, w_se2))       # (1, hid)
            h = h * gate

        # ---- projection 1x1 conv + folded BN (+ residual) ------------------
        out2d = _pointwise(h.reshape(Ho * Wo, hid), w_proj, b_proj)
        if use_res:                # s==1 and inp==oup => Ho==H, Wo==W
            out2d = out2d + x_ref[b].reshape(H * W, cin)      # re-read input
        o_ref[b] = out2d.reshape(Ho, Wo, cout)


# ---------------------------------------------------------------------------
# Wrapper: batch-blocked grid, resident weights, generation-aware VMEM budget
# ---------------------------------------------------------------------------

def mbconv_forward(x_nchw, params, *, inp, oup, k, s, expand, se):
    use_res = (s == 1 and inp == oup)
    has_expand = (expand != 1)
    hid = inp * expand
    pad = k // 2

    x = jnp.transpose(x_nchw, (0, 2, 3, 1)).astype(jnp.float32)  # NCHW->NHWC
    N, H, W, _ = x.shape
    Ho = (H + 2 * pad - k) // s + 1
    Wo = (W + 2 * pad - k) // s + 1
    Hp, Wp = H + 2 * pad, W + 2 * pad

    # Weights / biases: constant index_map -> stay VMEM-resident across grid.
    weights = []
    if has_expand:
        weights += [params["w_exp"], params["b_exp"]]
    weights += [params["w_dw"], params["b_dw"]]
    if se:
        weights += [params["w_se1"], params["w_se2"]]
    weights += [params["w_proj"], params["b_proj"]]

    # Generation-aware VMEM capacity (v5e/v6e: 128 MiB, v7x: 64 MiB).
    try:
        vmem_cap = int(getattr(pltpu.get_tpu_info(), "vmem_capacity_bytes",
                               128 << 20))
    except Exception:  # noqa: BLE001 - best-effort query only
        vmem_cap = 128 << 20

    w_bytes = sum(_padded_bytes(a.shape) for a in weights)

    def step_bytes(bt):
        blk = (_padded_bytes((bt, H, W, inp))
               + _padded_bytes((bt, Ho, Wo, oup)))
        scr = _padded_bytes((Hp, Wp, hid))
        tmp = 10 * _padded_bytes((max(H, Ho), max(W, Wo), hid))
        return 2 * blk + 2 * w_bytes + scr + tmp      # 2x: double-buffering

    # Pick the largest batch block (<=8, divides N) that fits the budget.
    budget = min(int(0.4 * vmem_cap), 48 << 20)
    bt = 1
    for cand in range(min(N, 8), 0, -1):
        if N % cand == 0 and step_bytes(cand) <= budget:
            bt = cand
            break

    vmem_limit = int(min(max(2 * step_bytes(bt), 16 << 20),
                         int(0.85 * vmem_cap)))

    def _resident(arr):
        nd = arr.ndim
        return pl.BlockSpec(arr.shape, lambda n, _nd=nd: (0,) * _nd)

    in_specs = [pl.BlockSpec((bt, H, W, inp), lambda n: (n, 0, 0, 0))]
    in_specs += [_resident(a) for a in weights]
    out_spec = pl.BlockSpec((bt, Ho, Wo, oup), lambda n: (n, 0, 0, 0))

    kern = functools.partial(_mbconv_kernel, k=k, s=s, bt=bt,
                             has_expand=has_expand, se=se, use_res=use_res)

    out = pl.pallas_call(
        kern,
        out_shape=jax.ShapeDtypeStruct((N, Ho, Wo, oup), jnp.float32),
        grid_spec=pltpu.PrefetchScalarGridSpec(
            num_scalar_prefetch=0,
            grid=(N // bt,),
            in_specs=in_specs,
            out_specs=out_spec,
            scratch_shapes=[pltpu.VMEM((Hp, Wp, hid), jnp.float32)],
        ),
        compiler_params=pltpu.CompilerParams(
            dimension_semantics=("parallel",),
            vmem_limit_bytes=vmem_limit),
    )(x, *weights)
    return jnp.transpose(out, (0, 3, 1, 2))                   # NHWC -> NCHW


# ---------------------------------------------------------------------------
# Parameters: raw (conv weights + BN stats) and BN-folded (kernel-ready)
# ---------------------------------------------------------------------------

def make_mbconv_params(key, inp, oup, k, expand, se, r=4):
    """Raw parameters mirroring the nn.Module (conv weights + BN statistics)."""
    hid = inp * expand
    keys = jax.random.split(key, 20)

    def bn_stats(i, c):
        return (1.0 + 0.1 * jax.random.normal(keys[i], (c,), jnp.float32),   # gamma
                0.1 * jax.random.normal(keys[i + 1], (c,), jnp.float32),     # beta
                0.1 * jax.random.normal(keys[i + 2], (c,), jnp.float32),     # mean
                0.5 + jax.random.uniform(keys[i + 3], (c,), jnp.float32))    # var

    p = {}
    if expand != 1:
        # Conv2d(inp, hid, 1): weight (hid, inp, 1, 1) stored as (inp, hid)
        p["w_exp"] = 0.2 * jax.random.normal(keys[0], (inp, hid), jnp.float32)
        p["bn_exp"] = bn_stats(1, hid)
    # Depthwise Conv2d(hid, hid, k, groups=hid): (hid, 1, k, k) -> (k, k, hid)
    p["w_dw"] = 0.2 * jax.random.normal(keys[5], (k, k, hid), jnp.float32)
    p["bn_dw"] = bn_stats(6, hid)
    if se:
        p["w_se1"] = 0.3 * jax.random.normal(keys[10], (hid, hid // r), jnp.float32)
        p["w_se2"] = 0.3 * jax.random.normal(keys[11], (hid // r, hid), jnp.float32)
    # Conv2d(hid, oup, 1): (oup, hid, 1, 1) -> (hid, oup)
    p["w_proj"] = 0.2 * jax.random.normal(keys[12], (hid, oup), jnp.float32)
    p["bn_proj"] = bn_stats(13, oup)
    return p


def fold_mbconv_params(raw, *, expand, se, eps=1e-5):
    """Fold eval-mode BatchNorm into the conv weights (kernel only adds bias)."""
    def fold(bn):
        g, b, m, v = bn
        scale = g / jnp.sqrt(v + eps)
        return scale, b - m * scale

    p = {}
    if expand != 1:
        sc, bi = fold(raw["bn_exp"])
        p["w_exp"] = raw["w_exp"] * sc[None, :]
        p["b_exp"] = bi[None, :]
    sc, bi = fold(raw["bn_dw"])
    p["w_dw"] = raw["w_dw"] * sc[None, None, :]
    p["b_dw"] = bi[None, :]
    if se:
        p["w_se1"] = raw["w_se1"]
        p["w_se2"] = raw["w_se2"]
    sc, bi = fold(raw["bn_proj"])
    p["w_proj"] = raw["w_proj"] * sc[None, :]
    p["b_proj"] = bi[None, :]
    return p


# ---------------------------------------------------------------------------
# Pure-JAX reference (un-folded BN, exact PyTorch eval-mode math)
# ---------------------------------------------------------------------------

def mbconv_reference(x_nchw, raw, *, inp, oup, k, s, expand, se, eps=1e-5):
    use_res = (s == 1 and inp == oup)

    def bn(y, p):
        g, b, m, v = p
        return (y - m) * (g / jnp.sqrt(v + eps)) + b

    x = jnp.transpose(x_nchw, (0, 2, 3, 1)).astype(jnp.float32)
    N, H, W, _ = x.shape
    h = x
    if expand != 1:
        h = jnp.clip(bn(h @ raw["w_exp"], raw["bn_exp"]), 0.0, 6.0)
    pad = k // 2
    Ho = (H + 2 * pad - k) // s + 1
    Wo = (W + 2 * pad - k) // s + 1
    xp = jnp.pad(h, ((0, 0), (pad, pad), (pad, pad), (0, 0)))
    acc = jnp.zeros((N, Ho, Wo, h.shape[-1]), jnp.float32)
    for kh in range(k):
        for kw in range(k):
            win = xp[:, kh:kh + (Ho - 1) * s + 1:s, kw:kw + (Wo - 1) * s + 1:s, :]
            acc = acc + win * raw["w_dw"][kh, kw, :]
    h = jnp.clip(bn(acc, raw["bn_dw"]), 0.0, 6.0)
    if se:
        pooled = jnp.mean(h, axis=(1, 2))
        gate = jax.nn.sigmoid(jnp.maximum(pooled @ raw["w_se1"], 0.0) @ raw["w_se2"])
        h = h * gate[:, None, None, :]
    out = bn(h @ raw["w_proj"], raw["bn_proj"])
    if use_res:
        out = out + x
    return jnp.transpose(out, (0, 3, 1, 2))


# ---------------------------------------------------------------------------

if __name__ == "__main__":
    # MBConv(inp=4, oup=4, k=3, s=1, expand=2, se=True) -> residual path active
    inp, oup, k, s, expand, se = 4, 4, 3, 1, 2, True
    N, H, W = 2, 16, 16

    key = jax.random.PRNGKey(0)
    kx, kp = jax.random.split(key)
    x = jax.random.normal(kx, (N, inp, H, W), jnp.float32)       # NCHW input
    raw = make_mbconv_params(kp, inp, oup, k, expand, se)
    params = fold_mbconv_params(raw, expand=expand, se=se)

    out = mbconv_forward(x, params, inp=inp, oup=oup, k=k, s=s,
                         expand=expand, se=se)
    out = jax.block_until_ready(out)

    ref = mbconv_reference(x, raw, inp=inp, oup=oup, k=k, s=s,
                           expand=expand, se=se)
    assert out.shape == (N, oup, H, W), out.shape
    assert jnp.allclose(out, ref, atol=1e-4, rtol=1e-4), "mismatch vs reference"

    print("KERNEL_OK")
</pallas_src>

<mosaic_0001>
module attributes {stable_mosaic.version = 11 : i64} {
  func.func @_mbconv_kernel(%arg0: i32, %arg1: memref<2x16x16x4xf32, #tpu.memory_space<vmem>>, %arg2: memref<4x8xf32, #tpu.memory_space<vmem>>, %arg3: memref<1x8xf32, #tpu.memory_space<vmem>>, %arg4: memref<3x3x8xf32, #tpu.memory_space<vmem>>, %arg5: memref<1x8xf32, #tpu.memory_space<vmem>>, %arg6: memref<8x2xf32, #tpu.memory_space<vmem>>, %arg7: memref<2x8xf32, #tpu.memory_space<vmem>>, %arg8: memref<8x4xf32, #tpu.memory_space<vmem>>, %arg9: memref<1x4xf32, #tpu.memory_space<vmem>>, %arg10: memref<2x16x16x4xf32, #tpu.memory_space<vmem>>, %arg11: memref<18x18x8xf32, #tpu.memory_space<vmem>>) attributes {dimension_semantics = [#tpu.dimension_semantics<parallel>], iteration_bounds = array<i64: 1>, scalar_prefetch = 0 : i64, scratch_operands = 1 : i64, tpu.core_type = #tpu.core_type<tc>, window_params = [{transform_indices = @transform_0, window_bounds = array<i64: 2, 16, 16, 4>}, {pipeline_mode = #tpu.pipeline_mode<synchronous>, transform_indices = @transform_1, window_bounds = array<i64: 4, 8>}, {pipeline_mode = #tpu.pipeline_mode<synchronous>, transform_indices = @transform_2, window_bounds = array<i64: 1, 8>}, {pipeline_mode = #tpu.pipeline_mode<synchronous>, transform_indices = @transform_3, window_bounds = array<i64: 3, 3, 8>}, {pipeline_mode = #tpu.pipeline_mode<synchronous>, transform_indices = @transform_4, window_bounds = array<i64: 1, 8>}, {pipeline_mode = #tpu.pipeline_mode<synchronous>, transform_indices = @transform_5, window_bounds = array<i64: 8, 2>}, {pipeline_mode = #tpu.pipeline_mode<synchronous>, transform_indices = @transform_6, window_bounds = array<i64: 2, 8>}, {pipeline_mode = #tpu.pipeline_mode<synchronous>, transform_indices = @transform_7, window_bounds = array<i64: 8, 4>}, {pipeline_mode = #tpu.pipeline_mode<synchronous>, transform_indices = @transform_8, window_bounds = array<i64: 1, 4>}, {transform_indices = @transform_9, window_bounds = array<i64: 2, 16, 16, 4>}]} {
    %cst = arith.constant 0.000000e+00 : f32
    %0 = vector.broadcast %cst : f32 to vector<1x18x8xf32>
    %c0 = arith.constant 0 : index
    %c0_0 = arith.constant 0 : index
    %c0_1 = arith.constant 0 : index
    %1 = vector.load %arg11[%c0, %c0_0, %c0_1] : memref<18x18x8xf32, #tpu.memory_space<vmem>>, vector<1x18x8xf32>
    tpu.vector_store %arg11[%c0, %c0_0, %c0_1], %0 {strides = array<i32>} : memref<18x18x8xf32, #tpu.memory_space<vmem>>, vector<1x18x8xf32>,
    %cst_2 = arith.constant 0.000000e+00 : f32
    %2 = vector.broadcast %cst_2 : f32 to vector<1x18x8xf32>
    %c17 = arith.constant 17 : index
    %c0_3 = arith.constant 0 : index
    %c0_4 = arith.constant 0 : index
    %3 = vector.load %arg11[%c17, %c0_3, %c0_4] : memref<18x18x8xf32, #tpu.memory_space<vmem>>, vector<1x18x8xf32>
    tpu.vector_store %arg11[%c17, %c0_3, %c0_4], %2 {strides = array<i32>} : memref<18x18x8xf32, #tpu.memory_space<vmem>>, vector<1x18x8xf32>,
    %cst_5 = arith.constant 0.000000e+00 : f32
    %4 = vector.broadcast %cst_5 : f32 to vector<16x1x8xf32>
    %c1 = arith.constant 1 : index
    %c0_6 = arith.constant 0 : index
    %c0_7 = arith.constant 0 : index
    %5 = vector.load %arg11[%c1, %c0_6, %c0_7] : memref<18x18x8xf32, #tpu.memory_space<vmem>>, vector<16x1x8xf32>
    tpu.vector_store %arg11[%c1, %c0_6, %c0_7], %4 {strides = array<i32>} : memref<18x18x8xf32, #tpu.memory_space<vmem>>, vector<16x1x8xf32>,
    %cst_8 = arith.constant 0.000000e+00 : f32
    %6 = vector.broadcast %cst_8 : f32 to vector<16x1x8xf32>
    %c1_9 = arith.constant 1 : index
    %c17_10 = arith.constant 17 : index
    %c0_11 = arith.constant 0 : index
    %7 = vector.load %arg11[%c1_9, %c17_10, %c0_11] : memref<18x18x8xf32, #tpu.memory_space<vmem>>, vector<16x1x8xf32>
    tpu.vector_store %arg11[%c1_9, %c17_10, %c0_11], %6 {strides = array<i32>} : memref<18x18x8xf32, #tpu.memory_space<vmem>>, vector<16x1x8xf32>,
    %c0_12 = arith.constant 0 : index
    %c0_13 = arith.constant 0 : index
    %c0_14 = arith.constant 0 : index
    %8 = vector.load %arg4[%c0_12, %c0_13, %c0_14] : memref<3x3x8xf32, #tpu.memory_space<vmem>>, vector<3x3x8xf32>
    %c0_15 = arith.constant 0 : index
    %c0_16 = arith.constant 0 : index
    %9 = vector.load %arg5[%c0_15, %c0_16] : memref<1x8xf32, #tpu.memory_space<vmem>>, vector<1x8xf32>
    %c0_17 = arith.constant 0 : index
    %c0_18 = arith.constant 0 : index
    %10 = vector.load %arg2[%c0_17, %c0_18] : memref<4x8xf32, #tpu.memory_space<vmem>>, vector<4x8xf32>
    %c0_19 = arith.constant 0 : index
    %c0_20 = arith.constant 0 : index
    %11 = vector.load %arg3[%c0_19, %c0_20] : memref<1x8xf32, #tpu.memory_space<vmem>>, vector<1x8xf32>
    %c0_21 = arith.constant 0 : index
    %c0_22 = arith.constant 0 : index
    %12 = vector.load %arg6[%c0_21, %c0_22] : memref<8x2xf32, #tpu.memory_space<vmem>>, vector<8x2xf32>
    %c0_23 = arith.constant 0 : index
    %c0_24 = arith.constant 0 : index
    %13 = vector.load %arg7[%c0_23, %c0_24] : memref<2x8xf32, #tpu.memory_space<vmem>>, vector<2x8xf32>
    %c0_25 = arith.constant 0 : index
    %c0_26 = arith.constant 0 : index
    %14 = vector.load %arg8[%c0_25, %c0_26] : memref<8x4xf32, #tpu.memory_space<vmem>>, vector<8x4xf32>
    %c0_27 = arith.constant 0 : index
    %c0_28 = arith.constant 0 : index
    %15 = vector.load %arg9[%c0_27, %c0_28] : memref<1x4xf32, #tpu.memory_space<vmem>>, vector<1x4xf32>
    %c0_29 = arith.constant 0 : index
    %c0_30 = arith.constant 0 : index
    %c0_31 = arith.constant 0 : index
    %c0_32 = arith.constant 0 : index
    %16 = vector.load %arg1[%c0_29, %c0_30, %c0_31, %c0_32] : memref<2x16x16x4xf32, #tpu.memory_space<vmem>>, vector<1x16x16x4xf32>
    %17 = vector.shape_cast %16 : vector<1x16x16x4xf32> to vector<16x16x4xf32>
    %18 = vector.shape_cast %17 : vector<16x16x4xf32> to vector<256x4xf32>
    %cst_33 = arith.constant 0.000000e+00 : f32
    %19 = vector.broadcast %cst_33 : f32 to vector<256x8xf32>
    %20 = vector.extract_strided_slice %18 {offsets = [0, 0], sizes = [256, 1], strides = [1, 1]} : vector<256x4xf32> to vector<256x1xf32>
    %21 = vector.extract_strided_slice %10 {offsets = [0, 0], sizes = [1, 8], strides = [1, 1]} : vector<4x8xf32> to vector<1x8xf32>
    %22 = vector.broadcast %20 : vector<256x1xf32> to vector<256x8xf32>
    %23 = vector.broadcast %21 : vector<1x8xf32> to vector<256x8xf32>
    %24 = arith.mulf %22, %23 : vector<256x8xf32>
    %25 = arith.addf %19, %24 : vector<256x8xf32>
    %26 = vector.extract_strided_slice %18 {offsets = [0, 1], sizes = [256, 1], strides = [1, 1]} : vector<256x4xf32> to vector<256x1xf32>
    %27 = vector.extract_strided_slice %10 {offsets = [1, 0], sizes = [1, 8], strides = [1, 1]} : vector<4x8xf32> to vector<1x8xf32>
    %28 = vector.broadcast %26 : vector<256x1xf32> to vector<256x8xf32>
    %29 = vector.broadcast %27 : vector<1x8xf32> to vector<256x8xf32>
    %30 = arith.mulf %28, %29 : vector<256x8xf32>
    %31 = arith.addf %25, %30 : vector<256x8xf32>
    %32 = vector.extract_strided_slice %18 {offsets = [0, 2], sizes = [256, 1], strides = [1, 1]} : vector<256x4xf32> to vector<256x1xf32>
    %33 = vector.extract_strided_slice %10 {offsets = [2, 0], sizes = [1, 8], strides = [1, 1]} : vector<4x8xf32> to vector<1x8xf32>
    %34 = vector.broadcast %32 : vector<256x1xf32> to vector<256x8xf32>
    %35 = vector.broadcast %33 : vector<1x8xf32> to vector<256x8xf32>
    %36 = arith.mulf %34, %35 : vector<256x8xf32>
    %37 = arith.addf %31, %36 : vector<256x8xf32>
    %38 = vector.extract_strided_slice %18 {offsets = [0, 3], sizes = [256, 1], strides = [1, 1]} : vector<256x4xf32> to vector<256x1xf32>
    %39 = vector.extract_strided_slice %10 {offsets = [3, 0], sizes = [1, 8], strides = [1, 1]} : vector<4x8xf32> to vector<1x8xf32>
    %40 = vector.broadcast %38 : vector<256x1xf32> to vector<256x8xf32>
    %41 = vector.broadcast %39 : vector<1x8xf32> to vector<256x8xf32>
    %42 = arith.mulf %40, %41 : vector<256x8xf32>
    %43 = arith.addf %37, %42 : vector<256x8xf32>
    %44 = vector.broadcast %11 : vector<1x8xf32> to vector<256x8xf32>
    %45 = arith.addf %43, %44 : vector<256x8xf32>
    %cst_34 = arith.constant 0.000000e+00 : f32
    %cst_35 = arith.constant 6.000000e+00 : f32
    %46 = vector.broadcast %cst_34 : f32 to vector<256x8xf32>
    %47 = arith.maximumf %46, %45 : vector<256x8xf32>
    %48 = vector.broadcast %cst_35 : f32 to vector<256x8xf32>
    %49 = arith.minimumf %48, %47 : vector<256x8xf32>
    %50 = vector.shape_cast %49 : vector<256x8xf32> to vector<16x16x8xf32>
    %c1_36 = arith.constant 1 : index
    %c1_37 = arith.constant 1 : index
    %c0_38 = arith.constant 0 : index
    %51 = vector.load %arg11[%c1_36, %c1_37, %c0_38] : memref<18x18x8xf32, #tpu.memory_space<vmem>>, vector<16x16x8xf32>
    tpu.vector_store %arg11[%c1_36, %c1_37, %c0_38], %50 {strides = array<i32>} : memref<18x18x8xf32, #tpu.memory_space<vmem>>, vector<16x16x8xf32>,
    %cst_39 = arith.constant 0.000000e+00 : f32
    %52 = vector.broadcast %cst_39 : f32 to vector<16x16x8xf32>
    %c0_40 = arith.constant 0 : index
    %c0_41 = arith.constant 0 : index
    %c0_42 = arith.constant 0 : index
    %53 = vector.load %arg11[%c0_40, %c0_41, %c0_42] : memref<18x18x8xf32, #tpu.memory_space<vmem>>, vector<16x16x8xf32>
    %54 = vector.extract_strided_slice %8 {offsets = [0, 0, 0], sizes = [1, 1, 8], strides = [1, 1, 1]} : vector<3x3x8xf32> to vector<1x1x8xf32>
    %55 = vector.shape_cast %54 : vector<1x1x8xf32> to vector<8xf32>
    %56 = vector.shape_cast %55 : vector<8xf32> to vector<1x1x8xf32>
    %57 = vector.broadcast %56 : vector<1x1x8xf32> to vector<16x16x8xf32>
    %58 = arith.mulf %53, %57 : vector<16x16x8xf32>
    %59 = arith.addf %52, %58 : vector<16x16x8xf32>
    %c0_43 = arith.constant 0 : index
    %c1_44 = arith.constant 1 : index
    %c0_45 = arith.constant 0 : index
    %60 = vector.load %arg11[%c0_43, %c1_44, %c0_45] : memref<18x18x8xf32, #tpu.memory_space<vmem>>, vector<16x16x8xf32>
    %61 = vector.extract_strided_slice %8 {offsets = [0, 1, 0], sizes = [1, 1, 8], strides = [1, 1, 1]} : vector<3x3x8xf32> to vector<1x1x8xf32>
    %62 = vector.shape_cast %61 : vector<1x1x8xf32> to vector<8xf32>
    %63 = vector.shape_cast %62 : vector<8xf32> to vector<1x1x8xf32>
    %64 = vector.broadcast %63 : vector<1x1x8xf32> to vector<16x16x8xf32>
    %65 = arith.mulf %60, %64 : vector<16x16x8xf32>
    %66 = arith.addf %59, %65 : vector<16x16x8xf32>
    %c0_46 = arith.constant 0 : index
    %c2 = arith.constant 2 : index
    %c0_47 = arith.constant 0 : index
    %67 = vector.load %arg11[%c0_46, %c2, %c0_47] : memref<18x18x8xf32, #tpu.memory_space<vmem>>, vector<16x16x8xf32>
    %68 = vector.extract_strided_slice %8 {offsets = [0, 2, 0], sizes = [1, 1, 8], strides = [1, 1, 1]} : vector<3x3x8xf32> to vector<1x1x8xf32>
    %69 = vector.shape_cast %68 : vector<1x1x8xf32> to vector<8xf32>
    %70 = vector.shape_cast %69 : vector<8xf32> to vector<1x1x8xf32>
    %71 = vector.broadcast %70 : vector<1x1x8xf32> to vector<16x16x8xf32>
    %72 = arith.mulf %67, %71 : vector<16x16x8xf32>
    %73 = arith.addf %66, %72 : vector<16x16x8xf32>
    %c1_48 = arith.constant 1 : index
    %c0_49 = arith.constant 0 : index
    %c0_50 = arith.constant 0 : index
    %74 = vector.load %arg11[%c1_48, %c0_49, %c0_50] : memref<18x18x8xf32, #tpu.memory_space<vmem>>, vector<16x16x8xf32>
    %75 = vector.extract_strided_slice %8 {offsets = [1, 0, 0], sizes = [1, 1, 8], strides = [1, 1, 1]} : vector<3x3x8xf32> to vector<1x1x8xf32>
    %76 = vector.shape_cast %75 : vector<1x1x8xf32> to vector<8xf32>
    %77 = vector.shape_cast %76 : vector<8xf32> to vector<1x1x8xf32>
    %78 = vector.broadcast %77 : vector<1x1x8xf32> to vector<16x16x8xf32>
    %79 = arith.mulf %74, %78 : vector<16x16x8xf32>
    %80 = arith.addf %73, %79 : vector<16x16x8xf32>
    %c1_51 = arith.constant 1 : index
    %c1_52 = arith.constant 1 : index
    %c0_53 = arith.constant 0 : index
    %81 = vector.load %arg11[%c1_51, %c1_52, %c0_53] : memref<18x18x8xf32, #tpu.memory_space<vmem>>, vector<16x16x8xf32>
    %82 = vector.extract_strided_slice %8 {offsets = [1, 1, 0], sizes = [1, 1, 8], strides = [1, 1, 1]} : vector<3x3x8xf32> to vector<1x1x8xf32>
    %83 = vector.shape_cast %82 : vector<1x1x8xf32> to vector<8xf32>
    %84 = vector.shape_cast %83 : vector<8xf32> to vector<1x1x8xf32>
    %85 = vector.broadcast %84 : vector<1x1x8xf32> to vector<16x16x8xf32>
    %86 = arith.mulf %81, %85 : vector<16x16x8xf32>
    %87 = arith.addf %80, %86 : vector<16x16x8xf32>
    %c1_54 = arith.constant 1 : index
    %c2_55 = arith.constant 2 : index
    %c0_56 = arith.constant 0 : index
    %88 = vector.load %arg11[%c1_54, %c2_55, %c0_56] : memref<18x18x8xf32, #tpu.memory_space<vmem>>, vector<16x16x8xf32>
    %89 = vector.extract_strided_slice %8 {offsets = [1, 2, 0], sizes = [1, 1, 8], strides = [1, 1, 1]} : vector<3x3x8xf32> to vector<1x1x8xf32>
    %90 = vector.shape_cast %89 : vector<1x1x8xf32> to vector<8xf32>
    %91 = vector.shape_cast %90 : vector<8xf32> to vector<1x1x8xf32>
    %92 = vector.broadcast %91 : vector<1x1x8xf32> to vector<16x16x8xf32>
    %93 = arith.mulf %88, %92 : vector<16x16x8xf32>
    %94 = arith.addf %87, %93 : vector<16x16x8xf32>
    %c2_57 = arith.constant 2 : index
    %c0_58 = arith.constant 0 : index
    %c0_59 = arith.constant 0 : index
    %95 = vector.load %arg11[%c2_57, %c0_58, %c0_59] : memref<18x18x8xf32, #tpu.memory_space<vmem>>, vector<16x16x8xf32>
    %96 = vector.extract_strided_slice %8 {offsets = [2, 0, 0], sizes = [1, 1, 8], strides = [1, 1, 1]} : vector<3x3x8xf32> to vector<1x1x8xf32>
    %97 = vector.shape_cast %96 : vector<1x1x8xf32> to vector<8xf32>
    %98 = vector.shape_cast %97 : vector<8xf32> to vector<1x1x8xf32>
    %99 = vector.broadcast %98 : vector<1x1x8xf32> to vector<16x16x8xf32>
    %100 = arith.mulf %95, %99 : vector<16x16x8xf32>
    %101 = arith.addf %94, %100 : vector<16x16x8xf32>
    %c2_60 = arith.constant 2 : index
    %c1_61 = arith.constant 1 : index
    %c0_62 = arith.constant 0 : index
    %102 = vector.load %arg11[%c2_60, %c1_61, %c0_62] : memref<18x18x8xf32, #tpu.memory_space<vmem>>, vector<16x16x8xf32>
    %103 = vector.extract_strided_slice %8 {offsets = [2, 1, 0], sizes = [1, 1, 8], strides = [1, 1, 1]} : vector<3x3x8xf32> to vector<1x1x8xf32>
    %104 = vector.shape_cast %103 : vector<1x1x8xf32> to vector<8xf32>
    %105 = vector.shape_cast %104 : vector<8xf32> to vector<1x1x8xf32>
    %106 = vector.broadcast %105 : vector<1x1x8xf32> to vector<16x16x8xf32>
    %107 = arith.mulf %102, %106 : vector<16x16x8xf32>
    %108 = arith.addf %101, %107 : vector<16x16x8xf32>
    %c2_63 = arith.constant 2 : index
    %c2_64 = arith.constant 2 : index
    %c0_65 = arith.constant 0 : index
    %109 = vector.load %arg11[%c2_63, %c2_64, %c0_65] : memref<18x18x8xf32, #tpu.memory_space<vmem>>, vector<16x16x8xf32>
    %110 = vector.extract_strided_slice %8 {offsets = [2, 2, 0], sizes = [1, 1, 8], strides = [1, 1, 1]} : vector<3x3x8xf32> to vector<1x1x8xf32>
    %111 = vector.shape_cast %110 : vector<1x1x8xf32> to vector<8xf32>
    %112 = vector.shape_cast %111 : vector<8xf32> to vector<1x1x8xf32>
    %113 = vector.broadcast %112 : vector<1x1x8xf32> to vector<16x16x8xf32>
    %114 = arith.mulf %109, %113 : vector<16x16x8xf32>
    %115 = arith.addf %108, %114 : vector<16x16x8xf32>
    %116 = vector.shape_cast %9 : vector<1x8xf32> to vector<1x1x8xf32>
    %117 = vector.broadcast %116 : vector<1x1x8xf32> to vector<16x16x8xf32>
    %118 = arith.addf %115, %117 : vector<16x16x8xf32>
    %cst_66 = arith.constant 0.000000e+00 : f32
    %cst_67 = arith.constant 6.000000e+00 : f32
    %119 = vector.broadcast %cst_66 : f32 to vector<16x16x8xf32>
    %120 = arith.maximumf %119, %118 : vector<16x16x8xf32>
    %121 = vector.broadcast %cst_67 : f32 to vector<16x16x8xf32>
    %122 = arith.minimumf %121, %120 : vector<16x16x8xf32>
    %123 = vector.shape_cast %122 : vector<16x16x8xf32> to vector<256x8xf32>
    %cst_68 = arith.constant dense<0.000000e+00> : vector<8xf32>
    %124 = vector.multi_reduction <add>, %123, %cst_68 [0] : vector<256x8xf32> to vector<8xf32>
    %125 = vector.shape_cast %124 : vector<8xf32> to vector<1x8xf32>
    %cst_69 = arith.constant 2.560000e+02 : f32
    %126 = vector.broadcast %cst_69 : f32 to vector<1x8xf32>
    %127 = arith.divf %125, %126 : vector<1x8xf32>
    %cst_70 = arith.constant 0.000000e+00 : f32
    %128 = vector.broadcast %cst_70 : f32 to vector<1x2xf32>
    %129 = vector.extract_strided_slice %127 {offsets = [0, 0], sizes = [1, 1], strides = [1, 1]} : vector<1x8xf32> to vector<1x1xf32>
    %130 = vector.extract_strided_slice %12 {offsets = [0, 0], sizes = [1, 2], strides = [1, 1]} : vector<8x2xf32> to vector<1x2xf32>
    %131 = vector.broadcast %129 : vector<1x1xf32> to vector<1x2xf32>
    %132 = arith.mulf %131, %130 : vector<1x2xf32>
    %133 = arith.addf %128, %132 : vector<1x2xf32>
    %134 = vector.extract_strided_slice %127 {offsets = [0, 1], sizes = [1, 1], strides = [1, 1]} : vector<1x8xf32> to vector<1x1xf32>
    %135 = vector.extract_strided_slice %12 {offsets = [1, 0], sizes = [1, 2], strides = [1, 1]} : vector<8x2xf32> to vector<1x2xf32>
    %136 = vector.broadcast %134 : vector<1x1xf32> to vector<1x2xf32>
    %137 = arith.mulf %136, %135 : vector<1x2xf32>
    %138 = arith.addf %133, %137 : vector<1x2xf32>
    %139 = vector.extract_strided_slice %127 {offsets = [0, 2], sizes = [1, 1], strides = [1, 1]} : vector<1x8xf32> to vector<1x1xf32>
    %140 = vector.extract_strided_slice %12 {offsets = [2, 0], sizes = [1, 2], strides = [1, 1]} : vector<8x2xf32> to vector<1x2xf32>
    %141 = vector.broadcast %139 : vector<1x1xf32> to vector<1x2xf32>
    %142 = arith.mulf %141, %140 : vector<1x2xf32>
    %143 = arith.addf %138, %142 : vector<1x2xf32>
    %144 = vector.extract_strided_slice %127 {offsets = [0, 3], sizes = [1, 1], strides = [1, 1]} : vector<1x8xf32> to vector<1x1xf32>
    %145 = vector.extract_strided_slice %12 {offsets = [3, 0], sizes = [1, 2], strides = [1, 1]} : vector<8x2xf32> to vector<1x2xf32>
    %146 = vector.broadcast %144 : vector<1x1xf32> to vector<1x2xf32>
    %147 = arith.mulf %146, %145 : vector<1x2xf32>
    %148 = arith.addf %143, %147 : vector<1x2xf32>
    %149 = vector.extract_strided_slice %127 {offsets = [0, 4], sizes = [1, 1], strides = [1, 1]} : vector<1x8xf32> to vector<1x1xf32>
    %150 = vector.extract_strided_slice %12 {offsets = [4, 0], sizes = [1, 2], strides = [1, 1]} : vector<8x2xf32> to vector<1x2xf32>
    %151 = vector.broadcast %149 : vector<1x1xf32> to vector<1x2xf32>
    %152 = arith.mulf %151, %150 : vector<1x2xf32>
    %153 = arith.addf %148, %152 : vector<1x2xf32>
    %154 = vector.extract_strided_slice %127 {offsets = [0, 5], sizes = [1, 1], strides = [1, 1]} : vector<1x8xf32> to vector<1x1xf32>
    %155 = vector.extract_strided_slice %12 {offsets = [5, 0], sizes = [1, 2], strides = [1, 1]} : vector<8x2xf32> to vector<1x2xf32>
    %156 = vector.broadcast %154 : vector<1x1xf32> to vector<1x2xf32>
    %157 = arith.mulf %156, %155 : vector<1x2xf32>
    %158 = arith.addf %153, %157 : vector<1x2xf32>
    %159 = vector.extract_strided_slice %127 {offsets = [0, 6], sizes = [1, 1], strides = [1, 1]} : vector<1x8xf32> to vector<1x1xf32>
    %160 = vector.extract_strided_slice %12 {offsets = [6, 0], sizes = [1, 2], strides = [1, 1]} : vector<8x2xf32> to vector<1x2xf32>
    %161 = vector.broadcast %159 : vector<1x1xf32> to vector<1x2xf32>
    %162 = arith.mulf %161, %160 : vector<1x2xf32>
    %163 = arith.addf %158, %162 : vector<1x2xf32>
    %164 = vector.extract_strided_slice %127 {offsets = [0, 7], sizes = [1, 1], strides = [1, 1]} : vector<1x8xf32> to vector<1x1xf32>
    %165 = vector.extract_strided_slice %12 {offsets = [7, 0], sizes = [1, 2], strides = [1, 1]} : vector<8x2xf32> to vector<1x2xf32>
    %166 = vector.broadcast %164 : vector<1x1xf32> to vector<1x2xf32>
    %167 = arith.mulf %166, %165 : vector<1x2xf32>
    %168 = arith.addf %163, %167 : vector<1x2xf32>
    %cst_71 = arith.constant 0.000000e+00 : f32
    %169 = vector.broadcast %cst_71 : f32 to vector<1x2xf32>
    %170 = arith.maximumf %168, %169 : vector<1x2xf32>
    %cst_72 = arith.constant 0.000000e+00 : f32
    %171 = vector.broadcast %cst_72 : f32 to vector<1x8xf32>
    %172 = vector.extract_strided_slice %170 {offsets = [0, 0], sizes = [1, 1], strides = [1, 1]} : vector<1x2xf32> to vector<1x1xf32>
    %173 = vector.extract_strided_slice %13 {offsets = [0, 0], sizes = [1, 8], strides = [1, 1]} : vector<2x8xf32> to vector<1x8xf32>
    %174 = vector.broadcast %172 : vector<1x1xf32> to vector<1x8xf32>
    %175 = arith.mulf %174, %173 : vector<1x8xf32>
    %176 = arith.addf %171, %175 : vector<1x8xf32>
    %177 = vector.extract_strided_slice %170 {offsets = [0, 1], sizes = [1, 1], strides = [1, 1]} : vector<1x2xf32> to vector<1x1xf32>
    %178 = vector.extract_strided_slice %13 {offsets = [1, 0], sizes = [1, 8], strides = [1, 1]} : vector<2x8xf32> to vector<1x8xf32>
    %179 = vector.broadcast %177 : vector<1x1xf32> to vector<1x8xf32>
    %180 = arith.mulf %179, %178 : vector<1x8xf32>
    %181 = arith.addf %176, %180 : vector<1x8xf32>
    %182 = arith.negf %181 : vector<1x8xf32>
    %183 = math.exp %182 : vector<1x8xf32>
    %cst_73 = arith.constant 1.000000e+00 : f32
    %184 = vector.broadcast %cst_73 : f32 to vector<1x8xf32>
    %185 = arith.addf %184, %183 : vector<1x8xf32>
    %186 = arith.divf %184, %185 : vector<1x8xf32>
    %187 = vector.shape_cast %186 : vector<1x8xf32> to vector<1x1x8xf32>
    %188 = vector.broadcast %187 : vector<1x1x8xf32> to vector<16x16x8xf32>
    %189 = arith.mulf %122, %188 : vector<16x16x8xf32>
    %190 = vector.shape_cast %189 : vector<16x16x8xf32> to vector<256x8xf32>
    %cst_74 = arith.constant 0.000000e+00 : f32
    %191 = vector.broadcast %cst_74 : f32 to vector<256x4xf32>
    %192 = vector.extract_strided_slice %190 {offsets = [0, 0], sizes = [256, 1], strides = [1, 1]} : vector<256x8xf32> to vector<256x1xf32>
    %193 = vector.extract_strided_slice %14 {offsets = [0, 0], sizes = [1, 4], strides = [1, 1]} : vector<8x4xf32> to vector<1x4xf32>
    %194 = vector.broadcast %192 : vector<256x1xf32> to vector<256x4xf32>
    %195 = vector.broadcast %193 : vector<1x4xf32> to vector<256x4xf32>
    %196 = arith.mulf %194, %195 : vector<256x4xf32>
    %197 = arith.addf %191, %196 : vector<256x4xf32>
    %198 = vector.extract_strided_slice %190 {offsets = [0, 1], sizes = [256, 1], strides = [1, 1]} : vector<256x8xf32> to vector<256x1xf32>
    %199 = vector.extract_strided_slice %14 {offsets = [1, 0], sizes = [1, 4], strides = [1, 1]} : vector<8x4xf32> to vector<1x4xf32>
    %200 = vector.broadcast %198 : vector<256x1xf32> to vector<256x4xf32>
    %201 = vector.broadcast %199 : vector<1x4xf32> to vector<256x4xf32>
    %202 = arith.mulf %200, %201 : vector<256x4xf32>
    %203 = arith.addf %197, %202 : vector<256x4xf32>
    %204 = vector.extract_strided_slice %190 {offsets = [0, 2], sizes = [256, 1], strides = [1, 1]} : vector<256x8xf32> to vector<256x1xf32>
    %205 = vector.extract_strided_slice %14 {offsets = [2, 0], sizes = [1, 4], strides = [1, 1]} : vector<8x4xf32> to vector<1x4xf32>
    %206 = vector.broadcast %204 : vector<256x1xf32> to vector<256x4xf32>
    %207 = vector.broadcast %205 : vector<1x4xf32> to vector<256x4xf32>
    %208 = arith.mulf %206, %207 : vector<256x4xf32>
    %209 = arith.addf %203, %208 : vector<256x4xf32>
    %210 = vector.extract_strided_slice %190 {offsets = [0, 3], sizes = [256, 1], strides = [1, 1]} : vector<256x8xf32> to vector<256x1xf32>
    %211 = vector.extract_strided_slice %14 {offsets = [3, 0], sizes = [1, 4], strides = [1, 1]} : vector<8x4xf32> to vector<1x4xf32>
    %212 = vector.broadcast %210 : vector<256x1xf32> to vector<256x4xf32>
    %213 = vector.broadcast %211 : vector<1x4xf32> to vector<256x4xf32>
    %214 = arith.mulf %212, %213 : vector<256x4xf32>
    %215 = arith.addf %209, %214 : vector<256x4xf32>
    %216 = vector.extract_strided_slice %190 {offsets = [0, 4], sizes = [256, 1], strides = [1, 1]} : vector<256x8xf32> to vector<256x1xf32>
    %217 = vector.extract_strided_slice %14 {offsets = [4, 0], sizes = [1, 4], strides = [1, 1]} : vector<8x4xf32> to vector<1x4xf32>
    %218 = vector.broadcast %216 : vector<256x1xf32> to vector<256x4xf32>
    %219 = vector.broadcast %217 : vector<1x4xf32> to vector<256x4xf32>
    %220 = arith.mulf %218, %219 : vector<256x4xf32>
    %221 = arith.addf %215, %220 : vector<256x4xf32>
    %222 = vector.extract_strided_slice %190 {offsets = [0, 5], sizes = [256, 1], strides = [1, 1]} : vector<256x8xf32> to vector<256x1xf32>
    %223 = vector.extract_strided_slice %14 {offsets = [5, 0], sizes = [1, 4], strides = [1, 1]} : vector<8x4xf32> to vector<1x4xf32>
    %224 = vector.broadcast %222 : vector<256x1xf32> to vector<256x4xf32>
    %225 = vector.broadcast %223 : vector<1x4xf32> to vector<256x4xf32>
    %226 = arith.mulf %224, %225 : vector<256x4xf32>
    %227 = arith.addf %221, %226 : vector<256x4xf32>
    %228 = vector.extract_strided_slice %190 {offsets = [0, 6], sizes = [256, 1], strides = [1, 1]} : vector<256x8xf32> to vector<256x1xf32>
    %229 = vector.extract_strided_slice %14 {offsets = [6, 0], sizes = [1, 4], strides = [1, 1]} : vector<8x4xf32> to vector<1x4xf32>
    %230 = vector.broadcast %228 : vector<256x1xf32> to vector<256x4xf32>
    %231 = vector.broadcast %229 : vector<1x4xf32> to vector<256x4xf32>
    %232 = arith.mulf %230, %231 : vector<256x4xf32>
    %233 = arith.addf %227, %232 : vector<256x4xf32>
    %234 = vector.extract_strided_slice %190 {offsets = [0, 7], sizes = [256, 1], strides = [1, 1]} : vector<256x8xf32> to vector<256x1xf32>
    %235 = vector.extract_strided_slice %14 {offsets = [7, 0], sizes = [1, 4], strides = [1, 1]} : vector<8x4xf32> to vector<1x4xf32>
    %236 = vector.broadcast %234 : vector<256x1xf32> to vector<256x4xf32>
    %237 = vector.broadcast %235 : vector<1x4xf32> to vector<256x4xf32>
    %238 = arith.mulf %236, %237 : vector<256x4xf32>
    %239 = arith.addf %233, %238 : vector<256x4xf32>
    %240 = vector.broadcast %15 : vector<1x4xf32> to vector<256x4xf32>
    %241 = arith.addf %239, %240 : vector<256x4xf32>
    %c0_75 = arith.constant 0 : index
    %c0_76 = arith.constant 0 : index
    %c0_77 = arith.constant 0 : index
    %c0_78 = arith.constant 0 : index
    %242 = vector.load %arg1[%c0_75, %c0_76, %c0_77, %c0_78] : memref<2x16x16x4xf32, #tpu.memory_space<vmem>>, vector<1x16x16x4xf32>
    %243 = vector.shape_cast %242 : vector<1x16x16x4xf32> to vector<16x16x4xf32>
    %244 = vector.shape_cast %243 : vector<16x16x4xf32> to vector<256x4xf32>
    %245 = arith.addf %241, %244 : vector<256x4xf32>
    %246 = vector.shape_cast %245 : vector<256x4xf32> to vector<16x16x4xf32>
    %c0_79 = arith.constant 0 : index
    %c0_80 = arith.constant 0 : index
    %c0_81 = arith.constant 0 : index
    %c0_82 = arith.constant 0 : index
    %247 = vector.load %arg10[%c0_79, %c0_80, %c0_81, %c0_82] : memref<2x16x16x4xf32, #tpu.memory_space<vmem>>, vector<1x16x16x4xf32>
    %248 = vector.shape_cast %247 : vector<1x16x16x4xf32> to vector<16x16x4xf32>
    %249 = vector.shape_cast %246 : vector<16x16x4xf32> to vector<1x16x16x4xf32>
    tpu.vector_store %arg10[%c0_79, %c0_80, %c0_81, %c0_82], %249 {strides = array<i32>} : memref<2x16x16x4xf32, #tpu.memory_space<vmem>>, vector<1x16x16x4xf32>,
    %c1_83 = arith.constant 1 : index
    %c0_84 = arith.constant 0 : index
    %c0_85 = arith.constant 0 : index
    %c0_86 = arith.constant 0 : index
    %250 = vector.load %arg1[%c1_83, %c0_84, %c0_85, %c0_86] : memref<2x16x16x4xf32, #tpu.memory_space<vmem>>, vector<1x16x16x4xf32>
    %251 = vector.shape_cast %250 : vector<1x16x16x4xf32> to vector<16x16x4xf32>
    %252 = vector.shape_cast %251 : vector<16x16x4xf32> to vector<256x4xf32>
    %cst_87 = arith.constant 0.000000e+00 : f32
    %253 = vector.broadcast %cst_87 : f32 to vector<256x8xf32>
    %254 = vector.extract_strided_slice %252 {offsets = [0, 0], sizes = [256, 1], strides = [1, 1]} : vector<256x4xf32> to vector<256x1xf32>
    %255 = vector.extract_strided_slice %10 {offsets = [0, 0], sizes = [1, 8], strides = [1, 1]} : vector<4x8xf32> to vector<1x8xf32>
    %256 = vector.broadcast %254 : vector<256x1xf32> to vector<256x8xf32>
    %257 = vector.broadcast %255 : vector<1x8xf32> to vector<256x8xf32>
    %258 = arith.mulf %256, %257 : vector<256x8xf32>
    %259 = arith.addf %253, %258 : vector<256x8xf32>
    %260 = vector.extract_strided_slice %252 {offsets = [0, 1], sizes = [256, 1], strides = [1, 1]} : vector<256x4xf32> to vector<256x1xf32>
    %261 = vector.extract_strided_slice %10 {offsets = [1, 0], sizes = [1, 8], strides = [1, 1]} : vector<4x8xf32> to vector<1x8xf32>
    %262 = vector.broadcast %260 : vector<256x1xf32> to vector<256x8xf32>
    %263 = vector.broadcast %261 : vector<1x8xf32> to vector<256x8xf32>
    %264 = arith.mulf %262, %263 : vector<256x8xf32>
    %265 = arith.addf %259, %264 : vector<256x8xf32>
    %266 = vector.extract_strided_slice %252 {offsets = [0, 2], sizes = [256, 1], strides = [1, 1]} : vector<256x4xf32> to vector<256x1xf32>
    %267 = vector.extract_strided_slice %10 {offsets = [2, 0], sizes = [1, 8], strides = [1, 1]} : vector<4x8xf32> to vector<1x8xf32>
    %268 = vector.broadcast %266 : vector<256x1xf32> to vector<256x8xf32>
    %269 = vector.broadcast %267 : vector<1x8xf32> to vector<256x8xf32>
    %270 = arith.mulf %268, %269 : vector<256x8xf32>
    %271 = arith.addf %265, %270 : vector<256x8xf32>
    %272 = vector.extract_strided_slice %252 {offsets = [0, 3], sizes = [256, 1], strides = [1, 1]} : vector<256x4xf32> to vector<256x1xf32>
    %273 = vector.extract_strided_slice %10 {offsets = [3, 0], sizes = [1, 8], strides = [1, 1]} : vector<4x8xf32> to vector<1x8xf32>
    %274 = vector.broadcast %272 : vector<256x1xf32> to vector<256x8xf32>
    %275 = vector.broadcast %273 : vector<1x8xf32> to vector<256x8xf32>
    %276 = arith.mulf %274, %275 : vector<256x8xf32>
    %277 = arith.addf %271, %276 : vector<256x8xf32>
    %278 = vector.broadcast %11 : vector<1x8xf32> to vector<256x8xf32>
    %279 = arith.addf %277, %278 : vector<256x8xf32>
    %cst_88 = arith.constant 0.000000e+00 : f32
    %cst_89 = arith.constant 6.000000e+00 : f32
    %280 = vector.broadcast %cst_88 : f32 to vector<256x8xf32>
    %281 = arith.maximumf %280, %279 : vector<256x8xf32>
    %282 = vector.broadcast %cst_89 : f32 to vector<256x8xf32>
    %283 = arith.minimumf %282, %281 : vector<256x8xf32>
    %284 = vector.shape_cast %283 : vector<256x8xf32> to vector<16x16x8xf32>
    %c1_90 = arith.constant 1 : index
    %c1_91 = arith.constant 1 : index
    %c0_92 = arith.constant 0 : index
    %285 = vector.load %arg11[%c1_90, %c1_91, %c0_92] : memref<18x18x8xf32, #tpu.memory_space<vmem>>, vector<16x16x8xf32>
    tpu.vector_store %arg11[%c1_90, %c1_91, %c0_92], %284 {strides = array<i32>} : memref<18x18x8xf32, #tpu.memory_space<vmem>>, vector<16x16x8xf32>,
    %cst_93 = arith.constant 0.000000e+00 : f32
    %286 = vector.broadcast %cst_93 : f32 to vector<16x16x8xf32>
    %c0_94 = arith.constant 0 : index
    %c0_95 = arith.constant 0 : index
    %c0_96 = arith.constant 0 : index
    %287 = vector.load %arg11[%c0_94, %c0_95, %c0_96] : memref<18x18x8xf32, #tpu.memory_space<vmem>>, vector<16x16x8xf32>
    %288 = vector.extract_strided_slice %8 {offsets = [0, 0, 0], sizes = [1, 1, 8], strides = [1, 1, 1]} : vector<3x3x8xf32> to vector<1x1x8xf32>
    %289 = vector.shape_cast %288 : vector<1x1x8xf32> to vector<8xf32>
    %290 = vector.shape_cast %289 : vector<8xf32> to vector<1x1x8xf32>
    %291 = vector.broadcast %290 : vector<1x1x8xf32> to vector<16x16x8xf32>
    %292 = arith.mulf %287, %291 : vector<16x16x8xf32>
    %293 = arith.addf %286, %292 : vector<16x16x8xf32>
    %c0_97 = arith.constant 0 : index
    %c1_98 = arith.constant 1 : index
    %c0_99 = arith.constant 0 : index
    %294 = vector.load %arg11[%c0_97, %c1_98, %c0_99] : memref<18x18x8xf32, #tpu.memory_space<vmem>>, vector<16x16x8xf32>
    %295 = vector.extract_strided_slice %8 {offsets = [0, 1, 0], sizes = [1, 1, 8], strides = [1, 1, 1]} : vector<3x3x8xf32> to vector<1x1x8xf32>
    %296 = vector.shape_cast %295 : vector<1x1x8xf32> to vector<8xf32>
    %297 = vector.shape_cast %296 : vector<8xf32> to vector<1x1x8xf32>
    %298 = vector.broadcast %297 : vector<1x1x8xf32> to vector<16x16x8xf32>
    %299 = arith.mulf %294, %298 : vector<16x16x8xf32>
    %300 = arith.addf %293, %299 : vector<16x16x8xf32>
    %c0_100 = arith.constant 0 : index
    %c2_101 = arith.constant 2 : index
    %c0_102 = arith.constant 0 : index
    %301 = vector.load %arg11[%c0_100, %c2_101, %c0_102] : memref<18x18x8xf32, #tpu.memory_space<vmem>>, vector<16x16x8xf32>
    %302 = vector.extract_strided_slice %8 {offsets = [0, 2, 0], sizes = [1, 1, 8], strides = [1, 1, 1]} : vector<3x3x8xf32> to vector<1x1x8xf32>
    %303 = vector.shape_cast %302 : vector<1x1x8xf32> to vector<8xf32>
    %304 = vector.shape_cast %303 : vector<8xf32> to vector<1x1x8xf32>
    %305 = vector.broadcast %304 : vector<1x1x8xf32> to vector<16x16x8xf32>
    %306 = arith.mulf %301, %305 : vector<16x16x8xf32>
    %307 = arith.addf %300, %306 : vector<16x16x8xf32>
    %c1_103 = arith.constant 1 : index
    %c0_104 = arith.constant 0 : index
    %c0_105 = arith.constant 0 : index
    %308 = vector.load %arg11[%c1_103, %c0_104, %c0_105] : memref<18x18x8xf32, #tpu.memory_space<vmem>>, vector<16x16x8xf32>
    %309 = vector.extract_strided_slice %8 {offsets = [1, 0, 0], sizes = [1, 1, 8], strides = [1, 1, 1]} : vector<3x3x8xf32> to vector<1x1x8xf32>
    %310 = vector.shape_cast %309 : vector<1x1x8xf32> to vector<8xf32>
    %311 = vector.shape_cast %310 : vector<8xf32> to vector<1x1x8xf32>
    %312 = vector.broadcast %311 : vector<1x1x8xf32> to vector<16x16x8xf32>
    %313 = arith.mulf %308, %312 : vector<16x16x8xf32>
    %314 = arith.addf %307, %313 : vector<16x16x8xf32>
    %c1_106 = arith.constant 1 : index
    %c1_107 = arith.constant 1 : index
    %c0_108 = arith.constant 0 : index
    %315 = vector.load %arg11[%c1_106, %c1_107, %c0_108] : memref<18x18x8xf32, #tpu.memory_space<vmem>>, vector<16x16x8xf32>
    %316 = vector.extract_strided_slice %8 {offsets = [1, 1, 0], sizes = [1, 1, 8], strides = [1, 1, 1]} : vector<3x3x8xf32> to vector<1x1x8xf32>
    %317 = vector.shape_cast %316 : vector<1x1x8xf32> to vector<8xf32>
    %318 = vector.shape_cast %317 : vector<8xf32> to vector<1x1x8xf32>
    %319 = vector.broadcast %318 : vector<1x1x8xf32> to vector<16x16x8xf32>
    %320 = arith.mulf %315, %319 : vector<16x16x8xf32>
    %321 = arith.addf %314, %320 : vector<16x16x8xf32>
    %c1_109 = arith.constant 1 : index
    %c2_110 = arith.constant 2 : index
    %c0_111 = arith.constant 0 : index
    %322 = vector.load %arg11[%c1_109, %c2_110, %c0_111] : memref<18x18x8xf32, #tpu.memory_space<vmem>>, vector<16x16x8xf32>
    %323 = vector.extract_strided_slice %8 {offsets = [1, 2, 0], sizes = [1, 1, 8], strides = [1, 1, 1]} : vector<3x3x8xf32> to vector<1x1x8xf32>
    %324 = vector.shape_cast %323 : vector<1x1x8xf32> to vector<8xf32>
    %325 = vector.shape_cast %324 : vector<8xf32> to vector<1x1x8xf32>
    %326 = vector.broadcast %325 : vector<1x1x8xf32> to vector<16x16x8xf32>
    %327 = arith.mulf %322, %326 : vector<16x16x8xf32>
    %328 = arith.addf %321, %327 : vector<16x16x8xf32>
    %c2_112 = arith.constant 2 : index
    %c0_113 = arith.constant 0 : index
    %c0_114 = arith.constant 0 : index
    %329 = vector.load %arg11[%c2_112, %c0_113, %c0_114] : memref<18x18x8xf32, #tpu.memory_space<vmem>>, vector<16x16x8xf32>
    %330 = vector.extract_strided_slice %8 {offsets = [2, 0, 0], sizes = [1, 1, 8], strides = [1, 1, 1]} : vector<3x3x8xf32> to vector<1x1x8xf32>
    %331 = vector.shape_cast %330 : vector<1x1x8xf32> to vector<8xf32>
    %332 = vector.shape_cast %331 : vector<8xf32> to vector<1x1x8xf32>
    %333 = vector.broadcast %332 : vector<1x1x8xf32> to vector<16x16x8xf32>
    %334 = arith.mulf %329, %333 : vector<16x16x8xf32>
    %335 = arith.addf %328, %334 : vector<16x16x8xf32>
    %c2_115 = arith.constant 2 : index
    %c1_116 = arith.constant 1 : index
    %c0_117 = arith.constant 0 : index
    %336 = vector.load %arg11[%c2_115, %c1_116, %c0_117] : memref<18x18x8xf32, #tpu.memory_space<vmem>>, vector<16x16x8xf32>
    %337 = vector.extract_strided_slice %8 {offsets = [2, 1, 0], sizes = [1, 1, 8], strides = [1, 1, 1]} : vector<3x3x8xf32> to vector<1x1x8xf32>
    %338 = vector.shape_cast %337 : vector<1x1x8xf32> to vector<8xf32>
    %339 = vector.shape_cast %338 : vector<8xf32> to vector<1x1x8xf32>
    %340 = vector.broadcast %339 : vector<1x1x8xf32> to vector<16x16x8xf32>
    %341 = arith.mulf %336, %340 : vector<16x16x8xf32>
    %342 = arith.addf %335, %341 : vector<16x16x8xf32>
    %c2_118 = arith.constant 2 : index
    %c2_119 = arith.constant 2 : index
    %c0_120 = arith.constant 0 : index
    %343 = vector.load %arg11[%c2_118, %c2_119, %c0_120] : memref<18x18x8xf32, #tpu.memory_space<vmem>>, vector<16x16x8xf32>
    %344 = vector.extract_strided_slice %8 {offsets = [2, 2, 0], sizes = [1, 1, 8], strides = [1, 1, 1]} : vector<3x3x8xf32> to vector<1x1x8xf32>
    %345 = vector.shape_cast %344 : vector<1x1x8xf32> to vector<8xf32>
    %346 = vector.shape_cast %345 : vector<8xf32> to vector<1x1x8xf32>
    %347 = vector.broadcast %346 : vector<1x1x8xf32> to vector<16x16x8xf32>
    %348 = arith.mulf %343, %347 : vector<16x16x8xf32>
    %349 = arith.addf %342, %348 : vector<16x16x8xf32>
    %350 = vector.shape_cast %9 : vector<1x8xf32> to vector<1x1x8xf32>
    %351 = vector.broadcast %350 : vector<1x1x8xf32> to vector<16x16x8xf32>
    %352 = arith.addf %349, %351 : vector<16x16x8xf32>
    %cst_121 = arith.constant 0.000000e+00 : f32
    %cst_122 = arith.constant 6.000000e+00 : f32
    %353 = vector.broadcast %cst_121 : f32 to vector<16x16x8xf32>
    %354 = arith.maximumf %353, %352 : vector<16x16x8xf32>
    %355 = vector.broadcast %cst_122 : f32 to vector<16x16x8xf32>
    %356 = arith.minimumf %355, %354 : vector<16x16x8xf32>
    %357 = vector.shape_cast %356 : vector<16x16x8xf32> to vector<256x8xf32>
    %cst_123 = arith.constant dense<0.000000e+00> : vector<8xf32>
    %358 = vector.multi_reduction <add>, %357, %cst_123 [0] : vector<256x8xf32> to vector<8xf32>
    %359 = vector.shape_cast %358 : vector<8xf32> to vector<1x8xf32>
    %cst_124 = arith.constant 2.560000e+02 : f32
    %360 = vector.broadcast %cst_124 : f32 to vector<1x8xf32>
    %361 = arith.divf %359, %360 : vector<1x8xf32>
    %cst_125 = arith.constant 0.000000e+00 : f32
    %362 = vector.broadcast %cst_125 : f32 to vector<1x2xf32>
    %363 = vector.extract_strided_slice %361 {offsets = [0, 0], sizes = [1, 1], strides = [1, 1]} : vector<1x8xf32> to vector<1x1xf32>
    %364 = vector.extract_strided_slice %12 {offsets = [0, 0], sizes = [1, 2], strides = [1, 1]} : vector<8x2xf32> to vector<1x2xf32>
    %365 = vector.broadcast %363 : vector<1x1xf32> to vector<1x2xf32>
    %366 = arith.mulf %365, %364 : vector<1x2xf32>
    %367 = arith.addf %362, %366 : vector<1x2xf32>
    %368 = vector.extract_strided_slice %361 {offsets = [0, 1], sizes = [1, 1], strides = [1, 1]} : vector<1x8xf32> to vector<1x1xf32>
    %369 = vector.extract_strided_slice %12 {offsets = [1, 0], sizes = [1, 2], strides = [1, 1]} : vector<8x2xf32> to vector<1x2xf32>
    %370 = vector.broadcast %368 : vector<1x1xf32> to vector<1x2xf32>
    %371 = arith.mulf %370, %369 : vector<1x2xf32>
    %372 = arith.addf %367, %371 : vector<1x2xf32>
    %373 = vector.extract_strided_slice %361 {offsets = [0, 2], sizes = [1, 1], strides = [1, 1]} : vector<1x8xf32> to vector<1x1xf32>
    %374 = vector.extract_strided_slice %12 {offsets = [2, 0], sizes = [1, 2], strides = [1, 1]} : vector<8x2xf32> to vector<1x2xf32>
    %375 = vector.broadcast %373 : vector<1x1xf32> to vector<1x2xf32>
    %376 = arith.mulf %375, %374 : vector<1x2xf32>
    %377 = arith.addf %372, %376 : vector<1x2xf32>
    %378 = vector.extract_strided_slice %361 {offsets = [0, 3], sizes = [1, 1], strides = [1, 1]} : vector<1x8xf32> to vector<1x1xf32>
    %379 = vector.extract_strided_slice %12 {offsets = [3, 0], sizes = [1, 2], strides = [1, 1]} : vector<8x2xf32> to vector<1x2xf32>
    %380 = vector.broadcast %378 : vector<1x1xf32> to vector<1x2xf32>
    %381 = arith.mulf %380, %379 : vector<1x2xf32>
    %382 = arith.addf %377, %381 : vector<1x2xf32>
    %383 = vector.extract_strided_slice %361 {offsets = [0, 4], sizes = [1, 1], strides = [1, 1]} : vector<1x8xf32> to vector<1x1xf32>
    %384 = vector.extract_strided_slice %12 {offsets = [4, 0], sizes = [1, 2], strides = [1, 1]} : vector<8x2xf32> to vector<1x2xf32>
    %385 = vector.broadcast %383 : vector<1x1xf32> to vector<1x2xf32>
    %386 = arith.mulf %385, %384 : vector<1x2xf32>
    %387 = arith.addf %382, %386 : vector<1x2xf32>
    %388 = vector.extract_strided_slice %361 {offsets = [0, 5], sizes = [1, 1], strides = [1, 1]} : vector<1x8xf32> to vector<1x1xf32>
    %389 = vector.extract_strided_slice %12 {offsets = [5, 0], sizes = [1, 2], strides = [1, 1]} : vector<8x2xf32> to vector<1x2xf32>
    %390 = vector.broadcast %388 : vector<1x1xf32> to vector<1x2xf32>
    %391 = arith.mulf %390, %389 : vector<1x2xf32>
    %392 = arith.addf %387, %391 : vector<1x2xf32>
    %393 = vector.extract_strided_slice %361 {offsets = [0, 6], sizes = [1, 1], strides = [1, 1]} : vector<1x8xf32> to vector<1x1xf32>
    %394 = vector.extract_strided_slice %12 {offsets = [6, 0], sizes = [1, 2], strides = [1, 1]} : vector<8x2xf32> to vector<1x2xf32>
    %395 = vector.broadcast %393 : vector<1x1xf32> to vector<1x2xf32>
    %396 = arith.mulf %395, %394 : vector<1x2xf32>
    %397 = arith.addf %392, %396 : vector<1x2xf32>
    %398 = vector.extract_strided_slice %361 {offsets = [0, 7], sizes = [1, 1], strides = [1, 1]} : vector<1x8xf32> to vector<1x1xf32>
    %399 = vector.extract_strided_slice %12 {offsets = [7, 0], sizes = [1, 2], strides = [1, 1]} : vector<8x2xf32> to vector<1x2xf32>
    %400 = vector.broadcast %398 : vector<1x1xf32> to vector<1x2xf32>
    %401 = arith.mulf %400, %399 : vector<1x2xf32>
    %402 = arith.addf %397, %401 : vector<1x2xf32>
    %cst_126 = arith.constant 0.000000e+00 : f32
    %403 = vector.broadcast %cst_126 : f32 to vector<1x2xf32>
    %404 = arith.maximumf %402, %403 : vector<1x2xf32>
    %cst_127 = arith.constant 0.000000e+00 : f32
    %405 = vector.broadcast %cst_127 : f32 to vector<1x8xf32>
    %406 = vector.extract_strided_slice %404 {offsets = [0, 0], sizes = [1, 1], strides = [1, 1]} : vector<1x2xf32> to vector<1x1xf32>
    %407 = vector.extract_strided_slice %13 {offsets = [0, 0], sizes = [1, 8], strides = [1, 1]} : vector<2x8xf32> to vector<1x8xf32>
    %408 = vector.broadcast %406 : vector<1x1xf32> to vector<1x8xf32>
    %409 = arith.mulf %408, %407 : vector<1x8xf32>
    %410 = arith.addf %405, %409 : vector<1x8xf32>
    %411 = vector.extract_strided_slice %404 {offsets = [0, 1], sizes = [1, 1], strides = [1, 1]} : vector<1x2xf32> to vector<1x1xf32>
    %412 = vector.extract_strided_slice %13 {offsets = [1, 0], sizes = [1, 8], strides = [1, 1]} : vector<2x8xf32> to vector<1x8xf32>
    %413 = vector.broadcast %411 : vector<1x1xf32> to vector<1x8xf32>
    %414 = arith.mulf %413, %412 : vector<1x8xf32>
    %415 = arith.addf %410, %414 : vector<1x8xf32>
    %416 = arith.negf %415 : vector<1x8xf32>
    %417 = math.exp %416 : vector<1x8xf32>
    %cst_128 = arith.constant 1.000000e+00 : f32
    %418 = vector.broadcast %cst_128 : f32 to vector<1x8xf32>
    %419 = arith.addf %418, %417 : vector<1x8xf32>
    %420 = arith.divf %418, %419 : vector<1x8xf32>
    %421 = vector.shape_cast %420 : vector<1x8xf32> to vector<1x1x8xf32>
    %422 = vector.broadcast %421 : vector<1x1x8xf32> to vector<16x16x8xf32>
    %423 = arith.mulf %356, %422 : vector<16x16x8xf32>
    %424 = vector.shape_cast %423 : vector<16x16x8xf32> to vector<256x8xf32>
    %cst_129 = arith.constant 0.000000e+00 : f32
    %425 = vector.broadcast %cst_129 : f32 to vector<256x4xf32>
    %426 = vector.extract_strided_slice %424 {offsets = [0, 0], sizes = [256, 1], strides = [1, 1]} : vector<256x8xf32> to vector<256x1xf32>
    %427 = vector.extract_strided_slice %14 {offsets = [0, 0], sizes = [1, 4], strides = [1, 1]} : vector<8x4xf32> to vector<1x4xf32>
    %428 = vector.broadcast %426 : vector<256x1xf32> to vector<256x4xf32>
    %429 = vector.broadcast %427 : vector<1x4xf32> to vector<256x4xf32>
    %430 = arith.mulf %428, %429 : vector<256x4xf32>
    %431 = arith.addf %425, %430 : vector<256x4xf32>
    %432 = vector.extract_strided_slice %424 {offsets = [0, 1], sizes = [256, 1], strides = [1, 1]} : vector<256x8xf32> to vector<256x1xf32>
    %433 = vector.extract_strided_slice %14 {offsets = [1, 0], sizes = [1, 4], strides = [1, 1]} : vector<8x4xf32> to vector<1x4xf32>
    %434 = vector.broadcast %432 : vector<256x1xf32> to vector<256x4xf32>
    %435 = vector.broadcast %433 : vector<1x4xf32> to vector<256x4xf32>
    %436 = arith.mulf %434, %435 : vector<256x4xf32>
    %437 = arith.addf %431, %436 : vector<256x4xf32>
    %438 = vector.extract_strided_slice %424 {offsets = [0, 2], sizes = [256, 1], strides = [1, 1]} : vector<256x8xf32> to vector<256x1xf32>
    %439 = vector.extract_strided_slice %14 {offsets = [2, 0], sizes = [1, 4], strides = [1, 1]} : vector<8x4xf32> to vector<1x4xf32>
    %440 = vector.broadcast %438 : vector<256x1xf32> to vector<256x4xf32>
    %441 = vector.broadcast %439 : vector<1x4xf32> to vector<256x4xf32>
    %442 = arith.mulf %440, %441 : vector<256x4xf32>
    %443 = arith.addf %437, %442 : vector<256x4xf32>
    %444 = vector.extract_strided_slice %424 {offsets = [0, 3], sizes = [256, 1], strides = [1, 1]} : vector<256x8xf32> to vector<256x1xf32>
    %445 = vector.extract_strided_slice %14 {offsets = [3, 0], sizes = [1, 4], strides = [1, 1]} : vector<8x4xf32> to vector<1x4xf32>
    %446 = vector.broadcast %444 : vector<256x1xf32> to vector<256x4xf32>
    %447 = vector.broadcast %445 : vector<1x4xf32> to vector<256x4xf32>
    %448 = arith.mulf %446, %447 : vector<256x4xf32>
    %449 = arith.addf %443, %448 : vector<256x4xf32>
    %450 = vector.extract_strided_slice %424 {offsets = [0, 4], sizes = [256, 1], strides = [1, 1]} : vector<256x8xf32> to vector<256x1xf32>
    %451 = vector.extract_strided_slice %14 {offsets = [4, 0], sizes = [1, 4], strides = [1, 1]} : vector<8x4xf32> to vector<1x4xf32>
    %452 = vector.broadcast %450 : vector<256x1xf32> to vector<256x4xf32>
    %453 = vector.broadcast %451 : vector<1x4xf32> to vector<256x4xf32>
    %454 = arith.mulf %452, %453 : vector<256x4xf32>
    %455 = arith.addf %449, %454 : vector<256x4xf32>
    %456 = vector.extract_strided_slice %424 {offsets = [0, 5], sizes = [256, 1], strides = [1, 1]} : vector<256x8xf32> to vector<256x1xf32>
    %457 = vector.extract_strided_slice %14 {offsets = [5, 0], sizes = [1, 4], strides = [1, 1]} : vector<8x4xf32> to vector<1x4xf32>
    %458 = vector.broadcast %456 : vector<256x1xf32> to vector<256x4xf32>
    %459 = vector.broadcast %457 : vector<1x4xf32> to vector<256x4xf32>
    %460 = arith.mulf %458, %459 : vector<256x4xf32>
    %461 = arith.addf %455, %460 : vector<256x4xf32>
    %462 = vector.extract_strided_slice %424 {offsets = [0, 6], sizes = [256, 1], strides = [1, 1]} : vector<256x8xf32> to vector<256x1xf32>
    %463 = vector.extract_strided_slice %14 {offsets = [6, 0], sizes = [1, 4], strides = [1, 1]} : vector<8x4xf32> to vector<1x4xf32>
    %464 = vector.broadcast %462 : vector<256x1xf32> to vector<256x4xf32>
    %465 = vector.broadcast %463 : vector<1x4xf32> to vector<256x4xf32>
    %466 = arith.mulf %464, %465 : vector<256x4xf32>
    %467 = arith.addf %461, %466 : vector<256x4xf32>
    %468 = vector.extract_strided_slice %424 {offsets = [0, 7], sizes = [256, 1], strides = [1, 1]} : vector<256x8xf32> to vector<256x1xf32>
    %469 = vector.extract_strided_slice %14 {offsets = [7, 0], sizes = [1, 4], strides = [1, 1]} : vector<8x4xf32> to vector<1x4xf32>
    %470 = vector.broadcast %468 : vector<256x1xf32> to vector<256x4xf32>
    %471 = vector.broadcast %469 : vector<1x4xf32> to vector<256x4xf32>
    %472 = arith.mulf %470, %471 : vector<256x4xf32>
    %473 = arith.addf %467, %472 : vector<256x4xf32>
    %474 = vector.broadcast %15 : vector<1x4xf32> to vector<256x4xf32>
    %475 = arith.addf %473, %474 : vector<256x4xf32>
    %c1_130 = arith.constant 1 : index
    %c0_131 = arith.constant 0 : index
    %c0_132 = arith.constant 0 : index
    %c0_133 = arith.constant 0 : index
    %476 = vector.load %arg1[%c1_130, %c0_131, %c0_132, %c0_133] : memref<2x16x16x4xf32, #tpu.memory_space<vmem>>, vector<1x16x16x4xf32>
    %477 = vector.shape_cast %476 : vector<1x16x16x4xf32> to vector<16x16x4xf32>
    %478 = vector.shape_cast %477 : vector<16x16x4xf32> to vector<256x4xf32>
    %479 = arith.addf %475, %478 : vector<256x4xf32>
    %480 = vector.shape_cast %479 : vector<256x4xf32> to vector<16x16x4xf32>
    %c1_134 = arith.constant 1 : index
    %c0_135 = arith.constant 0 : index
    %c0_136 = arith.constant 0 : index
    %c0_137 = arith.constant 0 : index
    %481 = vector.load %arg10[%c1_134, %c0_135, %c0_136, %c0_137] : memref<2x16x16x4xf32, #tpu.memory_space<vmem>>, vector<1x16x16x4xf32>
    %482 = vector.shape_cast %481 : vector<1x16x16x4xf32> to vector<16x16x4xf32>
    %483 = vector.shape_cast %480 : vector<16x16x4xf32> to vector<1x16x16x4xf32>
    tpu.vector_store %arg10[%c1_134, %c0_135, %c0_136, %c0_137], %483 {strides = array<i32>} : memref<2x16x16x4xf32, #tpu.memory_space<vmem>>, vector<1x16x16x4xf32>,
    return
  }
  func.func @transform_0(%arg0: i32) -> (i32, i32, i32, i32) {
    %c0_i32 = arith.constant 0 : i32
    %c0_i32_0 = arith.constant 0 : i32
    %c0_i32_1 = arith.constant 0 : i32
    %c0_i32_2 = arith.constant 0 : i32
    return %arg0, %c0_i32, %c0_i32_0, %c0_i32_1 : i32, i32, i32, i32
  }
  func.func @transform_1(%arg0: i32) -> (i32, i32) {
    %c0_i32 = arith.constant 0 : i32
    %c0_i32_0 = arith.constant 0 : i32
    %c0_i32_1 = arith.constant 0 : i32
    return %c0_i32, %c0_i32_0 : i32, i32
  }
  func.func @transform_2(%arg0: i32) -> (i32, i32) {
    %c0_i32 = arith.constant 0 : i32
    %c0_i32_0 = arith.constant 0 : i32
    %c0_i32_1 = arith.constant 0 : i32
    return %c0_i32, %c0_i32_0 : i32, i32
  }
  func.func @transform_3(%arg0: i32) -> (i32, i32, i32) {
    %c0_i32 = arith.constant 0 : i32
    %c0_i32_0 = arith.constant 0 : i32
    %c0_i32_1 = arith.constant 0 : i32
    %c0_i32_2 = arith.constant 0 : i32
    return %c0_i32, %c0_i32_0, %c0_i32_1 : i32, i32, i32
  }
  func.func @transform_4(%arg0: i32) -> (i32, i32) {
    %c0_i32 = arith.constant 0 : i32
    %c0_i32_0 = arith.constant 0 : i32
    %c0_i32_1 = arith.constant 0 : i32
    return %c0_i32, %c0_i32_0 : i32, i32
  }
  func.func @transform_5(%arg0: i32) -> (i32, i32) {
    %c0_i32 = arith.constant 0 : i32
    %c0_i32_0 = arith.constant 0 : i32
    %c0_i32_1 = arith.constant 0 : i32
    return %c0_i32, %c0_i32_0 : i32, i32
  }
  func.func @transform_6(%arg0: i32) -> (i32, i32) {
    %c0_i32 = arith.constant 0 : i32
    %c0_i32_0 = arith.constant 0 : i32
    %c0_i32_1 = arith.constant 0 : i32
    return %c0_i32, %c0_i32_0 : i32, i32
  }
  func.func @transform_7(%arg0: i32) -> (i32, i32) {
    %c0_i32 = arith.constant 0 : i32
    %c0_i32_0 = arith.constant 0 : i32
    %c0_i32_1 = arith.constant 0 : i32
    return %c0_i32, %c0_i32_0 : i32, i32
  }
  func.func @transform_8(%arg0: i32) -> (i32, i32) {
    %c0_i32 = arith.constant 0 : i32
    %c0_i32_0 = arith.constant 0 : i32
    %c0_i32_1 = arith.constant 0 : i32
    return %c0_i32, %c0_i32_0 : i32, i32
  }
  func.func @transform_9(%arg0: i32) -> (i32, i32, i32, i32) {
    %c0_i32 = arith.constant 0 : i32
    %c0_i32_0 = arith.constant 0 : i32
    %c0_i32_1 = arith.constant 0 : i32
    %c0_i32_2 = arith.constant 0 : i32
    return %arg0, %c0_i32, %c0_i32_0, %c0_i32_1 : i32, i32, i32, i32
  }
}

</mosaic_0001>

<bundles_post_ra>
// kernel: tpu_custom_call.1
= control target key start
LH: loop header
LB: loop body
LE: loop exit
PB: predicated region body
PF: predicated region fallthrough
CT: control target
= control target key end

     0   :  { %v15580_v0 = vmov 0   ;;  %v15584_v33 = vmov 1   ;;  %v15586_v34 = vmov 2   ;;  %v15582_v59 = vmov 3   ;;  %s15570_s0 = inlined_call_operand.vmem [shape: f32[2,16,16,4], index: 0, kind: input, shape index: {}]   ;;  %s15571_s2 = inlined_call_operand.vmem [shape: f32[1,8], index: 2, kind: input, shape index: {}]   ;;  %s15572_s4 = inlined_call_operand.vmem [shape: f32[1,8], index: 4, kind: input, shape index: {}]   ;;  %s15573_s1 = inlined_call_operand.vmem [shape: f32[4,8], index: 1, kind: input, shape index: {}]   ;;  %s15574_s3 = inlined_call_operand.vmem [shape: f32[3,3,8], index: 3, kind: input, shape index: {}]   ;;  %s15575_s5 = inlined_call_operand.vmem [shape: f32[8,2], index: 5, kind: input, shape index: {}]   ;;  %s15576_s6 = inlined_call_operand.vmem [shape: f32[2,8], index: 6, kind: input, shape index: {}]   ;;  %s15577_s8 = inlined_call_operand.vmem [shape: f32[1,4], index: 8, kind: input, shape index: {}]   ;;  %s15578_s7 = inlined_call_operand.vmem [shape: f32[8,4], index: 7, kind: input, shape index: {}]   ;;  %s15579_s9 = inlined_call_operand.vmem [shape: f32[2,16,16,4], index: 9, kind: output, shape index: {}]  }
   0x1   :  { %7887 = vset.pattern.permute.xlu2 %v15580_v0  ;;  %7886 = vset.pattern.permute.xlu1 %v15580_v0  ;;  %v8058_v1 = vld [vmem:[%s15570_s0 + $0x20] sm:$0xff]  ;;  %v8063_v2 = vld [vmem:[%s15570_s0 + $0x10] sm:$0xff]  ;;  %v8077_v4 = vld [vmem:[%s15570_s0 + $0x28] sm:$0xff]  ;;  %vm32_vm0 = vcmask 64512   ;;  %vm42_vm1 = vcmask 57344   ;;  %vm35_vm2 = vcmask 58368  }
   0x2   :  { %v8068_v3 = vld [vmem:[%s15570_s0] sm:$0xff]  ;;  %7885 = vset.pattern.permute.xlu0 %v15580_v0  ;;  %139 = vperm.xlu2 %7887, %v8058_v1   ;;  %v8082_v5 = vld [vmem:[%s15570_s0 + $0x18] sm:$0xff]  ;;  %v8087_v6 = vld [vmem:[%s15570_s0 + $0x8] sm:$0xff]  ;;  %vm3916_vm8 = vcmask 31744  }
   0x3   :  { %129 = vperm.xlu1 %7886, %v8063_v2   ;;  %119 = vperm.xlu0 %7885, %v8068_v3   ;;  %v8095_v7 = vld [vmem:[%s15570_s0 + $0x40] sm:$0xff]  ;;  %v8100_v8 = vld [vmem:[%s15570_s0 + $0x38] sm:$0xff]  ;;  %v8105_v9 = vld [vmem:[%s15570_s0 + $0x30] sm:$0xff] }
   0x4   :  { %v8113_v10 = vld [vmem:[%s15570_s0 + $0x58] sm:$0xff]  ;;  %v8118_v11 = vld [vmem:[%s15570_s0 + $0x50] sm:$0xff]  ;;  %v8123_v12 = vld [vmem:[%s15570_s0 + $0x48] sm:$0xff] }
   0x5   :  { %v8131_v13 = vld [vmem:[%s15570_s0 + $0x70] sm:$0xff]  ;;  %v8136_v14 = vld [vmem:[%s15570_s0 + $0x68] sm:$0xff]  ;;  %v8141_v15 = vld [vmem:[%s15570_s0 + $0x60] sm:$0xff] }
   0x6   :  { %v8149_v16 = vld [vmem:[%s15570_s0 + $0x88] sm:$0xff]  ;;  %v8154_v17 = vld [vmem:[%s15570_s0 + $0x80] sm:$0xff]  ;;  %v8159_v18 = vld [vmem:[%s15570_s0 + $0x78] sm:$0xff] }
   0x7   :  { %v8167_v19 = vld [vmem:[%s15570_s0 + $0xa0] sm:$0xff]  ;;  %v8172_v20 = vld [vmem:[%s15570_s0 + $0x98] sm:$0xff]  ;;  %v8177_v21 = vld [vmem:[%s15570_s0 + $0x90] sm:$0xff] }
   0x8   :  { %v8185_v22 = vld [vmem:[%s15570_s0 + $0xb8] sm:$0xff]  ;;  %v8190_v23 = vld [vmem:[%s15570_s0 + $0xb0] sm:$0xff]  ;;  %v8195_v24 = vld [vmem:[%s15570_s0 + $0xa8] sm:$0xff] }
   0x9   :  { %v8203_v25 = vld [vmem:[%s15570_s0 + $0xd0] sm:$0xff]  ;;  %v8208_v26 = vld [vmem:[%s15570_s0 + $0xc8] sm:$0xff]  ;;  %v8213_v27 = vld [vmem:[%s15570_s0 + $0xc0] sm:$0xff] }
   0xa   :  { %144 = vperm.xlu2 %7887, %v8077_v4   ;;  %v8221_v28 = vld [vmem:[%s15570_s0 + $0xe8] sm:$0xff]  ;;  %v8226_v29 = vld [vmem:[%s15570_s0 + $0xe0] sm:$0xff]  ;;  %v8231_v30 = vld [vmem:[%s15570_s0 + $0xd8] sm:$0xff] }
   0xb   :  { %134 = vperm.xlu1 %7886, %v8082_v5   ;;  %124 = vperm.xlu0 %7885, %v8087_v6   ;;  %v8239_v31 = vld [vmem:[%s15570_s0 + $0xf8] sm:$0xff]  ;;  %v8244_v32 = vld [vmem:[%s15570_s0 + $0xf0] sm:$0xff] }
  0x12   :  { %159 = vperm.xlu2 %7887, %v8095_v7  }
  0x13   :  { %154 = vperm.xlu1 %7886, %v8100_v8   ;;  %149 = vperm.xlu0 %7885, %v8105_v9  }
  0x1a   :  { %174 = vperm.xlu2 %7887, %v8113_v10  }
  0x1b   :  { %169 = vperm.xlu1 %7886, %v8118_v11   ;;  %164 = vperm.xlu0 %7885, %v8123_v12  }
  0x22   :  { %189 = vperm.xlu2 %7887, %v8131_v13  }
  0x23   :  { %184 = vperm.xlu1 %7886, %v8136_v14   ;;  %179 = vperm.xlu0 %7885, %v8141_v15  }
  0x2a   :  { %204 = vperm.xlu2 %7887, %v8149_v16  }
  0x2b   :  { %199 = vperm.xlu1 %7886, %v8154_v17   ;;  %194 = vperm.xlu0 %7885, %v8159_v18  }
  0x32   :  { %219 = vperm.xlu2 %7887, %v8167_v19  }
  0x33   :  { %214 = vperm.xlu1 %7886, %v8172_v20   ;;  %209 = vperm.xlu0 %7885, %v8177_v21  }
  0x3a   :  { %234 = vperm.xlu2 %7887, %v8185_v22  }
  0x3b   :  { %229 = vperm.xlu1 %7886, %v8190_v23   ;;  %224 = vperm.xlu0 %7885, %v8195_v24  }
  0x42   :  { %249 = vperm.xlu2 %7887, %v8203_v25  }
  0x43   :  { %244 = vperm.xlu1 %7886, %v8208_v26   ;;  %239 = vperm.xlu0 %7885, %v8213_v27  }
  0x4a   :  { %264 = vperm.xlu2 %7887, %v8221_v28  }
  0x4b   :  { %259 = vperm.xlu1 %7886, %v8226_v29   ;;  %254 = vperm.xlu0 %7885, %v8231_v30  }
  0x52   :  { %7888 = vset.pattern.permute.xlu2 %v15584_v33 }
  0x53   :  { %274 = vperm.xlu1 %7886, %v8239_v31   ;;  %269 = vperm.xlu0 %7885, %v8244_v32  }
  0x54   :  { %343 = vperm.xlu2 %7888, %v8068_v3  }
  0x5b   :  { %7889 = vset.pattern.permute.xlu1 %v15584_v33  ;;  %7891 = vset.pattern.permute.xlu0 %v15586_v34 }
  0x5c   :  { %351 = vperm.xlu1 %7889, %v8063_v2   ;;  %355 = vperm.xlu2 %7888, %v8082_v5   ;;  %v8254_v35 = vpop.permute.xlu2 %139 }
  0x5d   :  { %540 = vperm.xlu0 %7891, %v8087_v6  }
  0x64   :  { %359 = vperm.xlu1 %7889, %v8058_v1   ;;  %363 = vperm.xlu2 %7888, %v8077_v4   ;;  %v8259_v36 = vpop.permute.xlu2 %144 }
  0x65   :  { %560 = vperm.xlu0 %7891, %v8105_v9  }
  0x6c   :  { %371 = vperm.xlu1 %7889, %v8100_v8   ;;  %375 = vperm.xlu2 %7888, %v8095_v7   ;;  %v8264_v37 = vpop.permute.xlu2 %159 }
  0x6d   :  { %572 = vperm.xlu0 %7891, %v8123_v12  }
  0x74   :  { %383 = vperm.xlu1 %7889, %v8118_v11   ;;  %387 = vperm.xlu2 %7888, %v8113_v10   ;;  %v8269_v38 = vpop.permute.xlu2 %174 }
  0x75   :  { %584 = vperm.xlu0 %7891, %v8141_v15   ;;  %v8272_v39 = vpop.permute.xlu1 %129  ;;  %v8274_v40 = vpop.permute.xlu0 %119 }
  0x7c   :  { %395 = vperm.xlu1 %7889, %v8136_v14   ;;  %399 = vperm.xlu2 %7888, %v8131_v13   ;;  %v8278_v41 = vpop.permute.xlu2 %189 }
  0x7d   :  { %596 = vperm.xlu0 %7891, %v8159_v18   ;;  %v8281_v42 = vpop.permute.xlu1 %134  ;;  %v8283_v43 = vpop.permute.xlu0 %124 }
  0x84   :  { %407 = vperm.xlu1 %7889, %v8154_v17   ;;  %411 = vperm.xlu2 %7888, %v8149_v16   ;;  %v8287_v44 = vpop.permute.xlu2 %204 }
  0x85   :  { %608 = vperm.xlu0 %7891, %v8177_v21   ;;  %v8290_v45 = vpop.permute.xlu1 %154  ;;  %v8292_v46 = vpop.permute.xlu0 %149 }
  0x8c   :  { %419 = vperm.xlu1 %7889, %v8172_v20   ;;  %423 = vperm.xlu2 %7888, %v8167_v19   ;;  %v8296_v47 = vpop.permute.xlu2 %219 }
  0x8d   :  { %620 = vperm.xlu0 %7891, %v8195_v24   ;;  %v8299_v48 = vpop.permute.xlu1 %169  ;;  %v8301_v49 = vpop.permute.xlu0 %164 }
  0x94   :  { %431 = vperm.xlu1 %7889, %v8190_v23   ;;  %435 = vperm.xlu2 %7888, %v8185_v22   ;;  %v8305_v50 = vpop.permute.xlu2 %234 }
  0x95   :  { %632 = vperm.xlu0 %7891, %v8213_v27   ;;  %v8308_v51 = vpop.permute.xlu1 %184  ;;  %v8310_v52 = vpop.permute.xlu0 %179 }
  0x9c   :  { %443 = vperm.xlu1 %7889, %v8208_v26   ;;  %447 = vperm.xlu2 %7888, %v8203_v25   ;;  %v8314_v53 = vpop.permute.xlu2 %249 }
  0x9d   :  { %644 = vperm.xlu0 %7891, %v8231_v30   ;;  %v8317_v54 = vpop.permute.xlu1 %199  ;;  %v8319_v55 = vpop.permute.xlu0 %194 }
  0xa4   :  { %455 = vperm.xlu1 %7889, %v8226_v29   ;;  %459 = vperm.xlu2 %7888, %v8221_v28   ;;  %v8323_v56 = vpop.permute.xlu2 %264 }
  0xa5   :  { %656 = vperm.xlu0 %7891, %v8244_v32   ;;  %v8326_v57 = vpop.permute.xlu1 %214  ;;  %v8328_v58 = vpop.permute.xlu0 %209 }
  0xa6   :  { %15801 = vst [vmem:[#allocation3_spill] sm:$0xff] %v8328_v58 }
  0xac   :  { %467 = vperm.xlu1 %7889, %v8239_v31   ;;  %7890 = vset.pattern.permute.xlu2 %v15586_v34 }
  0xad   :  { %7894 = vset.pattern.permute.xlu0 %v15582_v59  ;;  %v8333_v60 = vpop.permute.xlu1 %229  ;;  %536 = vperm.xlu2 %7890, %v8068_v3   ;;  %v8336_v61 = vpop.permute.xlu0 %224 }
  0xae   :  { %15802 = vst [vmem:[#allocation4_spill] sm:$0xff] %v8333_v60  ;;  %733 = vperm.xlu0 %7894, %v8087_v6   ;;  %v8339_v62 = vpop.permute.xlu2 %343 }
  0xaf   :  { %15803 = vst [vmem:[#allocation5_spill] sm:$0xff] %v8336_v61 }
  0xb4   :  { %7892 = vset.pattern.permute.xlu1 %v15586_v34 }
  0xb5   :  { %544 = vperm.xlu1 %7892, %v8063_v2   ;;  %v8343_v63 = vpop.permute.xlu1 %244  ;;  %548 = vperm.xlu2 %7890, %v8082_v5   ;;  %v8346_v0 = vpop.permute.xlu0 %239 }
  0xb6   :  { %15804 = vst [vmem:[#allocation6_spill] sm:$0xff] %v8343_v63  ;;  %753 = vperm.xlu0 %7894, %v8105_v9   ;;  %v8349_v59 = vpop.permute.xlu2 %355 }
  0xb7   :  { %15805 = vst [vmem:[#allocation7_spill] sm:$0xff] %v8346_v0 }
  0xbd   :  { %552 = vperm.xlu1 %7892, %v8058_v1   ;;  %v8352_v33 = vpop.permute.xlu1 %259  ;;  %556 = vperm.xlu2 %7890, %v8077_v4   ;;  %v8355_v61 = vpop.permute.xlu0 %254 }
  0xbe   :  { %15806 = vst [vmem:[#allocation8_spill] sm:$0xff] %v8352_v33  ;;  %765 = vperm.xlu0 %7894, %v8123_v12   ;;  %v8358_v34 = vpop.permute.xlu2 %363 }
  0xbf   :  { %15807 = vst [vmem:[#allocation9_spill] sm:$0xff] %v8355_v61 }
  0xc0   :  { %15808 = vst [vmem:[#allocation10_spill] sm:$0xff] %v8358_v34 }
  0xc5   :  { %564 = vperm.xlu1 %7892, %v8100_v8   ;;  %v8361_v63 = vpop.permute.xlu1 %274  ;;  %568 = vperm.xlu2 %7890, %v8095_v7   ;;  %v8364_v0 = vpop.permute.xlu0 %269 }
  0xc6   :  { %15809 = vst [vmem:[#allocation11_spill] sm:$0xff] %v8361_v63  ;;  %777 = vperm.xlu0 %7894, %v8141_v15   ;;  %v8367_v60 = vpop.permute.xlu2 %375 }
  0xc7   :  { %15810 = vst [vmem:[#allocation12_spill] sm:$0xff] %v8364_v0 }
  0xc8   :  { %15811 = vst [vmem:[#allocation13_spill] sm:$0xff] %v8367_v60 }
  0xcd   :  { %576 = vperm.xlu1 %7892, %v8118_v11   ;;  %580 = vperm.xlu2 %7890, %v8113_v10  }
  0xce   :  { %789 = vperm.xlu0 %7894, %v8159_v18   ;;  %v8372_v61 = vpop.permute.xlu1 %351  ;;  %v8374_v33 = vpop.permute.xlu2 %387 }
  0xcf   :  { %15812 = vst [vmem:[#allocation14_spill] sm:$0xff] %v8372_v61  ;;  %v8376_v34 = vpop.permute.xlu0 %540 }
  0xd0   :  { %15813 = vst [vmem:[#allocation15_spill] sm:$0xff] %v8374_v33 }
  0xd1   :  { %15814 = vst [vmem:[#allocation16_spill] sm:$0xff] %v8376_v34 }
  0xd5   :  { %588 = vperm.xlu1 %7892, %v8136_v14   ;;  %592 = vperm.xlu2 %7890, %v8131_v13  }
  0xd6   :  { %801 = vperm.xlu0 %7894, %v8177_v21   ;;  %v8381_v0 = vpop.permute.xlu1 %359  ;;  %v8383_v63 = vpop.permute.xlu2 %399 }
  0xd7   :  { %15815 = vst [vmem:[#allocation17_spill] sm:$0xff] %v8381_v0  ;;  %v8385_v60 = vpop.permute.xlu0 %560 }
  0xd8   :  { %15816 = vst [vmem:[#allocation18_spill] sm:$0xff] %v8383_v63 }
  0xd9   :  { %15817 = vst [vmem:[#allocation19_spill] sm:$0xff] %v8385_v60 }
  0xdd   :  { %600 = vperm.xlu1 %7892, %v8154_v17   ;;  %604 = vperm.xlu2 %7890, %v8149_v16  }
  0xde   :  { %813 = vperm.xlu0 %7894, %v8195_v24   ;;  %v8390_v33 = vpop.permute.xlu1 %371  ;;  %v8392_v34 = vpop.permute.xlu2 %411 }
  0xdf   :  { %15818 = vst [vmem:[#allocation20_spill] sm:$0xff] %v8390_v33  ;;  %v8394_v61 = vpop.permute.xlu0 %572 }
  0xe0   :  { %15819 = vst [vmem:[#allocation21_spill] sm:$0xff] %v8392_v34 }
  0xe1   :  { %15820 = vst [vmem:[#allocation22_spill] sm:$0xff] %v8394_v61 }
  0xe5   :  { %612 = vperm.xlu1 %7892, %v8172_v20   ;;  %616 = vperm.xlu2 %7890, %v8167_v19  }
  0xe6   :  { %825 = vperm.xlu0 %7894, %v8213_v27   ;;  %v8399_v63 = vpop.permute.xlu1 %383  ;;  %v8401_v60 = vpop.permute.xlu2 %423 }
  0xe7   :  { %15821 = vst [vmem:[#allocation23_spill] sm:$0xff] %v8399_v63  ;;  %v8403_v0 = vpop.permute.xlu0 %584 }
  0xe8   :  { %15822 = vst [vmem:[#allocation24_spill] sm:$0xff] %v8401_v60 }
  0xe9   :  { %15823 = vst [vmem:[#allocation25_spill] sm:$0xff] %v8403_v0 }
  0xed   :  { %624 = vperm.xlu1 %7892, %v8190_v23   ;;  %628 = vperm.xlu2 %7890, %v8185_v22  }
  0xee   :  { %837 = vperm.xlu0 %7894, %v8231_v30   ;;  %v8408_v34 = vpop.permute.xlu1 %395  ;;  %v8410_v61 = vpop.permute.xlu2 %435 }
  0xef   :  { %15824 = vst [vmem:[#allocation26_spill] sm:$0xff] %v8408_v34  ;;  %v8412_v33 = vpop.permute.xlu0 %596  ;;  %v15830_v34 = vmov 1  }
  0xf0   :  { %15825 = vst [vmem:[#allocation27_spill] sm:$0xff] %v8410_v61 }
  0xf1   :  { %15826 = vst [vmem:[#allocation28_spill] sm:$0xff] %v8412_v33 }
  0xf5   :  { %636 = vperm.xlu1 %7892, %v8208_v26   ;;  %640 = vperm.xlu2 %7890, %v8203_v25  }
  0xf6   :  { %849 = vperm.xlu0 %7894, %v8244_v32   ;;  %v8417_v60 = vpop.permute.xlu1 %407  ;;  %v8419_v0 = vpop.permute.xlu2 %447 }
  0xf7   :  { %15827 = vst [vmem:[#allocation29_spill] sm:$0xff] %v8417_v60  ;;  %v8421_v63 = vpop.permute.xlu0 %608  ;;  %v15832_v60 = vmov 3  }
  0xf8   :  { %15828 = vst [vmem:[#allocation30_spill] sm:$0xff] %v8419_v0 }
  0xf9   :  { %15829 = vst [vmem:[#allocation31_spill] sm:$0xff] %v8421_v63 }
  0xfd   :  { %648 = vperm.xlu1 %7892, %v8226_v29   ;;  %652 = vperm.xlu2 %7890, %v8221_v28  }
  0xfe   :  { %7896 = vset.pattern.permute.xlu0 %v15830_v34  ;;  %v8426_v61 = vpop.permute.xlu1 %419  ;;  %v8428_v33 = vpop.permute.xlu2 %459 }
  0xff   :  { %347 = vperm.xlu0 %7896, %v8087_v6   ;;  %v8431_v58 = vpop.permute.xlu0 %620 }
 0x100   :  { %15831 = vst [vmem:[#allocation32_spill] sm:$0xff] %v8431_v58 }
 0x105   :  { %660 = vperm.xlu1 %7892, %v8239_v31   ;;  %7893 = vset.pattern.permute.xlu2 %v15832_v60 }
 0x106   :  { %v8435_v0 = vpop.permute.xlu1 %431  ;;  %729 = vperm.xlu2 %7893, %v8068_v3  }
 0x107   :  { %15833 = vst [vmem:[#allocation33_spill] sm:$0xff] %v8435_v0  ;;  %367 = vperm.xlu0 %7896, %v8105_v9   ;;  %v8439_v63 = vpop.permute.xlu0 %632  ;;  %v8441_v34 = vpop.permute.xlu2 %536 }
 0x10d   :  { %7895 = vset.pattern.permute.xlu1 %v15832_v60 }
 0x10e   :  { %737 = vperm.xlu1 %7895, %v8063_v2   ;;  %v8445_v6 = vpop.permute.xlu1 %443  ;;  %741 = vperm.xlu2 %7893, %v8082_v5  }
 0x10f   :  { %379 = vperm.xlu0 %7896, %v8123_v12   ;;  %v8449_v58 = vpop.permute.xlu0 %644  ;;  %v8451_v0 = vpop.permute.xlu2 %548 }
 0x116   :  { %745 = vperm.xlu1 %7895, %v8058_v1   ;;  %v8454_v3 = vpop.permute.xlu1 %455  ;;  %749 = vperm.xlu2 %7893, %v8077_v4  }
 0x117   :  { %391 = vperm.xlu0 %7896, %v8141_v15   ;;  %v8458_v9 = vpop.permute.xlu0 %656  ;;  %v8460_v2 = vpop.permute.xlu2 %556 }
 0x11e   :  { %757 = vperm.xlu1 %7895, %v8100_v8   ;;  %v8463_v5 = vpop.permute.xlu1 %467  ;;  %761 = vperm.xlu2 %7893, %v8095_v7  }
 0x11f   :  { %403 = vperm.xlu0 %7896, %v8159_v18   ;;  %v8467_v12 = vpop.permute.xlu2 %568 }
 0x120   :  { %v8469_v1 = vpop.permute.xlu0 %733 }
 0x126   :  { %769 = vperm.xlu1 %7895, %v8118_v11   ;;  %773 = vperm.xlu2 %7893, %v8113_v10  }
 0x127   :  { %415 = vperm.xlu0 %7896, %v8177_v21   ;;  %v8474_v4 = vpop.permute.xlu1 %544  ;;  %v8476_v15 = vpop.permute.xlu2 %580 }
 0x128   :  { %v8478_v8 = vpop.permute.xlu0 %753 }
 0x12e   :  { %781 = vperm.xlu1 %7895, %v8136_v14   ;;  %785 = vperm.xlu2 %7893, %v8131_v13  }
 0x12f   :  { %427 = vperm.xlu0 %7896, %v8195_v24   ;;  %v8483_v7 = vpop.permute.xlu1 %552  ;;  %v8485_v18 = vpop.permute.xlu2 %592 }
 0x130   :  { %v8487_v11 = vpop.permute.xlu0 %765 }
 0x136   :  { %793 = vperm.xlu1 %7895, %v8154_v17   ;;  %797 = vperm.xlu2 %7893, %v8149_v16   ;;  %v7997_v16 = vmov 0.0  }
 0x137   :  { %439 = vperm.xlu0 %7896, %v8213_v27   ;;  %v8492_v10 = vpop.permute.xlu1 %564  ;;  %v8494_v21 = vpop.permute.xlu2 %604  ;;  %33 = vst.msk [vmem:[#allocation2] sm:$0xff] %vm32_vm0, %v7997_v16 }
 0x138   :  { %15834 = vst [vmem:[#allocation34_spill] sm:$0xff] %v8494_v21  ;;  %v8496_v14 = vpop.permute.xlu0 %777 }
 0x139   :  { %15835 = vst [vmem:[#allocation35_spill] sm:$0xff] %v8496_v14  ;;  %v15880_v14 = vld [vmem:[#allocation20_spill] sm:$0xff] }
 0x13a   :  { %34 = vst.msk [vmem:[#allocation2 + $0x8] sm:$0xff] %vm32_vm0, %v7997_v16 }
 0x13b   :  { %43 = vst.msk [vmem:[#allocation2 + $0x18] sm:$0x1] %vm42_vm1, %v7997_v16 }
 0x13c   :  { %38 = vst.msk [vmem:[#allocation2 + $0x198] sm:$0xff] %vm32_vm0, %v7997_v16 }
 0x13d   :  { %39 = vst.msk [vmem:[#allocation2 + $0x1a0] sm:$0xff] %vm32_vm0, %v7997_v16 }
 0x13e   :  { %805 = vperm.xlu1 %7895, %v8172_v20   ;;  %809 = vperm.xlu2 %7893, %v8167_v19   ;;  %44 = vst.msk [vmem:[#allocation2 + $0x30] sm:$0x1] %vm42_vm1, %v7997_v16 }
 0x13f   :  { %451 = vperm.xlu0 %7896, %v8231_v30   ;;  %v8501_v13 = vpop.permute.xlu1 %576  ;;  %v8503_v24 = vpop.permute.xlu2 %616  ;;  %45 = vst.msk [vmem:[#allocation2 + $0x48] sm:$0x1] %vm42_vm1, %v7997_v16 }
 0x140   :  { %15836 = vst [vmem:[#allocation36_spill] sm:$0xff] %v8501_v13  ;;  %v8505_v17 = vpop.permute.xlu0 %789 }
 0x141   :  { %15837 = vst [vmem:[#allocation37_spill] sm:$0xff] %v8503_v24 }
 0x142   :  { %15838 = vst [vmem:[#allocation38_spill] sm:$0xff] %v8505_v17 }
 0x143   :  { %46 = vst.msk [vmem:[#allocation2 + $0x60] sm:$0x1] %vm42_vm1, %v7997_v16 }
 0x144   :  { %47 = vst.msk [vmem:[#allocation2 + $0x78] sm:$0x1] %vm42_vm1, %v7997_v16 }
 0x145   :  { %48 = vst.msk [vmem:[#allocation2 + $0x90] sm:$0x1] %vm42_vm1, %v7997_v16 }
 0x146   :  { %817 = vperm.xlu1 %7895, %v8190_v23   ;;  %821 = vperm.xlu2 %7893, %v8185_v22   ;;  %49 = vst.msk [vmem:[#allocation2 + $0xa8] sm:$0x1] %vm42_vm1, %v7997_v16 }
 0x147   :  { %463 = vperm.xlu0 %7896, %v8244_v32   ;;  %v8518_v19 = vpop.permute.xlu1 %588  ;;  %v8520_v20 = vpop.permute.xlu2 %628  ;;  %50 = vst.msk [vmem:[#allocation2 + $0xc0] sm:$0x1] %vm42_vm1, %v7997_v16 }
 0x148   :  { %15839 = vst [vmem:[#allocation39_spill] sm:$0xff] %v8518_v19  ;;  %v8524_v27 = vpop.permute.xlu0 %801 }
 0x149   :  { %15840 = vst [vmem:[#allocation40_spill] sm:$0xff] %v8520_v20 }
 0x14a   :  { %15841 = vst [vmem:[#allocation41_spill] sm:$0xff] %v8524_v27 }
 0x14b   :  { %51 = vst.msk [vmem:[#allocation2 + $0xd8] sm:$0x1] %vm42_vm1, %v7997_v16 }
 0x14c   :  { %52 = vst.msk [vmem:[#allocation2 + $0xf0] sm:$0x1] %vm42_vm1, %v7997_v16 }
 0x14d   :  { %53 = vst.msk [vmem:[#allocation2 + $0x108] sm:$0x1] %vm42_vm1, %v7997_v16 }
 0x14e   :  { %829 = vperm.xlu1 %7895, %v8208_v26   ;;  %833 = vperm.xlu2 %7893, %v8203_v25   ;;  %v79_v26 = vld [vmem:[%s15573_s1] sm:$0xf]  ;;  %54 = vst.msk [vmem:[#allocation2 + $0x120] sm:$0x1] %vm42_vm1, %v7997_v16 }
 0x14f   :  { %v8542_v22 = vpop.permute.xlu1 %600  ;;  %v8544_v23 = vpop.permute.xlu2 %640  ;;  %55 = vst.msk [vmem:[#allocation2 + $0x138] sm:$0x1] %vm42_vm1, %v7997_v16  ;;  %v8561_v25 = vperm.slane %v79_v26, 0  ;;  %v8583_v27 = vperm.slane %v79_v26, 1 }
 0x150   :  { %15842 = vst [vmem:[#allocation42_spill] sm:$0xff] %v8542_v22  ;;  %v8548_v30 = vpop.permute.xlu0 %813 }
 0x151   :  { %15843 = vst [vmem:[#allocation43_spill] sm:$0xff] %v8544_v23  ;;  %v8573_v32 = vmul.f32 %v8561_v25, %v8254_v35  ;;  %v8577_v60 = vmul.f32 %v8561_v25, %v8259_v36  ;;  %v8593_v35 = vmul.f32 %v8561_v25, %v8269_v38  ;;  %v8597_v36 = vmul.f32 %v8561_v25, %v8272_v39 }
 0x152   :  { %15844 = vst [vmem:[#allocation44_spill] sm:$0xff] %v8548_v30  ;;  %v8581_v30 = vmul.f32 %v8561_v25, %v8264_v37  ;;  %v278_v37 = vmul.f32 %v8561_v25, %v8274_v40  ;;  %v8603_v23 = vmul.f32 %v8561_v25, %v8278_v41  ;;  %v281_v38 = vmul.f32 %v8561_v25, %v8281_v42 }
 0x153   :  { %15845 = vst [vmem:[#allocation45_spill] sm:$0xff] %v8561_v25  ;;  %v8617_v39 = vmul.f32 %v8561_v25, %v8287_v44  ;;  %v8621_v40 = vmul.f32 %v8561_v25, %v8290_v45  ;;  %v8627_v41 = vmul.f32 %v8561_v25, %v8292_v46  ;;  %v8631_v42 = vmul.f32 %v8561_v25, %v8296_v47 }
 0x154   :  { %56 = vst.msk [vmem:[#allocation2 + $0x150] sm:$0x1] %vm42_vm1, %v7997_v16  ;;  %v8639_v44 = vmul.f32 %v8561_v25, %v8301_v49  ;;  %v8645_v45 = vmul.f32 %v8561_v25, %v8305_v50  ;;  %v8649_v46 = vmul.f32 %v8561_v25, %v8308_v51  ;;  %v471_v47 = vmul.f32 %v8583_v27, %v8339_v62 }
 0x155   :  { %57 = vst.msk [vmem:[#allocation2 + $0x168] sm:$0x1] %vm42_vm1, %v7997_v16  ;;  %v8659_v49 = vmul.f32 %v8561_v25, %v8310_v52  ;;  %v8663_v50 = vmul.f32 %v8561_v25, %v8314_v53  ;;  %v8667_v51 = vmul.f32 %v8561_v25, %v8317_v54  ;;  %v474_v62 = vmul.f32 %v8583_v27, %v8349_v59  ;;  %v15855_v59 = vld [vmem:[#allocation3_spill] sm:$0xff] }
 0x156   :  { %841 = vperm.xlu1 %7895, %v8226_v29   ;;  %845 = vperm.xlu2 %7893, %v8221_v28   ;;  %58 = vst.msk [vmem:[#allocation2 + $0x180] sm:$0x1] %vm42_vm1, %v7997_v16  ;;  %v8679_v52 = vmul.f32 %v8561_v25, %v8323_v56  ;;  %v8683_v53 = vmul.f32 %v8561_v25, %v8326_v57  ;;  %v15858_v56 = vld [vmem:[#allocation10_spill] sm:$0xff]  ;;  %v15860_v57 = vld [vmem:[#allocation5_spill] sm:$0xff] }
 0x157   :  { %15846 = vst [vmem:[#allocation46_spill] sm:$0xff] %v8583_v27  ;;  %v8585_v29 = vpop.permute.xlu1 %612  ;;  %v8587_v28 = vpop.permute.xlu2 %652 }
 0x158   :  { %15847 = vst [vmem:[#allocation47_spill] sm:$0xff] %v8585_v29  ;;  %v8605_v29 = vpop.permute.xlu0 %825 }
 0x159   :  { %15848 = vst [vmem:[#allocation48_spill] sm:$0xff] %v8587_v28  ;;  %v8613_v28 = vmul.f32 %v8561_v25, %v8283_v43  ;;  %v8635_v43 = vmul.f32 %v8561_v25, %v8299_v48  ;;  %v8653_v48 = vperm.slane %v79_v26, 2 }
 0x15a   :  { %59 = vst.msk [vmem:[#allocation2 + $0x29] sm:$0x1] %vm42_vm1, %v7997_v16 }
 0x15b   :  { %15849 = vst [vmem:[#allocation49_spill] sm:$0xff] %v8605_v29  ;;  %v664_v54 = vmul.f32 %v8653_v48, %v8441_v34  ;;  %v476_v29 = vmul.f32 %v8583_v27, %v15858_v56  ;;  %v15859_v34 = vmov 0  }
 0x15c   :  { %60 = vst.msk [vmem:[#allocation2 + $0x41] sm:$0x1] %vm42_vm1, %v7997_v16 }
 0x15d   :  { %61 = vst.msk [vmem:[#allocation2 + $0x59] sm:$0x1] %vm42_vm1, %v7997_v16 }
 0x15e   :  { %15850 = vst [vmem:[#allocation50_spill] sm:$0xff] %v8627_v41  ;;  %853 = vperm.xlu1 %7895, %v8239_v31   ;;  %7897 = vset.pattern.permute.xlu2 %v15859_v34  ;;  %v8705_v41 = vmul.f32 %v8561_v25, %v15860_v57  ;;  %v15865_v31 = vld [vmem:[#allocation6_spill] sm:$0xff]  ;;  %v15866_v34 = vld [vmem:[#allocation7_spill] sm:$0xff]  ;;  %v506_v57 = vadd.f32 %v474_v62, %v281_v38  ;;  %v8738_v38 = vld [vmem:[%s15571_s2] ss:$0 sm:$0xff] }
 0x15f   :  { %15851 = vst [vmem:[#allocation51_spill] sm:$0xff] %v8639_v44  ;;  %v8675_v44 = vmul.f32 %v8561_v25, %v8319_v55  ;;  %v15857_v55 = vld [vmem:[#allocation4_spill] sm:$0xff]  ;;  %v8711_v20 = vpop.permute.xlu1 %624  ;;  %v8717_v56 = vmul.f32 %v8561_v25, %v15865_v31  ;;  %v8721_v19 = vmul.f32 %v8561_v25, %v15866_v34  ;;  %v15871_v31 = vld [vmem:[#allocation15_spill] sm:$0xff]  ;;  %v15872_v34 = vld [vmem:[#allocation9_spill] sm:$0xff] }
 0x160   :  { %62 = vst.msk [vmem:[#allocation2 + $0x71] sm:$0x1] %vm42_vm1, %v7997_v16  ;;  %v482_v17 = vmul.f32 %v8583_v27, %v15871_v31 }
 0x161   :  { %15852 = vst [vmem:[#allocation52_spill] sm:$0xff] %v8653_v48 }
 0x162   :  { %63 = vst.msk [vmem:[#allocation2 + $0x89] sm:$0x1] %vm42_vm1, %v7997_v16 }
 0x163   :  { %15853 = vst [vmem:[#allocation53_spill] sm:$0xff] %v8659_v49  ;;  %v8691_v49 = vmul.f32 %v8561_v25, %v15855_v59  ;;  %v503_v59 = vadd.f32 %v471_v47, %v278_v37  ;;  %v15868_v37 = vld [vmem:[#allocation14_spill] sm:$0xff] }
 0x164   :  { %64 = vst.msk [vmem:[#allocation2 + $0xa1] sm:$0x1] %vm42_vm1, %v7997_v16  ;;  %v473_v47 = vmul.f32 %v8583_v27, %v15868_v37  ;;  %v8745_v37 = vmul.f32 %v8561_v25, %v15872_v34 }
 0x165   :  { %15854 = vst [vmem:[#allocation54_spill] sm:$0xff] %v8675_v44  ;;  %v8695_v44 = vmul.f32 %v8561_v25, %v15857_v55  ;;  %v8709_v55 = vperm.slane %v79_v26, 3  ;;  %v730_v26 = vpop.permute.xlu2 %729  ;;  %v696_v24 = vadd.f32 %v664_v54, %v503_v59  ;;  %v15875_v59 = vld [vmem:[#allocation17_spill] sm:$0xff] }
 0x166   :  { %65 = vst.msk [vmem:[#allocation2 + $0xb9] sm:$0x1] %vm42_vm1, %v7997_v16  ;;  %v475_v31 = vmul.f32 %v8583_v27, %v15875_v59  ;;  %v15879_v59 = vld [vmem:[#allocation16_spill] sm:$0xff] }
 0x167   :  { %15856 = vst [vmem:[#allocation3_spill] sm:$0xff] %v8691_v49  ;;  %v15862_v49 = vld [vmem:[#allocation13_spill] sm:$0xff]  ;;  %v857_v62 = vmul.f32 %v8709_v55, %v730_v26  ;;  %v15876_v26 = vld [vmem:[#allocation12_spill] sm:$0xff]  ;;  %v8774_v13 = vmul.f32 %v8653_v48, %v15879_v59  ;;  %v15885_v59 = vmov 2  }
 0x168   :  { %66 = vst.msk [vmem:[#allocation2 + $0xd1] sm:$0x1] %vm42_vm1, %v7997_v16  ;;  %v479_v22 = vmul.f32 %v8583_v27, %v15862_v49  ;;  %v8725_v49 = vpop.permute.xlu0 %837  ;;  %7898 = vset.pattern.permute.xlu1 %v15885_v59  ;;  %v15891_v59 = vld [vmem:[#allocation26_spill] sm:$0xff] }
 0x169   :  { %15861 = vst [vmem:[#allocation4_spill] sm:$0xff] %v8705_v41  ;;  %v15870_v41 = vld [vmem:[#allocation8_spill] sm:$0xff] }
 0x16a   :  { %15863 = vst [vmem:[#allocation10_spill] sm:$0xff] %v8709_v55  ;;  %v8763_v34 = vadd.f32 %v479_v22, %v8581_v30  ;;  %v8781_v22 = vadd.f32 %v482_v17, %v8593_v35  ;;  %v15884_v17 = vld [vmem:[#allocation23_spill] sm:$0xff] }
 0x16b   :  { %15864 = vst [vmem:[#allocation5_spill] sm:$0xff] %v8711_v20  ;;  %v8731_v20 = vmul.f32 %v8561_v25, %v15870_v41  ;;  %v8748_v41 = vadd.f32 %v476_v29, %v8577_v60  ;;  %v889_v29 = vadd.f32 %v857_v62, %v696_v24  ;;  %v15881_v24 = vld [vmem:[#allocation19_spill] sm:$0xff]  ;;  %v15883_v62 = vld [vmem:[#allocation21_spill] sm:$0xff]  ;;  %v481_v35 = vmul.f32 %v8583_v27, %v15884_v17 }
 0x16c   :  { %67 = vst.msk [vmem:[#allocation2 + $0xe9] sm:$0x1] %vm42_vm1, %v7997_v16  ;;  %v8785_v30 = vmul.f32 %v8653_v48, %v15881_v24 }
 0x16d   :  { %15867 = vst [vmem:[#allocation13_spill] sm:$0xff] %v8721_v19  ;;  %v15874_v19 = vld [vmem:[#allocation11_spill] sm:$0xff] }
 0x16e   :  { %15869 = vst [vmem:[#allocation6_spill] sm:$0xff] %v8725_v49  ;;  %v8752_v54 = vmul.f32 %v8561_v25, %v15874_v19  ;;  %v8760_v49 = vmul.f32 %v8561_v25, %v15876_v26  ;;  %v8770_v19 = vadd.f32 %v473_v47, %v8597_v36  ;;  %v478_v26 = vmul.f32 %v8583_v27, %v15880_v14 }
 0x16f   :  { %68 = vst.msk [vmem:[#allocation2 + $0x101] sm:$0x1] %vm42_vm1, %v7997_v16  ;;  %v667_v36 = vmul.f32 %v8653_v48, %v8451_v0  ;;  %v924_v47 = vadd.f32 %v8738_v38, %v889_v29  ;;  %v8793_v14 = vadd.f32 %v475_v31, %v8573_v32  ;;  %v15886_v29 = vld [vmem:[#allocation22_spill] sm:$0xff]  ;;  %v15888_v32 = vld [vmem:[#allocation24_spill] sm:$0xff] }
 0x170   :  { %69 = vst.msk [vmem:[#allocation2 + $0x119] sm:$0x1] %vm42_vm1, %v7997_v16  ;;  %v8807_v24 = vmul.f32 %v8653_v48, %v15886_v29  ;;  %v491_v31 = vmul.f32 %v8583_v27, %v15888_v32  ;;  %v8816_v17 = vadd.f32 %v478_v26, %v8621_v40  ;;  %v15893_v29 = vld [vmem:[#allocation29_spill] sm:$0xff]  ;;  %v15895_v32 = vld [vmem:[#allocation30_spill] sm:$0xff] }
 0x171   :  { %15873 = vst [vmem:[#allocation7_spill] sm:$0xff] %v8745_v37  ;;  %v15878_v37 = vld [vmem:[#allocation18_spill] sm:$0xff]  ;;  %v956_v25 = vmax.f32 %v924_v47, 0.0  ;;  %v742_v47 = vpop.permute.xlu2 %741  ;;  %v699_v40 = vadd.f32 %v667_v36, %v506_v57  ;;  %v15897_v57 = vld [vmem:[#allocation28_spill] sm:$0xff] }
 0x172   :  { %70 = vst.msk [vmem:[#allocation2 + $0x131] sm:$0x1] %vm42_vm1, %v7997_v16  ;;  %v485_v60 = vmul.f32 %v8583_v27, %v15878_v37  ;;  %v488_v37 = vmul.f32 %v8583_v27, %v15883_v62  ;;  %v8811_v62 = vpop.permute.xlu1 %636  ;;  %v8844_v21 = vadd.f32 %v491_v31, %v8631_v42 }
 0x173   :  { %15877 = vst [vmem:[#allocation14_spill] sm:$0xff] %v8760_v49  ;;  %v988_v26 = vmin.f32 %v956_v25, 6.0  ;;  %v8848_v25 = vmul.f32 %v8653_v48, %v15897_v57 }
 0x174   :  { %71 = vst.msk [vmem:[#allocation2 + $0x149] sm:$0x1] %vm42_vm1, %v7997_v16  ;;  %v8803_v0 = vadd.f32 %v485_v60, %v8603_v23  ;;  %v484_v23 = vmul.f32 %v8583_v27, %v15891_v59  ;;  %v15892_v60 = vld [vmem:[#allocation27_spill] sm:$0xff]  ;;  %v8832_v59 = vadd.f32 %v488_v37, %v8617_v39  ;;  %v500_v39 = vmul.f32 %v8583_v27, %v8428_v33 }
 0x175   :  { %72 = vst.msk [vmem:[#allocation2 + $0x161] sm:$0x1] %vm42_vm1, %v7997_v16  ;;  %v494_v49 = vmul.f32 %v8583_v27, %v15892_v60  ;;  %v8835_v60 = vadd.f32 %v481_v35, %v8635_v43  ;;  %v496_v35 = vmul.f32 %v8583_v27, %v8445_v6  ;;  %v499_v6 = vmul.f32 %v8583_v27, %v8454_v3 }
 0x176   :  { %15882 = vst [vmem:[#allocation8_spill] sm:$0xff] %v8785_v30  ;;  %v8824_v30 = vpop.permute.xlu0 %849  ;;  %v8854_v36 = vadd.f32 %v484_v23, %v8649_v46 }
 0x177   :  { %73 = vst.msk [vmem:[#allocation2 + $0x179] sm:$0x1] %vm42_vm1, %v7997_v16  ;;  %v8857_v37 = vadd.f32 %v494_v49, %v8645_v45  ;;  %v15901_v49 = vld [vmem:[#allocation32_spill] sm:$0xff]  ;;  %v8900_v3 = vadd.f32 %v496_v35, %v8717_v56 }
 0x178   :  { %74 = vst.msk [vmem:[#allocation2 + $0x191] sm:$0x1] %vm42_vm1, %v7997_v16  ;;  %v8879_v23 = vmul.f32 %v8653_v48, %v15901_v49 }
 0x179   :  { %15887 = vst [vmem:[#allocation15_spill] sm:$0xff] %v8807_v24  ;;  %v487_v24 = vmul.f32 %v8583_v27, %v15893_v29  ;;  %v15896_v29 = vld [vmem:[#allocation25_spill] sm:$0xff] }
 0x17a   :  { %15889 = vst [vmem:[#allocation9_spill] sm:$0xff] %v8811_v62  ;;  %v497_v62 = vmul.f32 %v8583_v27, %v15895_v32  ;;  %v8894_v32 = vpop.permute.xlu1 %648 }
 0x17b   :  { %36 = vst.msk [vmem:[#allocation2 + $0x10] sm:$0x3] %vm35_vm2, %v7997_v16  ;;  %v8864_v31 = vadd.f32 %v487_v24, %v8667_v51  ;;  %v8886_v51 = vadd.f32 %v500_v39, %v8679_v52  ;;  %v8890_v24 = vmul.f32 %v8653_v48, %v8439_v63  ;;  %v672_v63 = vmul.f32 %v8653_v48, %v8467_v12  ;;  %v750_v52 = vpop.permute.xlu2 %749 }
 0x17c   :  { %15890 = vst [vmem:[#allocation11_spill] sm:$0xff] %v8816_v17  ;;  %v860_v17 = vmul.f32 %v8709_v55, %v742_v47  ;;  %v8867_v33 = vadd.f32 %v497_v62, %v8663_v50  ;;  %v15899_v47 = vld [vmem:[#allocation31_spill] sm:$0xff]  ;;  %v669_v50 = vmul.f32 %v8653_v48, %v8460_v2  ;;  %v8904_v2 = vmul.f32 %v8653_v48, %v8449_v58 }
 0x17d   :  { %15894 = vst [vmem:[#allocation17_spill] sm:$0xff] %v8824_v30  ;;  %v8839_v30 = vmul.f32 %v8653_v48, %v15896_v29  ;;  %v862_v29 = vmul.f32 %v8709_v55, %v750_v52  ;;  %v8917_v58 = vadd.f32 %v499_v6, %v8731_v20  ;;  %v8921_v12 = vmul.f32 %v8653_v48, %v8458_v9  ;;  %v15910_v52 = vld [vmem:[#allocation35_spill] sm:$0xff] }
 0x17e   :  { %40 = vst.msk [vmem:[#allocation2 + $0x1a8] sm:$0x3] %vm35_vm2, %v7997_v16  ;;  %v490_v16 = vmul.f32 %v8583_v27, %v8426_v61  ;;  %v892_v43 = vadd.f32 %v860_v17, %v699_v40  ;;  %v15898_v61 = vld [vmem:[#allocation33_spill] sm:$0xff]  ;;  %v8871_v17 = vmul.f32 %v8653_v48, %v15899_v47  ;;  %v858_v39 = vmul.f32 %v8709_v55, %v8469_v1 }
 0x17f   :  { %1020 = vst.msk [vmem:[#allocation2 + $0x19] sm:$0xff] %vm32_vm0, %v988_v26  ;;  %v493_v42 = vmul.f32 %v8583_v27, %v15898_v61  ;;  %v675_v26 = vmul.f32 %v8653_v48, %v8476_v15  ;;  %v678_v20 = vmul.f32 %v8653_v48, %v8485_v18  ;;  %v1052_v18 = vld [vmem:[#allocation2] sm:$0xff] }
 0x180   :  { %15900 = vst [vmem:[#allocation12_spill] sm:$0xff] %v8871_v17  ;;  %v927_v46 = vadd.f32 %v8738_v38, %v892_v43  ;;  %v8875_v45 = vadd.f32 %v490_v16, %v8683_v53  ;;  %v502_v53 = vmul.f32 %v8583_v27, %v8463_v5  ;;  %v666_v5 = vmul.f32 %v8653_v48, %v8474_v4  ;;  %v348_v16 = vpop.permute.xlu0 %347  ;;  %v1149_v47 = vld [vmem:[#allocation2 + $0x1] sm:$0xff] }
 0x181   :  { %15902 = vst [vmem:[#allocation18_spill] sm:$0xff] %v8879_v23  ;;  %v8897_v40 = vadd.f32 %v493_v42, %v8695_v44  ;;  %v75_v44 = vld [vmem:[%s15574_s3] sm:$0x7]  ;;  %v701_v4 = vadd.f32 %v669_v50, %v8748_v41  ;;  %v472_v57 = vmul.f32 %v8583_v27, %v348_v16  ;;  %v668_v43 = vmul.f32 %v8653_v48, %v8483_v7 }
 0x182   :  { %15903 = vst [vmem:[#allocation16_spill] sm:$0xff] %v8890_v24  ;;  %v959_v62 = vmax.f32 %v927_v46, 0.0  ;;  %v8926_v15 = vadd.f32 %v502_v53, %v8752_v54  ;;  %v8935_v9 = vperm.slane %v75_v44, 0  ;;  %v8937_v61 = vperm.slane %v75_v44, 1 }
 0x183   :  { %15904 = vst [vmem:[#allocation20_spill] sm:$0xff] %v8904_v2  ;;  %v894_v41 = vadd.f32 %v862_v29, %v701_v4  ;;  %v504_v42 = vadd.f32 %v472_v57, %v8613_v28  ;;  %v704_v54 = vadd.f32 %v672_v63, %v8763_v34  ;;  %v8942_v35 = vadd.f32 %v666_v5, %v8770_v19  ;;  %v15913_v4 = vld [vmem:[#allocation11_spill] sm:$0xff] }
 0x184   :  { %v991_v56 = vmin.f32 %v959_v62, 6.0  ;;  %15905 = vst [vmem:[#allocation19_spill] sm:$0xff] %v8921_v12  ;;  %v8945_v1 = vadd.f32 %v675_v26, %v8781_v22  ;;  %v863_v7 = vmul.f32 %v8709_v55, %v8478_v8  ;;  %v8951_v46 = vmul.f32 %v8709_v55, %v8487_v11  ;;  %v15908_v8 = vld [vmem:[#allocation34_spill] sm:$0xff]  ;;  %v8967_v11 = vpop.permute.xlu1 %660  ;;  %v15912_v26 = vld [vmem:[#allocation37_spill] sm:$0xff] }
 0x185   :  { %15906 = vst [vmem:[#allocation21_spill] sm:$0xff] %v8935_v9  ;;  %v671_v28 = vmul.f32 %v8653_v48, %v8492_v10  ;;  %v929_v34 = vadd.f32 %v8738_v38, %v894_v41  ;;  %v697_v19 = vadd.f32 %v8774_v13, %v504_v42  ;;  %v8958_v49 = vadd.f32 %v668_v43, %v8793_v14  ;;  %v762_v13 = vpop.permute.xlu2 %761  ;;  %v15914_v42 = vld [vmem:[#allocation38_spill] sm:$0xff] }
 0x186   :  { %1023 = vst.msk [vmem:[#allocation2 + $0x39] sm:$0xff] %vm32_vm0, %v991_v56  ;;  %v8961_v22 = vadd.f32 %v678_v20, %v8803_v0  ;;  %v681_v6 = vmul.f32 %v8653_v48, %v15908_v8  ;;  %v8965_v50 = vperm.slane %v75_v44, 2  ;;  %v1085_v53 = vmul.f32 %v8935_v9, %v1052_v18  ;;  %v15911_v0 = vld [vmem:[#allocation36_spill] sm:$0xff]  ;;  %v1246_v56 = vld [vmem:[#allocation2 + $0x2] sm:$0xff] }
 0x187   :  { %15907 = vst [vmem:[#allocation23_spill] sm:$0xff] %v8937_v61  ;;  %v1182_v10 = vmul.f32 %v8937_v61, %v1149_v47  ;;  %v961_v62 = vmax.f32 %v929_v34, 0.0  ;;  %v890_v63 = vadd.f32 %v858_v39, %v697_v19  ;;  %v8973_v14 = vmul.f32 %v8709_v55, %v15910_v52  ;;  %v15915_v47 = vld [vmem:[#allocation39_spill] sm:$0xff]  ;;  %v15916_v19 = vld [vmem:[#allocation40_spill] sm:$0xff] }
 0x188   :  { %15909 = vst [vmem:[#allocation22_spill] sm:$0xff] %v8965_v50  ;;  %v674_v5 = vmul.f32 %v8653_v48, %v15911_v0  ;;  %v684_v44 = vmul.f32 %v8653_v48, %v15912_v26  ;;  %v865_v29 = vmul.f32 %v8709_v55, %v762_v13  ;;  %v368_v16 = vpop.permute.xlu0 %367  ;;  %v8981_v57 = vadd.f32 %v671_v28, %v15913_v4  ;;  %v76_v28 = vld [vmem:[%s15574_s3 + $0x4] sm:$0x7]  ;;  %v15917_v0 = vld [vmem:[#allocation42_spill] sm:$0xff] }
 0x189   :  { %v993_v43 = vmin.f32 %v961_v62, 6.0  ;;  %v925_v39 = vadd.f32 %v8738_v38, %v890_v63  ;;  %v477_v20 = vmul.f32 %v8583_v27, %v368_v16  ;;  %v8986_v41 = vadd.f32 %v681_v6, %v8832_v59  ;;  %v15918_v16 = vld [vmem:[#allocation50_spill] sm:$0xff] }
 0x18a   :  { %v8990_v18 = vmul.f32 %v8709_v55, %v15914_v42  ;;  %v677_v34 = vmul.f32 %v8653_v48, %v15915_v47  ;;  %v687_v8 = vmul.f32 %v8653_v48, %v15916_v19  ;;  %v1214_v62 = vadd.f32 %v1182_v10, %v1085_v53  ;;  %v15919_v42 = vld [vmem:[#allocation43_spill] sm:$0xff]  ;;  %v15927_v19 = vld [vmem:[#allocation44_spill] sm:$0xff] }
 0x18b   :  { %v1279_v63 = vmul.f32 %v8965_v50, %v1246_v56  ;;  %1025 = vst.msk [vmem:[#allocation2 + $0x51] sm:$0xff] %vm32_vm0, %v993_v43  ;;  %v957_v59 = vmax.f32 %v925_v39, 0.0  ;;  %v897_v6 = vadd.f32 %v865_v29, %v704_v54  ;;  %v9002_v13 = vadd.f32 %v674_v5, %v8835_v60  ;;  %v15922_v60 = vld [vmem:[#allocation41_spill] sm:$0xff]  ;;  %v1150_v29 = vld [vmem:[#allocation2 + $0x9] sm:$0xff]  ;;  %v15925_v39 = vld [vmem:[#allocation8_spill] sm:$0xff] }
 0x18c   :  { %v9005_v52 = vadd.f32 %v684_v44, %v8844_v21  ;;  %v680_v26 = vmul.f32 %v8653_v48, %v15917_v0  ;;  %v509_v4 = vadd.f32 %v477_v20, %v15918_v16  ;;  %v690_v53 = vmul.f32 %v8653_v48, %v15919_v42  ;;  %v1053_v44 = vld [vmem:[#allocation2 + $0x8] sm:$0xff] }
 0x18d   :  { %v9012_v10 = vperm.slane %v76_v28, 0  ;;  %v989_v56 = vmin.f32 %v957_v59, 6.0  ;;  %v932_v43 = vadd.f32 %v8738_v38, %v897_v6  ;;  %v9016_v54 = vadd.f32 %v677_v34, %v8854_v36  ;;  %v738_v34 = vpop.permute.xlu1 %737  ;;  %v774_v0 = vpop.permute.xlu2 %773 }
 0x18e   :  { %v9020_v21 = vmul.f32 %v8709_v55, %v15922_v60  ;;  %v9022_v5 = vperm.slane %v76_v28, 1  ;;  %v702_v20 = vadd.f32 %v15925_v39, %v509_v4  ;;  %v9026_v47 = vadd.f32 %v687_v8, %v8857_v37  ;;  %v77_v4 = vld [vmem:[%s15574_s3 + $0x8] sm:$0x7] }
 0x18f   :  { %15920 = vst [vmem:[#allocation24_spill] sm:$0xff] %v9012_v10  ;;  %v9030_v59 = vmul.f32 %v8709_v55, %v15927_v19  ;;  %v1311_v6 = vadd.f32 %v1279_v63, %v1214_v62  ;;  %v964_v36 = vmax.f32 %v932_v43, 0.0  ;;  %v9034_v16 = vadd.f32 %v680_v26, %v8864_v31  ;;  %v1054_v63 = vld [vmem:[#allocation2 + $0x18] sm:$0xff]  ;;  %v1247_v26 = vld [vmem:[#allocation2 + $0xa] sm:$0xff] }
 0x190   :  { %15921 = vst [vmem:[#allocation26_spill] sm:$0xff] %v9016_v54  ;;  %v895_v42 = vadd.f32 %v863_v7, %v702_v20  ;;  %v859_v37 = vmul.f32 %v8709_v55, %v738_v34  ;;  %v868_v8 = vmul.f32 %v8709_v55, %v774_v0  ;;  %v380_v60 = vpop.permute.xlu0 %379  ;;  %v9042_v62 = vadd.f32 %v690_v53, %v8867_v33  ;;  %v15931_v34 = vld [vmem:[#allocation47_spill] sm:$0xff]  ;;  %v15932_v33 = vld [vmem:[#allocation48_spill] sm:$0xff] }
 0x191   :  { %15923 = vst [vmem:[#allocation27_spill] sm:$0xff] %v9020_v21  ;;  %v1183_v43 = vmul.f32 %v8937_v61, %v1150_v29  ;;  %v996_v31 = vmin.f32 %v964_v36, 6.0  ;;  %v480_v20 = vmul.f32 %v8583_v27, %v380_v60  ;;  %v683_v0 = vmul.f32 %v8653_v48, %v15931_v34 }
 0x192   :  { %15924 = vst [vmem:[#allocation29_spill] sm:$0xff] %v9022_v5  ;;  %v930_v39 = vadd.f32 %v8738_v38, %v895_v42  ;;  %v891_v19 = vadd.f32 %v859_v37, %v8942_v35  ;;  %v900_v7 = vadd.f32 %v868_v8, %v8945_v1  ;;  %v693_v53 = vmul.f32 %v8653_v48, %v15932_v33  ;;  %v15936_v42 = vld [vmem:[#allocation49_spill] sm:$0xff] }
 0x193   :  { %15926 = vst [vmem:[#allocation30_spill] sm:$0xff] %v9026_v47  ;;  %v9054_v12 = vperm.slane %v76_v28, 2  ;;  %v1376_v29 = vmul.f32 %v9012_v10, %v1054_v63  ;;  %v9060_v36 = vperm.slane %v77_v4, 2  ;;  %v9065_v37 = vmul.f32 %v8709_v55, %v15936_v42  ;;  %v15938_v8 = vld [vmem:[#allocation5_spill] sm:$0xff] }
 0x194   :  { %15928 = vst [vmem:[#allocation25_spill] sm:$0xff] %v9030_v59  ;;  %v962_v35 = vmax.f32 %v930_v39, 0.0  ;;  %v926_v1 = vadd.f32 %v8738_v38, %v891_v19  ;;  %v686_v60 = vmul.f32 %v8653_v48, %v15938_v8  ;;  %v1151_v28 = vld [vmem:[#allocation2 + $0x19] sm:$0xff]  ;;  %v1280_v33 = vmul.f32 %v8965_v50, %v1247_v26  ;;  %v15946_v8 = vld [vmem:[#allocation15_spill] sm:$0xff] }
 0x195   :  { %1021 = vst.msk [vmem:[#allocation2 + $0x21] sm:$0xff] %vm32_vm0, %v989_v56  ;;  %v1086_v56 = vmul.f32 %v8935_v9, %v1053_v44  ;;  %v9056_v44 = vperm.slane %v77_v4, 1  ;;  %v935_v24 = vadd.f32 %v8738_v38, %v900_v7  ;;  %v9073_v39 = vadd.f32 %v683_v0, %v8875_v45  ;;  %v15942_v42 = vld [vmem:[#allocation9_spill] sm:$0xff] }
 0x196   :  { %15929 = vst [vmem:[#allocation28_spill] sm:$0xff] %v9034_v16  ;;  %v994_v2 = vmin.f32 %v962_v35, 6.0  ;;  %v9076_v19 = vadd.f32 %v693_v53, %v8886_v51  ;;  %v1087_v26 = vmul.f32 %v8935_v9, %v1054_v63  ;;  %v1184_v35 = vmul.f32 %v8937_v61, %v1151_v28  ;;  %v15944_v51 = vld [vmem:[#allocation6_spill] sm:$0xff]  ;;  %v1154_v0 = vld [vmem:[#allocation2 + $0x39] sm:$0xff] }
 0x197   :  { %15930 = vst [vmem:[#allocation33_spill] sm:$0xff] %v9042_v62  ;;  %v1215_v34 = vadd.f32 %v1183_v43, %v1086_v56  ;;  %v15939_v62 = vld [vmem:[#allocation51_spill] sm:$0xff]  ;;  %v692_v56 = vmul.f32 %v8653_v48, %v8894_v32  ;;  %v1408_v7 = vadd.f32 %v1376_v29, %v1311_v6  ;;  %v9088_v45 = vadd.f32 %v686_v60, %v8897_v40  ;;  %v1251_v63 = vld [vmem:[#allocation2 + $0x3a] sm:$0xff] }
 0x198   :  { %15933 = vst [vmem:[#allocation31_spill] sm:$0xff] %v9054_v12  ;;  %v512_v59 = vadd.f32 %v480_v20, %v15939_v62  ;;  %v695_v62 = vmul.f32 %v8653_v48, %v8967_v11  ;;  %v9092_v20 = vmul.f32 %v8709_v55, %v15944_v51  ;;  %v1473_v32 = vmul.f32 %v9022_v5, %v1151_v28  ;;  %v15948_v40 = vld [vmem:[#allocation17_spill] sm:$0xff] }
 0x199   :  { %15934 = vst [vmem:[#allocation32_spill] sm:$0xff] %v9056_v44  ;;  %v967_v29 = vmax.f32 %v935_v24, 0.0  ;;  %v9102_v60 = vmul.f32 %v8709_v55, %v15948_v40  ;;  %v9107_v28 = vperm.slane %v77_v4, 0  ;;  %v9111_v24 = vmul.f32 %v8937_v61, %v1154_v0 }
 0x19a   :  { %1028 = vst.msk [vmem:[#allocation2 + $0x79] sm:$0xff] %vm32_vm0, %v996_v31  ;;  %v958_v31 = vmax.f32 %v926_v1, 0.0  ;;  %v1312_v1 = vadd.f32 %v1280_v33, %v1215_v34  ;;  %v705_v11 = vadd.f32 %v15946_v8, %v512_v59  ;;  %v746_v34 = vpop.permute.xlu1 %745  ;;  %v1216_v33 = vadd.f32 %v1184_v35, %v1087_v26  ;;  %v1253_v26 = vld [vmem:[#allocation2 + $0x52] sm:$0xff] }
 0x19b   :  { %15935 = vst [vmem:[#allocation34_spill] sm:$0xff] %v9060_v36  ;;  %v9117_v51 = vmul.f32 %v8965_v50, %v1251_v63  ;;  %v9123_v4 = vmul.f32 %v9054_v12, %v1251_v63  ;;  %v999_v35 = vmin.f32 %v967_v29, 6.0  ;;  %v9149_v29 = vmul.f32 %v9054_v12, %v1253_v26 }
 0x19c   :  { %15937 = vst [vmem:[#allocation35_spill] sm:$0xff] %v9065_v37  ;;  %v689_v37 = vmul.f32 %v8653_v48, %v15942_v42  ;;  %v1055_v43 = vld [vmem:[#allocation2 + $0x20] sm:$0xff]  ;;  %v990_v53 = vmin.f32 %v958_v31, 6.0  ;;  %v9105_v42 = vadd.f32 %v692_v56, %v8917_v58  ;;  %v1505_v31 = vadd.f32 %v1473_v32, %v1408_v7  ;;  %v1156_v56 = vld [vmem:[#allocation2 + $0x51] sm:$0xff] }
 0x19d   :  { %15940 = vst [vmem:[#allocation36_spill] sm:$0xff] %v9073_v39  ;;  %v1377_v6 = vmul.f32 %v9012_v10, %v1055_v43  ;;  %v1152_v59 = vld [vmem:[#allocation2 + $0x21] sm:$0xff]  ;;  %v9120_v58 = vmul.f32 %v9022_v5, %v1154_v0  ;;  %v9126_v7 = vmul.f32 %v9056_v44, %v1154_v0  ;;  %v1088_v8 = vmul.f32 %v8935_v9, %v1055_v43 }
 0x19e   :  { %15941 = vst [vmem:[#allocation37_spill] sm:$0xff] %v9076_v19  ;;  %v1185_v40 = vmul.f32 %v8937_v61, %v1152_v59  ;;  %v1249_v48 = vld [vmem:[#allocation2 + $0x22] sm:$0xff]  ;;  %v9138_v0 = vmul.f32 %v8937_v61, %v1156_v56  ;;  %v9146_v43 = vmul.f32 %v9022_v5, %v1156_v56 }
 0x19f   :  { %1026 = vst.msk [vmem:[#allocation2 + $0x61] sm:$0xff] %vm32_vm0, %v994_v2  ;;  %v9098_v2 = vadd.f32 %v689_v37, %v8900_v3  ;;  %v1248_v3 = vld [vmem:[#allocation2 + $0x1a] sm:$0xff]  ;;  %v9114_v37 = vadd.f32 %v695_v62, %v8926_v15  ;;  %v1409_v32 = vadd.f32 %v1377_v6, %v1312_v1  ;;  %v861_v15 = vmul.f32 %v8709_v55, %v746_v34  ;;  %v786_v6 = vpop.permute.xlu2 %785 }
 0x1a0   :  { %15943 = vst [vmem:[#allocation11_spill] sm:$0xff] %v9088_v45  ;;  %v9131_v62 = vmul.f32 %v9060_v36, %v1251_v63  ;;  %v9141_v1 = vmul.f32 %v8965_v50, %v1253_v26  ;;  %v1570_v63 = vmul.f32 %v9054_v12, %v1248_v3  ;;  %v9155_v34 = vmul.f32 %v9060_v36, %v1253_v26  ;;  %v392_v45 = vpop.permute.xlu0 %391 }
 0x1a1   :  { %15945 = vst [vmem:[#allocation38_spill] sm:$0xff] %v9092_v20  ;;  %v893_v20 = vadd.f32 %v861_v15, %v8958_v49  ;;  %v1217_v19 = vadd.f32 %v1185_v40, %v1088_v8  ;;  %v1571_v39 = vmul.f32 %v9054_v12, %v1249_v48  ;;  %v871_v23 = vmul.f32 %v8709_v55, %v786_v6 }
 0x1a2   :  { %15947 = vst [vmem:[#allocation39_spill] sm:$0xff] %v9098_v2 }
 0x1a3   :  { %15949 = vst [vmem:[#allocation40_spill] sm:$0xff] %v9102_v60  ;;  %v1282_v60 = vmul.f32 %v8965_v50, %v1249_v48  ;;  %v928_v54 = vadd.f32 %v8738_v38, %v893_v20 }
 0x1a4   :  { %15950 = vst [vmem:[#allocation42_spill] sm:$0xff] %v9105_v42  ;;  %v1159_v42 = vld [vmem:[#allocation2 + $0x79] sm:$0xff] }
 0x1a5   :  { %15951 = vst [vmem:[#allocation50_spill] sm:$0xff] %v9107_v28  ;;  %v1192_v47 = vmul.f32 %v8937_v61, %v1159_v42 }
 0x1a6   :  { %1022 = vst.msk [vmem:[#allocation2 + $0x31] sm:$0xff] %vm32_vm0, %v990_v53  ;;  %v898_v53 = vadd.f32 %v8951_v46, %v705_v11  ;;  %v1474_v46 = vmul.f32 %v9022_v5, %v1152_v59  ;;  %v9152_v11 = vmul.f32 %v9056_v44, %v1156_v56  ;;  %v1060_v15 = vld [vmem:[#allocation2 + $0x60] sm:$0xff] }
 0x1a7   :  { %15952 = vst [vmem:[#allocation43_spill] sm:$0xff] %v9114_v37  ;;  %v1281_v37 = vmul.f32 %v8965_v50, %v1248_v3 }
 0x1a8   :  { %1031 = vst.msk [vmem:[#allocation2 + $0x99] sm:$0xff] %vm32_vm0, %v999_v35  ;;  %v1062_v35 = vld [vmem:[#allocation2 + $0x78] sm:$0xff]  ;;  %v1506_v59 = vadd.f32 %v1474_v46, %v1409_v32  ;;  %v933_v3 = vadd.f32 %v8738_v38, %v898_v53  ;;  %v1602_v46 = vadd.f32 %v1570_v63, %v1505_v31  ;;  %v9168_v53 = vmul.f32 %v9022_v5, %v1159_v42 }
 0x1a9   :  { %15953 = vst [vmem:[#allocation41_spill] sm:$0xff] %v9141_v1  ;;  %v1313_v56 = vadd.f32 %v1281_v37, %v1216_v33  ;;  %v1095_v26 = vmul.f32 %v8935_v9, %v1062_v35  ;;  %v9165_v21 = vmul.f32 %v9012_v10, %v1062_v35  ;;  %v9171_v49 = vmul.f32 %v9107_v28, %v1062_v35  ;;  %v758_v37 = vpop.permute.xlu1 %757 }
 0x1aa   :  { %15954 = vst [vmem:[#allocation8_spill] sm:$0xff] %v9149_v29  ;;  %v483_v33 = vmul.f32 %v8583_v27, %v392_v45  ;;  %v1603_v8 = vadd.f32 %v1571_v39, %v1506_v59  ;;  %v965_v6 = vmax.f32 %v933_v3, 0.0  ;;  %v9178_v31 = vmul.f32 %v9056_v44, %v1159_v42  ;;  %v1157_v3 = vld [vmem:[#allocation2 + $0x61] sm:$0xff] }
 0x1ab   :  { %15955 = vst [vmem:[#allocation44_spill] sm:$0xff] %v9165_v21  ;;  %v9182_v21 = vadd.f32 %v1192_v47, %v1095_v26  ;;  %v1314_v45 = vadd.f32 %v1282_v60, %v1217_v19  ;;  %v864_v39 = vmul.f32 %v8709_v55, %v758_v37  ;;  %v1093_v59 = vmul.f32 %v8935_v9, %v1060_v15  ;;  %v15959_v42 = vld [vmem:[#allocation53_spill] sm:$0xff] }
 0x1ac   :  { %15956 = vst [vmem:[#allocation47_spill] sm:$0xff] %v9168_v53  ;;  %v903_v53 = vadd.f32 %v871_v23, %v8961_v22  ;;  %v997_v1 = vmin.f32 %v965_v6, 6.0  ;;  %v960_v23 = vmax.f32 %v928_v54, 0.0  ;;  %v1190_v26 = vmul.f32 %v8937_v61, %v1157_v3 }
 0x1ad   :  { %v1056_v2 = vld [vmem:[#allocation2 + $0x30] sm:$0xff]  ;;  %v1057_v16 = vld [vmem:[#allocation2 + $0x38] sm:$0xff]  ;;  %15957 = vst [vmem:[#allocation48_spill] sm:$0xff] %v9171_v49  ;;  %v896_v54 = vadd.f32 %v864_v39, %v8981_v57 }
 0x1ae   :  { %v1153_v32 = vld [vmem:[#allocation2 + $0x31] sm:$0xff]  ;;  %v1668_v48 = vmul.f32 %v9107_v28, %v1056_v2  ;;  %v1669_v40 = vmul.f32 %v9107_v28, %v1057_v16  ;;  %15958 = vst [vmem:[#allocation49_spill] sm:$0xff] %v9178_v31  ;;  %v1378_v20 = vmul.f32 %v9012_v10, %v1056_v2  ;;  %v515_v31 = vadd.f32 %v483_v33, %v15959_v42 }
 0x1af   :  { %v1250_v63 = vld [vmem:[#allocation2 + $0x32] sm:$0xff]  ;;  %v1765_v35 = vmul.f32 %v9056_v44, %v1153_v32  ;;  %v1089_v22 = vmul.f32 %v8935_v9, %v1056_v2  ;;  %v1186_v47 = vmul.f32 %v8937_v61, %v1153_v32  ;;  %v938_v60 = vadd.f32 %v8738_v38, %v903_v53  ;;  %1029 = vst.msk [vmem:[#allocation2 + $0x81] sm:$0xff] %vm32_vm0, %v997_v1 }
 0x1b0   :  { %v1700_v17 = vadd.f32 %v1668_v48, %v1602_v46  ;;  %v1701_v49 = vadd.f32 %v1669_v40, %v1603_v8  ;;  %v1379_v46 = vmul.f32 %v9012_v10, %v1057_v16  ;;  %v1862_v48 = vmul.f32 %v9060_v36, %v1250_v63  ;;  %v798_v8 = vpop.permute.xlu2 %797 }
 0x1b1   :  { %v992_v37 = vmin.f32 %v960_v23, 6.0  ;;  %v9203_v2 = vmul.f32 %v9012_v10, %v1060_v15  ;;  %v1410_v53 = vadd.f32 %v1378_v20, %v1313_v56  ;;  %v1090_v40 = vmul.f32 %v8935_v9, %v1057_v16 }
 0x1b2   :  { %v1797_v29 = vadd.f32 %v1765_v35, %v1700_v17  ;;  %v1798_v19 = vadd.f32 %v9126_v7, %v1701_v49  ;;  %v9198_v17 = vld [vmem:[%s15572_s4] ss:$0 sm:$0xff]  ;;  %v9206_v7 = vmul.f32 %v9022_v5, %v1157_v3  ;;  %v970_v49 = vmax.f32 %v938_v60, 0.0 }
 0x1b3   :  { %v1411_v6 = vadd.f32 %v1379_v46, %v1314_v45  ;;  %v1475_v35 = vmul.f32 %v9022_v5, %v1153_v32  ;;  %1024 = vst.msk [vmem:[#allocation2 + $0x49] sm:$0xff] %vm32_vm0, %v992_v37  ;;  %v931_v1 = vadd.f32 %v8738_v38, %v896_v54  ;;  %v708_v42 = vadd.f32 %v8839_v30, %v515_v31 }
 0x1b4   :  { %v1894_v33 = vadd.f32 %v1862_v48, %v1797_v29  ;;  %v1218_v29 = vadd.f32 %v1186_v47, %v1089_v22  ;;  %v1895_v57 = vadd.f32 %v9131_v62, %v1798_v19  ;;  %v1002_v39 = vmin.f32 %v970_v49, 6.0  ;;  %v404_v48 = vpop.permute.xlu0 %403  ;;  %v1162_v22 = vld [vmem:[#allocation2 + $0x99] sm:$0xff] }
 0x1b5   :  { %v9215_v56 = vmul.f32 %v9107_v28, %v1060_v15  ;;  %v963_v16 = vmax.f32 %v931_v1, 0.0  ;;  %v874_v45 = vmul.f32 %v8709_v55, %v798_v8  ;;  %v9220_v32 = vmul.f32 %v9056_v44, %v1157_v3  ;;  %v1259_v62 = vld [vmem:[#allocation2 + $0x9a] sm:$0xff] }
 0x1b6   :  { %v1929_v20 = vadd.f32 %v9198_v17, %v1894_v33  ;;  %v1283_v46 = vmul.f32 %v8965_v50, %v1250_v63  ;;  %v1507_v23 = vadd.f32 %v1475_v35, %v1410_v53  ;;  %1034 = vst.msk [vmem:[#allocation2 + $0xc1] sm:$0xff] %vm32_vm0, %v1002_v39  ;;  %v9224_v30 = vadd.f32 %v1190_v26, %v1093_v59 }
 0x1b7   :  { %v1219_v15 = vadd.f32 %v9111_v24, %v1090_v40  ;;  %v1508_v31 = vadd.f32 %v9120_v58, %v1411_v6  ;;  %v995_v47 = vmin.f32 %v963_v16, 6.0  ;;  %v486_v19 = vmul.f32 %v8583_v27, %v404_v48  ;;  %v770_v58 = vpop.permute.xlu1 %769 }
 0x1b8   :  { %v1315_v60 = vadd.f32 %v1283_v46, %v1218_v29  ;;  %v1572_v3 = vmul.f32 %v9054_v12, %v1250_v63  ;;  %v1930_v33 = vadd.f32 %v9198_v17, %v1895_v57  ;;  %v901_v37 = vadd.f32 %v8973_v14, %v708_v42  ;;  %v15964_v57 = vld [vmem:[#allocation54_spill] sm:$0xff] }
 0x1b9   :  { %v1961_v54 = vmax.f32 %v1929_v20, 0.0  ;;  %v9233_v53 = vmul.f32 %v8937_v61, %v1162_v22  ;;  %v9236_v59 = vmul.f32 %v8965_v50, %v1259_v62  ;;  %1027 = vst.msk [vmem:[#allocation2 + $0x69] sm:$0xff] %vm32_vm0, %v995_v47  ;;  %v906_v24 = vadd.f32 %v874_v45, %v8986_v41 }
 0x1ba   :  { %v1604_v26 = vadd.f32 %v1572_v3, %v1507_v23  ;;  %v9241_v49 = vmul.f32 %v9022_v5, %v1162_v22  ;;  %v9244_v63 = vmul.f32 %v9054_v12, %v1259_v62  ;;  %v9247_v14 = vmul.f32 %v9056_v44, %v1162_v22  ;;  %v1058_v8 = vld [vmem:[#allocation2 + $0x48] sm:$0xff]  ;;  %v1059_v35 = vld [vmem:[#allocation2 + $0x50] sm:$0xff] }
 0x1bb   :  { %15960 = vst [vmem:[#allocation5_spill] sm:$0xff] %v9233_v53  ;;  %v1155_v40 = vld [vmem:[#allocation2 + $0x49] sm:$0xff]  ;;  %v9250_v6 = vmul.f32 %v9060_v36, %v1259_v62  ;;  %v1316_v41 = vadd.f32 %v9117_v51, %v1219_v15  ;;  %v1605_v29 = vadd.f32 %v9123_v4, %v1508_v31  ;;  %v518_v39 = vadd.f32 %v486_v19, %v15964_v57  ;;  %v810_v51 = vpop.permute.xlu2 %809 }
 0x1bc   :  { %15961 = vst [vmem:[#allocation51_spill] sm:$0xff] %v9236_v59  ;;  %v1252_v1 = vld [vmem:[#allocation2 + $0x4a] sm:$0xff]  ;;  %v1962_v42 = vmax.f32 %v1930_v33, 0.0  ;;  %v1091_v48 = vmul.f32 %v8935_v9, %v1058_v8  ;;  %v936_v20 = vadd.f32 %v8738_v38, %v901_v37  ;;  %v867_v16 = vmul.f32 %v8709_v55, %v770_v58 }
 0x1bd   :  { %15962 = vst [vmem:[#allocation9_spill] sm:$0xff] %v9241_v49  ;;  %v9258_v45 = vmin.f32 %v1961_v54, 6.0  ;;  %v1188_v46 = vmul.f32 %v8937_v61, %v1155_v40  ;;  %v1380_v23 = vmul.f32 %v9012_v10, %v1058_v8  ;;  %v9263_v22 = vadd.f32 %v8738_v38, %v906_v24 }
 0x1be   :  { %15963 = vst [vmem:[#allocation6_spill] sm:$0xff] %v9244_v63  ;;  %v1092_v4 = vmul.f32 %v8935_v9, %v1059_v35  ;;  %v1285_v62 = vmul.f32 %v8965_v50, %v1252_v1  ;;  %v1381_v15 = vmul.f32 %v9012_v10, %v1059_v35  ;;  %v1670_v31 = vmul.f32 %v9107_v28, %v1058_v8 }
 0x1bf   :  { %15965 = vst [vmem:[#allocation15_spill] sm:$0xff] %v9258_v45  ;;  %v1220_v47 = vadd.f32 %v1188_v46, %v1091_v48  ;;  %v1412_v19 = vadd.f32 %v1380_v23, %v1315_v60  ;;  %v1477_v3 = vmul.f32 %v9022_v5, %v1155_v40  ;;  %v1671_v33 = vmul.f32 %v9107_v28, %v1059_v35  ;;  %v1063_v35 = vld [vmem:[#allocation2 + $0x80] sm:$0xff] }
 0x1c0   :  { %v1702_v37 = vadd.f32 %v1670_v31, %v1604_v26  ;;  %v1767_v54 = vmul.f32 %v9056_v44, %v1155_v40  ;;  %v711_v24 = vadd.f32 %v8848_v25, %v518_v39  ;;  %v877_v58 = vmul.f32 %v8709_v55, %v810_v51  ;;  %v1061_v23 = vld [vmem:[#allocation2 + $0x68] sm:$0xff] }
 0x1c1   :  { %v1317_v57 = vadd.f32 %v1285_v62, %v1220_v47  ;;  %v1509_v63 = vadd.f32 %v1477_v3, %v1412_v19  ;;  %v1703_v59 = vadd.f32 %v1671_v33, %v1605_v29  ;;  %v968_v49 = vmax.f32 %v936_v20, 0.0  ;;  %v9285_v20 = vld [vmem:[#allocation2 + $0x81] sm:$0xff] }
 0x1c2   :  { %v9274_v53 = vmin.f32 %v1962_v42, 6.0  ;;  %v1799_v8 = vadd.f32 %v1767_v54, %v1702_v37  ;;  %v1864_v60 = vmul.f32 %v9060_v36, %v1252_v1  ;;  %v9278_v48 = vadd.f32 %v867_v16, %v9002_v13  ;;  %v9289_v16 = vld [vmem:[#allocation2 + $0x7a] sm:$0xff]  ;;  %v1254_v62 = vld [vmem:[#allocation2 + $0x62] sm:$0xff] }
 0x1c3   :  { %v1221_v26 = vadd.f32 %v9138_v0, %v1092_v4  ;;  %v1413_v40 = vadd.f32 %v1381_v15, %v1316_v41  ;;  %v1574_v25 = vmul.f32 %v9054_v12, %v1252_v1  ;;  %v1800_v39 = vadd.f32 %v9152_v11, %v1703_v59  ;;  %v1158_v41 = vld [vmem:[#allocation2 + $0x69] sm:$0xff] }
 0x1c4   :  { %15966 = vst [vmem:[#allocation17_spill] sm:$0xff] %v9274_v53  ;;  %v2025_v29 = vsel %vm32_vm0, %v9258_v45, 0.0  ;;  %v1414_v42 = vadd.f32 %v9203_v2, %v1317_v57  ;;  %v1896_v46 = vadd.f32 %v1864_v60, %v1799_v8  ;;  %v973_v13 = vmax.f32 %v9263_v22, 0.0  ;;  %v9317_v33 = vld [vmem:[#allocation2 + $0x82] sm:$0xff] }
 0x1c5   :  { %v1606_v51 = vadd.f32 %v1574_v25, %v1509_v63  ;;  %v1000_v0 = vmin.f32 %v968_v49, 6.0  ;;  %v904_v1 = vadd.f32 %v8990_v18, %v711_v24  ;;  %v9293_v11 = vadd.f32 %v877_v58, %v9005_v52  ;;  %v1255_v52 = vld [vmem:[#allocation2 + $0x6a] sm:$0xff]  ;;  %v15967_v63 = vld [vmem:[#allocation41_spill] sm:$0xff] }
 0x1c6   :  { %v2026_v59 = vsel %vm32_vm0, %v9274_v53, 0.0  ;;  %v9298_v4 = vmul.f32 %v8935_v9, %v1063_v35  ;;  %v1897_v2 = vadd.f32 %v9155_v34, %v1800_v39  ;;  %v1931_v22 = vadd.f32 %v9198_v17, %v1896_v46 }
 0x1c7   :  { %v9304_v49 = vmul.f32 %v8937_v61, %v9285_v20  ;;  %v1510_v18 = vadd.f32 %v9146_v43, %v1413_v40  ;;  %1032 = vst.msk [vmem:[#allocation2 + $0xa9] sm:$0xff] %vm32_vm0, %v1000_v0  ;;  %v1318_v15 = vadd.f32 %v15967_v63, %v1221_v26  ;;  %v1383_v31 = vmul.f32 %v9012_v10, %v1061_v23  ;;  %v15968_v40 = vld [vmem:[#allocation8_spill] sm:$0xff] }
 0x1c8   :  { %v9312_v47 = vmul.f32 %v8965_v50, %v9289_v16  ;;  %v1094_v34 = vmul.f32 %v8935_v9, %v1061_v23  ;;  %v1191_v19 = vmul.f32 %v8937_v61, %v1158_v41  ;;  %v1511_v3 = vadd.f32 %v9206_v7, %v1414_v42 }
 0x1c9   :  { %v1704_v43 = vadd.f32 %v9215_v56, %v1606_v51  ;;  %v1415_v37 = vadd.f32 %v1383_v31, %v1318_v15  ;;  %v1480_v54 = vmul.f32 %v9022_v5, %v1158_v41  ;;  %v1576_v24 = vmul.f32 %v9054_v12, %v1254_v62 }
 0x1ca   :  { %v2027_v58 = vadd.f32 %v2026_v59, %v2025_v29  ;;  %v1932_v57 = vadd.f32 %v9198_v17, %v1897_v2  ;;  %v1963_v8 = vmax.f32 %v1931_v22, 0.0  ;;  %v1577_v60 = vmul.f32 %v9054_v12, %v1255_v52  ;;  %v15969_v59 = vld [vmem:[#allocation48_spill] sm:$0xff] }
 0x1cb   :  { %v1512_v26 = vadd.f32 %v1480_v54, %v1415_v37  ;;  %v1607_v25 = vadd.f32 %v15968_v40, %v1510_v18  ;;  %v1608_v39 = vadd.f32 %v1576_v24, %v1511_v3  ;;  %v1673_v7 = vmul.f32 %v9107_v28, %v1061_v23  ;;  %v15971_v24 = vld [vmem:[#allocation49_spill] sm:$0xff] }
 0x1cc   :  { %v9328_v56 = vmul.f32 %v8965_v50, %v9317_v33  ;;  %v1385_v42 = vmul.f32 %v9012_v10, %v1063_v35  ;;  %v1675_v46 = vmul.f32 %v9107_v28, %v1063_v35  ;;  %v1223_v29 = vadd.f32 %v1191_v19, %v1094_v34 }
 0x1cd   :  { %v1609_v51 = vadd.f32 %v1577_v60, %v1512_v26  ;;  %v1705_v0 = vadd.f32 %v1673_v7, %v1607_v25  ;;  %v1706_v2 = vadd.f32 %v15969_v59, %v1608_v39  ;;  %v1801_v22 = vadd.f32 %v9220_v32, %v1704_v43 }
 0x1ce   :  { %v1772_v18 = vmul.f32 %v9056_v44, %v9285_v20  ;;  %v1868_v23 = vmul.f32 %v9060_v36, %v9289_v16  ;;  %v1869_v63 = vmul.f32 %v9060_v36, %v9317_v33  ;;  %v1770_v15 = vmul.f32 %v9056_v44, %v1158_v41 }
 0x1cf   :  { %v1964_v31 = vmax.f32 %v1932_v57, 0.0  ;;  %v9341_v35 = vmin.f32 %v1963_v8, 6.0  ;;  %v1288_v34 = vmul.f32 %v8965_v50, %v1255_v52  ;;  %v1866_v19 = vmul.f32 %v9060_v36, %v1254_v62 }
 0x1d0   :  { %v1287_v32 = vmul.f32 %v8965_v50, %v1254_v62  ;;  %v1707_v3 = vadd.f32 %v1675_v46, %v1609_v51  ;;  %v1802_v43 = vadd.f32 %v1770_v15, %v1705_v0  ;;  %v1867_v37 = vmul.f32 %v9060_v36, %v1255_v52  ;;  %v1068_v46 = vld [vmem:[#allocation2 + $0xc0] sm:$0xff] }
 0x1d1   :  { %15970 = vst [vmem:[#allocation53_spill] sm:$0xff] %v9341_v35  ;;  %v1320_v54 = vadd.f32 %v1288_v34, %v1223_v29  ;;  %v1803_v60 = vadd.f32 %v15971_v24, %v1706_v2  ;;  %v1898_v26 = vadd.f32 %v1866_v19, %v1801_v22  ;;  %v1005_v40 = vmin.f32 %v973_v13, 6.0  ;;  %v1165_v29 = vld [vmem:[#allocation2 + $0xc1] sm:$0xff]  ;;  %v416_v34 = vpop.permute.xlu0 %415 }
 0x1d2   :  { %v1804_v25 = vadd.f32 %v1772_v18, %v1707_v3  ;;  %v1899_v41 = vadd.f32 %v1867_v37, %v1802_v43  ;;  %v939_v57 = vadd.f32 %v8738_v38, %v904_v1  ;;  %v934_v8 = vadd.f32 %v8738_v38, %v9278_v48 }
 0x1d3   :  { %v9351_v39 = vmin.f32 %v1964_v31, 6.0  ;;  %v2028_v62 = vsel %vm32_vm0, %v9341_v35, 0.0  ;;  %v1900_v7 = vadd.f32 %v1868_v23, %v1803_v60  ;;  %v1933_v52 = vadd.f32 %v9198_v17, %v1898_v26  ;;  %1037 = vst.msk [vmem:[#allocation2 + $0xe1] sm:$0xff] %vm32_vm0, %v1005_v40 }
 0x1d4   :  { %v1901_v13 = vadd.f32 %v1869_v63, %v1804_v25  ;;  %v1934_v51 = vadd.f32 %v9198_v17, %v1899_v41  ;;  %v971_v0 = vmax.f32 %v939_v57, 0.0  ;;  %v966_v1 = vmax.f32 %v934_v8, 0.0 }
 0x1d5   :  { %15972 = vst [vmem:[#allocation54_spill] sm:$0xff] %v9351_v39  ;;  %v1482_v48 = vmul.f32 %v9022_v5, %v9285_v20  ;;  %v1319_v59 = vadd.f32 %v1287_v32, %v9224_v30  ;;  %v1935_v2 = vadd.f32 %v9198_v17, %v1900_v7  ;;  %v1965_v22 = vmax.f32 %v1933_v52, 0.0  ;;  %v1163_v7 = vld [vmem:[#allocation2 + $0xa9] sm:$0xff] }
 0x1d6   :  { %v2029_v18 = vadd.f32 %v2028_v62, %v2027_v58  ;;  %v1966_v23 = vmax.f32 %v1934_v51, 0.0  ;;  %v1003_v15 = vmin.f32 %v971_v0, 6.0  ;;  %v998_v31 = vmin.f32 %v966_v1, 6.0  ;;  %v1066_v62 = vld [vmem:[#allocation2 + $0xa8] sm:$0xff]  ;;  %v15977_v1 = vld [vmem:[#allocation3_spill] sm:$0xff] }
 0x1d7   :  { %v1101_v19 = vmul.f32 %v8935_v9, %v1068_v46  ;;  %v1198_v63 = vmul.f32 %v8937_v61, %v1165_v29  ;;  %v9364_v3 = vmin.f32 %v1965_v22, 6.0  ;;  %v944_v43 = vadd.f32 %v8738_v38, %v9293_v11 }
 0x1d8   :  { %v1417_v20 = vadd.f32 %v1385_v42, %v1320_v54  ;;  %v1936_v30 = vadd.f32 %v9198_v17, %v1901_v13  ;;  %v1967_v32 = vmax.f32 %v1935_v2, 0.0  ;;  %v2030_v58 = vsel %vm32_vm0, %v9351_v39, 0.0  ;;  %1035 = vst.msk [vmem:[#allocation2 + $0xc9] sm:$0xff] %vm32_vm0, %v1003_v15  ;;  %v15975_v42 = vld [vmem:[#allocation44_spill] sm:$0xff] }
 0x1d9   :  { %15973 = vst [vmem:[#allocation41_spill] sm:$0xff] %v9364_v3  ;;  %v9372_v37 = vmin.f32 %v1966_v23, 6.0  ;;  %v2032_v24 = vsel %vm32_vm0, %v9364_v3, 0.0  ;;  %v976_v60 = vmax.f32 %v944_v43, 0.0  ;;  %v489_v26 = vmul.f32 %v8583_v27, %v416_v34 }
 0x1da   :  { %1030 = vst.msk [vmem:[#allocation2 + $0x91] sm:$0xff] %vm32_vm0, %v998_v31  ;;  %v1225_v38 = vadd.f32 %v9304_v49, %v9298_v4  ;;  %v1578_v11 = vmul.f32 %v9054_v12, %v9289_v16  ;;  %v1416_v54 = vadd.f32 %v15975_v42, %v1319_v59  ;;  %v2031_v40 = vadd.f32 %v2030_v58, %v2029_v18  ;;  %v782_v4 = vpop.permute.xlu1 %781  ;;  %v15978_v18 = vld [vmem:[#allocation47_spill] sm:$0xff]  ;;  %v822_v42 = vpop.permute.xlu2 %821 }
 0x1db   :  { %15974 = vst [vmem:[#allocation8_spill] sm:$0xff] %v9372_v37  ;;  %v1579_v25 = vmul.f32 %v9054_v12, %v9317_v33  ;;  %v9385_v41 = vadd.f32 %v1198_v63, %v1101_v19  ;;  %v9388_v57 = vmul.f32 %v9012_v10, %v1068_v46  ;;  %v9391_v8 = vmul.f32 %v9022_v5, %v1165_v29  ;;  %v1168_v19 = vld [vmem:[#allocation2 + $0xe1] sm:$0xff] }
 0x1dc   :  { %v9394_v49 = vmul.f32 %v9107_v28, %v1068_v46  ;;  %v1514_v16 = vadd.f32 %v1482_v48, %v1417_v20  ;;  %v1968_v52 = vmax.f32 %v1936_v30, 0.0  ;;  %v2033_v13 = vadd.f32 %v2032_v24, %v2031_v40 }
 0x1dd   :  { %v9396_v51 = vmin.f32 %v1967_v32, 6.0  ;;  %v2034_v33 = vsel %vm32_vm0, %v9372_v37, 0.0  ;;  %v1008_v0 = vmin.f32 %v976_v60, 6.0  ;;  %v521_v59 = vadd.f32 %v489_v26, %v15977_v1  ;;  %v15980_v60 = vld [vmem:[#allocation12_spill] sm:$0xff] }
 0x1de   :  { %v1099_v2 = vmul.f32 %v8935_v9, %v1066_v62  ;;  %v1196_v22 = vmul.f32 %v8937_v61, %v1163_v7  ;;  %v1513_v23 = vadd.f32 %v15978_v18, %v1416_v54  ;;  %v870_v46 = vmul.f32 %v8709_v55, %v782_v4 }
 0x1df   :  { %15976 = vst [vmem:[#allocation48_spill] sm:$0xff] %v9396_v51  ;;  %v9406_v48 = vmul.f32 %v9056_v44, %v1165_v29  ;;  %v9409_v15 = vmul.f32 %v9012_v10, %v1066_v62  ;;  %v9412_v31 = vmul.f32 %v9022_v5, %v1163_v7  ;;  %v9415_v34 = vmul.f32 %v9107_v28, %v1066_v62  ;;  %v1265_v29 = vld [vmem:[#allocation2 + $0xe2] sm:$0xff]  ;;  %v9461_v18 = vld [vmem:[#allocation2 + $0xca] sm:$0xff] }
 0x1e0   :  { %1040 = vst.msk [vmem:[#allocation2 + $0x109] sm:$0xff] %vm32_vm0, %v1008_v0  ;;  %v9419_v63 = vmul.f32 %v9056_v44, %v1163_v7  ;;  %v9421_v43 = vmin.f32 %v1968_v52, 6.0  ;;  %v2035_v20 = vadd.f32 %v2034_v33, %v2033_v13  ;;  %v1321_v30 = vadd.f32 %v9312_v47, %v9182_v21  ;;  %v15981_v7 = vld [vmem:[#allocation26_spill] sm:$0xff]  ;;  %v428_v21 = vpop.permute.xlu0 %427 }
 0x1e1   :  { %v2036_v32 = vsel %vm32_vm0, %v9396_v51, 0.0  ;;  %v9428_v58 = vadd.f32 %v9328_v56, %v1225_v38  ;;  %v1611_v24 = vadd.f32 %v1579_v25, %v1514_v16  ;;  %v714_v26 = vadd.f32 %v15980_v60, %v521_v59  ;;  %v1064_v40 = vld [vmem:[#allocation2 + $0x90] sm:$0xff]  ;;  %v1069_v16 = vld [vmem:[#allocation2 + $0xc8] sm:$0xff] }
 0x1e2   :  { %15979 = vst [vmem:[#allocation49_spill] sm:$0xff] %v9421_v43  ;;  %v9432_v54 = vmul.f32 %v8937_v61, %v1168_v19  ;;  %v1610_v62 = vadd.f32 %v1578_v11, %v1513_v23  ;;  %v902_v4 = vadd.f32 %v870_v46, %v15981_v7  ;;  %v9435_v52 = vadd.f32 %v1196_v22, %v1099_v2  ;;  %v1166_v13 = vld [vmem:[#allocation2 + $0xc9] sm:$0xff]  ;;  %v1065_v11 = vld [vmem:[#allocation2 + $0x98] sm:$0xff] }
 0x1e3   :  { %v9438_v47 = vmul.f32 %v8965_v50, %v1265_v29  ;;  %v9441_v56 = vmul.f32 %v9022_v5, %v1168_v19  ;;  %v9444_v38 = vmul.f32 %v9054_v12, %v1265_v29  ;;  %v9447_v25 = vmul.f32 %v9056_v44, %v1168_v19  ;;  %v9454_v1 = vld [vmem:[#allocation2 + $0xc2] sm:$0xff]  ;;  %v1161_v59 = vld [vmem:[#allocation2 + $0x91] sm:$0xff] }
 0x1e4   :  { %v9449_v33 = vadd.f32 %v2036_v32, %v2035_v20  ;;  %v9452_v0 = vmul.f32 %v9060_v36, %v1265_v29  ;;  %v9458_v2 = vsel %vm32_vm0, %v9421_v43, 0.0  ;;  %v880_v22 = vmul.f32 %v8709_v55, %v822_v42  ;;  %v15987_v19 = vld [vmem:[#allocation27_spill] sm:$0xff]  ;;  %v9473_v42 = vld [vmem:[%s15571_s2] ss:$0 sm:$0xff] }
 0x1e5   :  { %15982 = vst [vmem:[#allocation44_spill] sm:$0xff] %v9438_v47  ;;  %v1386_v23 = vmul.f32 %v9012_v10, %v1064_v40  ;;  %v1676_v46 = vmul.f32 %v9107_v28, %v1064_v40  ;;  %v907_v20 = vadd.f32 %v15987_v19, %v714_v26  ;;  %v492_v29 = vmul.f32 %v8583_v27, %v428_v21  ;;  %v1258_v7 = vld [vmem:[#allocation2 + $0x92] sm:$0xff] }
 0x1e6   :  { %15983 = vst [vmem:[#allocation3_spill] sm:$0xff] %v9441_v56  ;;  %v1102_v32 = vmul.f32 %v8935_v9, %v1069_v16  ;;  %v1199_v60 = vmul.f32 %v8937_v61, %v1166_v13  ;;  %v1677_v37 = vmul.f32 %v9107_v28, %v1065_v11  ;;  %v937_v43 = vadd.f32 %v9473_v42, %v902_v4 }
 0x1e7   :  { %15984 = vst [vmem:[#allocation47_spill] sm:$0xff] %v9444_v38  ;;  %v9478_v39 = vmul.f32 %v8965_v50, %v9454_v1  ;;  %v9481_v26 = vmul.f32 %v9012_v10, %v1069_v16  ;;  %v1708_v21 = vadd.f32 %v1676_v46, %v1610_v62  ;;  %v1773_v19 = vmul.f32 %v9056_v44, %v1161_v59 }
 0x1e8   :  { %15985 = vst [vmem:[#allocation12_spill] sm:$0xff] %v9447_v25  ;;  %v9486_v51 = vmul.f32 %v8965_v50, %v9461_v18  ;;  %v1097_v3 = vmul.f32 %v8935_v9, %v1064_v40  ;;  %v1194_v45 = vmul.f32 %v8937_v61, %v1161_v59  ;;  %v1709_v53 = vadd.f32 %v1677_v37, %v1611_v24  ;;  %v794_v25 = vpop.permute.xlu1 %793 }
 0x1e9   :  { %15986 = vst [vmem:[#allocation26_spill] sm:$0xff] %v9452_v0  ;;  %v9491_v4 = vmul.f32 %v9022_v5, %v1166_v13  ;;  %v1418_v35 = vadd.f32 %v1386_v23, %v1321_v30  ;;  %v1805_v38 = vadd.f32 %v1773_v19, %v1708_v21  ;;  %v1870_v47 = vmul.f32 %v9060_v36, %v1258_v7 }
 0x1ea   :  { %v9494_v0 = vadd.f32 %v1199_v60, %v1102_v32  ;;  %v9498_v62 = vmul.f32 %v9054_v12, %v9454_v1  ;;  %v9502_v46 = vmul.f32 %v9054_v12, %v9461_v18  ;;  %v1806_v40 = vadd.f32 %v9247_v14, %v1709_v53 }
 0x1eb   :  { %v9506_v37 = vmul.f32 %v9107_v28, %v1069_v16  ;;  %v1483_v30 = vmul.f32 %v9022_v5, %v1161_v59  ;;  %v1902_v24 = vadd.f32 %v1870_v47, %v1805_v38  ;;  %v942_v23 = vadd.f32 %v9473_v42, %v907_v20  ;;  %v15990_v59 = vld [vmem:[#allocation30_spill] sm:$0xff] }
 0x1ec   :  { %15988 = vst [vmem:[#allocation27_spill] sm:$0xff] %v9498_v62  ;;  %v1226_v32 = vadd.f32 %v1194_v45, %v1097_v3  ;;  %v1387_v60 = vmul.f32 %v9012_v10, %v1065_v11  ;;  %v1903_v21 = vadd.f32 %v9250_v6, %v1806_v40  ;;  %v969_v19 = vmax.f32 %v937_v43, 0.0  ;;  %v1074_v20 = vld [vmem:[#allocation2 + $0x108] sm:$0xff]  ;;  %v15991_v40 = vld [vmem:[#allocation4_spill] sm:$0xff] }
 0x1ed   :  { %15989 = vst [vmem:[#allocation55_spill] sm:$0xff] %v9502_v46  ;;  %v9513_v56 = vmul.f32 %v9056_v44, %v1166_v13  ;;  %v1515_v46 = vadd.f32 %v1483_v30, %v1418_v35  ;;  %v1937_v53 = vadd.f32 %v9198_v17, %v1902_v24  ;;  %v974_v14 = vmax.f32 %v942_v23, 0.0  ;;  %v1171_v6 = vld [vmem:[#allocation2 + $0x109] sm:$0xff] }
 0x1ee   :  { %v1098_v16 = vmul.f32 %v8935_v9, %v1065_v11  ;;  %v1291_v47 = vmul.f32 %v8965_v50, %v1258_v7  ;;  %v1001_v38 = vmin.f32 %v969_v19, 6.0  ;;  %v912_v45 = vadd.f32 %v880_v22, %v15990_v59 }
 0x1ef   :  { %v1580_v3 = vmul.f32 %v9054_v12, %v1258_v7  ;;  %v1006_v43 = vmin.f32 %v974_v14, 6.0  ;;  %v524_v62 = vadd.f32 %v492_v29, %v15991_v40  ;;  %v873_v13 = vmul.f32 %v8709_v55, %v794_v25  ;;  %v15992_v7 = vld [vmem:[#allocation18_spill] sm:$0xff]  ;;  %v15993_v14 = vld [vmem:[#allocation28_spill] sm:$0xff]  ;;  %v15996_v40 = vld [vmem:[#allocation9_spill] sm:$0xff] }
 0x1f0   :  { %v1323_v35 = vadd.f32 %v1291_v47, %v1226_v32  ;;  %v1419_v30 = vadd.f32 %v1387_v60, %v9428_v58  ;;  %v1938_v24 = vadd.f32 %v9198_v17, %v1903_v21  ;;  %1033 = vst.msk [vmem:[#allocation2 + $0xb1] sm:$0xff] %vm32_vm0, %v1001_v38  ;;  %v947_v11 = vadd.f32 %v9473_v42, %v912_v45  ;;  %v15995_v45 = vld [vmem:[#allocation25_spill] sm:$0xff] }
 0x1f1   :  { %v1612_v23 = vadd.f32 %v1580_v3, %v1515_v46  ;;  %v1969_v22 = vmax.f32 %v1937_v53, 0.0  ;;  %1038 = vst.msk [vmem:[#allocation2 + $0xf1] sm:$0xff] %vm32_vm0, %v1006_v43  ;;  %v717_v19 = vadd.f32 %v15992_v7, %v524_v62  ;;  %v905_v59 = vadd.f32 %v873_v13, %v15993_v14  ;;  %v15994_v46 = vld [vmem:[#allocation5_spill] sm:$0xff]  ;;  %v834_v43 = vpop.permute.xlu2 %833  ;;  %v440_v14 = vpop.permute.xlu0 %439 }
 0x1f2   :  { %v9531_v25 = vmul.f32 %v9060_v36, %v9454_v1  ;;  %v1107_v58 = vmul.f32 %v8935_v9, %v1074_v20  ;;  %v1204_v29 = vmul.f32 %v8937_v61, %v1171_v6  ;;  %v979_v32 = vmax.f32 %v947_v11, 0.0 }
 0x1f3   :  { %v9537_v60 = vmul.f32 %v9060_v36, %v9461_v18  ;;  %v1227_v21 = vadd.f32 %v15994_v46, %v1098_v16  ;;  %v2039_v62 = vadd.f32 %v9458_v2, %v9449_v33  ;;  %v940_v53 = vadd.f32 %v9473_v42, %v905_v59  ;;  %v16000_v46 = vld [vmem:[#allocation6_spill] sm:$0xff] }
 0x1f4   :  { %v1420_v47 = vadd.f32 %v9409_v15, %v1323_v35  ;;  %v1970_v1 = vmax.f32 %v1938_v24, 0.0  ;;  %v1011_v38 = vmin.f32 %v979_v32, 6.0  ;;  %v910_v3 = vadd.f32 %v15995_v45, %v717_v19  ;;  %v15998_v24 = vld [vmem:[#allocation51_spill] sm:$0xff] }
 0x1f5   :  { %v1516_v13 = vadd.f32 %v15996_v40, %v1419_v30  ;;  %v1710_v11 = vadd.f32 %v9415_v34, %v1612_v23  ;;  %v9547_v18 = vmin.f32 %v1969_v22, 6.0  ;;  %v972_v7 = vmax.f32 %v940_v53, 0.0 }
 0x1f6   :  { %v9549_v16 = vadd.f32 %v1204_v29, %v1107_v58  ;;  %v9552_v33 = vmul.f32 %v9012_v10, %v1074_v20  ;;  %v9555_v2 = vmul.f32 %v9022_v5, %v1171_v6  ;;  %v9558_v15 = vmul.f32 %v9107_v28, %v1074_v20  ;;  %1043 = vst.msk [vmem:[#allocation2 + $0x129] sm:$0xff] %vm32_vm0, %v1011_v38 }
 0x1f7   :  { %15997 = vst [vmem:[#allocation30_spill] sm:$0xff] %v9547_v18  ;;  %v9562_v35 = vmul.f32 %v9056_v44, %v1171_v6  ;;  %v1067_v34 = vld [vmem:[#allocation2 + $0xb0] sm:$0xff]  ;;  %v1324_v23 = vadd.f32 %v15998_v24, %v1227_v21  ;;  %v1004_v22 = vmin.f32 %v972_v7, 6.0  ;;  %v883_v19 = vmul.f32 %v8709_v55, %v834_v43 }
 0x1f8   :  { %v1164_v30 = vld [vmem:[#allocation2 + $0xb1] sm:$0xff]  ;;  %v9566_v59 = vmin.f32 %v1970_v1, 6.0  ;;  %v1389_v29 = vmul.f32 %v9012_v10, %v1067_v34  ;;  %v1517_v20 = vadd.f32 %v9412_v31, %v1420_v47  ;;  %v945_v32 = vadd.f32 %v9473_v42, %v910_v3 }
 0x1f9   :  { %v1260_v58 = vld [vmem:[#allocation2 + $0xaa] sm:$0xff]  ;;  %v2040_v6 = vsel %vm32_vm0, %v9547_v18, 0.0  ;;  %v1613_v53 = vadd.f32 %v16000_v46, %v1516_v13  ;;  %v1807_v21 = vadd.f32 %v9419_v63, %v1710_v11  ;;  %1036 = vst.msk [vmem:[#allocation2 + $0xd9] sm:$0xff] %vm32_vm0, %v1004_v22  ;;  %v9578_v1 = vadd.f32 %v9478_v39, %v9385_v41  ;;  %v1261_v31 = vld [vmem:[#allocation2 + $0xb2] sm:$0xff]  ;;  %v16001_v13 = vld [vmem:[#allocation33_spill] sm:$0xff] }
 0x1fa   :  { %15999 = vst [vmem:[#allocation4_spill] sm:$0xff] %v9566_v59  ;;  %v1100_v38 = vmul.f32 %v8935_v9, %v1067_v34  ;;  %v1197_v45 = vmul.f32 %v8937_v61, %v1164_v30  ;;  %v9584_v47 = vadd.f32 %v9486_v51, %v9494_v0  ;;  %v495_v3 = vmul.f32 %v8583_v27, %v440_v14 }
 0x1fb   :  { %v1421_v43 = vadd.f32 %v1389_v29, %v1324_v23  ;;  %v1486_v63 = vmul.f32 %v9022_v5, %v1164_v30  ;;  %v1582_v40 = vmul.f32 %v9054_v12, %v1260_v58  ;;  %v915_v11 = vadd.f32 %v883_v19, %v16001_v13  ;;  %v806_v19 = vpop.permute.xlu1 %805  ;;  %v16002_v13 = vld [vmem:[#allocation13_spill] sm:$0xff] }
 0x1fc   :  { %v2041_v39 = vadd.f32 %v2040_v6, %v2039_v62  ;;  %v1679_v41 = vmul.f32 %v9107_v28, %v1067_v34  ;;  %v2042_v7 = vsel %vm32_vm0, %v9566_v59, 0.0  ;;  %v977_v24 = vmax.f32 %v945_v32, 0.0 }
 0x1fd   :  { %v1518_v22 = vadd.f32 %v1486_v63, %v1421_v43  ;;  %v1583_v51 = vmul.f32 %v9054_v12, %v1261_v31  ;;  %v1614_v0 = vadd.f32 %v1582_v40, %v1517_v20  ;;  %v1872_v14 = vmul.f32 %v9060_v36, %v1260_v58  ;;  %v846_v40 = vpop.permute.xlu2 %845 }
 0x1fe   :  { %v1229_v23 = vadd.f32 %v1197_v45, %v1100_v38  ;;  %v1293_v29 = vmul.f32 %v8965_v50, %v1260_v58  ;;  %v1711_v46 = vadd.f32 %v1679_v41, %v1613_v53  ;;  %v1776_v18 = vmul.f32 %v9056_v44, %v1164_v30  ;;  %v1169_v41 = vld [vmem:[#allocation2 + $0xf1] sm:$0xff] }
 0x1ff   :  { %v1615_v62 = vadd.f32 %v1583_v51, %v1518_v22  ;;  %v1712_v34 = vadd.f32 %v9394_v49, %v1614_v0  ;;  %v1904_v6 = vadd.f32 %v1872_v14, %v1807_v21  ;;  %v527_v59 = vadd.f32 %v495_v3, %v16002_v13 }
 0x200   :  { %v1294_v32 = vmul.f32 %v8965_v50, %v1261_v31  ;;  %v1808_v43 = vadd.f32 %v1776_v18, %v1711_v46  ;;  %v1873_v20 = vmul.f32 %v9060_v36, %v1261_v31  ;;  %v9602_v63 = vadd.f32 %v9473_v42, %v915_v11  ;;  %v9607_v38 = vld [vmem:[#allocation2 + $0xd8] sm:$0xff]  ;;  %v1072_v11 = vld [vmem:[#allocation2 + $0xf0] sm:$0xff]  ;;  %v1071_v46 = vld [vmem:[#allocation2 + $0xe0] sm:$0xff] }
 0x201   :  { %v1713_v58 = vadd.f32 %v9506_v37, %v1615_v62  ;;  %v1809_v53 = vadd.f32 %v9406_v48, %v1712_v34  ;;  %v1939_v30 = vadd.f32 %v9198_v17, %v1904_v6  ;;  %v9609_v49 = vld [vmem:[#allocation2 + $0xd9] sm:$0xff]  ;;  %v876_v21 = vmul.f32 %v8709_v55, %v806_v19  ;;  %v1174_v6 = vld [vmem:[#allocation2 + $0x129] sm:$0xff] }
 0x202   :  { %v1325_v45 = vadd.f32 %v1293_v29, %v9435_v52  ;;  %v1326_v18 = vadd.f32 %v1294_v32, %v1229_v23  ;;  %v1905_v3 = vadd.f32 %v1873_v20, %v1808_v43  ;;  %v1009_v31 = vmin.f32 %v977_v24, 6.0  ;;  %v16003_v24 = vld [vmem:[#allocation16_spill] sm:$0xff] }
 0x203   :  { %v1810_v37 = vadd.f32 %v9513_v56, %v1713_v58  ;;  %v1906_v48 = vadd.f32 %v9531_v25, %v1809_v53  ;;  %v1971_v22 = vmax.f32 %v1939_v30, 0.0  ;;  %v2043_v51 = vadd.f32 %v2042_v7, %v2041_v39  ;;  %v16004_v25 = vld [vmem:[#allocation36_spill] sm:$0xff] }
 0x204   :  { %v1940_v0 = vadd.f32 %v9198_v17, %v1905_v3  ;;  %1041 = vst.msk [vmem:[#allocation2 + $0x111] sm:$0xff] %vm32_vm0, %v1009_v31  ;;  %v1103_v14 = vmul.f32 %v8935_v9, %v9607_v38  ;;  %v1200_v52 = vmul.f32 %v8937_v61, %v9609_v49  ;;  %v720_v23 = vadd.f32 %v16003_v24, %v527_v59  ;;  %v1264_v43 = vld [vmem:[#allocation2 + $0xda] sm:$0xff] }
 0x205   :  { %v1907_v29 = vadd.f32 %v9537_v60, %v1810_v37  ;;  %v982_v56 = vmax.f32 %v9602_v63, 0.0  ;;  %v908_v19 = vadd.f32 %v876_v21, %v16004_v25  ;;  %v9626_v39 = vmul.f32 %v8709_v55, %v846_v40 }
 0x206   :  { %v9629_v7 = vmul.f32 %v8935_v9, %v1072_v11  ;;  %v9632_v62 = vmul.f32 %v8937_v61, %v1169_v41  ;;  %v1422_v34 = vadd.f32 %v9388_v57, %v1325_v45  ;;  %v1423_v59 = vadd.f32 %v9481_v26, %v1326_v18  ;;  %v1271_v18 = vld [vmem:[#allocation2 + $0x12a] sm:$0xff] }
 0x207   :  { %v1941_v60 = vadd.f32 %v9198_v17, %v1906_v48  ;;  %v1972_v13 = vmax.f32 %v1940_v0, 0.0  ;;  %v9637_v32 = vmin.f32 %v1971_v22, 6.0  ;;  %v1392_v20 = vmul.f32 %v9012_v10, %v9607_v38 }
 0x208   :  { %v1394_v63 = vmul.f32 %v9012_v10, %v1072_v11  ;;  %v9643_v58 = vmul.f32 %v9022_v5, %v1169_v41  ;;  %v1232_v53 = vadd.f32 %v1200_v52, %v1103_v14  ;;  %v1393_v57 = vmul.f32 %v9012_v10, %v1071_v46 }
 0x209   :  { %16005 = vst [vmem:[#allocation18_spill] sm:$0xff] %v9637_v32  ;;  %v9647_v26 = vmul.f32 %v9107_v28, %v1072_v11  ;;  %v9650_v30 = vmul.f32 %v9056_v44, %v1169_v41  ;;  %v1942_v21 = vadd.f32 %v9198_v17, %v1907_v29  ;;  %v9654_v45 = vmul.f32 %v8937_v61, %v1174_v6 }
 0x20a   :  { %v1520_v3 = vadd.f32 %v9491_v4, %v1423_v59  ;;  %v1104_v31 = vmul.f32 %v8935_v9, %v1071_v46  ;;  %v1297_v40 = vmul.f32 %v8965_v50, %v1264_v43  ;;  %v1519_v37 = vadd.f32 %v9391_v8, %v1422_v34 }
 0x20b   :  { %v1973_v48 = vmax.f32 %v1941_v60, 0.0  ;;  %v9660_v11 = vmin.f32 %v1972_v13, 6.0  ;;  %v2044_v41 = vsel %vm32_vm0, %v9637_v32, 0.0  ;;  %v1424_v22 = vadd.f32 %v1392_v20, %v9578_v1  ;;  %v16009_v60 = vld [vmem:[#allocation27_spill] sm:$0xff]  ;;  %v16017_v32 = vld [vmem:[#allocation26_spill] sm:$0xff] }
 0x20c   :  { %v9666_v0 = vmul.f32 %v8965_v50, %v1271_v18  ;;  %v9669_v14 = vmul.f32 %v9022_v5, %v1174_v6  ;;  %v1329_v4 = vadd.f32 %v1297_v40, %v1232_v53  ;;  %v1425_v52 = vadd.f32 %v1393_v57, %v9584_v47 }
 0x20d   :  { %16006 = vst [vmem:[#allocation28_spill] sm:$0xff] %v9660_v11  ;;  %v1974_v24 = vmax.f32 %v1942_v21, 0.0  ;;  %v9673_v8 = vmul.f32 %v9054_v12, %v1271_v18  ;;  %v9676_v29 = vmul.f32 %v9056_v44, %v1174_v6  ;;  %v1489_v25 = vmul.f32 %v9022_v5, %v9609_v49  ;;  %v16011_v6 = vld [vmem:[#allocation55_spill] sm:$0xff] }
 0x20e   :  { %16007 = vst [vmem:[#allocation5_spill] sm:$0xff] %v9666_v0  ;;  %v2045_v1 = vadd.f32 %v2044_v41, %v2043_v51  ;;  %v9681_v34 = vmul.f32 %v9060_v36, %v1271_v18  ;;  %v9684_v59 = vadd.f32 %v9432_v54, %v1104_v31  ;;  %v1616_v13 = vadd.f32 %v16009_v60, %v1519_v37  ;;  %v1075_v21 = vld [vmem:[#allocation2 + $0x110] sm:$0xff] }
 0x20f   :  { %16008 = vst [vmem:[#allocation25_spill] sm:$0xff] %v9673_v8  ;;  %v9687_v47 = vmin.f32 %v1973_v48, 6.0  ;;  %v2046_v20 = vsel %vm32_vm0, %v9660_v11, 0.0  ;;  %v1521_v53 = vadd.f32 %v1489_v25, %v1424_v22  ;;  %v1617_v57 = vadd.f32 %v16011_v6, %v1520_v3  ;;  %v16012_v51 = vld [vmem:[#allocation3_spill] sm:$0xff] }
 0x210   :  { %v9692_v40 = vadd.f32 %v1394_v63, %v1329_v4  ;;  %v9695_v41 = vadd.f32 %v16012_v51, %v1425_v52  ;;  %v1682_v54 = vmul.f32 %v9107_v28, %v9607_v38  ;;  %v1683_v18 = vmul.f32 %v9107_v28, %v1071_v46  ;;  %v16014_v60 = vld [vmem:[#allocation35_spill] sm:$0xff]  ;;  %v452_v52 = vpop.permute.xlu0 %451 }
 0x211   :  { %16010 = vst [vmem:[#allocation9_spill] sm:$0xff] %v9687_v47  ;;  %v9700_v31 = vmin.f32 %v1974_v24, 6.0  ;;  %v1586_v37 = vmul.f32 %v9054_v12, %v1264_v43  ;;  %v1014_v48 = vmin.f32 %v982_v56, 6.0  ;;  %v913_v22 = vadd.f32 %v16014_v60, %v720_v23  ;;  %v1172_v25 = vld [vmem:[#allocation2 + $0x111] sm:$0xff]  ;;  %v818_v23 = vpop.permute.xlu1 %817  ;;  %v16016_v60 = vld [vmem:[#allocation37_spill] sm:$0xff] }
 0x212   :  { %v1714_v3 = vadd.f32 %v1682_v54, %v1616_v13  ;;  %v1715_v6 = vadd.f32 %v1683_v18, %v1617_v57  ;;  %v1779_v63 = vmul.f32 %v9056_v44, %v9609_v49  ;;  %v943_v4 = vadd.f32 %v9473_v42, %v908_v19  ;;  %v1268_v24 = vld [vmem:[#allocation2 + $0x10a] sm:$0xff]  ;;  %v16015_v57 = vld [vmem:[#allocation12_spill] sm:$0xff] }
 0x213   :  { %16013 = vst [vmem:[#allocation51_spill] sm:$0xff] %v9700_v31  ;;  %v2047_v51 = vadd.f32 %v2046_v20, %v2045_v1  ;;  %v2048_v38 = vsel %vm32_vm0, %v9687_v47, 0.0  ;;  %v1108_v46 = vmul.f32 %v8935_v9, %v1075_v21  ;;  %v948_v56 = vadd.f32 %v9473_v42, %v913_v22  ;;  %v1269_v1 = vld [vmem:[#allocation2 + $0x112] sm:$0xff] }
 0x214   :  { %1046 = vst.msk [vmem:[#allocation2 + $0x151] sm:$0xff] %vm32_vm0, %v1014_v48  ;;  %v1811_v13 = vadd.f32 %v1779_v63, %v1714_v3  ;;  %v1812_v54 = vadd.f32 %v16015_v57, %v1715_v6  ;;  %v1876_v49 = vmul.f32 %v9060_v36, %v1264_v43  ;;  %v975_v18 = vmax.f32 %v943_v4, 0.0 }
 0x215   :  { %v1205_v19 = vmul.f32 %v8937_v61, %v1172_v25  ;;  %v980_v20 = vmax.f32 %v948_v56, 0.0  ;;  %v918_v11 = vadd.f32 %v9626_v39, %v16016_v60  ;;  %v498_v47 = vmul.f32 %v8583_v27, %v452_v52  ;;  %v16018_v39 = vld [vmem:[#allocation11_spill] sm:$0xff] }
 0x216   :  { %v1908_v48 = vadd.f32 %v1876_v49, %v1811_v13  ;;  %v1909_v22 = vadd.f32 %v16017_v32, %v1812_v54  ;;  %v1007_v8 = vmin.f32 %v975_v18, 6.0  ;;  %v879_v3 = vmul.f32 %v8709_v55, %v818_v23 }
 0x217   :  { %v1301_v6 = vmul.f32 %v8965_v50, %v1268_v24  ;;  %v1618_v63 = vadd.f32 %v1586_v37, %v1521_v53  ;;  %v1012_v43 = vmin.f32 %v980_v20, 6.0  ;;  %v953_v4 = vadd.f32 %v9473_v42, %v918_v11 }
 0x218   :  { %v2049_v57 = vadd.f32 %v2048_v38, %v2047_v51  ;;  %v1302_v56 = vmul.f32 %v8965_v50, %v1269_v1  ;;  %v9724_v0 = vmul.f32 %v9012_v10, %v1075_v21  ;;  %1039 = vst.msk [vmem:[#allocation2 + $0xf9] sm:$0xff] %vm32_vm0, %v1007_v8  ;;  %v911_v52 = vadd.f32 %v879_v3, %v16018_v39  ;;  %v16019_v38 = vld [vmem:[#allocation7_spill] sm:$0xff] }
 0x219   :  { %v9729_v32 = vmul.f32 %v9022_v5, %v1172_v25  ;;  %v9732_v23 = vmul.f32 %v9054_v12, %v1268_v24  ;;  %v2050_v53 = vsel %vm32_vm0, %v9700_v31, 0.0  ;;  %1044 = vst.msk [vmem:[#allocation2 + $0x139] sm:$0xff] %vm32_vm0, %v1012_v43  ;;  %v985_v11 = vmax.f32 %v953_v4, 0.0 }
 0x21a   :  { %v1943_v37 = vadd.f32 %v9198_v17, %v1908_v48  ;;  %v1944_v51 = vadd.f32 %v9198_v17, %v1909_v22  ;;  %v530_v8 = vadd.f32 %v498_v47, %v16019_v38  ;;  %v946_v13 = vadd.f32 %v9473_v42, %v911_v52 }
 0x21b   :  { %v1237_v54 = vadd.f32 %v1205_v19, %v1108_v46  ;;  %v9742_v49 = vmul.f32 %v9054_v12, %v1269_v1  ;;  %v9745_v18 = vmul.f32 %v9107_v28, %v1075_v21  ;;  %v1716_v20 = vadd.f32 %v9647_v26, %v1618_v63  ;;  %v1080_v46 = vld [vmem:[#allocation2 + $0x150] sm:$0xff]  ;;  %v16020_v21 = vld [vmem:[#allocation44_spill] sm:$0xff] }
 0x21c   :  { %v9749_v60 = vmul.f32 %v9056_v44, %v1172_v25  ;;  %v9752_v48 = vmul.f32 %v9060_v36, %v1268_v24  ;;  %v9755_v17 = vmul.f32 %v9060_v36, %v1269_v1  ;;  %v9757_v47 = vadd.f32 %v2050_v53, %v2049_v57  ;;  %v1177_v19 = vld [vmem:[#allocation2 + $0x151] sm:$0xff]  ;;  %v464_v57 = vpop.permute.xlu0 %463 }
 0x21d   :  { %v9761_v22 = vadd.f32 %v9632_v62, %v9629_v7  ;;  %v1330_v26 = vadd.f32 %v16020_v21, %v9684_v59  ;;  %v1017_v3 = vmin.f32 %v985_v11, 6.0  ;;  %v978_v25 = vmax.f32 %v946_v13, 0.0  ;;  %v16021_v1 = vld [vmem:[#allocation20_spill] sm:$0xff]  ;;  %v16022_v7 = vld [vmem:[#allocation47_spill] sm:$0xff] }
 0x21e   :  { %v1975_v63 = vmax.f32 %v1943_v37, 0.0  ;;  %v1976_v43 = vmax.f32 %v1944_v51, 0.0  ;;  %v1523_v24 = vadd.f32 %v9643_v58, %v9692_v40  ;;  %v723_v4 = vadd.f32 %v16021_v1, %v530_v8  ;;  %v16025_v1 = vld [vmem:[#allocation38_spill] sm:$0xff] }
 0x21f   :  { %v1113_v39 = vmul.f32 %v8935_v9, %v1080_v46  ;;  %v1073_v52 = vld [vmem:[#allocation2 + $0xf8] sm:$0xff]  ;;  %v1619_v62 = vadd.f32 %v16022_v7, %v9695_v41  ;;  %v1813_v38 = vadd.f32 %v9650_v30, %v1716_v20  ;;  %1049 = vst.msk [vmem:[#allocation2 + $0x171] sm:$0xff] %vm32_vm0, %v1017_v3  ;;  %v1010_v59 = vmin.f32 %v978_v25, 6.0 }
 0x220   :  { %v1170_v53 = vld [vmem:[#allocation2 + $0xf9] sm:$0xff]  ;;  %v1210_v11 = vmul.f32 %v8937_v61, %v1177_v19  ;;  %v1106_v37 = vmul.f32 %v8935_v9, %v1073_v52  ;;  %v1395_v51 = vmul.f32 %v9012_v10, %v1073_v52  ;;  %v9778_v8 = vmul.f32 %v9012_v10, %v1080_v46 }
 0x221   :  { %v1203_v58 = vmul.f32 %v8937_v61, %v1170_v53  ;;  %v1266_v40 = vld [vmem:[#allocation2 + $0xf2] sm:$0xff]  ;;  %1042 = vst.msk [vmem:[#allocation2 + $0x121] sm:$0xff] %vm32_vm0, %v1010_v59  ;;  %v9782_v41 = vadd.f32 %v1301_v6, %v9549_v16  ;;  %v9784_v30 = vadd.f32 %v1302_v56, %v1237_v54  ;;  %v501_v13 = vmul.f32 %v8583_v27, %v464_v57  ;;  %v1267_v25 = vld [vmem:[#allocation2 + $0xfa] sm:$0xff] }
 0x222   :  { %v9787_v20 = vmin.f32 %v1975_v63, 6.0  ;;  %v9789_v21 = vmin.f32 %v1976_v43, 6.0  ;;  %v9792_v3 = vmul.f32 %v9022_v5, %v1177_v19  ;;  %v916_v7 = vadd.f32 %v16025_v1, %v723_v4 }
 0x223   :  { %v9796_v31 = vmul.f32 %v9107_v28, %v1080_v46  ;;  %v1427_v59 = vadd.f32 %v1395_v51, %v1330_v26  ;;  %v1492_v16 = vmul.f32 %v9022_v5, %v1170_v53  ;;  %v1588_v6 = vmul.f32 %v9054_v12, %v1266_v40 }
 0x224   :  { %16023 = vst [vmem:[#allocation6_spill] sm:$0xff] %v9787_v20  ;;  %v9800_v56 = vadd.f32 %v1210_v11, %v1113_v39  ;;  %v9803_v54 = vmul.f32 %v9056_v44, %v1177_v19  ;;  %v1235_v63 = vadd.f32 %v1203_v58, %v1106_v37  ;;  %v1685_v43 = vmul.f32 %v9107_v28, %v1073_v52 }
 0x225   :  { %16024 = vst [vmem:[#allocation33_spill] sm:$0xff] %v9789_v21  ;;  %v1524_v57 = vadd.f32 %v1492_v16, %v1427_v59  ;;  %v1589_v27 = vmul.f32 %v9054_v12, %v1267_v25  ;;  %v1620_v4 = vadd.f32 %v1588_v6, %v1523_v24  ;;  %v1878_v46 = vmul.f32 %v9060_v36, %v1266_v40 }
 0x226   :  { %v1299_v26 = vmul.f32 %v8965_v50, %v1266_v40  ;;  %v1717_v51 = vadd.f32 %v1685_v43, %v1619_v62  ;;  %v1782_v1 = vmul.f32 %v9056_v44, %v1170_v53  ;;  %v951_v39 = vadd.f32 %v9473_v42, %v916_v7  ;;  %v830_v53 = vpop.permute.xlu1 %829 }
 0x227   :  { %v1300_v11 = vmul.f32 %v8965_v50, %v1267_v25  ;;  %v1621_v19 = vadd.f32 %v1589_v27, %v1524_v57  ;;  %v1718_v37 = vadd.f32 %v9558_v15, %v1620_v4  ;;  %v1910_v58 = vadd.f32 %v1878_v46, %v1813_v38  ;;  %v9825_v15 = vld [vmem:[%s15572_s4] ss:$0 sm:$0xff]  ;;  %v16026_v4 = vld [vmem:[#allocation14_spill] sm:$0xff] }
 0x228   :  { %v2052_v52 = vsel %vm32_vm0, %v9787_v20, 0.0  ;;  %v1814_v59 = vadd.f32 %v1782_v1, %v1717_v51  ;;  %v1879_v24 = vmul.f32 %v9060_v36, %v1267_v25  ;;  %v2054_v40 = vsel %vm32_vm0, %v9789_v21, 0.0  ;;  %v9818_v62 = vld [vmem:[#allocation2 + $0x120] sm:$0xff] }
 0x229   :  { %v1332_v16 = vadd.f32 %v1300_v11, %v1235_v63  ;;  %v1719_v7 = vadd.f32 %v9745_v18, %v1621_v19  ;;  %v1815_v27 = vadd.f32 %v9562_v35, %v1718_v37  ;;  %v1945_v38 = vadd.f32 %v9825_v15, %v1910_v58  ;;  %v9828_v6 = vld [vmem:[#allocation2 + $0x121] sm:$0xff]  ;;  %v1078_v63 = vld [vmem:[#allocation2 + $0x138] sm:$0xff] }
 0x22a   :  { %v1331_v25 = vadd.f32 %v1299_v26, %v9761_v22  ;;  %v1911_v43 = vadd.f32 %v1879_v24, %v1814_v59  ;;  %v983_v57 = vmax.f32 %v951_v39, 0.0  ;;  %v9832_v46 = vadd.f32 %v501_v13, %v16026_v4  ;;  %v1175_v11 = vld [vmem:[#allocation2 + $0x139] sm:$0xff] }
 0x22b   :  { %v1816_v18 = vadd.f32 %v9749_v60, %v1719_v7  ;;  %v1912_v35 = vadd.f32 %v9752_v48, %v1815_v27  ;;  %v1977_v51 = vmax.f32 %v1945_v38, 0.0  ;;  %v1109_v1 = vmul.f32 %v8935_v9, %v9818_v62  ;;  %v1270_v27 = vld [vmem:[#allocation2 + $0x122] sm:$0xff] }
 0x22c   :  { %v1946_v19 = vadd.f32 %v9825_v15, %v1911_v43  ;;  %v1015_v37 = vmin.f32 %v983_v57, 6.0  ;;  %v1206_v22 = vmul.f32 %v8937_v61, %v9828_v6  ;;  %v9842_v26 = vmul.f32 %v8709_v55, %v830_v53 }
 0x22d   :  { %v2053_v13 = vadd.f32 %v2052_v52, %v9757_v47  ;;  %v1429_v60 = vadd.f32 %v9724_v0, %v1332_v16  ;;  %v1947_v48 = vadd.f32 %v9825_v15, %v1912_v35  ;;  %v9847_v39 = vmin.f32 %v1977_v51, 6.0  ;;  %v1077_v52 = vld [vmem:[#allocation2 + $0x128] sm:$0xff] }
 0x22e   :  { %v9850_v58 = vmul.f32 %v8935_v9, %v1078_v63  ;;  %v1428_v59 = vadd.f32 %v9552_v33, %v1331_v25  ;;  %v1913_v24 = vadd.f32 %v9755_v17, %v1816_v18  ;;  %v1978_v7 = vmax.f32 %v1946_v19, 0.0  ;;  %1047 = vst.msk [vmem:[#allocation2 + $0x159] sm:$0xff] %vm32_vm0, %v1015_v37  ;;  %v1180_v17 = vld [vmem:[#allocation2 + $0x171] sm:$0xff] }
 0x22f   :  { %16027 = vst [vmem:[#allocation13_spill] sm:$0xff] %v9847_v39  ;;  %v9856_v53 = vmul.f32 %v8937_v61, %v1175_v11  ;;  %v1400_v47 = vmul.f32 %v9012_v10, %v1078_v63  ;;  %v9860_v0 = vmul.f32 %v9022_v5, %v1175_v11  ;;  %v1238_v16 = vadd.f32 %v1206_v22, %v1109_v1  ;;  %v1277_v25 = vld [vmem:[#allocation2 + $0x172] sm:$0xff] }
 0x230   :  { %v1979_v38 = vmax.f32 %v1947_v48, 0.0  ;;  %v9862_v43 = vmin.f32 %v1978_v7, 6.0  ;;  %v2056_v33 = vsel %vm32_vm0, %v9847_v39, 0.0  ;;  %v1398_v57 = vmul.f32 %v9012_v10, %v9818_v62  ;;  %v842_v48 = vpop.permute.xlu1 %841 }
 0x231   :  { %v9869_v4 = vmul.f32 %v9107_v28, %v1078_v63  ;;  %v9872_v18 = vmul.f32 %v9056_v44, %v1175_v11  ;;  %v1526_v35 = vadd.f32 %v9729_v32, %v1429_v60  ;;  %v2055_v51 = vadd.f32 %v2054_v40, %v2053_v13 }
 0x232   :  { %16028 = vst [vmem:[#allocation16_spill] sm:$0xff] %v9862_v43  ;;  %v1948_v1 = vadd.f32 %v9825_v15, %v1913_v24  ;;  %v1303_v19 = vmul.f32 %v8965_v50, %v1270_v27  ;;  %v1399_v37 = vmul.f32 %v9012_v10, %v1077_v52  ;;  %v1525_v22 = vadd.f32 %v9555_v2, %v1428_v59 }
 0x233   :  { %v2057_v7 = vadd.f32 %v2056_v33, %v2055_v51  ;;  %v9880_v20 = vmul.f32 %v8937_v61, %v1180_v17  ;;  %v9883_v63 = vmul.f32 %v8965_v50, %v1277_v25  ;;  %v1110_v11 = vmul.f32 %v8935_v9, %v1077_v52 }
 0x234   :  { %v9886_v32 = vmin.f32 %v1979_v38, 6.0  ;;  %v2058_v40 = vsel %vm32_vm0, %v9862_v43, 0.0  ;;  %v1335_v13 = vadd.f32 %v1303_v19, %v1238_v16  ;;  %v1430_v60 = vadd.f32 %v1398_v57, %v9782_v41 }
 0x235   :  { %v9892_v2 = vmul.f32 %v9022_v5, %v1180_v17  ;;  %v1622_v59 = vadd.f32 %v9732_v23, %v1525_v22  ;;  %v1623_v24 = vadd.f32 %v9742_v49, %v1526_v35  ;;  %v1688_v33 = vmul.f32 %v9107_v28, %v9818_v62  ;;  %v1081_v19 = vld [vmem:[#allocation2 + $0x158] sm:$0xff] }
 0x236   :  { %16029 = vst [vmem:[#allocation36_spill] sm:$0xff] %v9886_v32  ;;  %v1980_v51 = vmax.f32 %v1948_v1, 0.0  ;;  %v9899_v38 = vmul.f32 %v9054_v12, %v1277_v25  ;;  %v1431_v39 = vadd.f32 %v1399_v37, %v9784_v30  ;;  %v1495_v16 = vmul.f32 %v9022_v5, %v9828_v6 }
 0x237   :  { %v2059_v41 = vadd.f32 %v2058_v40, %v2057_v7  ;;  %v9905_v57 = vmul.f32 %v9056_v44, %v1180_v17  ;;  %v9908_v23 = vmul.f32 %v9060_v36, %v1277_v25  ;;  %v1689_v49 = vmul.f32 %v9107_v28, %v1077_v52  ;;  %v1178_v52 = vld [vmem:[#allocation2 + $0x159] sm:$0xff] }
 0x238   :  { %v2060_v62 = vsel %vm32_vm0, %v9886_v32, 0.0  ;;  %v9914_v35 = vadd.f32 %v9654_v45, %v1110_v11  ;;  %v9916_v1 = vadd.f32 %v1400_v47, %v1335_v13  ;;  %v1527_v30 = vadd.f32 %v1495_v16, %v1430_v60  ;;  %v1274_v40 = vld [vmem:[#allocation2 + $0x152] sm:$0xff] }
 0x239   :  { %16030 = vst [vmem:[#allocation27_spill] sm:$0xff] %v9908_v23  ;;  %v1592_v37 = vmul.f32 %v9054_v12, %v1270_v27  ;;  %v1720_v22 = vadd.f32 %v1688_v33, %v1622_v59  ;;  %v1721_v17 = vadd.f32 %v1689_v49, %v1623_v24  ;;  %v1785_v25 = vmul.f32 %v9056_v44, %v9828_v6  ;;  %v16032_v45 = vld [vmem:[#allocation19_spill] sm:$0xff] }
 0x23a   :  { %v9921_v7 = vmin.f32 %v1980_v51, 6.0  ;;  %v1528_v43 = vadd.f32 %v9669_v14, %v1431_v39  ;;  %v726_v11 = vadd.f32 %v16032_v45, %v9832_v46  ;;  %v16033_v47 = vld [vmem:[#allocation39_spill] sm:$0xff]  ;;  %v2061_v60 = vadd.f32 %v2060_v62, %v2059_v41  ;;  %v16034_v51 = vld [vmem:[#allocation40_spill] sm:$0xff]  ;;  %v854_v14 = vpop.permute.xlu1 %853 }
 0x23b   :  { %v914_v13 = vadd.f32 %v9842_v26, %v16033_v47  ;;  %v1817_v16 = vadd.f32 %v1785_v25, %v1720_v22  ;;  %v1818_v59 = vadd.f32 %v9676_v29, %v1721_v17  ;;  %v1882_v24 = vmul.f32 %v9060_v36, %v1270_v27  ;;  %v1275_v46 = vld [vmem:[#allocation2 + $0x15a] sm:$0xff] }
 0x23c   :  { %16031 = vst [vmem:[#allocation55_spill] sm:$0xff] %v9921_v7  ;;  %v1114_v6 = vmul.f32 %v8935_v9, %v1081_v19  ;;  %v1624_v33 = vadd.f32 %v1592_v37, %v1527_v30  ;;  %v919_v49 = vadd.f32 %v16034_v51, %v726_v11  ;;  %v1211_v39 = vmul.f32 %v8937_v61, %v1178_v52 }
 0x23d   :  { %v949_v32 = vadd.f32 %v9473_v42, %v914_v13  ;;  %v1307_v45 = vmul.f32 %v8965_v50, %v1274_v40  ;;  %v1914_v26 = vadd.f32 %v1882_v24, %v1817_v16  ;;  %v1915_v41 = vadd.f32 %v9681_v34, %v1818_v59  ;;  %v16035_v13 = vld [vmem:[#allocation42_spill] sm:$0xff]  ;;  %v16036_v24 = vld [vmem:[#allocation43_spill] sm:$0xff] }
 0x23e   :  { %v9937_v29 = vmul.f32 %v9012_v10, %v1081_v19  ;;  %v954_v27 = vadd.f32 %v9473_v42, %v919_v49  ;;  %v885_v30 = vmul.f32 %v8709_v55, %v842_v48  ;;  %v2062_v17 = vsel %vm32_vm0, %v9921_v7, 0.0 }
 0x23f   :  { %v981_v62 = vmax.f32 %v949_v32, 0.0  ;;  %v1949_v37 = vadd.f32 %v9825_v15, %v1914_v26  ;;  %v1950_v22 = vadd.f32 %v9825_v15, %v1915_v41  ;;  %v888_v25 = vmul.f32 %v8709_v55, %v854_v14 }
 0x240   :  { %v1308_v11 = vmul.f32 %v8965_v50, %v1275_v46  ;;  %v986_v34 = vmax.f32 %v954_v27, 0.0  ;;  %v917_v16 = vadd.f32 %v885_v30, %v16035_v13  ;;  %v9949_v59 = vmul.f32 %v9022_v5, %v1178_v52 }
 0x241   :  { %v1013_v47 = vmin.f32 %v981_v62, 6.0  ;;  %v1981_v32 = vmax.f32 %v1949_v37, 0.0  ;;  %v1982_v48 = vmax.f32 %v1950_v22, 0.0  ;;  %v920_v51 = vadd.f32 %v888_v25, %v16036_v24 }
 0x242   :  { %v9953_v49 = vmul.f32 %v9054_v12, %v1274_v40  ;;  %v2063_v26 = vadd.f32 %v2062_v17, %v2061_v60  ;;  %v1018_v41 = vmin.f32 %v986_v34, 6.0  ;;  %v952_v14 = vadd.f32 %v9473_v42, %v917_v16 }
 0x243   :  { %1045 = vst.msk [vmem:[#allocation2 + $0x141] sm:$0xff] %vm32_vm0, %v1013_v47  ;;  %v9958_v27 = vmul.f32 %v9054_v12, %v1275_v46  ;;  %v9960_v62 = vmin.f32 %v1981_v32, 6.0  ;;  %v9962_v30 = vmin.f32 %v1982_v48, 6.0  ;;  %v955_v37 = vadd.f32 %v9473_v42, %v920_v51  ;;  %v1762_v48 = vld [vmem:[#allocation2 + $0x199] sm:$0xff] }
 0x244   :  { %v1243_v22 = vadd.f32 %v1211_v39, %v1114_v6  ;;  %v9966_v25 = vmul.f32 %v9107_v28, %v1081_v19  ;;  %v1722_v60 = vadd.f32 %v9869_v4, %v1624_v33  ;;  %1050 = vst.msk [vmem:[#allocation2 + $0x181] sm:$0xff] %vm32_vm0, %v1018_v41  ;;  %v984_v17 = vmax.f32 %v952_v14, 0.0  ;;  %v1665_v33 = vld [vmem:[#allocation2 + $0x198] sm:$0xff]  ;;  %v16039_v39 = vld [vmem:[#allocation5_spill] sm:$0xff] }
 0x245   :  { %16037 = vst [vmem:[#allocation3_spill] sm:$0xff] %v9960_v62  ;;  %v9971_v34 = vmul.f32 %v9056_v44, %v1178_v52  ;;  %v9974_v47 = vmul.f32 %v9060_v36, %v1274_v40  ;;  %v2064_v13 = vsel %vm32_vm0, %v9960_v62, 0.0  ;;  %v987_v16 = vmax.f32 %v955_v37, 0.0  ;;  %v16040_v51 = vld [vmem:[#allocation25_spill] sm:$0xff] }
 0x246   :  { %16038 = vst [vmem:[#allocation35_spill] sm:$0xff] %v9962_v30  ;;  %v9979_v42 = vmul.f32 %v9060_v36, %v1275_v46  ;;  %v2065_v19 = vadd.f32 %v2064_v13, %v2063_v26  ;;  %v2066_v4 = vsel %vm32_vm0, %v9962_v30, 0.0  ;;  %v1016_v6 = vmin.f32 %v984_v17, 6.0 }
 0x247   :  { %v1240_v52 = vadd.f32 %v9856_v53, %v9850_v58  ;;  %v1336_v40 = vadd.f32 %v16039_v39, %v9914_v35  ;;  %v1529_v32 = vadd.f32 %v9860_v0, %v9916_v1  ;;  %v1019_v24 = vmin.f32 %v987_v16, 6.0  ;;  %v1666_v58 = vld [vmem:[#allocation2 + $0x1a0] sm:$0xff] }
 0x248   :  { %v1625_v46 = vadd.f32 %v16040_v51, %v1528_v43  ;;  %v1819_v26 = vadd.f32 %v9872_v18, %v1722_v60  ;;  %1048 = vst.msk [vmem:[#allocation2 + $0x169] sm:$0xff] %vm32_vm0, %v1016_v6  ;;  %v9993_v41 = vadd.f32 %v1307_v45, %v9800_v56  ;;  %v9995_v14 = vadd.f32 %v1308_v11, %v1243_v22 }
 0x249   :  { %v9997_v17 = vadd.f32 %v2066_v4, %v2065_v19  ;;  %v10000_v0 = vmul.f32 %v9107_v28, %v1665_v33  ;;  %v10003_v43 = vmul.f32 %v9107_v28, %v1666_v58  ;;  %v10006_v18 = vmul.f32 %v9056_v44, %v1762_v48  ;;  %1051 = vst.msk [vmem:[#allocation2 + $0x189] sm:$0xff] %vm32_vm0, %v1019_v24 }
 0x24a   :  { %v1079_v53 = vld [vmem:[#allocation2 + $0x140] sm:$0xff] }
 0x24b   :  { %v1176_v37 = vld [vmem:[#allocation2 + $0x141] sm:$0xff]  ;;  %16041 = vst [vmem:[#allocation12_spill] sm:$0xff] %v10000_v0  ;;  %v1112_v56 = vmul.f32 %v8935_v9, %v1079_v53  ;;  %v1401_v22 = vmul.f32 %v9012_v10, %v1079_v53  ;;  %v1691_v30 = vmul.f32 %v9107_v28, %v1079_v53 }
 0x24c   :  { %v1272_v35 = vld [vmem:[#allocation2 + $0x13a] sm:$0xff]  ;;  %16042 = vst [vmem:[#allocation37_spill] sm:$0xff] %v10003_v43  ;;  %v1209_v1 = vmul.f32 %v8937_v61, %v1176_v37  ;;  %v1273_v45 = vld [vmem:[#allocation2 + $0x142] sm:$0xff]  ;;  %v1498_v19 = vmul.f32 %v9022_v5, %v1176_v37  ;;  %v1788_v7 = vmul.f32 %v9056_v44, %v1176_v37 }
 0x24d   :  { %16043 = vst [vmem:[#allocation26_spill] sm:$0xff] %v10006_v18  ;;  %v1305_v11 = vmul.f32 %v8965_v50, %v1272_v35  ;;  %v1373_v60 = vld [vmem:[#allocation2 + $0x180] sm:$0xff]  ;;  %v1306_v16 = vmul.f32 %v8965_v50, %v1273_v45  ;;  %v1594_v4 = vmul.f32 %v9054_v12, %v1272_v35  ;;  %v1595_v6 = vmul.f32 %v9054_v12, %v1273_v45 }
 0x24e   :  { %v1470_v13 = vld [vmem:[#allocation2 + $0x181] sm:$0xff]  ;;  %v1406_v33 = vmul.f32 %v9012_v10, %v1373_v60  ;;  %v10022_v48 = vmul.f32 %v9107_v28, %v1373_v60  ;;  %v1241_v51 = vadd.f32 %v1209_v1, %v1112_v56  ;;  %v1433_v55 = vadd.f32 %v1401_v22, %v1336_v40 }
 0x24f   :  { %v10019_v39 = vmul.f32 %v9022_v5, %v1470_v13  ;;  %v10025_v24 = vmul.f32 %v9056_v44, %v1470_v13  ;;  %v1337_v58 = vadd.f32 %v1305_v11, %v1240_v52  ;;  %v1626_v62 = vadd.f32 %v1594_v4, %v1529_v32  ;;  %v1082_v13 = vld [vmem:[#allocation2 + $0x168] sm:$0xff] }
 0x250   :  { %v1884_v21 = vmul.f32 %v9060_v36, %v1272_v35  ;;  %v1885_v43 = vmul.f32 %v9060_v36, %v1273_v45  ;;  %v1338_v18 = vadd.f32 %v1306_v16, %v1241_v51  ;;  %v1530_v60 = vadd.f32 %v1498_v19, %v1433_v55  ;;  %v1179_v56 = vld [vmem:[#allocation2 + $0x169] sm:$0xff] }
 0x251   :  { %16044 = vst [vmem:[#allocation11_spill] sm:$0xff] %v10025_v24  ;;  %v1434_v0 = vadd.f32 %v9778_v8, %v1337_v58  ;;  %v1724_v23 = vadd.f32 %v9796_v31, %v1626_v62  ;;  %v1083_v24 = vld [vmem:[#allocation2 + $0x170] sm:$0xff]  ;;  %v1723_v52 = vadd.f32 %v1691_v30, %v1625_v46  ;;  %v1115_v32 = vmul.f32 %v8935_v9, %v1082_v13 }
 0x252   :  { %v1916_v40 = vadd.f32 %v1884_v21, %v1819_v26  ;;  %v1116_v53 = vmul.f32 %v8935_v9, %v1083_v24  ;;  %v1276_v37 = vld [vmem:[#allocation2 + $0x16a] sm:$0xff]  ;;  %v1435_v35 = vadd.f32 %v9937_v29, %v1338_v18  ;;  %v1627_v1 = vadd.f32 %v1595_v6, %v1530_v60 }
 0x253   :  { %v1821_v45 = vadd.f32 %v9803_v54, %v1724_v23  ;;  %v1212_v8 = vmul.f32 %v8937_v61, %v1179_v56  ;;  %v1820_v55 = vadd.f32 %v1788_v7, %v1723_v52  ;;  %v1309_v30 = vmul.f32 %v8965_v50, %v1276_v37 }
 0x254   :  { %v1951_v31 = vadd.f32 %v9825_v15, %v1916_v40  ;;  %v1245_v62 = vadd.f32 %v9880_v20, %v1116_v53  ;;  %v1532_v21 = vadd.f32 %v9949_v59, %v1435_v35  ;;  %v1725_v46 = vadd.f32 %v9966_v25, %v1627_v1 }
 0x255   :  { %v1918_v26 = vadd.f32 %v9974_v47, %v1821_v45  ;;  %v1244_v11 = vadd.f32 %v1212_v8, %v1115_v32  ;;  %v1917_v29 = vadd.f32 %v1885_v43, %v1820_v55  ;;  %v1404_v54 = vmul.f32 %v9012_v10, %v1082_v13  ;;  %v1374_v45 = vld [vmem:[#allocation2 + $0x188] sm:$0xff] }
 0x256   :  { %v1983_v18 = vmax.f32 %v1951_v31, 0.0  ;;  %v1405_v23 = vmul.f32 %v9012_v10, %v1083_v24  ;;  %v1822_v7 = vadd.f32 %v9971_v34, %v1725_v46  ;;  %v1501_v16 = vmul.f32 %v9022_v5, %v1179_v56  ;;  %v1471_v8 = vld [vmem:[#allocation2 + $0x189] sm:$0xff] }
 0x257   :  { %v1953_v22 = vadd.f32 %v9825_v15, %v1918_v26  ;;  %v1341_v20 = vadd.f32 %v1309_v30, %v1244_v11  ;;  %v1952_v59 = vadd.f32 %v9825_v15, %v1917_v29  ;;  %v1436_v25 = vadd.f32 %v1404_v54, %v9993_v41  ;;  %v1568_v26 = vld [vmem:[#allocation2 + $0x18a] sm:$0xff] }
 0x258   :  { %v10050_v19 = vmin.f32 %v1983_v18, 6.0  ;;  %v1437_v47 = vadd.f32 %v1405_v23, %v9995_v14  ;;  %v1919_v43 = vadd.f32 %v9979_v42, %v1822_v7  ;;  %v1531_v51 = vadd.f32 %v9792_v3, %v1434_v0 }
 0x259   :  { %v1985_v4 = vmax.f32 %v1953_v22, 0.0  ;;  %v1438_v6 = vadd.f32 %v1406_v33, %v1341_v20  ;;  %v1984_v34 = vmax.f32 %v1952_v59, 0.0  ;;  %v1533_v60 = vadd.f32 %v1501_v16, %v1436_v25  ;;  %v16045_v16 = vld [vmem:[#allocation27_spill] sm:$0xff] }
 0x25a   :  { %v2068_v58 = vsel %vm32_vm0, %v10050_v19, 0.0  ;;  %v1534_v52 = vadd.f32 %v9892_v2, %v1437_v47  ;;  %v1954_v40 = vadd.f32 %v9825_v15, %v1919_v43  ;;  %v1598_v14 = vmul.f32 %v9054_v12, %v1276_v37  ;;  %v1763_v47 = vld [vmem:[#allocation2 + $0x1a1] sm:$0xff] }
 0x25b   :  { %v10060_v32 = vmin.f32 %v1985_v4, 6.0  ;;  %v2069_v41 = vadd.f32 %v2068_v58, %v9997_v17  ;;  %v10064_v42 = vmin.f32 %v1984_v34, 6.0  ;;  %v1628_v33 = vadd.f32 %v9953_v49, %v1531_v51  ;;  %v1859_v51 = vld [vmem:[#allocation2 + $0x19a] sm:$0xff]  ;;  %v1860_v34 = vld [vmem:[#allocation2 + $0x1a2] sm:$0xff] }
 0x25c   :  { %v1629_v3 = vadd.f32 %v9958_v27, %v1532_v21  ;;  %v1694_v0 = vmul.f32 %v9107_v28, %v1082_v13  ;;  %v1986_v53 = vmax.f32 %v1954_v40, 0.0  ;;  %v1630_v35 = vadd.f32 %v1598_v14, %v1533_v60  ;;  %v1567_v27 = vld [vmem:[#allocation2 + $0x182] sm:$0xff]  ;;  %v16047_v60 = vld [vmem:[#allocation12_spill] sm:$0xff] }
 0x25d   :  { %v2072_v2 = vsel %vm32_vm0, %v10060_v32, 0.0  ;;  %v1695_v1 = vmul.f32 %v9107_v28, %v1083_v24  ;;  %v2070_v17 = vsel %vm32_vm0, %v10064_v42, 0.0  ;;  %v1791_v31 = vmul.f32 %v9056_v44, %v1179_v56 }
 0x25e   :  { %v1726_v55 = vadd.f32 %v1694_v0, %v1628_v33  ;;  %v1888_v49 = vmul.f32 %v9060_v36, %v1276_v37  ;;  %v10076_v30 = vmin.f32 %v1986_v53, 6.0  ;;  %v2071_v13 = vadd.f32 %v2070_v17, %v2069_v41  ;;  %v16048_v53 = vld [vmem:[#allocation26_spill] sm:$0xff] }
 0x25f   :  { %v1727_v21 = vadd.f32 %v1695_v1, %v1629_v3  ;;  %v1728_v46 = vadd.f32 %v10022_v48, %v1630_v35  ;;  %v1342_v24 = vadd.f32 %v9883_v63, %v1245_v62  ;;  %v1407_v29 = vmul.f32 %v9012_v10, %v1374_v45 }
 0x260   :  { %v1823_v11 = vadd.f32 %v1791_v31, %v1726_v55  ;;  %v1504_v18 = vmul.f32 %v9022_v5, %v1471_v8  ;;  %v2073_v54 = vadd.f32 %v2072_v2, %v2071_v13  ;;  %v1535_v37 = vadd.f32 %v10019_v39, %v1438_v6  ;;  %v16046_v39 = vld [vmem:[#allocation11_spill] sm:$0xff] }
 0x261   :  { %v1824_v56 = vadd.f32 %v9905_v57, %v1727_v21  ;;  %v1600_v23 = vmul.f32 %v9054_v12, %v1567_v27  ;;  %v1439_v22 = vadd.f32 %v1407_v29, %v1342_v24  ;;  %v1601_v20 = vmul.f32 %v9054_v12, %v1568_v26 }
 0x262   :  { %v1920_v7 = vadd.f32 %v1888_v49, %v1823_v11  ;;  %v1631_v48 = vadd.f32 %v9899_v38, %v1534_v52  ;;  %v1697_v62 = vmul.f32 %v9107_v28, %v1374_v45  ;;  %v1794_v25 = vmul.f32 %v9056_v44, %v1471_v8  ;;  %v16049_v8 = vld [vmem:[#allocation37_spill] sm:$0xff] }
 0x263   :  { %v1921_v59 = vadd.f32 %v16045_v16, %v1824_v56  ;;  %v1632_v63 = vadd.f32 %v1600_v23, %v1535_v37  ;;  %v1536_v43 = vadd.f32 %v1504_v18, %v1439_v22  ;;  %v1825_v4 = vadd.f32 %v16046_v39, %v1728_v46 }
 0x264   :  { %v1955_v57 = vadd.f32 %v9825_v15, %v1920_v7  ;;  %v1890_v6 = vmul.f32 %v9060_v36, %v1567_v27  ;;  %v1729_v38 = vadd.f32 %v1697_v62, %v1631_v48  ;;  %v1891_v40 = vmul.f32 %v9060_v36, %v1568_v26 }
 0x265   :  { %v1956_v58 = vadd.f32 %v9825_v15, %v1921_v59  ;;  %v1730_v52 = vadd.f32 %v16047_v60, %v1632_v63  ;;  %v1633_v14 = vadd.f32 %v1601_v20, %v1536_v43  ;;  %v1796_v3 = vmul.f32 %v9056_v44, %v1763_v47 }
 0x266   :  { %v1987_v41 = vmax.f32 %v1955_v57, 0.0  ;;  %v1922_v33 = vadd.f32 %v1890_v6, %v1825_v4  ;;  %v1826_v0 = vadd.f32 %v1794_v25, %v1729_v38  ;;  %v1892_v35 = vmul.f32 %v9060_v36, %v1859_v51 }
 0x267   :  { %v1827_v2 = vadd.f32 %v16048_v53, %v1730_v52  ;;  %v1893_v1 = vmul.f32 %v9060_v36, %v1860_v34  ;;  %v1731_v17 = vadd.f32 %v16049_v8, %v1633_v14  ;;  %v1988_v31 = vmax.f32 %v1956_v58, 0.0 }
 0x268   :  { %v10100_v45 = vmin.f32 %v1987_v41, 6.0  ;;  %v1957_v55 = vadd.f32 %v9825_v15, %v1922_v33  ;;  %v1923_v49 = vadd.f32 %v1891_v40, %v1826_v0  ;;  %v2074_v13 = vsel %vm32_vm0, %v10076_v30, 0.0 }
 0x269   :  { %v1924_v27 = vadd.f32 %v1892_v35, %v1827_v2  ;;  %v1828_v26 = vadd.f32 %v1796_v3, %v1731_v17  ;;  %v10108_v11 = vmin.f32 %v1988_v31, 6.0  ;;  %v2075_v18 = vadd.f32 %v2074_v13, %v2073_v54 }
 0x26a   :  { %v2076_v21 = vsel %vm32_vm0, %v10100_v45, 0.0  ;;  %v1989_v46 = vmax.f32 %v1957_v55, 0.0  ;;  %v1958_v24 = vadd.f32 %v9825_v15, %v1923_v49  ;;  %v7998_v56 = vmov 256.0  }
 0x26b   :  { %v1959_v29 = vadd.f32 %v9825_v15, %v1924_v27  ;;  %7968 = vrcp.f32 %v7998_v56  ;;  %v1925_v23 = vadd.f32 %v1893_v1, %v1828_v26  ;;  %v2078_v7 = vsel %vm32_vm0, %v10108_v11, 0.0 }
 0x26c   :  { %v10112_v37 = vmin.f32 %v1989_v46, 6.0  ;;  %v1990_v22 = vmax.f32 %v1958_v24, 0.0  ;;  %v2077_v48 = vadd.f32 %v2076_v21, %v2075_v18  ;;  %v15626_v35 = vmov 4   ;;  %v81_v21 = vld [vmem:[%s15575_s5] sm:$0xff] }
 0x26d   :  { %v1991_v20 = vmax.f32 %v1959_v29, 0.0  ;;  %v1960_v16 = vadd.f32 %v9825_v15, %v1925_v23  ;;  %v15622_v1 = vmov 6   ;;  %v16051_v8 = vmov 3  }
 0x26e   :  { %v2080_v59 = vsel %vm32_vm0, %v10112_v37, 0.0  ;;  %v10119_v63 = vmin.f32 %v1990_v22, 6.0  ;;  %v2079_v54 = vadd.f32 %v2078_v7, %v2077_v48  ;;  %v15620_v17 = vmov 7  }
 0x26f   :  { %v10121_v62 = vmin.f32 %v1991_v20, 6.0  ;;  %v1992_v25 = vmax.f32 %v1960_v16, 0.0  ;;  %v15624_v55 = vmov 5   ;;  %v16052_v31 = vmov 0  }
 0x270   :  { %v2081_v57 = vadd.f32 %v2080_v59, %v2079_v54  ;;  %v2082_v43 = vsel %vm32_vm0, %v10119_v63, 0.0  ;;  %v16053_v49 = vmov 1  }
 0x271   :  { %v7969_v47 = vpop.eup %7968  ;;  %v10125_v39 = vmin.f32 %v1992_v25, 6.0  ;;  %v2084_v4 = vsel %vm32_vm0, %v10121_v62, 0.0 }
 0x272   :  { %v2095_v15 = vmul.f32 256.0, %v7969_v47  ;;  %v2083_v6 = vadd.f32 %v2082_v43, %v2081_v57  ;;  %vm2099_vm3 = vweird.f32 %v7969_v47 }
 0x273   :  { %v2086_v51 = vsel %vm32_vm0, %v10125_v39, 0.0 }
 0x274   :  { %v2085_v34 = vadd.f32 %v2084_v4, %v2083_v6  ;;  %v2096_v58 = vsub.f32 1.0, %v2095_v15 }
 0x276   :  { %v2087_v38 = vadd.f32 %v2086_v51, %v2085_v34  ;;  %v2097_v52 = vmul.f32 %v7969_v47, %v2096_v58 }
 0x278   :  { %v2088_v60 = vrot.slane %v2087_v38, 4  ;;  %v2098_v14 = vadd.f32 %v7969_v47, %v2097_v52 }
 0x27a   :  { %v2089_v40 = vadd.f32 %v2088_v60, %v2087_v38  ;;  %v10131_v0 = vsel %vm2099_vm3, %v7969_v47, %v2098_v14  ;;  %v10149_v14 = vld [vmem:[%s15576_s6] sm:$0x3] }
 0x27b   :  { %16050 = vst [vmem:[#allocation7_spill] sm:$0xff] %v10131_v0 }
 0x27c   :  { %v2090_v41 = vrot.slane %v2089_v40, 2  ;;  %16054 = vst [vmem:[#allocation44_spill] sm:$0xff] %v10149_v14 }
 0x27e   :  { %v2091_v33 = vadd.f32 %v2090_v41, %v2089_v40 }
 0x280   :  { %v2092_v3 = vrot.slane %v2091_v33, 1 }
 0x282   :  { %v2093_v53 = vadd.f32 %v2092_v3, %v2091_v33  ;;  %v15619_v33 = vrot.slane %v10149_v14, 1 }
 0x284   :  { %v2101_v2 = vmul.f32 %v10131_v0, %v2093_v53 }
 0x286   :  { %2119 = vperm.xlu1 %7898, %v2101_v2   ;;  %2110 = vperm.xlu0 %7896, %v2101_v2  }
 0x287   :  { %2104 = vperm.xlu2 %7897, %v2101_v2  }
 0x28e   :  { %7900 = vset.pattern.permute.xlu1 %v15626_v35  ;;  %7902 = vset.pattern.permute.xlu0 %v15622_v1  ;;  %v10386_v1 = vld [vmem:[%s15570_s0 + $0x1a8] sm:$0xff] }
 0x28f   :  { %7899 = vset.pattern.permute.xlu2 %v16051_v8  ;;  %2137 = vperm.xlu1 %7900, %v2101_v2  }
 0x290   :  { %2155 = vperm.xlu0 %7902, %v2101_v2   ;;  %2128 = vperm.xlu2 %7899, %v2101_v2  }
 0x297   :  { %7903 = vset.pattern.permute.xlu1 %v15620_v17 }
 0x298   :  { %7901 = vset.pattern.permute.xlu2 %v15624_v55  ;;  %2164 = vperm.xlu1 %7903, %v2101_v2  }
 0x299   :  { %2146 = vperm.xlu2 %7901, %v2101_v2   ;;  %7906 = vset.pattern.permute.xlu0 %v16052_v31 }
 0x2a0   :  { %7905 = vset.pattern.permute.xlu1 %v16053_v49 }
 0x2a1   :  { %7904 = vset.pattern.permute.xlu2 %v16052_v31 }
 0x2e1   :  { %v2105_v27 = vpop.permute.xlu2 %2104 }
 0x2e2   :  { %v2107_v18 = vmul.f32 %v2105_v27, %v81_v21 }
 0x2ea   :  { %v2129_v13 = vpop.permute.xlu2 %2128 }
 0x2eb   :  { %v2131_v7 = vmul.f32 %v2129_v13, %v81_v21 }
 0x2ed   :  { %v2133_v59 = vrot.slane %v2131_v7, 3 }
 0x2f3   :  { %v2147_v20 = vpop.permute.xlu2 %2146 }
 0x2f4   :  { %v2149_v25 = vmul.f32 %v2147_v20, %v81_v21 }
 0x2f6   :  { %v2151_v15 = vrot.slane %v2149_v25, 5 }
 0x2f8   :  { %v2120_v46 = vpop.permute.xlu1 %2119  ;;  %v2111_v26 = vpop.permute.xlu0 %2110 }
 0x2f9   :  { %v2113_v24 = vmul.f32 %v2111_v26, %v81_v21  ;;  %v2122_v29 = vmul.f32 %v2120_v46, %v81_v21 }
 0x2fb   :  { %v2115_v56 = vrot.slane %v2113_v24, 1  ;;  %v2124_v22 = vrot.slane %v2122_v29, 2 }
 0x2fd   :  { %v2117_v23 = vadd.f32 %v2115_v56, %v2107_v18 }
 0x2ff   :  { %v2126_v48 = vadd.f32 %v2124_v22, %v2117_v23 }
 0x301   :  { %v2138_v16 = vpop.permute.xlu1 %2137  ;;  %v2135_v47 = vadd.f32 %v2133_v59, %v2126_v48 }
 0x302   :  { %v2140_v54 = vmul.f32 %v2138_v16, %v81_v21  ;;  %v2156_v43 = vpop.permute.xlu0 %2155 }
 0x303   :  { %v2158_v6 = vmul.f32 %v2156_v43, %v81_v21  ;;  %v16058_v43 = vld [vmem:[#allocation15_spill] sm:$0xff] }
 0x304   :  { %v2142_v57 = vrot.slane %v2140_v54, 4  ;;  %v16055_v54 = vld [vmem:[#allocation53_spill] sm:$0xff] }
 0x305   :  { %v2160_v58 = vrot.slane %v2158_v6, 6 }
 0x306   :  { %v2144_v4 = vadd.f32 %v2142_v57, %v2135_v47  ;;  %v16056_v47 = vld [vmem:[#allocation17_spill] sm:$0xff] }
 0x308   :  { %v2153_v51 = vadd.f32 %v2151_v15, %v2144_v4  ;;  %v16059_v15 = vld [vmem:[#allocation41_spill] sm:$0xff] }
 0x30a   :  { %v2165_v34 = vpop.permute.xlu1 %2164  ;;  %v2162_v60 = vadd.f32 %v2160_v58, %v2153_v51  ;;  %v16060_v51 = vld [vmem:[#allocation48_spill] sm:$0xff]  ;;  %v16062_v58 = vld [vmem:[#allocation54_spill] sm:$0xff] }
 0x30b   :  { %v2167_v38 = vmul.f32 %v2165_v34, %v81_v21 }
 0x30d   :  { %v2169_v52 = vrot.slane %v2167_v38, 7 }
 0x30f   :  { %v2171_v40 = vadd.f32 %v2169_v52, %v2162_v60  ;;  %v16063_v60 = vld [vmem:[#allocation49_spill] sm:$0xff] }
 0x311   :  { %v2172_v41 = vmax.f32 %v2171_v40, 0.0  ;;  %v16064_v40 = vld [vmem:[#allocation4_spill] sm:$0xff] }
 0x313   :  { %2181 = vperm.xlu1 %7905, %v2172_v41   ;;  %2175 = vperm.xlu2 %7904, %v2172_v41  }
 0x31b   :  { %7907 = vset.pattern.permute.xlu1 %v16052_v31 }
 0x36d   :  { %v2176_v3 = vpop.permute.xlu2 %2175 }
 0x36e   :  { %v2178_v2 = vmul.f32 %v2176_v3, %v10149_v14  ;;  %v16066_v3 = vld [vmem:[#allocation8_spill] sm:$0xff] }
 0x385   :  { %v2182_v53 = vpop.permute.xlu1 %2181 }
 0x386   :  { %v2187_v27 = vmul.f32 %v15619_v33, %v2182_v53 }
 0x388   :  { %v2188_v13 = vadd.f32 %v2187_v27, %v2178_v2  ;;  %v16067_v2 = vld [vmem:[#allocation18_spill] sm:$0xff] }
 0x38a   :  { %v7777_v21 = vmul.f32 -1.442695, %v2188_v13  ;;  %v16068_v13 = vld [vmem:[#allocation9_spill] sm:$0xff] }
 0x38c   :  { %7970 = vpow2.f32 %v7777_v21 }
 0x392   :  { %v7971_v46 = vpop.eup %7970 }
 0x393   :  { %v2192_v26 = vadd.f32 1.0, %v7971_v46  ;;  %v16070_v46 = vld [vmem:[#allocation30_spill] sm:$0xff] }
 0x395   :  { %7972 = vrcp.f32 %v2192_v26  ;;  %v2204_v56 = vand.u32 2147483648, %v2192_v26  ;;  %v2202_v7 = vand.u32 2147483647, %v2192_v26  ;;  %vm2198_vm5 = vweird.f32 %v2192_v26 }
 0x397   :  { %v2205_v20 = vor.u32 1.1754944e-38, %v2204_v56  ;;  %vm2203_vm7 = vcmp.eq.f32.partialorder %v2202_v7, 8.507059e+37 }
 0x39b   :  { %v7973_v24 = vpop.eup %7972 }
 0x39c   :  { %v2194_v29 = vmul.f32 %v7973_v24, %v2192_v26  ;;  %vm2199_vm4 = vweird.f32 %v7973_v24 }
 0x39d   :  { %vm2200_vm6 = vmor %vm2198_vm5, %vm2199_vm4 }
 0x39e   :  { %v2195_v18 = vsub.f32 1.0, %v2194_v29 }
 0x3a0   :  { %v2196_v23 = vmul.f32 %v7973_v24, %v2195_v18  ;;  %v16072_v18 = vld [vmem:[#allocation33_spill] sm:$0xff] }
 0x3a2   :  { %v2197_v22 = vadd.f32 %v7973_v24, %v2196_v23  ;;  %v16074_v23 = vld [vmem:[#allocation28_spill] sm:$0xff] }
 0x3a4   :  { %v2201_v48 = vsel %vm2200_vm6, %v7973_v24, %v2197_v22  ;;  %v16071_v24 = vld [vmem:[#allocation51_spill] sm:$0xff]  ;;  %v16075_v22 = vld [vmem:[#allocation13_spill] sm:$0xff] }
 0x3a5   :  { %v2206_v16 = vsel %vm2203_vm7, %v2205_v20, %v2201_v48  ;;  %v16076_v48 = vld [vmem:[#allocation36_spill] sm:$0xff] }
 0x3a6   :  { %v10155_v59 = vperm.slane %v2206_v16, 0 }
 0x3a8   :  { %v10159_v25 = vmul.f32 %v10155_v59, %v16055_v54  ;;  %v10163_v57 = vmul.f32 %v10155_v59, %v16056_v47  ;;  %v10167_v4 = vmul.f32 %v10155_v59, %v16058_v43  ;;  %v10174_v6 = vmul.f32 %v10155_v59, %v16059_v15  ;;  %v16078_v54 = vld [vmem:[#allocation6_spill] sm:$0xff]  ;;  %v16079_v43 = vld [vmem:[#allocation55_spill] sm:$0xff] }
 0x3a9   :  { %v10178_v34 = vmul.f32 %v10155_v59, %v16060_v51  ;;  %v10182_v38 = vmul.f32 %v10155_v59, %v16062_v58  ;;  %v10189_v52 = vmul.f32 %v10155_v59, %v16063_v60  ;;  %v10193_v41 = vmul.f32 %v10155_v59, %v16064_v40  ;;  %v16080_v51 = vld [vmem:[#allocation35_spill] sm:$0xff]  ;;  %v16082_v60 = vld [vmem:[#allocation16_spill] sm:$0xff] }
 0x3aa   :  { %16057 = vst [vmem:[#allocation20_spill] sm:$0xff] %v10163_v57  ;;  %2253 = vperm.xlu1 %7907, %v10159_v25   ;;  %2248 = vperm.xlu0 %7906, %v10163_v57   ;;  %v10197_v53 = vmul.f32 %v10155_v59, %v16066_v3  ;;  %v10204_v27 = vmul.f32 %v10155_v59, %v16067_v2 }
 0x3ab   :  { %2243 = vperm.xlu2 %7904, %v10167_v4   ;;  %16061 = vst [vmem:[#allocation47_spill] sm:$0xff] %v10178_v34  ;;  %v10208_v21 = vmul.f32 %v10155_v59, %v16068_v13  ;;  %v10212_v26 = vmul.f32 %v10155_v59, %v16070_v46  ;;  %v10219_v29 = vmul.f32 %v10155_v59, %v16071_v24  ;;  %v16084_v13 = vld [vmem:[#allocation3_spill] sm:$0xff] }
 0x3ac   :  { %16065 = vst [vmem:[#allocation38_spill] sm:$0xff] %v10193_v41  ;;  %v10223_v56 = vmul.f32 %v10155_v59, %v16072_v18  ;;  %v10227_v7 = vmul.f32 %v10155_v59, %v16074_v23  ;;  %v10234_v20 = vmul.f32 %v10155_v59, %v16075_v22  ;;  %v10238_v16 = vmul.f32 %v10155_v59, %v16076_v48  ;;  %v10348_v23 = vld [vmem:[%s15570_s0 + $0x160] sm:$0xff]  ;;  %v10358_v48 = vld [vmem:[%s15570_s0 + $0x178] sm:$0xff] }
 0x3ad   :  { %16069 = vst [vmem:[#allocation14_spill] sm:$0xff] %v10208_v21  ;;  %v10242_v47 = vmul.f32 %v10155_v59, %v16078_v54  ;;  %v10249_v15 = vmul.f32 %v10155_v59, %v16079_v43  ;;  %v10253_v58 = vmul.f32 %v10155_v59, %v16080_v51  ;;  %v10257_v40 = vmul.f32 %v10155_v59, %v16082_v60  ;;  %v10372_v60 = vld [vmem:[%s15570_s0 + $0x190] sm:$0xff] }
 0x3ae   :  { %16073 = vst [vmem:[#allocation19_spill] sm:$0xff] %v10223_v56  ;;  %v10264_v3 = vmul.f32 %v10155_v59, %v10050_v19  ;;  %v10268_v2 = vmul.f32 %v10155_v59, %v10060_v32  ;;  %v10272_v46 = vmul.f32 %v10155_v59, %v16084_v13  ;;  %v10279_v24 = vmul.f32 %v10155_v59, %v10076_v30 }
 0x3af   :  { %16077 = vst [vmem:[#allocation39_spill] sm:$0xff] %v10238_v16  ;;  %v10283_v19 = vmul.f32 %v10155_v59, %v10108_v11  ;;  %v10287_v32 = vmul.f32 %v10155_v59, %v10064_v42  ;;  %v10294_v18 = vmul.f32 %v10155_v59, %v10112_v37  ;;  %v10298_v30 = vmul.f32 %v10155_v59, %v10121_v62  ;;  %v10310_v42 = vld [vmem:[%s15570_s0 + $0x108] sm:$0xff] }
 0x3b0   :  { %16081 = vst [vmem:[#allocation40_spill] sm:$0xff] %v10253_v58  ;;  %v10302_v11 = vmul.f32 %v10155_v59, %v10100_v45  ;;  %v10314_v37 = vmul.f32 %v10155_v59, %v10125_v39  ;;  %v10318_v62 = vmul.f32 %v10155_v59, %v10119_v63  ;;  %v10326_v45 = vld [vmem:[%s15570_s0 + $0x130] sm:$0xff]  ;;  %v10338_v39 = vld [vmem:[%s15570_s0 + $0x148] sm:$0xff] }
 0x3b1   :  { %16083 = vst [vmem:[#allocation42_spill] sm:$0xff] %v10268_v2 }
 0x3b2   :  { %2263 = vperm.xlu1 %7907, %v10174_v6   ;;  %2273 = vperm.xlu0 %7906, %v10178_v34   ;;  %16085 = vst [vmem:[#allocation43_spill] sm:$0xff] %v10283_v19 }
 0x3b3   :  { %2258 = vperm.xlu2 %7904, %v10182_v38   ;;  %16086 = vst [vmem:[#allocation5_spill] sm:$0xff] %v10298_v30 }
 0x3ba   :  { %2278 = vperm.xlu1 %7907, %v10189_v52   ;;  %2288 = vperm.xlu0 %7906, %v10193_v41  }
 0x3bb   :  { %2268 = vperm.xlu2 %7904, %v10197_v53  }
 0x3c2   :  { %2293 = vperm.xlu1 %7907, %v10204_v27   ;;  %2303 = vperm.xlu0 %7906, %v10208_v21  }
 0x3c3   :  { %2283 = vperm.xlu2 %7904, %v10212_v26  }
 0x3ca   :  { %2308 = vperm.xlu1 %7907, %v10219_v29   ;;  %2318 = vperm.xlu0 %7906, %v10223_v56  }
 0x3cb   :  { %2298 = vperm.xlu2 %7904, %v10227_v7  }
 0x3d2   :  { %2323 = vperm.xlu1 %7907, %v10234_v20   ;;  %2333 = vperm.xlu0 %7906, %v10238_v16  }
 0x3d3   :  { %2313 = vperm.xlu2 %7904, %v10242_v47  }
 0x3da   :  { %2338 = vperm.xlu1 %7907, %v10249_v15   ;;  %2348 = vperm.xlu0 %7906, %v10253_v58  }
 0x3db   :  { %2328 = vperm.xlu2 %7904, %v10257_v40  }
 0x3e2   :  { %2353 = vperm.xlu1 %7907, %v10264_v3   ;;  %2363 = vperm.xlu0 %7906, %v10268_v2  }
 0x3e3   :  { %2343 = vperm.xlu2 %7904, %v10272_v46  }
 0x3ea   :  { %2368 = vperm.xlu1 %7907, %v10279_v24   ;;  %2378 = vperm.xlu0 %7906, %v10283_v19  }
 0x3eb   :  { %2358 = vperm.xlu2 %7904, %v10287_v32  }
 0x3f2   :  { %2383 = vperm.xlu1 %7907, %v10294_v18   ;;  %2393 = vperm.xlu0 %7906, %v10298_v30  }
 0x3f3   :  { %2373 = vperm.xlu2 %7904, %v10302_v11  }
 0x3fa   :  { %2398 = vperm.xlu1 %7907, %v10314_v37   ;;  %3989 = vperm.xlu0 %7906, %v10310_v42  }
 0x3fb   :  { %2388 = vperm.xlu2 %7904, %v10318_v62  }
 0x402   :  { %7909 = vset.pattern.permute.xlu1 %v16053_v49  ;;  %4014 = vperm.xlu0 %7906, %v10326_v45  }
 0x403   :  { %7908 = vset.pattern.permute.xlu2 %v16053_v49  ;;  %2475 = vperm.xlu1 %7909, %v10159_v25  }
 0x404   :  { %2467 = vperm.xlu2 %7908, %v10167_v4  }
 0x405   :  { %v10333_v63 = vpop.permute.xlu2 %2243 }
 0x40a   :  { %4029 = vperm.xlu0 %7906, %v10338_v39  }
 0x40b   :  { %2483 = vperm.xlu1 %7909, %v10174_v6  }
 0x40c   :  { %2479 = vperm.xlu2 %7908, %v10182_v38  }
 0x40d   :  { %v10343_v59 = vpop.permute.xlu2 %2258 }
 0x412   :  { %4044 = vperm.xlu0 %7906, %v10348_v23  }
 0x413   :  { %2495 = vperm.xlu1 %7909, %v10189_v52  }
 0x414   :  { %2487 = vperm.xlu2 %7908, %v10197_v53  }
 0x415   :  { %v10353_v22 = vpop.permute.xlu2 %2268 }
 0x41a   :  { %4059 = vperm.xlu0 %7906, %v10358_v48  }
 0x41b   :  { %2507 = vperm.xlu1 %7909, %v10204_v27  }
 0x41c   :  { %2499 = vperm.xlu2 %7908, %v10212_v26   ;;  %v10363_v54 = vpop.permute.xlu1 %2253  ;;  %v10365_v43 = vpop.permute.xlu0 %2248 }
 0x41d   :  { %16087 = vst [vmem:[#allocation25_spill] sm:$0xff] %v10365_v43  ;;  %v10367_v51 = vpop.permute.xlu2 %2283 }
 0x422   :  { %4074 = vperm.xlu0 %7906, %v10372_v60  }
 0x423   :  { %2519 = vperm.xlu1 %7909, %v10219_v29  }
 0x424   :  { %2511 = vperm.xlu2 %7908, %v10227_v7   ;;  %v10377_v13 = vpop.permute.xlu1 %2263  ;;  %v10379_v33 = vpop.permute.xlu0 %2273 }
 0x425   :  { %16088 = vst [vmem:[#allocation27_spill] sm:$0xff] %v10379_v33  ;;  %v10381_v17 = vpop.permute.xlu2 %2298  ;;  %v10400_v33 = vld [vmem:[%s15570_s0 + $0x1c0] sm:$0xff] }
 0x42a   :  { %4089 = vperm.xlu0 %7906, %v10386_v1  }
 0x42b   :  { %2531 = vperm.xlu1 %7909, %v10234_v20  }
 0x42c   :  { %2523 = vperm.xlu2 %7908, %v10242_v47   ;;  %v10391_v55 = vpop.permute.xlu1 %2278  ;;  %v10393_v35 = vpop.permute.xlu0 %2288 }
 0x42d   :  { %16089 = vst [vmem:[#allocation11_spill] sm:$0xff] %v10393_v35  ;;  %v10395_v43 = vpop.permute.xlu2 %2313  ;;  %v10414_v35 = vld [vmem:[%s15570_s0 + $0x1d8] sm:$0xff] }
 0x432   :  { %4104 = vperm.xlu0 %7906, %v10400_v33  }
 0x433   :  { %2543 = vperm.xlu1 %7909, %v10249_v15  }
 0x434   :  { %2535 = vperm.xlu2 %7908, %v10257_v40   ;;  %v10405_v14 = vpop.permute.xlu1 %2293  ;;  %v10407_v0 = vpop.permute.xlu0 %2303 }
 0x435   :  { %16090 = vst [vmem:[#allocation12_spill] sm:$0xff] %v10407_v0  ;;  %v10409_v36 = vpop.permute.xlu2 %2328  ;;  %v10428_v0 = vld [vmem:[%s15570_s0 + $0x1f0] sm:$0xff] }
 0x436   :  { %16091 = vst [vmem:[#allocation26_spill] sm:$0xff] %v10409_v36 }
 0x43a   :  { %4119 = vperm.xlu0 %7906, %v10414_v35  }
 0x43b   :  { %2555 = vperm.xlu1 %7909, %v10264_v3  }
 0x43c   :  { %2547 = vperm.xlu2 %7908, %v10272_v46   ;;  %v10419_v44 = vpop.permute.xlu1 %2308  ;;  %v10421_v28 = vpop.permute.xlu0 %2318 }
 0x43d   :  { %16092 = vst [vmem:[#allocation37_spill] sm:$0xff] %v10419_v44  ;;  %v10423_v10 = vpop.permute.xlu2 %2343 }
 0x43e   :  { %16093 = vst [vmem:[#allocation53_spill] sm:$0xff] %v10421_v28  ;;  %v16098_v28 = vmov 2  }
 0x43f   :  { %16094 = vst [vmem:[#allocation17_spill] sm:$0xff] %v10423_v10 }
 0x442   :  { %4134 = vperm.xlu0 %7906, %v10428_v0  }
 0x443   :  { %2567 = vperm.xlu1 %7909, %v10279_v24  }
 0x444   :  { %2559 = vperm.xlu2 %7908, %v10287_v32   ;;  %v10433_v12 = vpop.permute.xlu1 %2323  ;;  %v10435_v5 = vpop.permute.xlu0 %2333 }
 0x445   :  { %16095 = vst [vmem:[#allocation15_spill] sm:$0xff] %v10433_v12  ;;  %v10437_v61 = vpop.permute.xlu2 %2358 }
 0x446   :  { %16096 = vst [vmem:[#allocation41_spill] sm:$0xff] %v10435_v5 }
 0x447   :  { %16097 = vst [vmem:[#allocation48_spill] sm:$0xff] %v10437_v61 }
 0x44a   :  { %7924 = vset.pattern.permute.xlu0 %v16098_v28 }
 0x44b   :  { %2579 = vperm.xlu1 %7909, %v10294_v18   ;;  %2664 = vperm.xlu0 %7924, %v10163_v57  }
 0x44c   :  { %2571 = vperm.xlu2 %7908, %v10302_v11   ;;  %v10443_v9 = vpop.permute.xlu1 %2338  ;;  %v10445_v50 = vpop.permute.xlu0 %2348 }
 0x44d   :  { %16099 = vst [vmem:[#allocation54_spill] sm:$0xff] %v10443_v9  ;;  %v10447_v31 = vpop.permute.xlu2 %2373 }
 0x44e   :  { %16100 = vst [vmem:[#allocation49_spill] sm:$0xff] %v10445_v50 }
 0x44f   :  { %16101 = vst [vmem:[#allocation4_spill] sm:$0xff] %v10447_v31 }
 0x453   :  { %2591 = vperm.xlu1 %7909, %v10314_v37   ;;  %2684 = vperm.xlu0 %7924, %v10178_v34  }
 0x454   :  { %2583 = vperm.xlu2 %7908, %v10318_v62   ;;  %v10452_v5 = vpop.permute.xlu1 %2353  ;;  %v10454_v61 = vpop.permute.xlu0 %2363 }
 0x455   :  { %16102 = vst [vmem:[#allocation8_spill] sm:$0xff] %v10452_v5  ;;  %v10456_v12 = vpop.permute.xlu2 %2388 }
 0x456   :  { %16103 = vst [vmem:[#allocation18_spill] sm:$0xff] %v10454_v61 }
 0x457   :  { %16104 = vst [vmem:[#allocation9_spill] sm:$0xff] %v10456_v12 }
 0x45b   :  { %7911 = vset.pattern.permute.xlu1 %v16098_v28  ;;  %2696 = vperm.xlu0 %7924, %v10193_v41  }
 0x45c   :  { %7910 = vset.pattern.permute.xlu2 %v16098_v28  ;;  %2668 = vperm.xlu1 %7911, %v10159_v25   ;;  %v10462_v50 = vpop.permute.xlu1 %2368  ;;  %v10464_v31 = vpop.permute.xlu0 %2378 }
 0x45d   :  { %16105 = vst [vmem:[#allocation30_spill] sm:$0xff] %v10462_v50  ;;  %2660 = vperm.xlu2 %7910, %v10167_v4  }
 0x45e   :  { %16106 = vst [vmem:[#allocation51_spill] sm:$0xff] %v10464_v31  ;;  %v10467_v9 = vpop.permute.xlu2 %2467 }
 0x45f   :  { %16107 = vst [vmem:[#allocation33_spill] sm:$0xff] %v10467_v9 }
 0x463   :  { %2708 = vperm.xlu0 %7924, %v10208_v21  }
 0x464   :  { %2676 = vperm.xlu1 %7911, %v10174_v6   ;;  %v10471_v61 = vpop.permute.xlu1 %2383  ;;  %v10473_v12 = vpop.permute.xlu0 %2393 }
 0x465   :  { %16108 = vst [vmem:[#allocation28_spill] sm:$0xff] %v10471_v61  ;;  %2672 = vperm.xlu2 %7910, %v10182_v38  }
 0x466   :  { %16109 = vst [vmem:[#allocation13_spill] sm:$0xff] %v10473_v12  ;;  %v10476_v28 = vpop.permute.xlu2 %2479 }
 0x467   :  { %16110 = vst [vmem:[#allocation36_spill] sm:$0xff] %v10476_v28 }
 0x46b   :  { %2720 = vperm.xlu0 %7924, %v10223_v56  }
 0x46c   :  { %2688 = vperm.xlu1 %7911, %v10189_v52   ;;  %v10480_v31 = vpop.permute.xlu1 %2398  ;;  %v10482_v50 = vpop.permute.xlu0 %3989 }
 0x46d   :  { %16111 = vst [vmem:[#allocation6_spill] sm:$0xff] %v10480_v31  ;;  %2680 = vperm.xlu2 %7910, %v10197_v53  }
 0x46e   :  { %v10485_v5 = vpop.permute.xlu2 %2487 }
 0x46f   :  { %16112 = vst [vmem:[#allocation55_spill] sm:$0xff] %v10485_v5 }
 0x473   :  { %2732 = vperm.xlu0 %7924, %v10238_v16  }
 0x474   :  { %2700 = vperm.xlu1 %7911, %v10204_v27   ;;  %v10489_v12 = vpop.permute.xlu0 %4014 }
 0x475   :  { %2692 = vperm.xlu2 %7910, %v10212_v26   ;;  %v10492_v61 = vpop.permute.xlu1 %2475 }
 0x476   :  { %16113 = vst [vmem:[#allocation35_spill] sm:$0xff] %v10492_v61  ;;  %v10494_v10 = vpop.permute.xlu2 %2499 }
 0x477   :  { %16114 = vst [vmem:[#allocation16_spill] sm:$0xff] %v10494_v10 }
 0x47b   :  { %2744 = vperm.xlu0 %7924, %v10253_v58  }
 0x47c   :  { %2712 = vperm.xlu1 %7911, %v10219_v29   ;;  %v10498_v31 = vpop.permute.xlu0 %4029 }
 0x47d   :  { %16115 = vst [vmem:[#allocation3_spill] sm:$0xff] %v10498_v31  ;;  %2704 = vperm.xlu2 %7910, %v10227_v7   ;;  %v10501_v5 = vpop.permute.xlu1 %2483 }
 0x47e   :  { %16116 = vst [vmem:[#allocation56_spill] sm:$0xff] %v10501_v5  ;;  %v10503_v28 = vpop.permute.xlu2 %2511 }
 0x47f   :  { %16117 = vst [vmem:[#allocation57_spill] sm:$0xff] %v10503_v28 }
 0x483   :  { %2756 = vperm.xlu0 %7924, %v10268_v2  }
 0x484   :  { %2724 = vperm.xlu1 %7911, %v10234_v20   ;;  %v10507_v9 = vpop.permute.xlu0 %4044 }
 0x485   :  { %16118 = vst [vmem:[#allocation58_spill] sm:$0xff] %v10507_v9  ;;  %2716 = vperm.xlu2 %7910, %v10242_v47   ;;  %v10510_v10 = vpop.permute.xlu1 %2495 }
 0x486   :  { %16119 = vst [vmem:[#allocation59_spill] sm:$0xff] %v10510_v10  ;;  %v10512_v61 = vpop.permute.xlu2 %2523 }
 0x487   :  { %16120 = vst [vmem:[#allocation60_spill] sm:$0xff] %v10512_v61 }
 0x48b   :  { %2768 = vperm.xlu0 %7924, %v10283_v19  }
 0x48c   :  { %2736 = vperm.xlu1 %7911, %v10249_v15   ;;  %v10516_v31 = vpop.permute.xlu0 %4059 }
 0x48d   :  { %16121 = vst [vmem:[#allocation61_spill] sm:$0xff] %v10516_v31  ;;  %2728 = vperm.xlu2 %7910, %v10257_v40   ;;  %v10519_v28 = vpop.permute.xlu1 %2507 }
 0x48e   :  { %16122 = vst [vmem:[#allocation62_spill] sm:$0xff] %v10519_v28  ;;  %v10521_v5 = vpop.permute.xlu2 %2535 }
 0x48f   :  { %16123 = vst [vmem:[#allocation63_spill] sm:$0xff] %v10521_v5 }
 0x493   :  { %2780 = vperm.xlu0 %7924, %v10298_v30  }
 0x494   :  { %2748 = vperm.xlu1 %7911, %v10264_v3   ;;  %v10525_v9 = vpop.permute.xlu0 %4074 }
 0x495   :  { %16124 = vst [vmem:[#allocation64_spill] sm:$0xff] %v10525_v9  ;;  %2740 = vperm.xlu2 %7910, %v10272_v46   ;;  %v10528_v61 = vpop.permute.xlu1 %2519 }
 0x496   :  { %16125 = vst [vmem:[#allocation65_spill] sm:$0xff] %v10528_v61  ;;  %v10530_v10 = vpop.permute.xlu2 %2547 }
 0x497   :  { %16126 = vst [vmem:[#allocation66_spill] sm:$0xff] %v10530_v10 }
 0x49b   :  { %4403 = vperm.xlu0 %7924, %v10310_v42  }
 0x49c   :  { %2760 = vperm.xlu1 %7911, %v10279_v24   ;;  %v10534_v31 = vpop.permute.xlu0 %4089 }
 0x49d   :  { %16127 = vst [vmem:[#allocation67_spill] sm:$0xff] %v10534_v31  ;;  %2752 = vperm.xlu2 %7910, %v10287_v32   ;;  %v10537_v5 = vpop.permute.xlu1 %2531 }
 0x49e   :  { %16128 = vst [vmem:[#allocation68_spill] sm:$0xff] %v10537_v5  ;;  %v10539_v28 = vpop.permute.xlu2 %2559 }
 0x49f   :  { %16129 = vst [vmem:[#allocation69_spill] sm:$0xff] %v10539_v28 }
 0x4a3   :  { %4423 = vperm.xlu0 %7924, %v10326_v45  }
 0x4a4   :  { %2772 = vperm.xlu1 %7911, %v10294_v18   ;;  %v10543_v9 = vpop.permute.xlu0 %4104 }
 0x4a5   :  { %16130 = vst [vmem:[#allocation70_spill] sm:$0xff] %v10543_v9  ;;  %2764 = vperm.xlu2 %7910, %v10302_v11   ;;  %v10546_v10 = vpop.permute.xlu1 %2543 }
 0x4a6   :  { %16131 = vst [vmem:[#allocation71_spill] sm:$0xff] %v10546_v10  ;;  %v10548_v61 = vpop.permute.xlu2 %2571 }
 0x4a7   :  { %16132 = vst [vmem:[#allocation72_spill] sm:$0xff] %v10548_v61 }
 0x4ab   :  { %4435 = vperm.xlu0 %7924, %v10338_v39  }
 0x4ac   :  { %2784 = vperm.xlu1 %7911, %v10314_v37   ;;  %v10552_v31 = vpop.permute.xlu0 %4119 }
 0x4ad   :  { %16133 = vst [vmem:[#allocation73_spill] sm:$0xff] %v10552_v31  ;;  %2776 = vperm.xlu2 %7910, %v10318_v62   ;;  %v10555_v28 = vpop.permute.xlu1 %2555 }
 0x4ae   :  { %16134 = vst [vmem:[#allocation74_spill] sm:$0xff] %v10555_v28  ;;  %v10557_v5 = vpop.permute.xlu2 %2583 }
 0x4af   :  { %16135 = vst [vmem:[#allocation75_spill] sm:$0xff] %v10557_v5 }
 0x4b3   :  { %4447 = vperm.xlu0 %7924, %v10348_v23  }
 0x4b4   :  { %7913 = vset.pattern.permute.xlu1 %v16051_v8  ;;  %v10561_v9 = vpop.permute.xlu0 %4134 }
 0x4b5   :  { %16136 = vst [vmem:[#allocation76_spill] sm:$0xff] %v10561_v9  ;;  %7912 = vset.pattern.permute.xlu2 %v16051_v8  ;;  %2861 = vperm.xlu1 %7913, %v10159_v25   ;;  %v10565_v61 = vpop.permute.xlu1 %2567 }
 0x4b6   :  { %16137 = vst [vmem:[#allocation77_spill] sm:$0xff] %v10565_v61  ;;  %2853 = vperm.xlu2 %7912, %v10167_v4  }
 0x4b7   :  { %v10568_v10 = vpop.permute.xlu2 %2660 }
 0x4b8   :  { %16138 = vst [vmem:[#allocation78_spill] sm:$0xff] %v10568_v10 }
 0x4bb   :  { %4459 = vperm.xlu0 %7924, %v10358_v48  }
 0x4bd   :  { %2869 = vperm.xlu1 %7913, %v10174_v6   ;;  %v10572_v5 = vpop.permute.xlu1 %2579  ;;  %v10574_v28 = vpop.permute.xlu0 %2664 }
 0x4be   :  { %16139 = vst [vmem:[#allocation79_spill] sm:$0xff] %v10572_v5  ;;  %2865 = vperm.xlu2 %7912, %v10182_v38  }
 0x4bf   :  { %16140 = vst [vmem:[#allocation80_spill] sm:$0xff] %v10574_v28  ;;  %v10577_v9 = vpop.permute.xlu2 %2672 }
 0x4c0   :  { %16141 = vst [vmem:[#allocation81_spill] sm:$0xff] %v10577_v9 }
 0x4c3   :  { %4471 = vperm.xlu0 %7924, %v10372_v60  }
 0x4c5   :  { %2881 = vperm.xlu1 %7913, %v10189_v52   ;;  %v10581_v61 = vpop.permute.xlu1 %2591  ;;  %v10583_v31 = vpop.permute.xlu0 %2684 }
 0x4c6   :  { %16142 = vst [vmem:[#allocation82_spill] sm:$0xff] %v10581_v61  ;;  %2873 = vperm.xlu2 %7912, %v10197_v53  }
 0x4c7   :  { %16143 = vst [vmem:[#allocation83_spill] sm:$0xff] %v10583_v31  ;;  %v10586_v10 = vpop.permute.xlu2 %2680 }
 0x4c8   :  { %16144 = vst [vmem:[#allocation84_spill] sm:$0xff] %v10586_v10 }
 0x4cb   :  { %4483 = vperm.xlu0 %7924, %v10386_v1  }
 0x4cd   :  { %2893 = vperm.xlu1 %7913, %v10204_v27   ;;  %v10590_v28 = vpop.permute.xlu0 %2696 }
 0x4ce   :  { %16145 = vst [vmem:[#allocation85_spill] sm:$0xff] %v10590_v28  ;;  %2885 = vperm.xlu2 %7912, %v10212_v26   ;;  %v10593_v5 = vpop.permute.xlu1 %2668 }
 0x4cf   :  { %16146 = vst [vmem:[#allocation86_spill] sm:$0xff] %v10593_v5  ;;  %v10595_v9 = vpop.permute.xlu2 %2692 }
 0x4d0   :  { %16147 = vst [vmem:[#allocation87_spill] sm:$0xff] %v10595_v9 }
 0x4d3   :  { %4495 = vperm.xlu0 %7924, %v10400_v33  }
 0x4d5   :  { %2905 = vperm.xlu1 %7913, %v10219_v29   ;;  %v10599_v31 = vpop.permute.xlu0 %2708 }
 0x4d6   :  { %16148 = vst [vmem:[#allocation88_spill] sm:$0xff] %v10599_v31  ;;  %2897 = vperm.xlu2 %7912, %v10227_v7   ;;  %v10602_v61 = vpop.permute.xlu1 %2676 }
 0x4d7   :  { %16149 = vst [vmem:[#allocation89_spill] sm:$0xff] %v10602_v61  ;;  %v10604_v10 = vpop.permute.xlu2 %2704 }
 0x4d8   :  { %16150 = vst [vmem:[#allocation90_spill] sm:$0xff] %v10604_v10 }
 0x4db   :  { %4507 = vperm.xlu0 %7924, %v10414_v35  }
 0x4dd   :  { %2917 = vperm.xlu1 %7913, %v10234_v20   ;;  %v10608_v28 = vpop.permute.xlu0 %2720 }
 0x4de   :  { %16151 = vst [vmem:[#allocation91_spill] sm:$0xff] %v10608_v28  ;;  %2909 = vperm.xlu2 %7912, %v10242_v47   ;;  %v10611_v9 = vpop.permute.xlu1 %2688 }
 0x4df   :  { %16152 = vst [vmem:[#allocation92_spill] sm:$0xff] %v10611_v9  ;;  %v10613_v5 = vpop.permute.xlu2 %2716 }
 0x4e0   :  { %16153 = vst [vmem:[#allocation93_spill] sm:$0xff] %v10613_v5 }
 0x4e3   :  { %4519 = vperm.xlu0 %7924, %v10428_v0  }
 0x4e5   :  { %2929 = vperm.xlu1 %7913, %v10249_v15   ;;  %v10617_v31 = vpop.permute.xlu0 %2732 }
 0x4e6   :  { %16154 = vst [vmem:[#allocation94_spill] sm:$0xff] %v10617_v31  ;;  %2921 = vperm.xlu2 %7912, %v10257_v40   ;;  %v10620_v10 = vpop.permute.xlu1 %2700 }
 0x4e7   :  { %16155 = vst [vmem:[#allocation95_spill] sm:$0xff] %v10620_v10  ;;  %v10622_v61 = vpop.permute.xlu2 %2728 }
 0x4e8   :  { %16156 = vst [vmem:[#allocation96_spill] sm:$0xff] %v10622_v61 }
 0x4eb   :  { %7929 = vset.pattern.permute.xlu0 %v16051_v8 }
 0x4ec   :  { %2857 = vperm.xlu0 %7929, %v10163_v57  }
 0x4ed   :  { %2941 = vperm.xlu1 %7913, %v10264_v3   ;;  %v10627_v28 = vpop.permute.xlu0 %2744 }
 0x4ee   :  { %16157 = vst [vmem:[#allocation97_spill] sm:$0xff] %v10627_v28  ;;  %2933 = vperm.xlu2 %7912, %v10272_v46   ;;  %v10630_v5 = vpop.permute.xlu1 %2712 }
 0x4ef   :  { %16158 = vst [vmem:[#allocation98_spill] sm:$0xff] %v10630_v5  ;;  %v10632_v9 = vpop.permute.xlu2 %2740 }
 0x4f0   :  { %16159 = vst [vmem:[#allocation99_spill] sm:$0xff] %v10632_v9 }
 0x4f4   :  { %2877 = vperm.xlu0 %7929, %v10178_v34  }
 0x4f5   :  { %2953 = vperm.xlu1 %7913, %v10279_v24   ;;  %v10636_v31 = vpop.permute.xlu0 %2756 }
 0x4f6   :  { %16160 = vst [vmem:[#allocation100_spill] sm:$0xff] %v10636_v31  ;;  %2945 = vperm.xlu2 %7912, %v10287_v32   ;;  %v10639_v8 = vpop.permute.xlu1 %2724 }
 0x4f7   :  { %16161 = vst [vmem:[#allocation101_spill] sm:$0xff] %v10639_v8  ;;  %v10641_v61 = vpop.permute.xlu2 %2752 }
 0x4f8   :  { %16162 = vst [vmem:[#allocation102_spill] sm:$0xff] %v10641_v61 }
 0x4fc   :  { %2889 = vperm.xlu0 %7929, %v10193_v41  }
 0x4fd   :  { %2965 = vperm.xlu1 %7913, %v10294_v18   ;;  %v10645_v28 = vpop.permute.xlu0 %2768 }
 0x4fe   :  { %16163 = vst [vmem:[#allocation103_spill] sm:$0xff] %v10645_v28  ;;  %2957 = vperm.xlu2 %7912, %v10302_v11   ;;  %v10648_v9 = vpop.permute.xlu1 %2736  ;;  %v16169_v28 = vmov 4  }
 0x4ff   :  { %16164 = vst [vmem:[#allocation104_spill] sm:$0xff] %v10648_v9  ;;  %v10650_v5 = vpop.permute.xlu2 %2764 }
 0x500   :  { %16165 = vst [vmem:[#allocation105_spill] sm:$0xff] %v10650_v5 }
 0x504   :  { %2901 = vperm.xlu0 %7929, %v10208_v21  }
 0x505   :  { %2977 = vperm.xlu1 %7913, %v10314_v37   ;;  %v10654_v31 = vpop.permute.xlu0 %2780 }
 0x506   :  { %16166 = vst [vmem:[#allocation106_spill] sm:$0xff] %v10654_v31  ;;  %2969 = vperm.xlu2 %7912, %v10318_v62   ;;  %v10657_v61 = vpop.permute.xlu1 %2748 }
 0x507   :  { %16167 = vst [vmem:[#allocation107_spill] sm:$0xff] %v10657_v61  ;;  %v10659_v8 = vpop.permute.xlu2 %2776 }
 0x508   :  { %16168 = vst [vmem:[#allocation108_spill] sm:$0xff] %v10659_v8 }
 0x50c   :  { %2913 = vperm.xlu0 %7929, %v10223_v56  }
 0x50d   :  { %7915 = vset.pattern.permute.xlu1 %v16169_v28  ;;  %v10663_v10 = vpop.permute.xlu0 %4403 }
 0x50e   :  { %7914 = vset.pattern.permute.xlu2 %v16169_v28  ;;  %3054 = vperm.xlu1 %7915, %v10159_v25   ;;  %v10667_v5 = vpop.permute.xlu1 %2760 }
 0x50f   :  { %16170 = vst [vmem:[#allocation109_spill] sm:$0xff] %v10667_v5  ;;  %3046 = vperm.xlu2 %7914, %v10167_v4  }
 0x510   :  { %v10670_v31 = vpop.permute.xlu2 %2853 }
 0x511   :  { %16171 = vst [vmem:[#allocation110_spill] sm:$0xff] %v10670_v31 }
 0x514   :  { %2925 = vperm.xlu0 %7929, %v10238_v16  }
 0x515   :  { %v10673_v61 = vpop.permute.xlu0 %4423 }
 0x516   :  { %3062 = vperm.xlu1 %7915, %v10174_v6   ;;  %v10676_v8 = vpop.permute.xlu1 %2772 }
 0x517   :  { %16172 = vst [vmem:[#allocation111_spill] sm:$0xff] %v10676_v8  ;;  %3058 = vperm.xlu2 %7914, %v10182_v38  }
 0x518   :  { %v10679_v9 = vpop.permute.xlu2 %2865 }
 0x519   :  { %16173 = vst [vmem:[#allocation112_spill] sm:$0xff] %v10679_v9 }
 0x51c   :  { %2937 = vperm.xlu0 %7929, %v10253_v58  }
 0x51d   :  { %v10682_v28 = vpop.permute.xlu0 %4435 }
 0x51e   :  { %16174 = vst [vmem:[#allocation113_spill] sm:$0xff] %v10682_v28  ;;  %3074 = vperm.xlu1 %7915, %v10189_v52   ;;  %v10685_v5 = vpop.permute.xlu1 %2784 }
 0x51f   :  { %16175 = vst [vmem:[#allocation114_spill] sm:$0xff] %v10685_v5  ;;  %3066 = vperm.xlu2 %7914, %v10197_v53  }
 0x520   :  { %v10688_v31 = vpop.permute.xlu2 %2873 }
 0x521   :  { %16176 = vst [vmem:[#allocation115_spill] sm:$0xff] %v10688_v31 }
 0x524   :  { %2949 = vperm.xlu0 %7929, %v10268_v2  }
 0x525   :  { %v10691_v44 = vpop.permute.xlu0 %4447 }
 0x526   :  { %16177 = vst [vmem:[#allocation116_spill] sm:$0xff] %v10691_v44  ;;  %3086 = vperm.xlu1 %7915, %v10204_v27  }
 0x527   :  { %3078 = vperm.xlu2 %7914, %v10212_v26   ;;  %v10695_v8 = vpop.permute.xlu1 %2861 }
 0x528   :  { %16178 = vst [vmem:[#allocation117_spill] sm:$0xff] %v10695_v8  ;;  %v10697_v9 = vpop.permute.xlu2 %2885 }
 0x529   :  { %16179 = vst [vmem:[#allocation118_spill] sm:$0xff] %v10697_v9 }
 0x52c   :  { %2961 = vperm.xlu0 %7929, %v10283_v19  }
 0x52d   :  { %v10700_v28 = vpop.permute.xlu0 %4459 }
 0x52e   :  { %16180 = vst [vmem:[#allocation119_spill] sm:$0xff] %v10700_v28  ;;  %3098 = vperm.xlu1 %7915, %v10219_v29  }
 0x52f   :  { %3090 = vperm.xlu2 %7914, %v10227_v7   ;;  %v10704_v5 = vpop.permute.xlu1 %2869 }
 0x530   :  { %16181 = vst [vmem:[#allocation120_spill] sm:$0xff] %v10704_v5  ;;  %v10706_v31 = vpop.permute.xlu2 %2897 }
 0x531   :  { %16182 = vst [vmem:[#allocation121_spill] sm:$0xff] %v10706_v31 }
 0x534   :  { %2973 = vperm.xlu0 %7929, %v10298_v30  }
 0x535   :  { %v10709_v44 = vpop.permute.xlu0 %4471 }
 0x536   :  { %16183 = vst [vmem:[#allocation122_spill] sm:$0xff] %v10709_v44  ;;  %3110 = vperm.xlu1 %7915, %v10234_v20  }
 0x537   :  { %3102 = vperm.xlu2 %7914, %v10242_v47   ;;  %v10713_v9 = vpop.permute.xlu1 %2881 }
 0x538   :  { %16184 = vst [vmem:[#allocation123_spill] sm:$0xff] %v10713_v9  ;;  %v10715_v8 = vpop.permute.xlu2 %2909 }
 0x539   :  { %16185 = vst [vmem:[#allocation124_spill] sm:$0xff] %v10715_v8 }
 0x53c   :  { %4595 = vperm.xlu0 %7929, %v10310_v42  }
 0x53d   :  { %v10718_v28 = vpop.permute.xlu0 %4483 }
 0x53e   :  { %16186 = vst [vmem:[#allocation125_spill] sm:$0xff] %v10718_v28  ;;  %3122 = vperm.xlu1 %7915, %v10249_v15  }
 0x53f   :  { %3114 = vperm.xlu2 %7914, %v10257_v40   ;;  %v10722_v31 = vpop.permute.xlu1 %2893 }
 0x540   :  { %16187 = vst [vmem:[#allocation126_spill] sm:$0xff] %v10722_v31  ;;  %v10724_v5 = vpop.permute.xlu2 %2921 }
 0x541   :  { %16188 = vst [vmem:[#allocation127_spill] sm:$0xff] %v10724_v5 }
 0x544   :  { %4615 = vperm.xlu0 %7929, %v10326_v45  }
 0x545   :  { %v10727_v44 = vpop.permute.xlu0 %4495 }
 0x546   :  { %16189 = vst [vmem:[#allocation128_spill] sm:$0xff] %v10727_v44  ;;  %3134 = vperm.xlu1 %7915, %v10264_v3  }
 0x547   :  { %3126 = vperm.xlu2 %7914, %v10272_v46   ;;  %v10731_v8 = vpop.permute.xlu1 %2905 }
 0x548   :  { %16190 = vst [vmem:[#allocation129_spill] sm:$0xff] %v10731_v8  ;;  %v10733_v9 = vpop.permute.xlu2 %2933 }
 0x549   :  { %16191 = vst [vmem:[#allocation130_spill] sm:$0xff] %v10733_v9 }
 0x54c   :  { %4627 = vperm.xlu0 %7929, %v10338_v39  }
 0x54d   :  { %v10736_v28 = vpop.permute.xlu0 %4507 }
 0x54e   :  { %16192 = vst [vmem:[#allocation131_spill] sm:$0xff] %v10736_v28  ;;  %3146 = vperm.xlu1 %7915, %v10279_v24  }
 0x54f   :  { %3138 = vperm.xlu2 %7914, %v10287_v32   ;;  %v10740_v5 = vpop.permute.xlu1 %2917 }
 0x550   :  { %16193 = vst [vmem:[#allocation132_spill] sm:$0xff] %v10740_v5  ;;  %v10742_v31 = vpop.permute.xlu2 %2945 }
 0x551   :  { %16194 = vst [vmem:[#allocation133_spill] sm:$0xff] %v10742_v31 }
 0x554   :  { %4639 = vperm.xlu0 %7929, %v10348_v23  }
 0x555   :  { %v10745_v44 = vpop.permute.xlu0 %4519 }
 0x556   :  { %16195 = vst [vmem:[#allocation134_spill] sm:$0xff] %v10745_v44  ;;  %3158 = vperm.xlu1 %7915, %v10294_v18   ;;  %v16201_v44 = vmov 5  }
 0x557   :  { %3150 = vperm.xlu2 %7914, %v10302_v11   ;;  %v10749_v9 = vpop.permute.xlu1 %2929 }
 0x558   :  { %16196 = vst [vmem:[#allocation135_spill] sm:$0xff] %v10749_v9  ;;  %v10751_v8 = vpop.permute.xlu2 %2957 }
 0x559   :  { %16197 = vst [vmem:[#allocation136_spill] sm:$0xff] %v10751_v8 }
 0x55c   :  { %4651 = vperm.xlu0 %7929, %v10358_v48  }
 0x55e   :  { %3170 = vperm.xlu1 %7915, %v10314_v37   ;;  %v10755_v28 = vpop.permute.xlu0 %2857 }
 0x55f   :  { %16198 = vst [vmem:[#allocation137_spill] sm:$0xff] %v10755_v28  ;;  %3162 = vperm.xlu2 %7914, %v10318_v62   ;;  %v10758_v31 = vpop.permute.xlu1 %2941 }
 0x560   :  { %16199 = vst [vmem:[#allocation138_spill] sm:$0xff] %v10758_v31  ;;  %v10760_v5 = vpop.permute.xlu2 %2969 }
 0x561   :  { %16200 = vst [vmem:[#allocation139_spill] sm:$0xff] %v10760_v5 }
 0x564   :  { %4663 = vperm.xlu0 %7929, %v10372_v60  }
 0x566   :  { %7917 = vset.pattern.permute.xlu1 %v16201_v44  ;;  %v10764_v36 = vpop.permute.xlu0 %2877 }
 0x567   :  { %16202 = vst [vmem:[#allocation140_spill] sm:$0xff] %v10764_v36  ;;  %7916 = vset.pattern.permute.xlu2 %v16201_v44  ;;  %3247 = vperm.xlu1 %7917, %v10159_v25   ;;  %v10768_v8 = vpop.permute.xlu1 %2953 }
 0x568   :  { %16203 = vst [vmem:[#allocation141_spill] sm:$0xff] %v10768_v8  ;;  %3239 = vperm.xlu2 %7916, %v10167_v4  }
 0x569   :  { %v10771_v28 = vpop.permute.xlu2 %3046 }
 0x56c   :  { %4675 = vperm.xlu0 %7929, %v10386_v1  }
 0x56e   :  { %v10774_v31 = vpop.permute.xlu0 %2889 }
 0x56f   :  { %16204 = vst [vmem:[#allocation142_spill] sm:$0xff] %v10774_v31  ;;  %3255 = vperm.xlu1 %7917, %v10174_v6   ;;  %v10777_v5 = vpop.permute.xlu1 %2965 }
 0x570   :  { %16205 = vst [vmem:[#allocation143_spill] sm:$0xff] %v10777_v5  ;;  %3251 = vperm.xlu2 %7916, %v10182_v38  }
 0x571   :  { %v10780_v36 = vpop.permute.xlu2 %3058 }
 0x572   :  { %16206 = vst [vmem:[#allocation144_spill] sm:$0xff] %v10780_v36 }
 0x574   :  { %4687 = vperm.xlu0 %7929, %v10400_v33  }
 0x576   :  { %v10783_v44 = vpop.permute.xlu0 %2901 }
 0x577   :  { %16207 = vst [vmem:[#allocation145_spill] sm:$0xff] %v10783_v44  ;;  %3267 = vperm.xlu1 %7917, %v10189_v52   ;;  %v10786_v8 = vpop.permute.xlu1 %2977 }
 0x578   :  { %16208 = vst [vmem:[#allocation146_spill] sm:$0xff] %v10786_v8  ;;  %3259 = vperm.xlu2 %7916, %v10197_v53  }
 0x579   :  { %v10789_v9 = vpop.permute.xlu2 %3066 }
 0x57a   :  { %16209 = vst [vmem:[#allocation147_spill] sm:$0xff] %v10789_v9 }
 0x57c   :  { %4699 = vperm.xlu0 %7929, %v10414_v35  }
 0x57e   :  { %v10792_v31 = vpop.permute.xlu0 %2913 }
 0x57f   :  { %16210 = vst [vmem:[#allocation148_spill] sm:$0xff] %v10792_v31  ;;  %3279 = vperm.xlu1 %7917, %v10204_v27  }
 0x580   :  { %3271 = vperm.xlu2 %7916, %v10212_v26   ;;  %v10796_v5 = vpop.permute.xlu1 %3054 }
 0x581   :  { %16211 = vst [vmem:[#allocation149_spill] sm:$0xff] %v10796_v5  ;;  %v10798_v36 = vpop.permute.xlu2 %3078 }
 0x582   :  { %16212 = vst [vmem:[#allocation150_spill] sm:$0xff] %v10798_v36 }
 0x584   :  { %4711 = vperm.xlu0 %7929, %v10428_v0  }
 0x586   :  { %v10801_v44 = vpop.permute.xlu0 %2925 }
 0x587   :  { %16213 = vst [vmem:[#allocation151_spill] sm:$0xff] %v10801_v44  ;;  %3291 = vperm.xlu1 %7917, %v10219_v29  }
 0x588   :  { %3283 = vperm.xlu2 %7916, %v10227_v7   ;;  %v10805_v8 = vpop.permute.xlu1 %3062 }
 0x589   :  { %16214 = vst [vmem:[#allocation152_spill] sm:$0xff] %v10805_v8  ;;  %v10807_v9 = vpop.permute.xlu2 %3090 }
 0x58a   :  { %16215 = vst [vmem:[#allocation153_spill] sm:$0xff] %v10807_v9 }
 0x58c   :  { %7932 = vset.pattern.permute.xlu0 %v16053_v49 }
 0x58d   :  { %2471 = vperm.xlu0 %7932, %v10163_v57  }
 0x58e   :  { %v10811_v31 = vpop.permute.xlu0 %2937 }
 0x58f   :  { %16216 = vst [vmem:[#allocation154_spill] sm:$0xff] %v10811_v31  ;;  %3303 = vperm.xlu1 %7917, %v10234_v20  }
 0x590   :  { %3295 = vperm.xlu2 %7916, %v10242_v47   ;;  %v10815_v36 = vpop.permute.xlu1 %3074 }
 0x591   :  { %16217 = vst [vmem:[#allocation155_spill] sm:$0xff] %v10815_v36  ;;  %v10817_v44 = vpop.permute.xlu2 %3102 }
 0x592   :  { %16218 = vst [vmem:[#allocation156_spill] sm:$0xff] %v10817_v44 }
 0x595   :  { %2491 = vperm.xlu0 %7932, %v10178_v34  }
 0x596   :  { %v10820_v5 = vpop.permute.xlu0 %2949 }
 0x597   :  { %16219 = vst [vmem:[#allocation157_spill] sm:$0xff] %v10820_v5  ;;  %3315 = vperm.xlu1 %7917, %v10249_v15  }
 0x598   :  { %3307 = vperm.xlu2 %7916, %v10257_v40   ;;  %v10824_v49 = vpop.permute.xlu1 %3086 }
 0x599   :  { %16220 = vst [vmem:[#allocation158_spill] sm:$0xff] %v10824_v49  ;;  %v10826_v57 = vpop.permute.xlu2 %3114 }
 0x59a   :  { %16221 = vst [vmem:[#allocation159_spill] sm:$0xff] %v10826_v57 }
 0x59d   :  { %2503 = vperm.xlu0 %7932, %v10193_v41  }
 0x59e   :  { %v10829_v31 = vpop.permute.xlu0 %2961 }
 0x59f   :  { %16222 = vst [vmem:[#allocation160_spill] sm:$0xff] %v10829_v31  ;;  %3327 = vperm.xlu1 %7917, %v10264_v3  }
 0x5a0   :  { %3319 = vperm.xlu2 %7916, %v10272_v46   ;;  %v10833_v44 = vpop.permute.xlu1 %3098 }
 0x5a1   :  { %16223 = vst [vmem:[#allocation161_spill] sm:$0xff] %v10833_v44  ;;  %v10835_v34 = vpop.permute.xlu2 %3126  ;;  %v16232_v44 = vmov 6  }
 0x5a2   :  { %16224 = vst [vmem:[#allocation162_spill] sm:$0xff] %v10835_v34 }
 0x5a5   :  { %2515 = vperm.xlu0 %7932, %v10208_v21  }
 0x5a6   :  { %v10838_v5 = vpop.permute.xlu0 %2973 }
 0x5a7   :  { %16225 = vst [vmem:[#allocation163_spill] sm:$0xff] %v10838_v5  ;;  %3339 = vperm.xlu1 %7917, %v10279_v24  }
 0x5a8   :  { %3331 = vperm.xlu2 %7916, %v10287_v32   ;;  %v10842_v57 = vpop.permute.xlu1 %3110 }
 0x5a9   :  { %16226 = vst [vmem:[#allocation164_spill] sm:$0xff] %v10842_v57  ;;  %v10844_v41 = vpop.permute.xlu2 %3138 }
 0x5aa   :  { %16227 = vst [vmem:[#allocation165_spill] sm:$0xff] %v10844_v41 }
 0x5ad   :  { %2527 = vperm.xlu0 %7932, %v10223_v56  }
 0x5ae   :  { %v10847_v31 = vpop.permute.xlu0 %4595 }
 0x5af   :  { %3351 = vperm.xlu1 %7917, %v10294_v18  }
 0x5b0   :  { %3343 = vperm.xlu2 %7916, %v10302_v11   ;;  %v10851_v34 = vpop.permute.xlu1 %3122 }
 0x5b1   :  { %16228 = vst [vmem:[#allocation166_spill] sm:$0xff] %v10851_v34  ;;  %v10853_v21 = vpop.permute.xlu2 %3150 }
 0x5b2   :  { %16229 = vst [vmem:[#allocation167_spill] sm:$0xff] %v10853_v21 }
 0x5b5   :  { %2539 = vperm.xlu0 %7932, %v10238_v16  }
 0x5b6   :  { %v10856_v5 = vpop.permute.xlu0 %4615 }
 0x5b7   :  { %3363 = vperm.xlu1 %7917, %v10314_v37  }
 0x5b8   :  { %3355 = vperm.xlu2 %7916, %v10318_v62   ;;  %v10860_v41 = vpop.permute.xlu1 %3134 }
 0x5b9   :  { %16230 = vst [vmem:[#allocation168_spill] sm:$0xff] %v10860_v41  ;;  %v10862_v56 = vpop.permute.xlu2 %3162 }
 0x5ba   :  { %16231 = vst [vmem:[#allocation169_spill] sm:$0xff] %v10862_v56 }
 0x5bd   :  { %2551 = vperm.xlu0 %7932, %v10253_v58  }
 0x5be   :  { %v10865_v57 = vpop.permute.xlu0 %4627 }
 0x5bf   :  { %7919 = vset.pattern.permute.xlu1 %v16232_v44 }
 0x5c0   :  { %7918 = vset.pattern.permute.xlu2 %v16232_v44  ;;  %3440 = vperm.xlu1 %7919, %v10159_v25   ;;  %v10870_v16 = vpop.permute.xlu1 %3146 }
 0x5c1   :  { %16233 = vst [vmem:[#allocation170_spill] sm:$0xff] %v10870_v16  ;;  %3432 = vperm.xlu2 %7918, %v10167_v4  }
 0x5c2   :  { %v10873_v21 = vpop.permute.xlu2 %3239 }
 0x5c5   :  { %2563 = vperm.xlu0 %7932, %v10268_v2  }
 0x5c6   :  { %v10876_v41 = vpop.permute.xlu0 %4639 }
 0x5c8   :  { %3448 = vperm.xlu1 %7919, %v10174_v6   ;;  %v10879_v58 = vpop.permute.xlu1 %3158 }
 0x5c9   :  { %16234 = vst [vmem:[#allocation171_spill] sm:$0xff] %v10879_v58  ;;  %3444 = vperm.xlu2 %7918, %v10182_v38  }
 0x5ca   :  { %v10882_v56 = vpop.permute.xlu2 %3251 }
 0x5cd   :  { %2575 = vperm.xlu0 %7932, %v10283_v19  }
 0x5ce   :  { %v10885_v44 = vpop.permute.xlu0 %4651 }
 0x5d0   :  { %3460 = vperm.xlu1 %7919, %v10189_v52   ;;  %v10888_v16 = vpop.permute.xlu1 %3170 }
 0x5d1   :  { %16235 = vst [vmem:[#allocation172_spill] sm:$0xff] %v10888_v16  ;;  %3452 = vperm.xlu2 %7918, %v10197_v53  }
 0x5d2   :  { %v10891_v2 = vpop.permute.xlu2 %3259 }
 0x5d5   :  { %2587 = vperm.xlu0 %7932, %v10298_v30  }
 0x5d6   :  { %v10894_v34 = vpop.permute.xlu0 %4663 }
 0x5d8   :  { %3472 = vperm.xlu1 %7919, %v10204_v27  }
 0x5d9   :  { %3464 = vperm.xlu2 %7918, %v10212_v26   ;;  %v10898_v58 = vpop.permute.xlu1 %3247 }
 0x5da   :  { %v10900_v19 = vpop.permute.xlu2 %3271 }
 0x5dd   :  { %4211 = vperm.xlu0 %7932, %v10310_v42  }
 0x5de   :  { %v10903_v49 = vpop.permute.xlu0 %4675 }
 0x5e0   :  { %3484 = vperm.xlu1 %7919, %v10219_v29  }
 0x5e1   :  { %3476 = vperm.xlu2 %7918, %v10227_v7   ;;  %v10907_v16 = vpop.permute.xlu1 %3255 }
 0x5e2   :  { %16236 = vst [vmem:[#allocation173_spill] sm:$0xff] %v10907_v16  ;;  %v10909_v30 = vpop.permute.xlu2 %3283 }
 0x5e3   :  { %16237 = vst [vmem:[#allocation174_spill] sm:$0xff] %v10909_v30 }
 0x5e5   :  { %4231 = vperm.xlu0 %7932, %v10326_v45  }
 0x5e6   :  { %v10912_v36 = vpop.permute.xlu0 %4687 }
 0x5e8   :  { %3496 = vperm.xlu1 %7919, %v10234_v20  }
 0x5e9   :  { %3488 = vperm.xlu2 %7918, %v10242_v47   ;;  %v10916_v9 = vpop.permute.xlu1 %3267 }
 0x5ea   :  { %16238 = vst [vmem:[#allocation175_spill] sm:$0xff] %v10916_v9  ;;  %v10918_v42 = vpop.permute.xlu2 %3295 }
 0x5eb   :  { %16239 = vst [vmem:[#allocation176_spill] sm:$0xff] %v10918_v42 }
 0x5ed   :  { %4243 = vperm.xlu0 %7932, %v10338_v39  }
 0x5ee   :  { %v10921_v8 = vpop.permute.xlu0 %4699 }
 0x5f0   :  { %3508 = vperm.xlu1 %7919, %v10249_v15  }
 0x5f1   :  { %3500 = vperm.xlu2 %7918, %v10257_v40   ;;  %v10925_v30 = vpop.permute.xlu1 %3279 }
 0x5f2   :  { %16240 = vst [vmem:[#allocation177_spill] sm:$0xff] %v10925_v30  ;;  %v10927_v45 = vpop.permute.xlu2 %3307 }
 0x5f3   :  { %16241 = vst [vmem:[#allocation178_spill] sm:$0xff] %v10927_v45 }
 0x5f5   :  { %4255 = vperm.xlu0 %7932, %v10348_v23  }
 0x5f6   :  { %v10930_v16 = vpop.permute.xlu0 %4711 }
 0x5f7   :  { %16242 = vst [vmem:[#allocation179_spill] sm:$0xff] %v10930_v16  ;;  %v16293_v16 = vld [vmem:[#allocation16_spill] sm:$0xff] }
 0x5f8   :  { %3520 = vperm.xlu1 %7919, %v10264_v3  }
 0x5f9   :  { %3512 = vperm.xlu2 %7918, %v10272_v46   ;;  %v10934_v42 = vpop.permute.xlu1 %3291 }
 0x5fa   :  { %16243 = vst [vmem:[#allocation180_spill] sm:$0xff] %v10934_v42  ;;  %v10936_v39 = vpop.permute.xlu2 %3319 }
 0x5fb   :  { %16244 = vst [vmem:[#allocation181_spill] sm:$0xff] %v10936_v39 }
 0x5fd   :  { %4267 = vperm.xlu0 %7932, %v10358_v48  }
 0x5ff   :  { %v10939_v9 = vpop.permute.xlu0 %2471 }
 0x600   :  { %16245 = vst [vmem:[#allocation182_spill] sm:$0xff] %v10939_v9  ;;  %3532 = vperm.xlu1 %7919, %v10279_v24  }
 0x601   :  { %3524 = vperm.xlu2 %7918, %v10287_v32   ;;  %v10943_v45 = vpop.permute.xlu1 %3303 }
 0x602   :  { %16246 = vst [vmem:[#allocation183_spill] sm:$0xff] %v10943_v45  ;;  %v10945_v23 = vpop.permute.xlu2 %3331  ;;  %v16255_v45 = vmov 7  }
 0x603   :  { %16247 = vst [vmem:[#allocation184_spill] sm:$0xff] %v10945_v23 }
 0x605   :  { %4279 = vperm.xlu0 %7932, %v10372_v60  }
 0x607   :  { %v10948_v30 = vpop.permute.xlu0 %2491 }
 0x608   :  { %16248 = vst [vmem:[#allocation185_spill] sm:$0xff] %v10948_v30  ;;  %3544 = vperm.xlu1 %7919, %v10294_v18  }
 0x609   :  { %3536 = vperm.xlu2 %7918, %v10302_v11   ;;  %v10952_v39 = vpop.permute.xlu1 %3315 }
 0x60a   :  { %16249 = vst [vmem:[#allocation186_spill] sm:$0xff] %v10952_v39  ;;  %v10954_v48 = vpop.permute.xlu2 %3343 }
 0x60b   :  { %16250 = vst [vmem:[#allocation187_spill] sm:$0xff] %v10954_v48 }
 0x60d   :  { %4291 = vperm.xlu0 %7932, %v10386_v1  }
 0x60f   :  { %v10957_v9 = vpop.permute.xlu0 %2503 }
 0x610   :  { %16251 = vst [vmem:[#allocation188_spill] sm:$0xff] %v10957_v9  ;;  %3556 = vperm.xlu1 %7919, %v10314_v37  }
 0x611   :  { %3548 = vperm.xlu2 %7918, %v10318_v62   ;;  %v10961_v23 = vpop.permute.xlu1 %3327 }
 0x612   :  { %16252 = vst [vmem:[#allocation189_spill] sm:$0xff] %v10961_v23  ;;  %v10963_v60 = vpop.permute.xlu2 %3355 }
 0x613   :  { %16253 = vst [vmem:[#allocation190_spill] sm:$0xff] %v10963_v60 }
 0x615   :  { %4303 = vperm.xlu0 %7932, %v10400_v33  }
 0x617   :  { %v10966_v30 = vpop.permute.xlu0 %2515 }
 0x618   :  { %16254 = vst [vmem:[#allocation191_spill] sm:$0xff] %v10966_v30  ;;  %7921 = vset.pattern.permute.xlu1 %v16255_v45 }
 0x619   :  { %7920 = vset.pattern.permute.xlu2 %v16255_v45  ;;  %3633 = vperm.xlu1 %7921, %v10159_v25   ;;  %v10971_v1 = vpop.permute.xlu1 %3339  ;;  %v16270_v45 = vld [vmem:[#allocation52_spill] sm:$0xff] }
 0x61a   :  { %16256 = vst [vmem:[#allocation192_spill] sm:$0xff] %v10971_v1  ;;  %3625 = vperm.xlu2 %7920, %v10167_v4  }
 0x61b   :  { %v10974_v9 = vpop.permute.xlu2 %3432 }
 0x61d   :  { %4315 = vperm.xlu0 %7932, %v10414_v35  }
 0x61f   :  { %v10977_v23 = vpop.permute.xlu0 %2527 }
 0x620   :  { %16257 = vst [vmem:[#allocation193_spill] sm:$0xff] %v10977_v23 }
 0x621   :  { %3641 = vperm.xlu1 %7921, %v10174_v6   ;;  %v10980_v33 = vpop.permute.xlu1 %3351 }
 0x622   :  { %16258 = vst [vmem:[#allocation194_spill] sm:$0xff] %v10980_v33  ;;  %3637 = vperm.xlu2 %7920, %v10182_v38  }
 0x623   :  { %v10983_v30 = vpop.permute.xlu2 %3444 }
 0x625   :  { %4327 = vperm.xlu0 %7932, %v10428_v0  }
 0x627   :  { %v10986_v25 = vpop.permute.xlu0 %2539 }
 0x628   :  { %16259 = vst [vmem:[#allocation195_spill] sm:$0xff] %v10986_v25 }
 0x629   :  { %3653 = vperm.xlu1 %7921, %v10189_v52   ;;  %v10989_v4 = vpop.permute.xlu1 %3363 }
 0x62a   :  { %16260 = vst [vmem:[#allocation196_spill] sm:$0xff] %v10989_v4  ;;  %3645 = vperm.xlu2 %7920, %v10197_v53   ;;  %v16271_v4 = vld [vmem:[#allocation46_spill] sm:$0xff] }
 0x62b   :  { %v10992_v35 = vpop.permute.xlu2 %3452 }
 0x62f   :  { %v10994_v23 = vpop.permute.xlu0 %2551 }
 0x630   :  { %16261 = vst [vmem:[#allocation197_spill] sm:$0xff] %v10994_v23 }
 0x631   :  { %3665 = vperm.xlu1 %7921, %v10204_v27  }
 0x632   :  { %3657 = vperm.xlu2 %7920, %v10212_v26   ;;  %v10998_v6 = vpop.permute.xlu1 %3440 }
 0x633   :  { %v11000_v38 = vpop.permute.xlu2 %3464 }
 0x637   :  { %v11002_v0 = vpop.permute.xlu0 %2563 }
 0x638   :  { %16262 = vst [vmem:[#allocation198_spill] sm:$0xff] %v11002_v0 }
 0x639   :  { %3677 = vperm.xlu1 %7921, %v10219_v29  }
 0x63a   :  { %3669 = vperm.xlu2 %7920, %v10227_v7   ;;  %v11006_v52 = vpop.permute.xlu1 %3448 }
 0x63b   :  { %v11008_v53 = vpop.permute.xlu2 %3476 }
 0x63f   :  { %v11010_v25 = vpop.permute.xlu0 %2575 }
 0x640   :  { %16263 = vst [vmem:[#allocation199_spill] sm:$0xff] %v11010_v25  ;;  %v16269_v25 = vld [vmem:[#allocation45_spill] sm:$0xff] }
 0x641   :  { %3689 = vperm.xlu1 %7921, %v10234_v20   ;;  %v4143_v20 = vmul.f32 %v10482_v50, %v16269_v25  ;;  %v11042_v50 = vld [vmem:[%s15578_s7] sm:$0xff] }
 0x642   :  { %3681 = vperm.xlu2 %7920, %v10242_v47   ;;  %v11014_v27 = vpop.permute.xlu1 %3460  ;;  %v4527_v47 = vmul.f32 %v10663_v10, %v16270_v45 }
 0x643   :  { %16264 = vst [vmem:[#allocation200_spill] sm:$0xff] %v11014_v27  ;;  %v11016_v26 = vpop.permute.xlu2 %3488  ;;  %v11207_v27 = vperm.slane %v11042_v50, 5 }
 0x644   :  { %16265 = vst [vmem:[#allocation201_spill] sm:$0xff] %v11016_v26 }
 0x647   :  { %v11018_v23 = vpop.permute.xlu0 %2587 }
 0x648   :  { %16266 = vst [vmem:[#allocation202_spill] sm:$0xff] %v11018_v23  ;;  %v16272_v23 = vld [vmem:[#allocation10_spill] sm:$0xff] }
 0x649   :  { %3701 = vperm.xlu1 %7921, %v10249_v15   ;;  %v4719_v15 = vmul.f32 %v10847_v31, %v16272_v23  ;;  %v4148_v31 = vmul.f32 %v10489_v12, %v16269_v25 }
 0x64a   :  { %3693 = vperm.xlu2 %7920, %v10257_v40   ;;  %v11022_v29 = vpop.permute.xlu1 %3472 }
 0x64b   :  { %16267 = vst [vmem:[#allocation203_spill] sm:$0xff] %v11022_v29  ;;  %v11024_v7 = vpop.permute.xlu2 %3500  ;;  %v16289_v29 = vld [vmem:[#allocation15_spill] sm:$0xff] }
 0x64c   :  { %16268 = vst [vmem:[#allocation204_spill] sm:$0xff] %v11024_v7 }
 0x64f   :  { %v4212_v0 = vpop.permute.xlu0 %4211 }
 0x650   :  { %v4335_v33 = vmul.f32 %v4212_v0, %v16271_v4  ;;  %v11045_v0 = vperm.slane %v11042_v50, 0 }
 0x651   :  { %3713 = vperm.xlu1 %7921, %v10264_v3  }
 0x652   :  { %v4367_v1 = vadd.f32 %v4335_v33, %v4143_v20  ;;  %3705 = vperm.xlu2 %7920, %v10272_v46   ;;  %v11035_v40 = vpop.permute.xlu1 %3484  ;;  %16275 = vst [vmem:[#allocation10_spill] sm:$0xff] %v11045_v0  ;;  %v4532_v46 = vmul.f32 %v10673_v61, %v16270_v45  ;;  %v11054_v33 = vld [vmem:[%s15571_s2] ss:$0 sm:$0xff]  ;;  %v2402_v39 = vmul.f32 %v11045_v0, %v10333_v63 }
 0x653   :  { %16273 = vst [vmem:[#allocation52_spill] sm:$0xff] %v11035_v40  ;;  %v11037_v60 = vpop.permute.xlu2 %3512  ;;  %v2406_v63 = vmul.f32 %v11045_v0, %v10377_v13  ;;  %v16279_v13 = vld [vmem:[#allocation26_spill] sm:$0xff]  ;;  %v16285_v40 = vld [vmem:[#allocation35_spill] sm:$0xff] }
 0x654   :  { %16274 = vst [vmem:[#allocation46_spill] sm:$0xff] %v11037_v60  ;;  %v4559_v10 = vadd.f32 %v4527_v47, %v4367_v1  ;;  %v4724_v47 = vmul.f32 %v10856_v5, %v16272_v23  ;;  %v2404_v5 = vmul.f32 %v11045_v0, %v10363_v54  ;;  %v11092_v54 = vmul.f32 %v11045_v0, %v10395_v43 }
 0x656   :  { %v4751_v48 = vadd.f32 %v4719_v15, %v4559_v10 }
 0x657   :  { %v4232_v3 = vpop.permute.xlu0 %4231 }
 0x658   :  { %v4783_v20 = vadd.f32 %v11054_v33, %v4751_v48  ;;  %v4340_v1 = vmul.f32 %v4232_v3, %v16271_v4  ;;  %v2405_v3 = vmul.f32 %v11045_v0, %v10343_v59 }
 0x659   :  { %3725 = vperm.xlu1 %7921, %v10279_v24   ;;  %v2407_v24 = vmul.f32 %v11045_v0, %v10353_v22  ;;  %v11088_v22 = vmul.f32 %v11045_v0, %v10391_v55  ;;  %v16281_v55 = vld [vmem:[#allocation3_spill] sm:$0xff] }
 0x65a   :  { %v4815_v15 = vmax.f32 %v4783_v20, 0.0  ;;  %v4372_v10 = vadd.f32 %v4340_v1, %v4148_v31  ;;  %3717 = vperm.xlu2 %7920, %v10287_v32   ;;  %v11062_v12 = vpop.permute.xlu1 %3496  ;;  %v11075_v32 = vperm.slane %v11042_v50, 1  ;;  %v2410_v31 = vmul.f32 %v11045_v0, %v10367_v51  ;;  %v16280_v1 = vld [vmem:[#allocation37_spill] sm:$0xff] }
 0x65b   :  { %16276 = vst [vmem:[#allocation205_spill] sm:$0xff] %v11062_v12  ;;  %v11064_v61 = vpop.permute.xlu2 %3524  ;;  %v11096_v51 = vmul.f32 %v11045_v0, %v10405_v14  ;;  %v11100_v20 = vmul.f32 %v11045_v0, %v16279_v13  ;;  %v16284_v13 = vld [vmem:[#allocation55_spill] sm:$0xff] }
 0x65c   :  { %16277 = vst [vmem:[#allocation206_spill] sm:$0xff] %v11064_v61  ;;  %v4847_v60 = vmin.f32 %v4815_v15, 6.0  ;;  %v4564_v48 = vadd.f32 %v4532_v46, %v4372_v10  ;;  %v11083_v46 = vmul.f32 %v11045_v0, %v10381_v17  ;;  %v16282_v10 = vld [vmem:[#allocation33_spill] sm:$0xff]  ;;  %v2600_v12 = vmul.f32 %v11075_v32, %v16284_v13 }
 0x65d   :  { %16278 = vst [vmem:[#allocation207_spill] sm:$0xff] %v11075_v32  ;;  %v2595_v14 = vmul.f32 %v11075_v32, %v16282_v10 }
 0x65e   :  { %4879 = vst.msk [vmem:[#allocation2 + $0x21] sm:$0xff] %vm32_vm0, %v4847_v60  ;;  %v4756_v59 = vadd.f32 %v4724_v47, %v4564_v48  ;;  %v11104_v60 = vmul.f32 %v11045_v0, %v16280_v1  ;;  %v4151_v47 = vmul.f32 %v16281_v55, %v16269_v25  ;;  %v16283_v48 = vld [vmem:[#allocation36_spill] sm:$0xff]  ;;  %v2597_v1 = vmul.f32 %v11075_v32, %v16285_v40  ;;  %v16286_v55 = vld [vmem:[#allocation113_spill] sm:$0xff] }
 0x65f   :  { %v4244_v17 = vpop.permute.xlu0 %4243  ;;  %v2598_v61 = vmul.f32 %v11075_v32, %v16283_v48  ;;  %v4535_v42 = vmul.f32 %v16286_v55, %v16270_v45  ;;  %v16288_v48 = vld [vmem:[#allocation17_spill] sm:$0xff]  ;;  %v11132_v40 = vmul.f32 %v11045_v0, %v16289_v29 }
 0x660   :  { %v4788_v15 = vadd.f32 %v11054_v33, %v4756_v59  ;;  %v4343_v43 = vmul.f32 %v4244_v17, %v16271_v4  ;;  %v4727_v59 = vmul.f32 %v10865_v57, %v16272_v23  ;;  %v11128_v13 = vmul.f32 %v11045_v0, %v16288_v48 }
 0x661   :  { %3737 = vperm.xlu1 %7921, %v10294_v18   ;;  %16290 = vst [vmem:[#allocation37_spill] sm:$0xff] %v11132_v40  ;;  %v16291_v18 = vld [vmem:[#allocation48_spill] sm:$0xff]  ;;  %v2603_v57 = vmul.f32 %v11075_v32, %v16293_v16  ;;  %v2627_v16 = vadd.f32 %v2595_v14, %v2402_v39  ;;  %v11175_v14 = vperm.slane %v11042_v50, 3 }
 0x662   :  { %v4820_v17 = vmax.f32 %v4788_v15, 0.0  ;;  %v4375_v7 = vadd.f32 %v4343_v43, %v4151_v47  ;;  %3729 = vperm.xlu2 %7920, %v10302_v11   ;;  %v11124_v10 = vpop.permute.xlu1 %3508  ;;  %v11136_v55 = vmul.f32 %v11045_v0, %v16291_v18  ;;  %v16295_v11 = vld [vmem:[#allocation54_spill] sm:$0xff]  ;;  %v16297_v43 = vld [vmem:[#allocation4_spill] sm:$0xff]  ;;  %v16301_v18 = vld [vmem:[#allocation9_spill] sm:$0xff] }
 0x663   :  { %16287 = vst [vmem:[#allocation26_spill] sm:$0xff] %v11124_v10  ;;  %v11140_v47 = vpop.permute.xlu2 %3536  ;;  %v11144_v15 = vmul.f32 %v11045_v0, %v16295_v11  ;;  %v11148_v48 = vmul.f32 %v11045_v0, %v16297_v43  ;;  %v16299_v40 = vld [vmem:[#allocation8_spill] sm:$0xff]  ;;  %v11161_v11 = vadd.f32 %v2598_v61, %v2405_v3  ;;  %v11165_v43 = vadd.f32 %v2597_v1, %v2404_v5  ;;  %v16307_v3 = vld [vmem:[#allocation59_spill] sm:$0xff] }
 0x664   :  { %16292 = vst [vmem:[#allocation3_spill] sm:$0xff] %v11136_v55  ;;  %v4852_v10 = vmin.f32 %v4820_v17, 6.0  ;;  %v4567_v29 = vadd.f32 %v4535_v42, %v4375_v7  ;;  %v11152_v26 = vmul.f32 %v11045_v0, %v16299_v40  ;;  %v11156_v55 = vmul.f32 %v11045_v0, %v16301_v18  ;;  %v16304_v17 = vld [vmem:[#allocation56_spill] sm:$0xff]  ;;  %v16305_v18 = vld [vmem:[#allocation57_spill] sm:$0xff] }
 0x665   :  { %16294 = vst [vmem:[#allocation33_spill] sm:$0xff] %v11140_v47  ;;  %v11159_v47 = vperm.slane %v11042_v50, 2  ;;  %v11168_v7 = vadd.f32 %v2603_v57, %v2410_v31  ;;  %v2599_v40 = vmul.f32 %v11075_v32, %v16304_v17  ;;  %v2606_v39 = vmul.f32 %v11075_v32, %v16305_v18  ;;  %v16310_v57 = vld [vmem:[#allocation62_spill] sm:$0xff] }
 0x666   :  { %16296 = vst [vmem:[#allocation36_spill] sm:$0xff] %v11144_v15  ;;  %v11163_v15 = vadd.f32 %v2600_v12, %v2407_v24  ;;  %v4759_v42 = vadd.f32 %v4727_v59, %v4567_v29  ;;  %v2602_v12 = vmul.f32 %v11075_v32, %v16307_v3  ;;  %v16308_v24 = vld [vmem:[#allocation58_spill] sm:$0xff]  ;;  %v16309_v59 = vld [vmem:[#allocation60_spill] sm:$0xff]  ;;  %v2605_v29 = vmul.f32 %v11075_v32, %v16310_v57 }
 0x667   :  { %16298 = vst [vmem:[#allocation55_spill] sm:$0xff] %v11148_v48  ;;  %v4256_v61 = vpop.permute.xlu0 %4255  ;;  %v4154_v5 = vmul.f32 %v16308_v24, %v16269_v25  ;;  %v16311_v17 = vld [vmem:[#allocation78_spill] sm:$0xff]  ;;  %v11190_v0 = vperm.slane %v11042_v50, 4  ;;  %v16313_v3 = vld [vmem:[#allocation116_spill] sm:$0xff]  ;;  %v11200_v57 = vadd.f32 %v2599_v40, %v2406_v63 }
 0x668   :  { %16300 = vst [vmem:[#allocation35_spill] sm:$0xff] %v11152_v26  ;;  %v4791_v1 = vadd.f32 %v11054_v33, %v4759_v42  ;;  %v4346_v31 = vmul.f32 %v4256_v61, %v16271_v4  ;;  %v2788_v18 = vmul.f32 %v11159_v47, %v16311_v17  ;;  %v4538_v24 = vmul.f32 %v16313_v3, %v16270_v45  ;;  %v16315_v17 = vld [vmem:[#allocation63_spill] sm:$0xff]  ;;  %v16316_v48 = vld [vmem:[#allocation110_spill] sm:$0xff] }
 0x669   :  { %16302 = vst [vmem:[#allocation113_spill] sm:$0xff] %v11156_v55  ;;  %3749 = vperm.xlu1 %7921, %v10314_v37   ;;  %v4730_v42 = vmul.f32 %v10876_v41, %v16272_v23  ;;  %v2612_v26 = vmul.f32 %v11075_v32, %v16315_v17  ;;  %v2981_v37 = vmul.f32 %v11175_v14, %v16316_v48  ;;  %v11222_v17 = vperm.slane %v11042_v50, 6 }
 0x66a   :  { %16303 = vst [vmem:[#allocation17_spill] sm:$0xff] %v11159_v47  ;;  %v4823_v61 = vmax.f32 %v4791_v1, 0.0  ;;  %v4378_v55 = vadd.f32 %v4346_v31, %v4154_v5  ;;  %3741 = vperm.xlu2 %7920, %v10318_v62   ;;  %v11212_v41 = vadd.f32 %v2606_v39, %v11083_v46  ;;  %v16319_v5 = vld [vmem:[#allocation65_spill] sm:$0xff]  ;;  %v11217_v40 = vadd.f32 %v2602_v12, %v11088_v22 }
 0x66b   :  { %4884 = vst.msk [vmem:[#allocation2 + $0x61] sm:$0xff] %vm32_vm0, %v4852_v10  ;;  %v2609_v10 = vmul.f32 %v11075_v32, %v16309_v59  ;;  %v11198_v59 = vpop.permute.xlu1 %3520  ;;  %v11209_v3 = vpop.permute.xlu2 %3548  ;;  %v2608_v62 = vmul.f32 %v11075_v32, %v16319_v5  ;;  %v2820_v31 = vadd.f32 %v2788_v18, %v2627_v16  ;;  %v3174_v48 = vmul.f32 %v11190_v0, %v10771_v28  ;;  %v16321_v39 = vld [vmem:[#allocation61_spill] sm:$0xff]  ;;  %v16322_v16 = vld [vmem:[#allocation66_spill] sm:$0xff]  ;;  %v16325_v18 = vld [vmem:[#allocation64_spill] sm:$0xff] }
 0x66c   :  { %16306 = vst [vmem:[#allocation15_spill] sm:$0xff] %v11175_v14  ;;  %v4855_v1 = vmin.f32 %v4823_v61, 6.0  ;;  %v4570_v63 = vadd.f32 %v4538_v24, %v4378_v55  ;;  %v11228_v46 = vadd.f32 %v2605_v29, %v11096_v51  ;;  %v4157_v61 = vmul.f32 %v16321_v39, %v16269_v25  ;;  %v11243_v51 = vld [vmem:[%s15570_s0 + $0x110] sm:$0xff] }
 0x66d   :  { %16312 = vst [vmem:[#allocation48_spill] sm:$0xff] %v11190_v0  ;;  %v11234_v55 = vadd.f32 %v2612_v26, %v11100_v20  ;;  %v2615_v28 = vmul.f32 %v11075_v32, %v16322_v16  ;;  %v3013_v12 = vadd.f32 %v2981_v37, %v2820_v31  ;;  %v11246_v29 = vadd.f32 %v2608_v62, %v11104_v60  ;;  %v16347_v32 = vld [vmem:[#allocation92_spill] sm:$0xff] }
 0x66e   :  { %16314 = vst [vmem:[#allocation16_spill] sm:$0xff] %v11198_v59  ;;  %v4762_v22 = vadd.f32 %v4730_v42, %v4570_v63  ;;  %v4160_v26 = vmul.f32 %v16325_v18, %v16269_v25  ;;  %v16327_v42 = vld [vmem:[#allocation81_spill] sm:$0xff]  ;;  %v3560_v60 = vmul.f32 %v11222_v17, %v10974_v9  ;;  %v16328_v62 = vmov 0   ;;  %v16330_v63 = vld [vmem:[#allocation119_spill] sm:$0xff] }
 0x66f   :  { %16317 = vst [vmem:[#allocation54_spill] sm:$0xff] %v11207_v27  ;;  %v2791_v37 = vmul.f32 %v11159_v47, %v16327_v42  ;;  %v3206_v5 = vadd.f32 %v3174_v48, %v3013_v12  ;;  %v4541_v31 = vmul.f32 %v16330_v63, %v16270_v45  ;;  %v4733_v39 = vmul.f32 %v10885_v44, %v16272_v23  ;;  %v16335_v44 = vld [vmem:[#allocation70_spill] sm:$0xff] }
 0x670   :  { %16318 = vst [vmem:[#allocation4_spill] sm:$0xff] %v11209_v3  ;;  %v11225_v3 = vadd.f32 %v2609_v10, %v11092_v54  ;;  %v3367_v54 = vmul.f32 %v11207_v27, %v10873_v21  ;;  %v4268_v10 = vpop.permute.xlu0 %4267  ;;  %v4794_v20 = vadd.f32 %v11054_v33, %v4762_v22  ;;  %v11255_v21 = vld [vmem:[%s15570_s0 + $0x100] sm:$0xff]  ;;  %v11274_v9 = vadd.f32 %v2615_v28, %v11128_v13 }
 0x671   :  { %16320 = vst [vmem:[#allocation8_spill] sm:$0xff] %v11222_v17  ;;  %v4349_v24 = vmul.f32 %v4268_v10, %v16271_v4  ;;  %7923 = vset.pattern.permute.xlu1 %v16328_v62  ;;  %v16334_v10 = vld [vmem:[#allocation112_spill] sm:$0xff] }
 0x672   :  { %4887 = vst.msk [vmem:[#allocation2 + $0x81] sm:$0xff] %vm32_vm0, %v4855_v1  ;;  %v11263_v1 = vperm.slane %v11042_v50, 7  ;;  %v4826_v22 = vmax.f32 %v4794_v20, 0.0  ;;  %7922 = vset.pattern.permute.xlu2 %v16328_v62  ;;  %3994 = vperm.xlu1 %7923, %v11243_v51   ;;  %v16333_v50 = vld [vmem:[#allocation67_spill] sm:$0xff]  ;;  %v2984_v18 = vmul.f32 %v11175_v14, %v16334_v10  ;;  %v3399_v42 = vadd.f32 %v3367_v54, %v3206_v5  ;;  %v16336_v20 = vld [vmem:[#allocation73_spill] sm:$0xff]  ;;  %v16337_v62 = vld [vmem:[#allocation144_spill] sm:$0xff] }
 0x673   :  { %16323 = vst [vmem:[#allocation9_spill] sm:$0xff] %v11243_v51  ;;  %v4381_v16 = vadd.f32 %v4349_v24, %v4157_v61  ;;  %v11271_v48 = vpop.permute.xlu1 %3532  ;;  %v11278_v12 = vmul.f32 %v16333_v50, %v16269_v25  ;;  %3984 = vperm.xlu2 %7922, %v11255_v21   ;;  %v11285_v61 = vmul.f32 %v16335_v44, %v16269_v25  ;;  %v11297_v54 = vld [vmem:[%s15577_s8] ss:$0 sm:$0xff]  ;;  %v16338_v44 = vld [vmem:[#allocation76_spill] sm:$0xff] }
 0x674   :  { %16324 = vst [vmem:[#allocation56_spill] sm:$0xff] %v11246_v29  ;;  %v11289_v24 = vmul.f32 %v16336_v20, %v16269_v25  ;;  %v4858_v13 = vmin.f32 %v4826_v22, 6.0  ;;  %v3626_v63 = vpop.permute.xlu2 %3625  ;;  %v2823_v50 = vadd.f32 %v2791_v37, %v11161_v11  ;;  %v3177_v51 = vmul.f32 %v11190_v0, %v16337_v62  ;;  %v16339_v22 = vld [vmem:[#allocation84_spill] sm:$0xff] }
 0x675   :  { %16326 = vst [vmem:[#allocation57_spill] sm:$0xff] %v11255_v21  ;;  %v4573_v28 = vadd.f32 %v4541_v31, %v4381_v16  ;;  %v3592_v10 = vadd.f32 %v3560_v60, %v3399_v42  ;;  %v3753_v5 = vmul.f32 %v11263_v1, %v3626_v63  ;;  %v11302_v20 = vmul.f32 %v16338_v44, %v16269_v25  ;;  %v16340_v16 = vld [vmem:[#allocation86_spill] sm:$0xff]  ;;  %v16341_v60 = vld [vmem:[#allocation87_spill] sm:$0xff]  ;;  %v11316_v44 = vld [vmem:[%s15570_s0 + $0x120] sm:$0xff] }
 0x676   :  { %16329 = vst [vmem:[#allocation59_spill] sm:$0xff] %v11263_v1  ;;  %v2793_v31 = vmul.f32 %v11159_v47, %v16339_v22  ;;  %v2790_v11 = vmul.f32 %v11159_v47, %v16340_v16  ;;  %v2796_v62 = vmul.f32 %v11159_v47, %v16341_v60  ;;  %v3016_v42 = vadd.f32 %v2984_v18, %v2823_v50  ;;  %v16343_v22 = vld [vmem:[#allocation89_spill] sm:$0xff]  ;;  %v16344_v25 = vld [vmem:[#allocation90_spill] sm:$0xff] }
 0x677   :  { %16331 = vst [vmem:[#allocation58_spill] sm:$0xff] %v11271_v48  ;;  %v4765_v37 = vadd.f32 %v4733_v39, %v4573_v28  ;;  %v3370_v63 = vmul.f32 %v11207_v27, %v10882_v56  ;;  %v3785_v21 = vadd.f32 %v3753_v5, %v3592_v10  ;;  %v2792_v16 = vmul.f32 %v11159_v47, %v16343_v22  ;;  %v3852_v18 = vld [vmem:[%s15570_s0] sm:$0xff]  ;;  %v11330_v28 = vld [vmem:[%s15570_s0 + $0x118] sm:$0xff]  ;;  %v16345_v50 = vld [vmem:[#allocation122_spill] sm:$0xff] }
 0x678   :  { %16332 = vst [vmem:[#allocation60_spill] sm:$0xff] %v11274_v9  ;;  %v4280_v48 = vpop.permute.xlu0 %4279  ;;  %v2799_v39 = vmul.f32 %v11159_v47, %v16344_v25  ;;  %v4544_v10 = vmul.f32 %v16345_v50, %v16270_v45  ;;  %v3209_v5 = vadd.f32 %v3177_v51, %v3016_v42  ;;  %v3563_v25 = vmul.f32 %v11222_v17, %v10983_v30  ;;  %v16348_v50 = vld [vmem:[#allocation115_spill] sm:$0xff] }
 0x679   :  { %4890 = vst.msk [vmem:[#allocation2 + $0xa9] sm:$0xff] %vm32_vm0, %v4858_v13  ;;  %v4797_v13 = vadd.f32 %v11054_v33, %v4765_v37  ;;  %v4352_v56 = vmul.f32 %v4280_v48, %v16271_v4  ;;  %v3820_v37 = vadd.f32 %v11297_v54, %v3785_v21  ;;  %v4736_v60 = vmul.f32 %v10894_v34, %v16272_v23 }
 0x67a   :  { %16342 = vst [vmem:[#allocation62_spill] sm:$0xff] %v11316_v44  ;;  %4004 = vperm.xlu1 %7923, %v11316_v44   ;;  %v2795_v9 = vmul.f32 %v11159_v47, %v16347_v32  ;;  %v2986_v51 = vmul.f32 %v11175_v14, %v16348_v50  ;;  %v3402_v42 = vadd.f32 %v3370_v63, %v3209_v5 }
 0x67b   :  { %v4829_v22 = vmax.f32 %v4797_v13, 0.0  ;;  %v4384_v48 = vadd.f32 %v4352_v56, %v4160_v26  ;;  %v11340_v59 = vpop.permute.xlu1 %3544  ;;  %v3884_v30 = vadd.f32 %v3852_v18, %v3820_v37  ;;  %3999 = vperm.xlu2 %7922, %v11330_v28   ;;  %v2825_v21 = vadd.f32 %v2793_v31, %v11163_v15  ;;  %v16350_v31 = vld [vmem:[#allocation93_spill] sm:$0xff]  ;;  %v11386_v37 = vld [vmem:[%s15570_s0 + $0x128] sm:$0xff] }
 0x67c   :  { %16346 = vst [vmem:[#allocation78_spill] sm:$0xff] %v11340_v59  ;;  %v2822_v34 = vadd.f32 %v2790_v11, %v11165_v43  ;;  %v3638_v56 = vpop.permute.xlu2 %3637  ;;  %v2828_v44 = vadd.f32 %v2796_v62, %v11168_v7  ;;  %v16349_v59 = vld [vmem:[#allocation147_spill] sm:$0xff]  ;;  %v3595_v32 = vadd.f32 %v3563_v25, %v3402_v42  ;;  %v2824_v15 = vadd.f32 %v2792_v16, %v11200_v57  ;;  %v11372_v57 = vld [vmem:[%s15570_s0 + $0x138] sm:$0xff]  ;;  %v16354_v42 = vld [vmem:[#allocation125_spill] sm:$0xff] }
 0x67d   :  { %v4861_v13 = vmin.f32 %v4829_v22, 6.0  ;;  %v4576_v26 = vadd.f32 %v4544_v10, %v4384_v48  ;;  %v3179_v29 = vmul.f32 %v11190_v0, %v16349_v59  ;;  %3917 = vst.msk [vmem:[%s15579_s9] sm:$0xff] %vm3916_vm8, %v3884_v30  ;;  %v3756_v63 = vmul.f32 %v11263_v1, %v3638_v56 }
 0x67e   :  { %v11359_v43 = vadd.f32 %v2799_v39, %v11212_v41  ;;  %v2802_v11 = vmul.f32 %v11159_v47, %v16350_v31  ;;  %v11365_v59 = vadd.f32 %v2795_v9, %v11217_v40  ;;  %v3018_v62 = vadd.f32 %v2986_v51, %v2825_v21  ;;  %v16351_v41 = vld [vmem:[#allocation95_spill] sm:$0xff]  ;;  %v16352_v39 = vld [vmem:[#allocation117_spill] sm:$0xff]  ;;  %v3855_v9 = vld [vmem:[%s15570_s0 + $0x18] sm:$0xff] }
 0x67f   :  { %4893 = vst.msk [vmem:[#allocation2 + $0xc9] sm:$0xff] %vm32_vm0, %v4861_v13  ;;  %v4768_v7 = vadd.f32 %v4736_v60, %v4576_v26  ;;  %v3372_v18 = vmul.f32 %v11207_v27, %v10891_v2  ;;  %v3788_v10 = vadd.f32 %v3756_v63, %v3595_v32  ;;  %v2798_v16 = vmul.f32 %v11159_v47, %v16351_v41  ;;  %v16353_v60 = vld [vmem:[#allocation118_spill] sm:$0xff]  ;;  %v16355_v32 = vld [vmem:[#allocation120_spill] sm:$0xff] }
 0x680   :  { %v4292_v5 = vpop.permute.xlu0 %4291  ;;  %v2983_v25 = vmul.f32 %v11175_v14, %v16352_v39  ;;  %v2989_v22 = vmul.f32 %v11175_v14, %v16353_v60  ;;  %v3211_v48 = vadd.f32 %v3179_v29, %v3018_v62  ;;  %v3565_v50 = vmul.f32 %v11222_v17, %v10992_v35  ;;  %v16357_v62 = vld [vmem:[#allocation149_spill] sm:$0xff] }
 0x681   :  { %v4800_v40 = vadd.f32 %v11054_v33, %v4768_v7  ;;  %v4355_v2 = vmul.f32 %v4292_v5, %v16271_v4  ;;  %v3823_v51 = vadd.f32 %v11297_v54, %v3788_v10  ;;  %v4547_v30 = vmul.f32 %v16354_v42, %v16270_v45  ;;  %v16356_v7 = vld [vmem:[#allocation96_spill] sm:$0xff] }
 0x682   :  { %v4739_v21 = vmul.f32 %v10903_v49, %v16272_v23  ;;  %4019 = vperm.xlu1 %7923, %v11372_v57   ;;  %v11402_v29 = vadd.f32 %v2802_v11, %v11225_v3  ;;  %v2985_v35 = vmul.f32 %v11175_v14, %v16355_v32  ;;  %v3404_v63 = vadd.f32 %v3372_v18, %v3211_v48  ;;  %v16358_v11 = vld [vmem:[#allocation150_spill] sm:$0xff]  ;;  %v16359_v48 = vld [vmem:[#allocation121_spill] sm:$0xff] }
 0x683   :  { %v4832_v13 = vmax.f32 %v4800_v40, 0.0  ;;  %v4387_v26 = vadd.f32 %v4355_v2, %v11278_v12  ;;  %v11399_v56 = vpop.permute.xlu1 %3556  ;;  %v3887_v31 = vadd.f32 %v3855_v9, %v3823_v51  ;;  %4009 = vperm.xlu2 %7922, %v11386_v37   ;;  %v11409_v49 = vmul.f32 %v11159_v47, %v16356_v7 }
 0x684   :  { %v3176_v12 = vmul.f32 %v11190_v0, %v16357_v62  ;;  %v3646_v41 = vpop.permute.xlu2 %3645  ;;  %v11414_v3 = vadd.f32 %v2798_v16, %v11228_v46  ;;  %v3182_v39 = vmul.f32 %v11190_v0, %v16358_v11  ;;  %v3597_v18 = vadd.f32 %v3565_v50, %v3404_v63 }
 0x685   :  { %v4864_v10 = vmin.f32 %v4832_v13, 6.0  ;;  %v4579_v5 = vadd.f32 %v4547_v30, %v4387_v26  ;;  %3920 = vst.msk [vmem:[%s15579_s9 + $0x18] sm:$0xff] %vm3916_vm8, %v3887_v31  ;;  %v3758_v40 = vmul.f32 %v11263_v1, %v3646_v41  ;;  %v3015_v9 = vadd.f32 %v2983_v25, %v2822_v34  ;;  %v11433_v34 = vld [vmem:[%s15570_s0 + $0x150] sm:$0xff] }
 0x686   :  { %v3021_v2 = vadd.f32 %v2989_v22, %v2828_v44  ;;  %v3369_v60 = vmul.f32 %v11207_v27, %v10898_v58  ;;  %v3017_v16 = vadd.f32 %v2985_v35, %v2824_v15  ;;  %v2992_v51 = vmul.f32 %v11175_v14, %v16359_v48  ;;  %v3857_v15 = vld [vmem:[%s15570_s0 + $0x28] sm:$0xff]  ;;  %v16364_v48 = vld [vmem:[#allocation123_spill] sm:$0xff] }
 0x687   :  { %4896 = vst.msk [vmem:[#allocation2 + $0xf1] sm:$0xff] %vm32_vm0, %v4864_v10  ;;  %v4771_v46 = vadd.f32 %v4739_v21, %v4579_v5  ;;  %v3375_v50 = vmul.f32 %v11207_v27, %v10900_v19  ;;  %v3790_v42 = vadd.f32 %v3758_v40, %v3597_v18  ;;  %v3208_v44 = vadd.f32 %v3176_v12, %v3015_v9  ;;  %v11445_v19 = vld [vmem:[%s15570_s0 + $0x140] sm:$0xff]  ;;  %v16360_v21 = vld [vmem:[#allocation128_spill] sm:$0xff] }
 0x688   :  { %v4304_v30 = vpop.permute.xlu0 %4303  ;;  %v3562_v58 = vmul.f32 %v11222_v17, %v10998_v6  ;;  %v4550_v13 = vmul.f32 %v16360_v21, %v16270_v45  ;;  %v3214_v26 = vadd.f32 %v3182_v39, %v3021_v2  ;;  %v3568_v6 = vmul.f32 %v11222_v17, %v11000_v38  ;;  %v16361_v12 = vld [vmem:[#allocation152_spill] sm:$0xff]  ;;  %v16362_v9 = vld [vmem:[#allocation153_spill] sm:$0xff] }
 0x689   :  { %v4803_v25 = vadd.f32 %v11054_v33, %v4771_v46  ;;  %v4358_v22 = vmul.f32 %v4304_v30, %v16271_v4  ;;  %v3825_v32 = vadd.f32 %v11297_v54, %v3790_v42  ;;  %v3401_v35 = vadd.f32 %v3369_v60, %v3208_v44  ;;  %v16363_v2 = vld [vmem:[#allocation173_spill] sm:$0xff] }
 0x68a   :  { %v4742_v63 = vmul.f32 %v10912_v36, %v16272_v23  ;;  %4034 = vperm.xlu1 %7923, %v11433_v34   ;;  %v3024_v62 = vadd.f32 %v2992_v51, %v11359_v43  ;;  %v3178_v10 = vmul.f32 %v11190_v0, %v16361_v12  ;;  %v3407_v5 = vadd.f32 %v3375_v50, %v3214_v26  ;;  %v16365_v50 = vld [vmem:[#allocation124_spill] sm:$0xff] }
 0x68b   :  { %v4835_v31 = vmax.f32 %v4803_v25, 0.0  ;;  %v4390_v7 = vadd.f32 %v4358_v22, %v11285_v61  ;;  %v3889_v41 = vadd.f32 %v3857_v15, %v3825_v32  ;;  %4024 = vperm.xlu2 %7922, %v11445_v19   ;;  %v3634_v38 = vpop.permute.xlu1 %3633  ;;  %v3594_v11 = vadd.f32 %v3562_v58, %v3401_v35  ;;  %v16366_v58 = vld [vmem:[#allocation131_spill] sm:$0xff]  ;;  %v16367_v22 = vld [vmem:[#allocation174_spill] sm:$0xff]  ;;  %v11498_v12 = vld [vmem:[%s15570_s0 + $0x158] sm:$0xff] }
 0x68c   :  { %v3755_v36 = vmul.f32 %v11263_v1, %v3634_v38  ;;  %v3658_v40 = vpop.permute.xlu2 %3657  ;;  %v3185_v61 = vmul.f32 %v11190_v0, %v16362_v9  ;;  %v3371_v43 = vmul.f32 %v11207_v27, %v16363_v2  ;;  %v3600_v60 = vadd.f32 %v3568_v6, %v3407_v5  ;;  %v11485_v32 = vld [vmem:[%s15570_s0 + $0x168] sm:$0xff] }
 0x68d   :  { %v4867_v39 = vmin.f32 %v4835_v31, 6.0  ;;  %v4582_v18 = vadd.f32 %v4550_v13, %v4390_v7  ;;  %3922 = vst.msk [vmem:[%s15579_s9 + $0x28] sm:$0xff] %vm3916_vm8, %v3889_v41  ;;  %v3761_v46 = vmul.f32 %v11263_v1, %v3658_v40  ;;  %v2988_v51 = vmul.f32 %v11175_v14, %v16364_v48  ;;  %v3854_v13 = vld [vmem:[%s15570_s0 + $0x10] sm:$0xff]  ;;  %v3860_v31 = vld [vmem:[%s15570_s0 + $0x40] sm:$0xff] }
 0x68e   :  { %v2995_v42 = vmul.f32 %v11175_v14, %v16365_v50  ;;  %v3787_v44 = vadd.f32 %v3755_v36, %v3594_v11  ;;  %v4553_v25 = vmul.f32 %v16366_v58, %v16270_v45  ;;  %v3210_v15 = vadd.f32 %v3178_v10, %v3017_v16  ;;  %v16368_v40 = vld [vmem:[#allocation155_spill] sm:$0xff]  ;;  %v16371_v58 = vld [vmem:[#allocation126_spill] sm:$0xff] }
 0x68f   :  { %4899 = vst.msk [vmem:[#allocation2 + $0x111] sm:$0xff] %vm32_vm0, %v4867_v39  ;;  %v4774_v30 = vadd.f32 %v4742_v63, %v4582_v18  ;;  %v3378_v21 = vmul.f32 %v11207_v27, %v16367_v22  ;;  %v3793_v26 = vadd.f32 %v3761_v46, %v3600_v60  ;;  %v3564_v35 = vmul.f32 %v11222_v17, %v11006_v52  ;;  %v16370_v48 = vld [vmem:[#allocation175_spill] sm:$0xff] }
 0x690   :  { %v4316_v6 = vpop.permute.xlu0 %4315  ;;  %v3822_v16 = vadd.f32 %v11297_v54, %v3787_v44  ;;  %v3217_v10 = vadd.f32 %v3185_v61, %v3024_v62  ;;  %v3403_v5 = vadd.f32 %v3371_v43, %v3210_v15  ;;  %v3571_v52 = vmul.f32 %v11222_v17, %v11008_v53 }
 0x691   :  { %v4806_v63 = vadd.f32 %v11054_v33, %v4774_v30  ;;  %v4361_v7 = vmul.f32 %v4316_v6, %v16271_v4  ;;  %v3828_v41 = vadd.f32 %v11297_v54, %v3793_v26  ;;  %v4745_v38 = vmul.f32 %v10921_v8, %v16272_v23  ;;  %v16373_v6 = vld [vmem:[#allocation176_spill] sm:$0xff] }
 0x692   :  { %v3886_v39 = vadd.f32 %v3854_v13, %v3822_v16  ;;  %4049 = vperm.xlu1 %7923, %v11485_v32   ;;  %v3020_v36 = vadd.f32 %v2988_v51, %v11365_v59  ;;  %v3181_v62 = vmul.f32 %v11190_v0, %v16368_v40  ;;  %v3410_v9 = vadd.f32 %v3378_v21, %v3217_v10  ;;  %v16369_v59 = vld [vmem:[#allocation156_spill] sm:$0xff]  ;;  %v16372_v21 = vld [vmem:[#allocation134_spill] sm:$0xff] }
 0x693   :  { %v4838_v11 = vmax.f32 %v4806_v63, 0.0  ;;  %v4393_v18 = vadd.f32 %v4361_v7, %v11289_v24  ;;  %v3892_v61 = vadd.f32 %v3860_v31, %v3828_v41  ;;  %4039 = vperm.xlu2 %7922, %v11498_v12   ;;  %v3642_v53 = vpop.permute.xlu1 %3641  ;;  %v3596_v2 = vadd.f32 %v3564_v35, %v3403_v5  ;;  %v3856_v63 = vld [vmem:[%s15570_s0 + $0x20] sm:$0xff]  ;;  %v16374_v31 = vld [vmem:[#allocation200_spill] sm:$0xff] }
 0x694   :  { %3919 = vst.msk [vmem:[%s15579_s9 + $0x10] sm:$0xff] %vm3916_vm8, %v3886_v39  ;;  %v3757_v24 = vmul.f32 %v11263_v1, %v3642_v53  ;;  %v3670_v60 = vpop.permute.xlu2 %3669  ;;  %v3188_v46 = vmul.f32 %v11190_v0, %v16369_v59  ;;  %v3374_v51 = vmul.f32 %v11207_v27, %v16370_v48  ;;  %v3603_v50 = vadd.f32 %v3571_v52, %v3410_v9  ;;  %v3863_v52 = vld [vmem:[%s15570_s0 + $0x58] sm:$0xff] }
 0x695   :  { %v4870_v43 = vmin.f32 %v4838_v11, 6.0  ;;  %v4585_v8 = vadd.f32 %v4553_v25, %v4393_v18  ;;  %3925 = vst.msk [vmem:[%s15579_s9 + $0x40] sm:$0xff] %vm3916_vm8, %v3892_v61  ;;  %v3764_v30 = vmul.f32 %v11263_v1, %v3670_v60  ;;  %v3027_v44 = vadd.f32 %v2995_v42, %v11402_v29  ;;  %v11539_v42 = vld [vmem:[%s15570_s0 + $0x180] sm:$0xff] }
 0x696   :  { %v2991_v25 = vmul.f32 %v11175_v14, %v16371_v58  ;;  %v3789_v22 = vadd.f32 %v3757_v24, %v3596_v2  ;;  %v4556_v13 = vmul.f32 %v16372_v21, %v16270_v45  ;;  %v3213_v26 = vadd.f32 %v3181_v62, %v3020_v36  ;;  %v16375_v18 = vld [vmem:[#allocation201_spill] sm:$0xff]  ;;  %v16376_v62 = vld [vmem:[#allocation179_spill] sm:$0xff]  ;;  %v16378_v24 = vld [vmem:[#allocation158_spill] sm:$0xff] }
 0x697   :  { %4902 = vst.msk [vmem:[#allocation2 + $0x139] sm:$0xff] %vm32_vm0, %v4870_v43  ;;  %v4777_v15 = vadd.f32 %v4745_v38, %v4585_v8  ;;  %v3381_v35 = vmul.f32 %v11207_v27, %v16373_v6  ;;  %v3796_v16 = vadd.f32 %v3764_v30, %v3603_v50  ;;  %v3567_v7 = vmul.f32 %v11222_v17, %v16374_v31  ;;  %v11552_v38 = vld [vmem:[%s15570_s0 + $0x170] sm:$0xff]  ;;  %v16382_v31 = vld [vmem:[#allocation178_spill] sm:$0xff] }
 0x698   :  { %v4328_v29 = vpop.permute.xlu0 %4327  ;;  %v3824_v5 = vadd.f32 %v11297_v54, %v3789_v22  ;;  %v3220_v11 = vadd.f32 %v3188_v46, %v3027_v44  ;;  %v3406_v39 = vadd.f32 %v3374_v51, %v3213_v26  ;;  %v3574_v36 = vmul.f32 %v11222_v17, %v16375_v18  ;;  %v16377_v43 = vld [vmem:[#allocation127_spill] sm:$0xff] }
 0x699   :  { %v4809_v10 = vadd.f32 %v11054_v33, %v4777_v15  ;;  %v4364_v41 = vmul.f32 %v4328_v29, %v16271_v4  ;;  %v3831_v40 = vadd.f32 %v11297_v54, %v3796_v16  ;;  %v4748_v9 = vmul.f32 %v16376_v62, %v16272_v23  ;;  %v16379_v15 = vld [vmem:[#allocation159_spill] sm:$0xff] }
 0x69a   :  { %v3888_v53 = vadd.f32 %v3856_v63, %v3824_v5  ;;  %4064 = vperm.xlu1 %7923, %v11539_v42   ;;  %v2998_v8 = vmul.f32 %v11175_v14, %v16377_v43  ;;  %v3184_v60 = vmul.f32 %v11190_v0, %v16378_v24  ;;  %v3413_v59 = vadd.f32 %v3381_v35, %v3220_v11  ;;  %v3866_v18 = vld [vmem:[%s15570_s0 + $0x70] sm:$0xff] }
 0x69b   :  { %v4841_v61 = vmax.f32 %v4809_v10, 0.0  ;;  %v4396_v2 = vadd.f32 %v4364_v41, %v11302_v20  ;;  %v3895_v46 = vadd.f32 %v3863_v52, %v3831_v40  ;;  %4054 = vperm.xlu2 %7922, %v11552_v38   ;;  %v3654_v48 = vpop.permute.xlu1 %3653  ;;  %v3599_v51 = vadd.f32 %v3567_v7, %v3406_v39  ;;  %v3859_v10 = vld [vmem:[%s15570_s0 + $0x38] sm:$0xff]  ;;  %v16383_v52 = vld [vmem:[#allocation203_spill] sm:$0xff] }
 0x69c   :  { %3921 = vst.msk [vmem:[%s15579_s9 + $0x20] sm:$0xff] %vm3916_vm8, %v3888_v53  ;;  %v3760_v30 = vmul.f32 %v11263_v1, %v3654_v48  ;;  %v3682_v44 = vpop.permute.xlu2 %3681  ;;  %v2837_v58 = vadd.f32 %v11409_v49, %v11234_v55  ;;  %v3191_v22 = vmul.f32 %v11190_v0, %v16379_v15  ;;  %v3606_v21 = vadd.f32 %v3574_v36, %v3413_v59  ;;  %v16381_v49 = vld [vmem:[#allocation98_spill] sm:$0xff]  ;;  %v16384_v40 = vld [vmem:[#allocation99_spill] sm:$0xff]  ;;  %v16387_v59 = vld [vmem:[#allocation56_spill] sm:$0xff] }
 0x69d   :  { %v4873_v50 = vmin.f32 %v4841_v61, 6.0  ;;  %v4588_v20 = vadd.f32 %v4556_v13, %v4396_v2  ;;  %3928 = vst.msk [vmem:[%s15579_s9 + $0x58] sm:$0xff] %vm3916_vm8, %v3895_v46  ;;  %v3767_v26 = vmul.f32 %v11263_v1, %v3682_v44  ;;  %v3023_v6 = vadd.f32 %v2991_v25, %v11414_v3  ;;  %v16380_v13 = vld [vmem:[#allocation177_spill] sm:$0xff]  ;;  %v11594_v3 = vld [vmem:[%s15570_s0 + $0x198] sm:$0xff]  ;;  %v11606_v36 = vld [vmem:[%s15570_s0 + $0x188] sm:$0xff] }
 0x69e   :  { %v3377_v35 = vmul.f32 %v11207_v27, %v16380_v13  ;;  %v3792_v55 = vadd.f32 %v3760_v30, %v3599_v51  ;;  %v2801_v16 = vmul.f32 %v11159_v47, %v16381_v49  ;;  %v3030_v29 = vadd.f32 %v2998_v8, %v2837_v58  ;;  %v16385_v61 = vld [vmem:[#allocation204_spill] sm:$0xff]  ;;  %v16386_v2 = vld [vmem:[#allocation129_spill] sm:$0xff]  ;;  %v16388_v48 = vld [vmem:[#allocation130_spill] sm:$0xff] }
 0x69f   :  { %4905 = vst.msk [vmem:[#allocation2 + $0x159] sm:$0xff] %vm32_vm0, %v4873_v50  ;;  %v4780_v63 = vadd.f32 %v4748_v9, %v4588_v20  ;;  %v3384_v7 = vmul.f32 %v11207_v27, %v16382_v31  ;;  %v3799_v5 = vadd.f32 %v3767_v26, %v3606_v21  ;;  %v3216_v25 = vadd.f32 %v3184_v60, %v3023_v6  ;;  %v16389_v44 = vld [vmem:[#allocation161_spill] sm:$0xff]  ;;  %v16390_v6 = vld [vmem:[#allocation60_spill] sm:$0xff] }
 0x6a0   :  { %v3570_v41 = vmul.f32 %v11222_v17, %v16383_v52  ;;  %v3827_v39 = vadd.f32 %v11297_v54, %v3792_v55  ;;  %v2808_v62 = vmul.f32 %v11159_v47, %v16384_v40  ;;  %v3223_v9 = vadd.f32 %v3191_v22, %v3030_v29  ;;  %v16393_v29 = vld [vmem:[#allocation207_spill] sm:$0xff]  ;;  %v16395_v52 = vld [vmem:[#allocation69_spill] sm:$0xff] }
 0x6a1   :  { %v4812_v11 = vadd.f32 %v11054_v33, %v4780_v63  ;;  %v3577_v53 = vmul.f32 %v11222_v17, %v16385_v61  ;;  %v3834_v33 = vadd.f32 %v11297_v54, %v3799_v5  ;;  %v2994_v43 = vmul.f32 %v11175_v14, %v16386_v2  ;;  %v3862_v40 = vld [vmem:[%s15570_s0 + $0x50] sm:$0xff]  ;;  %v16397_v61 = vld [vmem:[#allocation101_spill] sm:$0xff]  ;;  %v16398_v2 = vld [vmem:[#allocation52_spill] sm:$0xff] }
 0x6a2   :  { %v3409_v8 = vadd.f32 %v3377_v35, %v3216_v25  ;;  %v3891_v60 = vadd.f32 %v3859_v10, %v3827_v39  ;;  %4079 = vperm.xlu1 %7923, %v11594_v3   ;;  %v2833_v46 = vadd.f32 %v2801_v16, %v16387_v59  ;;  %v3001_v51 = vmul.f32 %v11175_v14, %v16388_v48  ;;  %v16391_v35 = vld [vmem:[#allocation162_spill] sm:$0xff]  ;;  %v16392_v16 = vld [vmem:[#allocation68_spill] sm:$0xff]  ;;  %v16396_v39 = vld [vmem:[#allocation181_spill] sm:$0xff] }
 0x6a3   :  { %v4844_v24 = vmax.f32 %v4812_v11, 0.0  ;;  %v3416_v50 = vadd.f32 %v3384_v7, %v3223_v9  ;;  %v3898_v20 = vadd.f32 %v3866_v18, %v3834_v33  ;;  %4069 = vperm.xlu2 %7922, %v11606_v36   ;;  %v3666_v30 = vpop.permute.xlu1 %3665  ;;  %v3187_v58 = vmul.f32 %v11190_v0, %v16389_v44  ;;  %v16394_v10 = vld [vmem:[#allocation180_spill] sm:$0xff]  ;;  %v11650_v9 = vld [vmem:[%s15570_s0 + $0x1b0] sm:$0xff]  ;;  %v16399_v59 = vld [vmem:[#allocation102_spill] sm:$0xff] }
 0x6a4   :  { %v3602_v15 = vadd.f32 %v3570_v41, %v3409_v8  ;;  %3924 = vst.msk [vmem:[%s15579_s9 + $0x38] sm:$0xff] %vm3916_vm8, %v3891_v60  ;;  %v3763_v21 = vmul.f32 %v11263_v1, %v3666_v30  ;;  %v3694_v26 = vpop.permute.xlu2 %3693  ;;  %v2840_v13 = vadd.f32 %v2808_v62, %v16390_v6  ;;  %v3194_v63 = vmul.f32 %v11190_v0, %v16391_v35  ;;  %v11663_v60 = vld [vmem:[%s15570_s0 + $0x1a0] sm:$0xff] }
 0x6a5   :  { %v4876_v22 = vmin.f32 %v4844_v24, 6.0  ;;  %v3609_v55 = vadd.f32 %v3577_v53, %v3416_v50  ;;  %3931 = vst.msk [vmem:[%s15579_s9 + $0x70] sm:$0xff] %vm3916_vm8, %v3898_v20  ;;  %v3770_v49 = vmul.f32 %v11263_v1, %v3694_v26  ;;  %v2611_v31 = vmul.f32 %v16393_v29, %v16392_v16  ;;  %v3869_v24 = vld [vmem:[%s15570_s0 + $0x88] sm:$0xff]  ;;  %v16401_v30 = vld [vmem:[#allocation37_spill] sm:$0xff]  ;;  %v16403_v26 = vld [vmem:[#allocation3_spill] sm:$0xff] }
 0x6a6   :  { %v3026_v7 = vadd.f32 %v2994_v43, %v2833_v46  ;;  %v3380_v5 = vmul.f32 %v11207_v27, %v16394_v10  ;;  %v3795_v25 = vadd.f32 %v3763_v21, %v3602_v15  ;;  %v2618_v41 = vmul.f32 %v16393_v29, %v16395_v52 }
 0x6a7   :  { %4908 = vst.msk [vmem:[#allocation2 + $0x181] sm:$0xff] %vm32_vm0, %v4876_v22  ;;  %v3033_v11 = vadd.f32 %v3001_v51, %v2840_v13  ;;  %v3387_v18 = vmul.f32 %v11207_v27, %v16396_v39  ;;  %v3802_v62 = vadd.f32 %v3770_v49, %v3609_v55  ;;  %v2804_v53 = vmul.f32 %v11159_v47, %v16397_v61  ;;  %v16400_v51 = vld [vmem:[#allocation46_spill] sm:$0xff]  ;;  %v16404_v13 = vld [vmem:[#allocation133_spill] sm:$0xff] }
 0x6a8   :  { %v3219_v33 = vadd.f32 %v3187_v58, %v3026_v7  ;;  %v3573_v43 = vmul.f32 %v11222_v17, %v16398_v2  ;;  %v3830_v8 = vadd.f32 %v11297_v54, %v3795_v25  ;;  %v2811_v46 = vmul.f32 %v11159_v47, %v16399_v59  ;;  %v16402_v58 = vld [vmem:[#allocation132_spill] sm:$0xff] }
 0x6a9   :  { %v3226_v48 = vadd.f32 %v3194_v63, %v3033_v11  ;;  %v3580_v50 = vmul.f32 %v11222_v17, %v16400_v51  ;;  %v3837_v20 = vadd.f32 %v11297_v54, %v3802_v62  ;;  %v2643_v44 = vadd.f32 %v2611_v31, %v16401_v30  ;;  %v16405_v7 = vld [vmem:[#allocation164_spill] sm:$0xff] }
 0x6aa   :  { %v2997_v15 = vmul.f32 %v11175_v14, %v16402_v58  ;;  %v3412_v22 = vadd.f32 %v3380_v5, %v3219_v33  ;;  %v3894_v21 = vadd.f32 %v3862_v40, %v3830_v8  ;;  %4094 = vperm.xlu1 %7923, %v11650_v9   ;;  %v2650_v6 = vadd.f32 %v2618_v41, %v16403_v26  ;;  %v16406_v41 = vld [vmem:[#allocation165_spill] sm:$0xff]  ;;  %v16407_v40 = vld [vmem:[#allocation71_spill] sm:$0xff]  ;;  %v16410_v59 = vld [vmem:[#allocation184_spill] sm:$0xff] }
 0x6ab   :  { %v3004_v35 = vmul.f32 %v11175_v14, %v16404_v13  ;;  %v3419_v63 = vadd.f32 %v3387_v18, %v3226_v48  ;;  %v3901_v55 = vadd.f32 %v3869_v24, %v3837_v20  ;;  %4084 = vperm.xlu2 %7922, %v11663_v60   ;;  %v3678_v49 = vpop.permute.xlu1 %3677  ;;  %v2836_v16 = vadd.f32 %v2804_v53, %v2643_v44  ;;  %v16408_v53 = vld [vmem:[#allocation183_spill] sm:$0xff]  ;;  %v3865_v48 = vld [vmem:[%s15570_s0 + $0x68] sm:$0xff]  ;;  %v16411_v20 = vld [vmem:[#allocation104_spill] sm:$0xff] }
 0x6ac   :  { %v3190_v31 = vmul.f32 %v11190_v0, %v16405_v7  ;;  %v3605_v10 = vadd.f32 %v3573_v43, %v3412_v22  ;;  %3927 = vst.msk [vmem:[%s15579_s9 + $0x50] sm:$0xff] %vm3916_vm8, %v3894_v21  ;;  %v3766_v5 = vmul.f32 %v11263_v1, %v3678_v49  ;;  %v3706_v25 = vpop.permute.xlu2 %3705  ;;  %v2843_v52 = vadd.f32 %v2811_v46, %v2650_v6  ;;  %v16409_v43 = vld [vmem:[#allocation72_spill] sm:$0xff]  ;;  %v16412_v58 = vld [vmem:[#allocation205_spill] sm:$0xff] }
 0x6ad   :  { %v3197_v11 = vmul.f32 %v11190_v0, %v16406_v41  ;;  %v3612_v39 = vadd.f32 %v3580_v50, %v3419_v63  ;;  %3934 = vst.msk [vmem:[%s15579_s9 + $0x88] sm:$0xff] %vm3916_vm8, %v3901_v55  ;;  %v3773_v18 = vmul.f32 %v11263_v1, %v3706_v25  ;;  %v2614_v62 = vmul.f32 %v16393_v29, %v16407_v40  ;;  %v11706_v50 = vld [vmem:[%s15570_s0 + $0x1c8] sm:$0xff]  ;;  %v3872_v21 = vld [vmem:[%s15570_s0 + $0xa0] sm:$0xff]  ;;  %v11719_v26 = vld [vmem:[%s15570_s0 + $0x1b8] sm:$0xff] }
 0x6ae   :  { %v3029_v61 = vadd.f32 %v2997_v15, %v2836_v16  ;;  %v3383_v33 = vmul.f32 %v11207_v27, %v16408_v53  ;;  %v3798_v2 = vadd.f32 %v3766_v5, %v3605_v10  ;;  %v2621_v8 = vmul.f32 %v16393_v29, %v16409_v43  ;;  %v16413_v6 = vld [vmem:[#allocation105_spill] sm:$0xff]  ;;  %v16414_v63 = vld [vmem:[#allocation206_spill] sm:$0xff]  ;;  %v16415_v16 = vld [vmem:[#allocation36_spill] sm:$0xff] }
 0x6af   :  { %v3036_v24 = vadd.f32 %v3004_v35, %v2843_v52  ;;  %v3390_v46 = vmul.f32 %v11207_v27, %v16410_v59  ;;  %v3805_v51 = vadd.f32 %v3773_v18, %v3612_v39  ;;  %v2807_v30 = vmul.f32 %v11159_v47, %v16411_v20  ;;  %v16417_v52 = vld [vmem:[#allocation55_spill] sm:$0xff]  ;;  %v16418_v39 = vld [vmem:[#allocation136_spill] sm:$0xff]  ;;  %v16421_v20 = vld [vmem:[#allocation74_spill] sm:$0xff] }
 0x6b0   :  { %v3222_v44 = vadd.f32 %v3190_v31, %v3029_v61  ;;  %v3576_v15 = vmul.f32 %v11222_v17, %v16412_v58  ;;  %v3833_v22 = vadd.f32 %v11297_v54, %v3798_v2  ;;  %v2814_v13 = vmul.f32 %v11159_v47, %v16413_v6  ;;  %v16416_v31 = vld [vmem:[#allocation135_spill] sm:$0xff]  ;;  %v16419_v2 = vld [vmem:[#allocation166_spill] sm:$0xff] }
 0x6b1   :  { %v3229_v35 = vadd.f32 %v3197_v11, %v3036_v24  ;;  %v3583_v55 = vmul.f32 %v11222_v17, %v16414_v63  ;;  %v3840_v49 = vadd.f32 %v11297_v54, %v3805_v51  ;;  %v2646_v7 = vadd.f32 %v2614_v62, %v16415_v16  ;;  %v16420_v59 = vld [vmem:[#allocation167_spill] sm:$0xff]  ;;  %v16422_v58 = vld [vmem:[#allocation186_spill] sm:$0xff]  ;;  %v11762_v16 = vld [vmem:[%s15570_s0 + $0x1e0] sm:$0xff] }
 0x6b2   :  { %v3000_v10 = vmul.f32 %v11175_v14, %v16416_v31  ;;  %v3415_v5 = vadd.f32 %v3383_v33, %v3222_v44  ;;  %v3897_v25 = vadd.f32 %v3865_v48, %v3833_v22  ;;  %4109 = vperm.xlu1 %7923, %v11706_v50   ;;  %v2653_v41 = vadd.f32 %v2621_v8, %v16417_v52 }
 0x6b3   :  { %v3007_v18 = vmul.f32 %v11175_v14, %v16418_v39  ;;  %v3422_v11 = vadd.f32 %v3390_v46, %v3229_v35  ;;  %v3904_v40 = vadd.f32 %v3872_v21, %v3840_v49  ;;  %4099 = vperm.xlu2 %7922, %v11719_v26   ;;  %v3690_v61 = vpop.permute.xlu1 %3689  ;;  %v2839_v53 = vadd.f32 %v2807_v30, %v2646_v7  ;;  %v16423_v21 = vld [vmem:[#allocation75_spill] sm:$0xff] }
 0x6b4   :  { %v3193_v62 = vmul.f32 %v11190_v0, %v16419_v2  ;;  %v3608_v43 = vadd.f32 %v3576_v15, %v3415_v5  ;;  %3930 = vst.msk [vmem:[%s15579_s9 + $0x68] sm:$0xff] %vm3916_vm8, %v3897_v25  ;;  %v3769_v33 = vmul.f32 %v11263_v1, %v3690_v61  ;;  %v3718_v8 = vpop.permute.xlu2 %3717  ;;  %v2846_v24 = vadd.f32 %v2814_v13, %v2653_v41  ;;  %v16424_v35 = vld [vmem:[#allocation187_spill] sm:$0xff]  ;;  %v16426_v5 = vld [vmem:[#allocation26_spill] sm:$0xff]  ;;  %v3875_v41 = vld [vmem:[%s15570_s0 + $0xb8] sm:$0xff] }
 0x6b5   :  { %v3200_v46 = vmul.f32 %v11190_v0, %v16420_v59  ;;  %v3615_v48 = vadd.f32 %v3583_v55, %v3422_v11  ;;  %3937 = vst.msk [vmem:[%s15579_s9 + $0xa0] sm:$0xff] %vm3916_vm8, %v3904_v40  ;;  %v3776_v51 = vmul.f32 %v11263_v1, %v3718_v8  ;;  %v2617_v30 = vmul.f32 %v16393_v29, %v16421_v20  ;;  %v3868_v55 = vld [vmem:[%s15570_s0 + $0x80] sm:$0xff]  ;;  %v16425_v7 = vld [vmem:[#allocation107_spill] sm:$0xff] }
 0x6b6   :  { %v3032_v44 = vadd.f32 %v3000_v10, %v2839_v53  ;;  %v3386_v15 = vmul.f32 %v11207_v27, %v16422_v58  ;;  %v3801_v22 = vadd.f32 %v3769_v33, %v3608_v43  ;;  %v2624_v6 = vmul.f32 %v16393_v29, %v16423_v21  ;;  %v11775_v39 = vld [vmem:[%s15570_s0 + $0x1d0] sm:$0xff]  ;;  %v16428_v61 = vld [vmem:[#allocation33_spill] sm:$0xff]  ;;  %v16430_v33 = vld [vmem:[#allocation138_spill] sm:$0xff] }
 0x6b7   :  { %v3039_v13 = vadd.f32 %v3007_v18, %v2846_v24  ;;  %v3393_v63 = vmul.f32 %v11207_v27, %v16424_v35  ;;  %v3808_v49 = vadd.f32 %v3776_v51, %v3615_v48  ;;  %v2810_v31 = vmul.f32 %v11159_v47, %v16425_v7  ;;  %v16427_v18 = vld [vmem:[#allocation108_spill] sm:$0xff]  ;;  %v16431_v48 = vld [vmem:[#allocation113_spill] sm:$0xff]  ;;  %v16432_v20 = vld [vmem:[#allocation139_spill] sm:$0xff] }
 0x6b8   :  { %v3225_v10 = vadd.f32 %v3193_v62, %v3032_v44  ;;  %v3579_v25 = vmul.f32 %v11222_v17, %v16426_v5  ;;  %v3836_v52 = vadd.f32 %v11297_v54, %v3801_v22  ;;  %v2817_v11 = vmul.f32 %v11159_v47, %v16427_v18  ;;  %v16429_v62 = vld [vmem:[#allocation35_spill] sm:$0xff] }
 0x6b9   :  { %v3232_v40 = vadd.f32 %v3200_v46, %v3039_v13  ;;  %v3586_v53 = vmul.f32 %v11222_v17, %v16428_v61  ;;  %v3843_v2 = vadd.f32 %v11297_v54, %v3808_v49  ;;  %v2649_v43 = vadd.f32 %v2617_v30, %v16429_v62  ;;  %v16433_v13 = vld [vmem:[#allocation168_spill] sm:$0xff]  ;;  %v16434_v49 = vld [vmem:[#allocation169_spill] sm:$0xff] }
 0x6ba   :  { %v3003_v8 = vmul.f32 %v11175_v14, %v16430_v33  ;;  %v3418_v24 = vadd.f32 %v3386_v15, %v3225_v10  ;;  %v3900_v59 = vadd.f32 %v3868_v55, %v3836_v52  ;;  %4124 = vperm.xlu1 %7923, %v11762_v16   ;;  %v2656_v51 = vadd.f32 %v2624_v6, %v16431_v48  ;;  %v16435_v10 = vld [vmem:[#allocation77_spill] sm:$0xff] }
 0x6bb   :  { %v3010_v44 = vmul.f32 %v11175_v14, %v16432_v20  ;;  %v3425_v46 = vadd.f32 %v3393_v63, %v3232_v40  ;;  %v3907_v58 = vadd.f32 %v3875_v41, %v3843_v2  ;;  %4114 = vperm.xlu2 %7922, %v11775_v39   ;;  %v3702_v22 = vpop.permute.xlu1 %3701  ;;  %v2842_v21 = vadd.f32 %v2810_v31, %v2649_v43  ;;  %v16436_v52 = vld [vmem:[#allocation189_spill] sm:$0xff]  ;;  %v16438_v40 = vld [vmem:[#allocation10_spill] sm:$0xff]  ;;  %v3871_v43 = vld [vmem:[%s15570_s0 + $0x98] sm:$0xff] }
 0x6bc   :  { %v3196_v30 = vmul.f32 %v11190_v0, %v16433_v13  ;;  %v3611_v35 = vadd.f32 %v3579_v25, %v3418_v24  ;;  %3933 = vst.msk [vmem:[%s15579_s9 + $0x80] sm:$0xff] %vm3916_vm8, %v3900_v59  ;;  %v3772_v15 = vmul.f32 %v11263_v1, %v3702_v22  ;;  %v3730_v6 = vpop.permute.xlu2 %3729  ;;  %v2849_v55 = vadd.f32 %v2817_v11, %v2656_v51  ;;  %v16437_v11 = vld [vmem:[#allocation30_spill] sm:$0xff]  ;;  %v16440_v24 = vld [vmem:[#allocation109_spill] sm:$0xff]  ;;  %v16441_v51 = vld [vmem:[#allocation16_spill] sm:$0xff] }
 0x6bd   :  { %v3203_v63 = vmul.f32 %v11190_v0, %v16434_v49  ;;  %v3618_v7 = vadd.f32 %v3586_v53, %v3425_v46  ;;  %3940 = vst.msk [vmem:[%s15579_s9 + $0xb8] sm:$0xff] %vm3916_vm8, %v3907_v58  ;;  %v3779_v31 = vmul.f32 %v11263_v1, %v3730_v6  ;;  %v2620_v5 = vmul.f32 %v16393_v29, %v16435_v10  ;;  %v16439_v53 = vld [vmem:[#allocation190_spill] sm:$0xff]  ;;  %v3878_v46 = vld [vmem:[%s15570_s0 + $0xd0] sm:$0xff] }
 0x6be   :  { %v3035_v25 = vadd.f32 %v3003_v8, %v2842_v21  ;;  %v3389_v41 = vmul.f32 %v11207_v27, %v16436_v52  ;;  %v3804_v18 = vadd.f32 %v3772_v15, %v3611_v35  ;;  %v2427_v61 = vmul.f32 %v16438_v40, %v16437_v11  ;;  %v11818_v8 = vld [vmem:[%s15570_s0 + $0x1f8] sm:$0xff]  ;;  %v11831_v58 = vld [vmem:[%s15570_s0 + $0x1e8] sm:$0xff]  ;;  %v16443_v15 = vld [vmem:[#allocation141_spill] sm:$0xff] }
 0x6bf   :  { %v3042_v2 = vadd.f32 %v3010_v44, %v2849_v55  ;;  %v3396_v62 = vmul.f32 %v11207_v27, %v16439_v53  ;;  %v3811_v33 = vadd.f32 %v3779_v31, %v3618_v7  ;;  %v2813_v59 = vmul.f32 %v11159_v47, %v16440_v24  ;;  %v16442_v21 = vld [vmem:[#allocation4_spill] sm:$0xff]  ;;  %v16445_v11 = vld [vmem:[#allocation79_spill] sm:$0xff] }
 0x6c0   :  { %v3228_v48 = vadd.f32 %v3196_v30, %v3035_v25  ;;  %v3582_v20 = vmul.f32 %v11222_v17, %v16441_v51  ;;  %v3839_v44 = vadd.f32 %v11297_v54, %v3804_v18  ;;  %v3589_v13 = vmul.f32 %v11222_v17, %v16442_v21  ;;  %v16448_v51 = vld [vmem:[#allocation111_spill] sm:$0xff]  ;;  %v16449_v21 = vld [vmem:[#allocation58_spill] sm:$0xff] }
 0x6c1   :  { %v3235_v22 = vadd.f32 %v3203_v63, %v3042_v2  ;;  %v3846_v30 = vadd.f32 %v11297_v54, %v3811_v33  ;;  %v2652_v35 = vadd.f32 %v2620_v5, %v2427_v61  ;;  %v3006_v6 = vmul.f32 %v11175_v14, %v16443_v15  ;;  %v16444_v63 = vld [vmem:[#allocation170_spill] sm:$0xff] }
 0x6c2   :  { %v3421_v55 = vadd.f32 %v3389_v41, %v3228_v48  ;;  %v3903_v49 = vadd.f32 %v3871_v43, %v3839_v44  ;;  %4139 = vperm.xlu1 %7923, %v11818_v8   ;;  %v3199_v52 = vmul.f32 %v11190_v0, %v16444_v63  ;;  %v2623_v61 = vmul.f32 %v16393_v29, %v16445_v11  ;;  %v16446_v43 = vld [vmem:[#allocation192_spill] sm:$0xff]  ;;  %v3874_v44 = vld [vmem:[%s15570_s0 + $0xb0] sm:$0xff] }
 0x6c3   :  { %v3428_v7 = vadd.f32 %v3396_v62, %v3235_v22  ;;  %v3910_v31 = vadd.f32 %v3878_v46, %v3846_v30  ;;  %4129 = vperm.xlu2 %7922, %v11831_v58   ;;  %v3714_v10 = vpop.permute.xlu1 %3713  ;;  %v2845_v25 = vadd.f32 %v2813_v59, %v2652_v35  ;;  %v3392_v33 = vmul.f32 %v11207_v27, %v16446_v43  ;;  %v16447_v59 = vld [vmem:[#allocation28_spill] sm:$0xff]  ;;  %v3881_v35 = vld [vmem:[%s15570_s0 + $0xe8] sm:$0xff] }
 0x6c4   :  { %v3614_v18 = vadd.f32 %v3582_v20, %v3421_v55  ;;  %3936 = vst.msk [vmem:[%s15579_s9 + $0x98] sm:$0xff] %vm3916_vm8, %v3903_v49  ;;  %v3775_v5 = vmul.f32 %v11263_v1, %v3714_v10  ;;  %v3742_v41 = vpop.permute.xlu2 %3741  ;;  %v2430_v48 = vmul.f32 %v16438_v40, %v16447_v59  ;;  %v2816_v20 = vmul.f32 %v11159_v47, %v16448_v51  ;;  %v16450_v55 = vld [vmem:[#allocation143_spill] sm:$0xff]  ;;  %v16457_v51 = vld [vmem:[#allocation6_spill] sm:$0xff] }
 0x6c5   :  { %v3621_v2 = vadd.f32 %v3589_v13, %v3428_v7  ;;  %3943 = vst.msk [vmem:[%s15579_s9 + $0xd0] sm:$0xff] %vm3916_vm8, %v3910_v31  ;;  %v3782_v53 = vmul.f32 %v11263_v1, %v3742_v41  ;;  %v3038_v62 = vadd.f32 %v3006_v6, %v2845_v25  ;;  %v3585_v13 = vmul.f32 %v11222_v17, %v16449_v21 }
 0x6c6   :  { %v3807_v24 = vadd.f32 %v3775_v5, %v3614_v18  ;;  %v2655_v15 = vadd.f32 %v2623_v61, %v2430_v48  ;;  %v3009_v49 = vmul.f32 %v11175_v14, %v16450_v55  ;;  %v16451_v10 = vmov 1   ;;  %v16453_v5 = vld [vmem:[#allocation171_spill] sm:$0xff] }
 0x6c7   :  { %v3814_v46 = vadd.f32 %v3782_v53, %v3621_v2  ;;  %v3231_v22 = vadd.f32 %v3199_v52, %v3038_v62  ;;  %v16452_v52 = vld [vmem:[#allocation9_spill] sm:$0xff]  ;;  %v3202_v41 = vmul.f32 %v11190_v0, %v16453_v5  ;;  %v16455_v53 = vld [vmem:[#allocation82_spill] sm:$0xff] }
 0x6c8   :  { %v3842_v30 = vadd.f32 %v11297_v54, %v3807_v24  ;;  %v2848_v25 = vadd.f32 %v2816_v20, %v2655_v15  ;;  %v16454_v2 = vld [vmem:[#allocation57_spill] sm:$0xff]  ;;  %v2626_v62 = vmul.f32 %v16393_v29, %v16455_v53  ;;  %v16456_v24 = vld [vmem:[#allocation194_spill] sm:$0xff]  ;;  %v2433_v20 = vmul.f32 %v16438_v40, %v16457_v51 }
 0x6c9   :  { %v3849_v6 = vadd.f32 %v11297_v54, %v3814_v46  ;;  %v3424_v7 = vadd.f32 %v3392_v33, %v3231_v22  ;;  %v3395_v59 = vmul.f32 %v11207_v27, %v16456_v24  ;;  %v3877_v22 = vld [vmem:[%s15570_s0 + $0xc8] sm:$0xff] }
 0x6ca   :  { %v3906_v31 = vadd.f32 %v3874_v44, %v3842_v30  ;;  %7926 = vset.pattern.permute.xlu1 %v16451_v10  ;;  %v3041_v33 = vadd.f32 %v3009_v49, %v2848_v25  ;;  %v16458_v44 = vld [vmem:[#allocation114_spill] sm:$0xff]  ;;  %v2658_v15 = vadd.f32 %v2626_v62, %v2433_v20 }
 0x6cb   :  { %v3913_v63 = vadd.f32 %v3881_v35, %v3849_v6  ;;  %7925 = vset.pattern.permute.xlu2 %v16451_v10  ;;  %4215 = vperm.xlu1 %7926, %v16452_v52   ;;  %v3726_v18 = vpop.permute.xlu1 %3725  ;;  %v3617_v11 = vadd.f32 %v3585_v13, %v3424_v7  ;;  %v2819_v46 = vmul.f32 %v11159_v47, %v16458_v44  ;;  %v16459_v13 = vld [vmem:[#allocation78_spill] sm:$0xff]  ;;  %v16462_v52 = vld [vmem:[#allocation172_spill] sm:$0xff] }
 0x6cc   :  { %3939 = vst.msk [vmem:[%s15579_s9 + $0xb0] sm:$0xff] %vm3916_vm8, %v3906_v31  ;;  %v3778_v61 = vmul.f32 %v11263_v1, %v3726_v18  ;;  %4207 = vperm.xlu2 %7925, %v16454_v2   ;;  %v3234_v21 = vadd.f32 %v3202_v41, %v3041_v33  ;;  %v3588_v30 = vmul.f32 %v11222_v17, %v16459_v13  ;;  %v16460_v6 = vld [vmem:[#allocation146_spill] sm:$0xff]  ;;  %v16463_v2 = vld [vmem:[#allocation196_spill] sm:$0xff]  ;;  %v3880_v33 = vld [vmem:[%s15570_s0 + $0xe0] sm:$0xff] }
 0x6cd   :  { %3946 = vst.msk [vmem:[%s15579_s9 + $0xe8] sm:$0xff] %vm3916_vm8, %v3913_v63  ;;  %v11889_v43 = vpop.permute.xlu2 %3984  ;;  %v3012_v55 = vmul.f32 %v11175_v14, %v16460_v6  ;;  %v2851_v31 = vadd.f32 %v2819_v46, %v2658_v15  ;;  %v16461_v25 = vld [vmem:[#allocation62_spill] sm:$0xff]  ;;  %v3205_v18 = vmul.f32 %v11190_v0, %v16462_v52  ;;  %v3398_v53 = vmul.f32 %v11207_v27, %v16463_v2 }
 0x6ce   :  { %v3810_v48 = vadd.f32 %v3778_v61, %v3617_v11  ;;  %v3427_v49 = vadd.f32 %v3395_v59, %v3234_v21  ;;  %v3591_v59 = vmul.f32 %v11222_v17, %v11399_v56  ;;  %v3883_v21 = vld [vmem:[%s15570_s0 + $0xf8] sm:$0xff] }
 0x6cf   :  { %v3044_v61 = vadd.f32 %v3012_v55, %v2851_v31 }
 0x6d0   :  { %v3845_v35 = vadd.f32 %v11297_v54, %v3810_v48  ;;  %v3620_v5 = vadd.f32 %v3588_v30, %v3427_v49 }
 0x6d1   :  { %v3237_v24 = vadd.f32 %v3205_v18, %v3044_v61 }
 0x6d2   :  { %v3909_v7 = vadd.f32 %v3877_v22, %v3845_v35 }
 0x6d3   :  { %4223 = vperm.xlu1 %7926, %v16461_v25   ;;  %v3738_v63 = vpop.permute.xlu1 %3737  ;;  %v3430_v51 = vadd.f32 %v3398_v53, %v3237_v24  ;;  %v16467_v53 = vmov 2   ;;  %v7982_v24 = vld [vmem:[%s15570_s0 + $0x100] sm:$0xff] }
 0x6d4   :  { %3942 = vst.msk [vmem:[%s15579_s9 + $0xc8] sm:$0xff] %vm3916_vm8, %v3909_v7  ;;  %v3781_v41 = vmul.f32 %v11263_v1, %v3738_v63  ;;  %4219 = vperm.xlu2 %7925, %v11330_v28  }
 0x6d5   :  { %v11914_v11 = vpop.permute.xlu2 %3999  ;;  %v3623_v44 = vadd.f32 %v3591_v59, %v3430_v51 }
 0x6d6   :  { %v3813_v62 = vadd.f32 %v3781_v41, %v3620_v5 }
 0x6d8   :  { %v3848_v48 = vadd.f32 %v11297_v54, %v3813_v62  ;;  %v7981_v62 = vld [vmem:[%s15570_s0 + $0x110] sm:$0xff] }
 0x6da   :  { %v3912_v20 = vadd.f32 %v3880_v33, %v3848_v48  ;;  %v7983_v48 = vld [vmem:[%s15570_s0 + $0x120] sm:$0xff] }
 0x6db   :  { %4235 = vperm.xlu1 %7926, %v11372_v57   ;;  %v3750_v28 = vpop.permute.xlu1 %3749 }
 0x6dc   :  { %3945 = vst.msk [vmem:[%s15579_s9 + $0xe0] sm:$0xff] %vm3916_vm8, %v3912_v20  ;;  %v3784_v46 = vmul.f32 %v11263_v1, %v3750_v28  ;;  %4227 = vperm.xlu2 %7925, %v11386_v37   ;;  %v7984_v20 = vld [vmem:[%s15570_s0 + $0x118] sm:$0xff] }
 0x6dd   :  { %v11931_v22 = vpop.permute.xlu2 %4009 }
 0x6de   :  { %v3816_v56 = vadd.f32 %v3784_v46, %v3623_v44 }
 0x6e0   :  { %v3851_v13 = vadd.f32 %v11297_v54, %v3816_v56 }
 0x6e2   :  { %v3915_v30 = vadd.f32 %v3883_v21, %v3851_v13 }
 0x6e3   :  { %4247 = vperm.xlu1 %7926, %v11433_v34  }
 0x6e4   :  { %3948 = vst.msk [vmem:[%s15579_s9 + $0xf8] sm:$0xff] %vm3916_vm8, %v3915_v30  ;;  %4239 = vperm.xlu2 %7925, %v11445_v19   ;;  %v11943_v35 = vpop.permute.xlu1 %3994 }
 0x6e5   :  { %v11945_v15 = vpop.permute.xlu2 %4024 }
 0x6eb   :  { %4259 = vperm.xlu1 %7926, %v11485_v32  }
 0x6ec   :  { %4251 = vperm.xlu2 %7925, %v11498_v12   ;;  %v11949_v6 = vpop.permute.xlu1 %4004 }
 0x6ed   :  { %v11951_v54 = vpop.permute.xlu2 %4039 }
 0x6f3   :  { %4271 = vperm.xlu1 %7926, %v11539_v42  }
 0x6f4   :  { %4263 = vperm.xlu2 %7925, %v11552_v38   ;;  %v11955_v55 = vpop.permute.xlu1 %4019 }
 0x6f5   :  { %v11957_v49 = vpop.permute.xlu2 %4054 }
 0x6fb   :  { %4283 = vperm.xlu1 %7926, %v11594_v3  }
 0x6fc   :  { %4275 = vperm.xlu2 %7925, %v11606_v36   ;;  %v11961_v7 = vpop.permute.xlu1 %4034 }
 0x6fd   :  { %v11963_v31 = vpop.permute.xlu2 %4069 }
 0x703   :  { %4295 = vperm.xlu1 %7926, %v11650_v9  }
 0x704   :  { %4287 = vperm.xlu2 %7925, %v11663_v60   ;;  %v11967_v25 = vpop.permute.xlu1 %4049 }
 0x705   :  { %v11969_v63 = vpop.permute.xlu2 %4084 }
 0x70b   :  { %4307 = vperm.xlu1 %7926, %v11706_v50  }
 0x70c   :  { %4299 = vperm.xlu2 %7925, %v11719_v26   ;;  %v11973_v52 = vpop.permute.xlu1 %4064 }
 0x70d   :  { %v11975_v18 = vpop.permute.xlu2 %4099 }
 0x713   :  { %4319 = vperm.xlu1 %7926, %v11762_v16  }
 0x714   :  { %4311 = vperm.xlu2 %7925, %v11775_v39   ;;  %v11979_v5 = vpop.permute.xlu1 %4079 }
 0x715   :  { %v11981_v41 = vpop.permute.xlu2 %4114 }
 0x716   :  { %16464 = vst [vmem:[#allocation116_spill] sm:$0xff] %v11981_v41 }
 0x71b   :  { %4331 = vperm.xlu1 %7926, %v11818_v8  }
 0x71c   :  { %4323 = vperm.xlu2 %7925, %v11831_v58   ;;  %v11985_v61 = vpop.permute.xlu1 %4094 }
 0x71d   :  { %16465 = vst [vmem:[#allocation63_spill] sm:$0xff] %v11985_v61  ;;  %v11987_v2 = vpop.permute.xlu2 %4129 }
 0x71e   :  { %16466 = vst [vmem:[#allocation110_spill] sm:$0xff] %v11987_v2 }
 0x723   :  { %7928 = vset.pattern.permute.xlu1 %v16467_v53 }
 0x724   :  { %7927 = vset.pattern.permute.xlu2 %v16467_v53  ;;  %4407 = vperm.xlu1 %7928, %v7981_v62   ;;  %v11994_v33 = vpop.permute.xlu1 %4109 }
 0x725   :  { %16468 = vst [vmem:[#allocation65_spill] sm:$0xff] %v11994_v33  ;;  %4399 = vperm.xlu2 %7927, %v7982_v24  }
 0x726   :  { %v11999_v59 = vpop.permute.xlu2 %4207 }
 0x72c   :  { %4415 = vperm.xlu1 %7928, %v7983_v48   ;;  %v12004_v51 = vpop.permute.xlu1 %4124 }
 0x72d   :  { %16469 = vst [vmem:[#allocation61_spill] sm:$0xff] %v12004_v51  ;;  %4411 = vperm.xlu2 %7927, %v7984_v20   ;;  %v16473_v51 = vmov 3  }
 0x72e   :  { %v12009_v28 = vpop.permute.xlu2 %4219 }
 0x734   :  { %4427 = vperm.xlu1 %7928, %v11372_v57   ;;  %v12012_v44 = vpop.permute.xlu1 %4139 }
 0x735   :  { %16470 = vst [vmem:[#allocation66_spill] sm:$0xff] %v12012_v44  ;;  %4419 = vperm.xlu2 %7927, %v11386_v37  }
 0x736   :  { %v12015_v46 = vpop.permute.xlu2 %4227 }
 0x73c   :  { %4439 = vperm.xlu1 %7928, %v11433_v34  }
 0x73d   :  { %4431 = vperm.xlu2 %7927, %v11445_v19   ;;  %v12019_v56 = vpop.permute.xlu1 %4215 }
 0x73e   :  { %v12021_v21 = vpop.permute.xlu2 %4239 }
 0x744   :  { %4451 = vperm.xlu1 %7928, %v11485_v32  }
 0x745   :  { %4443 = vperm.xlu2 %7927, %v11498_v12   ;;  %v12025_v13 = vpop.permute.xlu1 %4223 }
 0x746   :  { %v12027_v57 = vpop.permute.xlu2 %4251 }
 0x74c   :  { %4463 = vperm.xlu1 %7928, %v11539_v42  }
 0x74d   :  { %4455 = vperm.xlu2 %7927, %v11552_v38   ;;  %v12031_v37 = vpop.permute.xlu1 %4235 }
 0x74e   :  { %v12033_v30 = vpop.permute.xlu2 %4263 }
 0x754   :  { %4475 = vperm.xlu1 %7928, %v11594_v3  }
 0x755   :  { %4467 = vperm.xlu2 %7927, %v11606_v36   ;;  %v12037_v1 = vpop.permute.xlu1 %4247 }
 0x756   :  { %v12039_v17 = vpop.permute.xlu2 %4275 }
 0x75c   :  { %4487 = vperm.xlu1 %7928, %v11650_v9  }
 0x75d   :  { %4479 = vperm.xlu2 %7927, %v11663_v60   ;;  %v12043_v27 = vpop.permute.xlu1 %4259 }
 0x75e   :  { %v12045_v0 = vpop.permute.xlu2 %4287 }
 0x764   :  { %4499 = vperm.xlu1 %7928, %v11706_v50  }
 0x765   :  { %4491 = vperm.xlu2 %7927, %v11719_v26   ;;  %v12049_v14 = vpop.permute.xlu1 %4271 }
 0x766   :  { %v12051_v47 = vpop.permute.xlu2 %4299 }
 0x76c   :  { %4511 = vperm.xlu1 %7928, %v11762_v16  }
 0x76d   :  { %4503 = vperm.xlu2 %7927, %v11775_v39   ;;  %v12055_v40 = vpop.permute.xlu1 %4283 }
 0x76e   :  { %v12057_v29 = vpop.permute.xlu2 %4311 }
 0x774   :  { %4523 = vperm.xlu1 %7928, %v11818_v8  }
 0x775   :  { %4515 = vperm.xlu2 %7927, %v11831_v58   ;;  %v12061_v10 = vpop.permute.xlu1 %4295 }
 0x776   :  { %16471 = vst [vmem:[#allocation64_spill] sm:$0xff] %v12061_v10  ;;  %v12063_v44 = vpop.permute.xlu2 %4323  ;;  %v7985_v10 = vld [vmem:[%s15570_s0 + $0x138] sm:$0xff] }
 0x777   :  { %16472 = vst [vmem:[#allocation81_spill] sm:$0xff] %v12063_v44 }
 0x77c   :  { %7931 = vset.pattern.permute.xlu1 %v16473_v51 }
 0x77d   :  { %7930 = vset.pattern.permute.xlu2 %v16473_v51  ;;  %4599 = vperm.xlu1 %7931, %v7981_v62   ;;  %v12067_v33 = vpop.permute.xlu1 %4307  ;;  %v7986_v62 = vld [vmem:[%s15570_s0 + $0x128] sm:$0xff] }
 0x77e   :  { %16474 = vst [vmem:[#allocation119_spill] sm:$0xff] %v12067_v33  ;;  %4591 = vperm.xlu2 %7930, %v7982_v24   ;;  %v16483_v33 = vmov 0  }
 0x77f   :  { %v4400_v2 = vpop.permute.xlu2 %4399 }
 0x785   :  { %4607 = vperm.xlu1 %7931, %v7983_v48   ;;  %v12069_v61 = vpop.permute.xlu1 %4319 }
 0x786   :  { %16475 = vst [vmem:[#allocation67_spill] sm:$0xff] %v12069_v61  ;;  %4603 = vperm.xlu2 %7930, %v7984_v20  }
 0x787   :  { %v4412_v41 = vpop.permute.xlu2 %4411 }
 0x78d   :  { %4619 = vperm.xlu1 %7931, %v7985_v10   ;;  %v12074_v44 = vpop.permute.xlu1 %4331 }
 0x78e   :  { %16476 = vst [vmem:[#allocation112_spill] sm:$0xff] %v12074_v44  ;;  %4611 = vperm.xlu2 %7930, %v7986_v62   ;;  %v16481_v44 = vld [vmem:[#allocation45_spill] sm:$0xff] }
 0x78f   :  { %v4420_v51 = vpop.permute.xlu2 %4419 }
 0x795   :  { %4631 = vperm.xlu1 %7931, %v11433_v34  }
 0x796   :  { %4623 = vperm.xlu2 %7930, %v11445_v19   ;;  %v12081_v24 = vpop.permute.xlu1 %4407 }
 0x797   :  { %v12083_v48 = vpop.permute.xlu2 %4431 }
 0x79d   :  { %4643 = vperm.xlu1 %7931, %v11485_v32  }
 0x79e   :  { %4635 = vperm.xlu2 %7930, %v11498_v12   ;;  %v12087_v10 = vpop.permute.xlu1 %4415 }
 0x79f   :  { %v12089_v20 = vpop.permute.xlu2 %4443 }
 0x7a5   :  { %4655 = vperm.xlu1 %7931, %v11539_v42  }
 0x7a6   :  { %4647 = vperm.xlu2 %7930, %v11552_v38   ;;  %v12093_v62 = vpop.permute.xlu1 %4427 }
 0x7a7   :  { %v12095_v34 = vpop.permute.xlu2 %4455 }
 0x7ad   :  { %4667 = vperm.xlu1 %7931, %v11594_v3  }
 0x7ae   :  { %4659 = vperm.xlu2 %7930, %v11606_v36   ;;  %v12099_v19 = vpop.permute.xlu1 %4439 }
 0x7af   :  { %v12101_v32 = vpop.permute.xlu2 %4467 }
 0x7b5   :  { %4679 = vperm.xlu1 %7931, %v11650_v9  }
 0x7b6   :  { %4671 = vperm.xlu2 %7930, %v11663_v60   ;;  %v12105_v12 = vpop.permute.xlu1 %4451 }
 0x7b7   :  { %v12107_v42 = vpop.permute.xlu2 %4479 }
 0x7bd   :  { %4691 = vperm.xlu1 %7931, %v11706_v50  }
 0x7be   :  { %4683 = vperm.xlu2 %7930, %v11719_v26   ;;  %v12111_v38 = vpop.permute.xlu1 %4463  ;;  %v4334_v26 = vmul.f32 %v11999_v59, %v16271_v4 }
 0x7bf   :  { %v12113_v3 = vpop.permute.xlu2 %4491 }
 0x7c5   :  { %4703 = vperm.xlu1 %7931, %v11762_v16   ;;  %v4142_v16 = vmul.f32 %v11889_v43, %v16481_v44  ;;  %v4145_v43 = vmul.f32 %v11914_v11, %v16481_v44 }
 0x7c6   :  { %4695 = vperm.xlu2 %7930, %v11775_v39   ;;  %v12117_v36 = vpop.permute.xlu1 %4475  ;;  %v4526_v39 = vmul.f32 %v4400_v2, %v16270_v45  ;;  %v4529_v2 = vmul.f32 %v4412_v41, %v16270_v45  ;;  %v4339_v41 = vmul.f32 %v12015_v46, %v16271_v4  ;;  %v4342_v46 = vmul.f32 %v12021_v21, %v16271_v4 }
 0x7c7   :  { %16477 = vst [vmem:[#allocation70_spill] sm:$0xff] %v12117_v36  ;;  %v12119_v9 = vpop.permute.xlu2 %4503 }
 0x7c8   :  { %16478 = vst [vmem:[#allocation73_spill] sm:$0xff] %v12119_v9 }
 0x7cd   :  { %4715 = vperm.xlu1 %7931, %v11818_v8   ;;  %v4366_v8 = vadd.f32 %v4334_v26, %v4142_v16 }
 0x7ce   :  { %4707 = vperm.xlu2 %7930, %v11831_v58   ;;  %v12123_v60 = vpop.permute.xlu1 %4487 }
 0x7cf   :  { %16479 = vst [vmem:[#allocation144_spill] sm:$0xff] %v12123_v60  ;;  %v12125_v50 = vpop.permute.xlu2 %4515  ;;  %v4558_v9 = vadd.f32 %v4526_v39, %v4366_v8 }
 0x7d0   :  { %16480 = vst [vmem:[#allocation76_spill] sm:$0xff] %v12125_v50  ;;  %v4337_v50 = vmul.f32 %v12009_v28, %v16271_v4 }
 0x7d2   :  { %v4369_v39 = vadd.f32 %v4337_v50, %v4145_v43  ;;  %v4531_v50 = vmul.f32 %v4420_v51, %v16270_v45  ;;  %v4528_v51 = vmul.f32 %v12081_v24, %v16270_v45  ;;  %v5014_v24 = vld [vmem:[#allocation2 + $0x61] sm:$0xff] }
 0x7d5   :  { %7935 = vset.pattern.permute.xlu1 %v16467_v53  ;;  %v12145_v53 = vld [vmem:[%s15571_s2] ss:$0 sm:$0xff] }
 0x7d6   :  { %v12133_v61 = vpop.permute.xlu1 %4499  ;;  %7933 = vset.pattern.permute.xlu2 %v16483_v33  ;;  %v4561_v33 = vadd.f32 %v4529_v2, %v4369_v39 }
 0x7d7   :  { %16482 = vst [vmem:[#allocation84_spill] sm:$0xff] %v12133_v61 }
 0x7d8   :  { %v4592_v58 = vpop.permute.xlu2 %4591 }
 0x7d9   :  { %v4718_v60 = vmul.f32 %v4592_v58, %v16272_v23 }
 0x7db   :  { %v4750_v59 = vadd.f32 %v4718_v60, %v4558_v9 }
 0x7dd   :  { %v4782_v26 = vadd.f32 %v12145_v53, %v4750_v59  ;;  %v4147_v59 = vmul.f32 %v11931_v22, %v16481_v44  ;;  %v4144_v22 = vmul.f32 %v11943_v35, %v16481_v44 }
 0x7de   :  { %v12148_v16 = vpop.permute.xlu1 %4511 }
 0x7df   :  { %16484 = vst [vmem:[#allocation86_spill] sm:$0xff] %v12148_v16  ;;  %v4814_v8 = vmax.f32 %v4782_v26, 0.0  ;;  %v4371_v26 = vadd.f32 %v4339_v41, %v4147_v59  ;;  %v5105_v41 = vld [vmem:[#allocation2 + $0x22] sm:$0xff] }
 0x7e0   :  { %v4604_v58 = vpop.permute.xlu2 %4603 }
 0x7e1   :  { %v4846_v28 = vmin.f32 %v4814_v8, 6.0  ;;  %v4721_v9 = vmul.f32 %v4604_v58, %v16272_v23  ;;  %v4563_v58 = vadd.f32 %v4531_v50, %v4371_v26  ;;  %v12175_v50 = vld [vmem:[#allocation2 + $0x60] sm:$0xff] }
 0x7e2   :  { %v5009_v26 = vld [vmem:[#allocation2 + $0x21] sm:$0xff] }
 0x7e3   :  { %4878 = vst.msk [vmem:[#allocation2 + $0x19] sm:$0xff] %vm32_vm0, %v4846_v28  ;;  %v4753_v11 = vadd.f32 %v4721_v9, %v4561_v33  ;;  %v4336_v33 = vmul.f32 %v12019_v56, %v16271_v4  ;;  %v4150_v28 = vmul.f32 %v11945_v15, %v16481_v44  ;;  %v4534_v9 = vmul.f32 %v12083_v48, %v16270_v45  ;;  %v16486_v48 = vld [vmem:[#allocation22_spill] sm:$0xff] }
 0x7e5   :  { %v4785_v60 = vadd.f32 %v12145_v53, %v4753_v11  ;;  %v4368_v56 = vadd.f32 %v4336_v33, %v4144_v22  ;;  %v4338_v33 = vmul.f32 %v12025_v13, %v16271_v4  ;;  %v4530_v13 = vmul.f32 %v12087_v10, %v16270_v45 }
 0x7e6   :  { %v12155_v61 = vpop.permute.xlu1 %4523 }
 0x7e7   :  { %16485 = vst [vmem:[#allocation87_spill] sm:$0xff] %v12155_v61  ;;  %v4817_v43 = vmax.f32 %v4785_v60, 0.0  ;;  %v4374_v60 = vadd.f32 %v4342_v46, %v4150_v28 }
 0x7e8   :  { %v4612_v2 = vpop.permute.xlu2 %4611 }
 0x7e9   :  { %v4849_v39 = vmin.f32 %v4817_v43, 6.0  ;;  %v4723_v8 = vmul.f32 %v4612_v2, %v16272_v23  ;;  %v4560_v43 = vadd.f32 %v4528_v51, %v4368_v56  ;;  %v4345_v51 = vmul.f32 %v12027_v57, %v16271_v4  ;;  %v16489_v56 = vld [vmem:[#allocation23_spill] sm:$0xff] }
 0x7ea   :  { %v4153_v57 = vmul.f32 %v11951_v54, %v16481_v44  ;;  %v12209_v10 = vmul.f32 %v5009_v26, %v16489_v56 }
 0x7eb   :  { %4881 = vst.msk [vmem:[#allocation2 + $0x39] sm:$0xff] %vm32_vm0, %v4849_v39  ;;  %v4755_v11 = vadd.f32 %v4723_v8, %v4563_v58  ;;  %v4566_v39 = vadd.f32 %v4534_v9, %v4374_v60  ;;  %v12180_v8 = vmul.f32 %v5105_v41, %v16486_v48  ;;  %v16488_v58 = vld [vmem:[#allocation21_spill] sm:$0xff]  ;;  %v5046_v9 = vmul.f32 %v5014_v24, %v16489_v56 }
 0x7ec   :  { %v4950_v22 = vmul.f32 %v12175_v50, %v16488_v58  ;;  %v16490_v60 = vld [vmem:[#allocation29_spill] sm:$0xff]  ;;  %16494 = vst [vmem:[#allocation92_spill] sm:$0xff] %v12209_v10  ;;  %v4377_v54 = vadd.f32 %v4345_v51, %v4153_v57 }
 0x7ed   :  { %v4787_v21 = vadd.f32 %v12145_v53, %v4755_v11  ;;  %16487 = vst [vmem:[#allocation89_spill] sm:$0xff] %v12180_v8  ;;  %v5020_v8 = vld [vmem:[#allocation2 + $0xa9] sm:$0xff] }
 0x7ee   :  { %v12215_v36 = vadd.f32 %v5046_v9, %v4950_v22  ;;  %v5052_v22 = vmul.f32 %v5020_v8, %v16489_v56  ;;  %v4341_v9 = vmul.f32 %v12031_v37, %v16271_v4 }
 0x7ef   :  { %v4600_v59 = vpop.permute.xlu1 %4599  ;;  %v4819_v15 = vmax.f32 %v4787_v21, 0.0  ;;  %v12190_v21 = vmul.f32 %v5009_v26, %v16490_v60 }
 0x7f0   :  { %v4720_v35 = vmul.f32 %v4600_v59, %v16272_v23  ;;  %v4624_v2 = vpop.permute.xlu2 %4623  ;;  %v4146_v59 = vmul.f32 %v11949_v6, %v16481_v44  ;;  %16497 = vst [vmem:[#allocation147_spill] sm:$0xff] %v12215_v36 }
 0x7f1   :  { %v4726_v61 = vmul.f32 %v4624_v2, %v16272_v23  ;;  %v4851_v28 = vmin.f32 %v4819_v15, 6.0  ;;  %16491 = vst [vmem:[#allocation90_spill] sm:$0xff] %v12190_v21  ;;  %v12206_v15 = vld [vmem:[#allocation2 + $0xa8] sm:$0xff] }
 0x7f2   :  { %v4752_v46 = vadd.f32 %v4720_v35, %v4560_v43  ;;  %v16492_v35 = vld [vmem:[#allocation31_spill] sm:$0xff]  ;;  %v4370_v6 = vadd.f32 %v4338_v33, %v4146_v59  ;;  %v4956_v10 = vmul.f32 %v12206_v15, %v16488_v58 }
 0x7f3   :  { %v4758_v11 = vadd.f32 %v4726_v61, %v4566_v39  ;;  %v12198_v2 = vmul.f32 %v5105_v41, %v16492_v35  ;;  %v4537_v61 = vmul.f32 %v12089_v20, %v16270_v45  ;;  %4883 = vst.msk [vmem:[#allocation2 + $0x51] sm:$0xff] %vm32_vm0, %v4851_v28  ;;  %v16495_v41 = vld [vmem:[#allocation24_spill] sm:$0xff]  ;;  %v5017_v20 = vld [vmem:[#allocation2 + $0x81] sm:$0xff] }
 0x7f4   :  { %v4784_v43 = vadd.f32 %v12145_v53, %v4752_v46  ;;  %v12217_v28 = vld [vmem:[#allocation2 + $0x82] sm:$0xff]  ;;  %v4562_v33 = vadd.f32 %v4530_v13, %v4370_v6  ;;  %v12231_v13 = vmul.f32 %v5017_v20, %v16489_v56  ;;  %v5026_v6 = vld [vmem:[#allocation2 + $0xf1] sm:$0xff]  ;;  %v12244_v37 = vmul.f32 %v12206_v15, %v16495_v41 }
 0x7f5   :  { %16493 = vst [vmem:[#allocation122_spill] sm:$0xff] %v12198_v2  ;;  %v4790_v39 = vadd.f32 %v12145_v53, %v4758_v11  ;;  %v12213_v2 = vmul.f32 %v12175_v50, %v16495_v41  ;;  %v12220_v11 = vmul.f32 %v5014_v24, %v16490_v60 }
 0x7f6   :  { %v4816_v46 = vmax.f32 %v4784_v43, 0.0  ;;  %16499 = vst [vmem:[#allocation95_spill] sm:$0xff] %v12244_v37 }
 0x7f7   :  { %16496 = vst [vmem:[#allocation115_spill] sm:$0xff] %v12213_v2  ;;  %v4822_v21 = vmax.f32 %v4790_v39, 0.0  ;;  %v4608_v16 = vpop.permute.xlu1 %4607  ;;  %v4569_v2 = vadd.f32 %v4537_v61, %v4377_v54  ;;  %v12240_v39 = vld [vmem:[#allocation2 + $0xf0] sm:$0xff]  ;;  %v4149_v54 = vmul.f32 %v11955_v55, %v16481_v44  ;;  %v12264_v55 = vadd.f32 %v5052_v22, %v4956_v10 }
 0x7f8   :  { %16498 = vst [vmem:[#allocation93_spill] sm:$0xff] %v12220_v11  ;;  %v4848_v26 = vmin.f32 %v4816_v46, 6.0  ;;  %v4722_v59 = vmul.f32 %v4608_v16, %v16272_v23  ;;  %v4636_v43 = vpop.permute.xlu2 %4635  ;;  %v12235_v16 = vmul.f32 %v12217_v28, %v16486_v48  ;;  %v12247_v46 = vmul.f32 %v5017_v20, %v16490_v60 }
 0x7f9   :  { %v4854_v51 = vmin.f32 %v4822_v21, 6.0  ;;  %v4729_v57 = vmul.f32 %v4636_v43, %v16272_v23  ;;  %v4348_v21 = vmul.f32 %v12033_v30, %v16271_v4  ;;  %v4156_v43 = vmul.f32 %v11957_v49, %v16481_v44  ;;  %16502 = vst [vmem:[#allocation125_spill] sm:$0xff] %v12264_v55  ;;  %v5029_v55 = vld [vmem:[#allocation2 + $0x111] sm:$0xff] }
 0x7fa   :  { %4880 = vst.msk [vmem:[#allocation2 + $0x31] sm:$0xff] %vm32_vm0, %v4848_v26  ;;  %v4754_v24 = vadd.f32 %v4722_v59, %v4562_v33  ;;  %v4533_v33 = vmul.f32 %v12093_v62, %v16270_v45  ;;  %v5023_v26 = vld [vmem:[#allocation2 + $0xc9] sm:$0xff]  ;;  %v12257_v59 = vmul.f32 %v5020_v8, %v16490_v60  ;;  %v4540_v20 = vmul.f32 %v12095_v34, %v16270_v45 }
 0x7fb   :  { %4886 = vst.msk [vmem:[#allocation2 + $0x79] sm:$0xff] %vm32_vm0, %v4854_v51  ;;  %v4761_v61 = vadd.f32 %v4729_v57, %v4569_v2  ;;  %v12254_v2 = vld [vmem:[#allocation2 + $0xca] sm:$0xff]  ;;  %v4373_v57 = vadd.f32 %v4341_v9, %v4149_v54  ;;  %v4380_v11 = vadd.f32 %v4348_v21, %v4156_v43  ;;  %v12270_v37 = vmul.f32 %v5023_v26, %v16489_v56  ;;  %v5032_v54 = vld [vmem:[#allocation2 + $0x139] sm:$0xff] }
 0x7fc   :  { %16500 = vst [vmem:[#allocation117_spill] sm:$0xff] %v12247_v46  ;;  %v4786_v30 = vadd.f32 %v12145_v53, %v4754_v24  ;;  %v4962_v24 = vmul.f32 %v12240_v39, %v16488_v58  ;;  %v5058_v46 = vmul.f32 %v5026_v6, %v16489_v56  ;;  %v12274_v49 = vmul.f32 %v12254_v2, %v16486_v48 }
 0x7fd   :  { %16501 = vst [vmem:[#allocation118_spill] sm:$0xff] %v12257_v59  ;;  %v4793_v51 = vadd.f32 %v12145_v53, %v4761_v61  ;;  %v4565_v34 = vadd.f32 %v4533_v33, %v4373_v57  ;;  %v12277_v61 = vld [vmem:[#allocation2 + $0x138] sm:$0xff]  ;;  %v4572_v21 = vadd.f32 %v4540_v20, %v4380_v11  ;;  %v12285_v36 = vmul.f32 %v12240_v39, %v16495_v41 }
 0x7fe   :  { %v4818_v62 = vmax.f32 %v4786_v30, 0.0  ;;  %v12280_v30 = vmul.f32 %v5023_v26, %v16490_v60  ;;  %v4344_v33 = vmul.f32 %v12037_v1, %v16271_v4  ;;  %v12290_v57 = vadd.f32 %v5058_v46, %v4962_v24 }
 0x7ff   :  { %v4825_v8 = vmax.f32 %v4793_v51, 0.0  ;;  %v4620_v59 = vpop.permute.xlu1 %4619  ;;  %16504 = vst [vmem:[#allocation96_spill] sm:$0xff] %v12285_v36  ;;  %v12295_v11 = vmul.f32 %v5026_v6, %v16490_v60  ;;  %v4351_v26 = vmul.f32 %v12039_v17, %v16271_v4  ;;  %v5064_v1 = vmul.f32 %v5032_v54, %v16489_v56 }
 0x800   :  { %v4850_v10 = vmin.f32 %v4818_v62, 6.0  ;;  %v4725_v22 = vmul.f32 %v4620_v59, %v16272_v23  ;;  %v4648_v9 = vpop.permute.xlu2 %4647  ;;  %16503 = vst [vmem:[#allocation120_spill] sm:$0xff] %v12280_v30  ;;  %v12292_v62 = vld [vmem:[#allocation2 + $0x112] sm:$0xff]  ;;  %v4152_v46 = vmul.f32 %v11961_v7, %v16481_v44  ;;  %v4536_v24 = vmul.f32 %v12099_v19, %v16270_v45 }
 0x801   :  { %v4857_v43 = vmin.f32 %v4825_v8, 6.0  ;;  %v4732_v51 = vmul.f32 %v4648_v9, %v16272_v23  ;;  %16505 = vst [vmem:[#allocation149_spill] sm:$0xff] %v12290_v57  ;;  %v4968_v8 = vmul.f32 %v12277_v61, %v16488_v58  ;;  %v4159_v17 = vmul.f32 %v11963_v31, %v16481_v44  ;;  %v12333_v57 = vld [vmem:[#allocation2 + $0x180] sm:$0xff] }
 0x802   :  { %4882 = vst.msk [vmem:[#allocation2 + $0x49] sm:$0xff] %vm32_vm0, %v4850_v10  ;;  %v4757_v59 = vadd.f32 %v4725_v22, %v4565_v34  ;;  %v12309_v34 = vmul.f32 %v5029_v55, %v16489_v56  ;;  %v4543_v10 = vmul.f32 %v12101_v32, %v16270_v45  ;;  %v12318_v9 = vmul.f32 %v12292_v62, %v16486_v48 }
 0x803   :  { %16506 = vst [vmem:[#allocation150_spill] sm:$0xff] %v12295_v11  ;;  %v4764_v20 = vadd.f32 %v4732_v51, %v4572_v21  ;;  %v4376_v7 = vadd.f32 %v4344_v33, %v4152_v46  ;;  %v12322_v19 = vmul.f32 %v12277_v61, %v16495_v41  ;;  %v4383_v51 = vadd.f32 %v4351_v26, %v4159_v17  ;;  %v5035_v11 = vld [vmem:[#allocation2 + $0x159] sm:$0xff] }
 0x804   :  { %4889 = vst.msk [vmem:[#allocation2 + $0x99] sm:$0xff] %vm32_vm0, %v4857_v43  ;;  %v4789_v6 = vadd.f32 %v12145_v53, %v4757_v59  ;;  %v12325_v43 = vmul.f32 %v5029_v55, %v16490_v60  ;;  %v12327_v32 = vadd.f32 %v5064_v1, %v4968_v8  ;;  %v12330_v30 = vmul.f32 %v5032_v54, %v16490_v60  ;;  %v12340_v1 = vld [vmem:[#allocation2 + $0x181] sm:$0xff] }
 0x805   :  { %v4796_v22 = vadd.f32 %v12145_v53, %v4764_v20  ;;  %v5131_v20 = vld [vmem:[#allocation2 + $0x15a] sm:$0xff]  ;;  %v4568_v36 = vadd.f32 %v4536_v24, %v4376_v7  ;;  %v12337_v55 = vmul.f32 %v12217_v28, %v16492_v35  ;;  %v4575_v26 = vadd.f32 %v4543_v10, %v4383_v51 }
 0x806   :  { %v4821_v21 = vmax.f32 %v4789_v6, 0.0  ;;  %16507 = vst [vmem:[#allocation121_spill] sm:$0xff] %v12325_v43  ;;  %v4347_v24 = vmul.f32 %v12043_v27, %v16271_v4  ;;  %v12353_v28 = vmul.f32 %v5131_v20, %v16486_v48  ;;  %v4354_v10 = vmul.f32 %v12045_v0, %v16271_v4 }
 0x807   :  { %v4828_v31 = vmax.f32 %v4796_v22, 0.0  ;;  %v4632_v59 = vpop.permute.xlu1 %4631  ;;  %16508 = vst [vmem:[#allocation128_spill] sm:$0xff] %v12330_v30  ;;  %v16510_v22 = vld [vmem:[#allocation50_spill] sm:$0xff]  ;;  %v12363_v27 = vmul.f32 %v5035_v11, %v16490_v60  ;;  %v12372_v0 = vmul.f32 %v12340_v1, %v16490_v60 }
 0x808   :  { %v4853_v33 = vmin.f32 %v4821_v21, 6.0  ;;  %v4728_v46 = vmul.f32 %v4632_v59, %v16272_v23  ;;  %v4660_v6 = vpop.permute.xlu2 %4659  ;;  %16509 = vst [vmem:[#allocation152_spill] sm:$0xff] %v12337_v55  ;;  %v12344_v54 = vmul.f32 %v12175_v50, %v16510_v22  ;;  %v12350_v21 = vmul.f32 %v5035_v11, %v16489_v56 }
 0x809   :  { %v4860_v17 = vmin.f32 %v4828_v31, 6.0  ;;  %v4735_v8 = vmul.f32 %v4660_v6, %v16272_v23  ;;  %v12360_v50 = vmul.f32 %v12333_v57, %v16495_v41  ;;  %16513 = vst [vmem:[#allocation123_spill] sm:$0xff] %v12363_v27  ;;  %v4155_v31 = vmul.f32 %v11967_v25, %v16481_v44 }
 0x80a   :  { %16511 = vst [vmem:[#allocation153_spill] sm:$0xff] %v12344_v54  ;;  %v4760_v7 = vadd.f32 %v4728_v46, %v4568_v36  ;;  %v5586_v36 = vld [vmem:[#allocation2 + $0x61] sm:$0xff]  ;;  %v4539_v59 = vmul.f32 %v12105_v12, %v16270_v45  ;;  %v4162_v46 = vmul.f32 %v11969_v63, %v16481_v44  ;;  %v4546_v11 = vmul.f32 %v12107_v42, %v16270_v45  ;;  %v16517_v54 = vld [vmem:[#allocation32_spill] sm:$0xff] }
 0x80b   :  { %4885 = vst.msk [vmem:[#allocation2 + $0x69] sm:$0xff] %vm32_vm0, %v4853_v33  ;;  %v4767_v51 = vadd.f32 %v4735_v8, %v4575_v26  ;;  %v12381_v25 = vmul.f32 %v12254_v2, %v16492_v35  ;;  %v5589_v26 = vld [vmem:[#allocation2 + $0x81] sm:$0xff]  ;;  %v4379_v12 = vadd.f32 %v4347_v24, %v4155_v31  ;;  %v12385_v8 = vmul.f32 %v12206_v15, %v16510_v22 }
 0x80c   :  { %4892 = vst.msk [vmem:[#allocation2 + $0xc1] sm:$0xff] %vm32_vm0, %v4860_v17  ;;  %v4792_v33 = vadd.f32 %v12145_v53, %v4760_v7  ;;  %v5592_v7 = vld [vmem:[#allocation2 + $0xa9] sm:$0xff]  ;;  %v12388_v55 = vmul.f32 %v5586_v36, %v16517_v54  ;;  %v4386_v63 = vadd.f32 %v4354_v10, %v4162_v46  ;;  %v12396_v2 = vmul.f32 %v12240_v39, %v16510_v22 }
 0x80d   :  { %16512 = vst [vmem:[#allocation173_spill] sm:$0xff] %v12360_v50  ;;  %v4799_v6 = vadd.f32 %v12145_v53, %v4767_v51  ;;  %v12392_v51 = vmul.f32 %v12292_v62, %v16492_v35  ;;  %v4571_v24 = vadd.f32 %v4539_v59, %v4379_v12  ;;  %v12400_v36 = vmul.f32 %v5589_v26, %v16517_v54  ;;  %v5685_v10 = vld [vmem:[#allocation2 + $0x82] sm:$0xff]  ;;  %v5598_v62 = vld [vmem:[#allocation2 + $0xf1] sm:$0xff] }
 0x80e   :  { %16514 = vst [vmem:[#allocation124_spill] sm:$0xff] %v12372_v0  ;;  %v4824_v17 = vmax.f32 %v4792_v33, 0.0  ;;  %v4578_v46 = vadd.f32 %v4546_v11, %v4386_v63  ;;  %v4350_v39 = vmul.f32 %v12049_v14, %v16271_v4  ;;  %v12410_v12 = vmul.f32 %v5131_v20, %v16492_v35  ;;  %v5691_v14 = vld [vmem:[#allocation2 + $0xca] sm:$0xff] }
 0x80f   :  { %16515 = vst [vmem:[#allocation131_spill] sm:$0xff] %v12381_v25  ;;  %v4831_v0 = vmax.f32 %v4799_v6, 0.0  ;;  %v4644_v42 = vpop.permute.xlu1 %4643  ;;  %v12414_v26 = vmul.f32 %v12277_v61, %v16510_v22  ;;  %v16526_v63 = vld [vmem:[#allocation34_spill] sm:$0xff]  ;;  %v4158_v20 = vmul.f32 %v11973_v52, %v16481_v44  ;;  %v4542_v61 = vmul.f32 %v12111_v38, %v16270_v45 }
 0x810   :  { %16516 = vst [vmem:[#allocation174_spill] sm:$0xff] %v12385_v8  ;;  %v4856_v31 = vmin.f32 %v4824_v17, 6.0  ;;  %v4731_v15 = vmul.f32 %v4644_v42, %v16272_v23  ;;  %v4672_v33 = vpop.permute.xlu2 %4671  ;;  %v5595_v8 = vld [vmem:[#allocation2 + $0xc9] sm:$0xff]  ;;  %v5601_v17 = vld [vmem:[#allocation2 + $0x111] sm:$0xff]  ;;  %v12423_v42 = vmul.f32 %v5685_v10, %v16526_v63  ;;  %v12440_v52 = vmul.f32 %v12333_v57, %v16510_v22  ;;  %v12619_v22 = vld [vmem:[#allocation2 + $0x9a] sm:$0xff] }
 0x811   :  { %16518 = vst [vmem:[#allocation155_spill] sm:$0xff] %v12388_v55  ;;  %v4863_v6 = vmin.f32 %v4831_v0, 6.0  ;;  %v4738_v55 = vmul.f32 %v4672_v33, %v16272_v23  ;;  %v4357_v0 = vmul.f32 %v12051_v47, %v16271_v4  ;;  %v5604_v47 = vld [vmem:[#allocation2 + $0x139] sm:$0xff]  ;;  %v4382_v33 = vadd.f32 %v4350_v39, %v4158_v20 }
 0x812   :  { %16519 = vst [vmem:[#allocation156_spill] sm:$0xff] %v12392_v51  ;;  %v12404_v51 = vmul.f32 %v5592_v7, %v16517_v54  ;;  %v4763_v59 = vadd.f32 %v4731_v15, %v4571_v24  ;;  %v12420_v7 = vmul.f32 %v5595_v8, %v16517_v54  ;;  %v4549_v8 = vmul.f32 %v12113_v3, %v16270_v45  ;;  %v12623_v25 = vld [vmem:[#allocation2 + $0x68] sm:$0xff] }
 0x813   :  { %16520 = vst [vmem:[#allocation175_spill] sm:$0xff] %v12396_v2  ;;  %v4770_v11 = vadd.f32 %v4738_v55, %v4578_v46  ;;  %v4165_v55 = vmul.f32 %v11975_v18, %v16481_v44  ;;  %v12443_v10 = vmul.f32 %v5601_v17, %v16517_v54  ;;  %v5697_v46 = vld [vmem:[#allocation2 + $0x112] sm:$0xff]  ;;  %v4353_v18 = vmul.f32 %v12055_v40, %v16271_v4  ;;  %v12625_v50 = vld [vmem:[#allocation2 + $0x69] sm:$0xff] }
 0x814   :  { %16521 = vst [vmem:[#allocation126_spill] sm:$0xff] %v12400_v36  ;;  %v4795_v24 = vadd.f32 %v12145_v53, %v4763_v59  ;;  %v4360_v57 = vmul.f32 %v12057_v29, %v16271_v4  ;;  %v4574_v39 = vadd.f32 %v4542_v61, %v4382_v33  ;;  %v12458_v40 = vmul.f32 %v5697_v46, %v16526_v63  ;;  %v5006_v29 = vld [vmem:[#allocation2 + $0x1] sm:$0xff] }
 0x815   :  { %16522 = vst [vmem:[#allocation134_spill] sm:$0xff] %v12404_v51  ;;  %v4802_v15 = vadd.f32 %v12145_v53, %v4770_v11  ;;  %v5607_v11 = vld [vmem:[#allocation2 + $0x159] sm:$0xff]  ;;  %v16537_v46 = vld [vmem:[#allocation110_spill] sm:$0xff] }
 0x816   :  { %4888 = vst.msk [vmem:[#allocation2 + $0x91] sm:$0xff] %vm32_vm0, %v4856_v31  ;;  %v12431_v31 = vmul.f32 %v5598_v62, %v16517_v54  ;;  %v4827_v38 = vmax.f32 %v4795_v24, 0.0  ;;  %v4389_v62 = vadd.f32 %v4357_v0, %v4165_v55  ;;  %v4161_v55 = vmul.f32 %v11979_v5, %v16481_v44  ;;  %v12627_v27 = vld [vmem:[#allocation2 + $0x62] sm:$0xff] }
 0x817   :  { %16523 = vst [vmem:[#allocation176_spill] sm:$0xff] %v12410_v12  ;;  %v4834_v3 = vmax.f32 %v4802_v15, 0.0  ;;  %v4656_v59 = vpop.permute.xlu1 %4655  ;;  %v12466_v33 = vmul.f32 %v5607_v11, %v16517_v54  ;;  %v16539_v11 = vld [vmem:[#allocation70_spill] sm:$0xff] }
 0x818   :  { %16524 = vst [vmem:[#allocation200_spill] sm:$0xff] %v12414_v26  ;;  %v4859_v17 = vmin.f32 %v4827_v38, 6.0  ;;  %v4734_v20 = vmul.f32 %v4656_v59, %v16272_v23  ;;  %v4684_v24 = vpop.permute.xlu2 %4683  ;;  %v5007_v59 = vld [vmem:[#allocation2 + $0x9] sm:$0xff] }
 0x819   :  { %4895 = vst.msk [vmem:[#allocation2 + $0xe1] sm:$0xff] %vm32_vm0, %v4863_v6  ;;  %v12446_v6 = vmul.f32 %v5691_v14, %v16526_v63  ;;  %v4581_v14 = vadd.f32 %v4549_v8, %v4389_v62  ;;  %v4741_v0 = vmul.f32 %v4684_v24, %v16272_v23  ;;  %v16536_v8 = vld [vmem:[#allocation63_spill] sm:$0xff]  ;;  %v4171_v62 = vmul.f32 %v16537_v46, %v16481_v44 }
 0x81a   :  { %16525 = vst [vmem:[#allocation201_spill] sm:$0xff] %v12420_v7  ;;  %v4766_v61 = vadd.f32 %v4734_v20, %v4574_v39  ;;  %v4164_v38 = vmul.f32 %v16536_v8, %v16481_v44  ;;  %v12475_v24 = vmul.f32 %v12340_v1, %v16517_v54  ;;  %v4545_v20 = vmul.f32 %v16539_v11, %v16270_v45  ;;  %v16540_v8 = vld [vmem:[#allocation73_spill] sm:$0xff]  ;;  %v16541_v1 = vld [vmem:[#allocation64_spill] sm:$0xff]  ;;  %v16543_v11 = vld [vmem:[#allocation119_spill] sm:$0xff] }
 0x81b   :  { %16527 = vst [vmem:[#allocation179_spill] sm:$0xff] %v12423_v42  ;;  %v4773_v5 = vadd.f32 %v4741_v0, %v4581_v14  ;;  %v4356_v0 = vmul.f32 %v16541_v1, %v16271_v4 }
 0x81c   :  { %16528 = vst [vmem:[#allocation127_spill] sm:$0xff] %v12431_v31  ;;  %v12451_v31 = vmul.f32 %v5604_v47, %v16517_v54  ;;  %v16534_v47 = vld [vmem:[#allocation116_spill] sm:$0xff] }
 0x81d   :  { %16529 = vst [vmem:[#allocation158_spill] sm:$0xff] %v12440_v52  ;;  %v4168_v15 = vmul.f32 %v16534_v47, %v16481_v44  ;;  %v4798_v47 = vadd.f32 %v12145_v53, %v4766_v61  ;;  %v4805_v14 = vadd.f32 %v12145_v53, %v4773_v5  ;;  %v12578_v54 = vld [vmem:[#allocation2 + $0x7a] sm:$0xff]  ;;  %v12679_v30 = vld [vmem:[#allocation2 + $0x90] sm:$0xff] }
 0x81e   :  { %16530 = vst [vmem:[#allocation159_spill] sm:$0xff] %v12443_v10  ;;  %v4866_v10 = vmin.f32 %v4834_v3, 6.0  ;;  %v4911_v3 = vld [vmem:[#allocation2 + $0x8] sm:$0xff] }
 0x81f   :  { %16531 = vst [vmem:[#allocation177_spill] sm:$0xff] %v12446_v6  ;;  %v4392_v39 = vadd.f32 %v4360_v57, %v4168_v15  ;;  %v5039_v57 = vmul.f32 %v5007_v59, %v16489_v56  ;;  %v16542_v15 = vld [vmem:[#allocation81_spill] sm:$0xff]  ;;  %v4837_v6 = vmax.f32 %v4805_v14, 0.0  ;;  %v4668_v5 = vpop.permute.xlu1 %4667  ;;  %v16547_v14 = vld [vmem:[#allocation66_spill] sm:$0xff] }
 0x820   :  { %16532 = vst [vmem:[#allocation98_spill] sm:$0xff] %v12451_v31  ;;  %v4910_v31 = vld [vmem:[#allocation2] sm:$0xff]  ;;  %v4363_v61 = vmul.f32 %v16542_v15, %v16271_v4  ;;  %v4696_v59 = vpop.permute.xlu2 %4695 }
 0x821   :  { %16533 = vst [vmem:[#allocation178_spill] sm:$0xff] %v12458_v40  ;;  %v4942_v46 = vmul.f32 %v4910_v31, %v16488_v58  ;;  %v5038_v40 = vmul.f32 %v5006_v29, %v16489_v56  ;;  %v16544_v31 = vld [vmem:[#allocation67_spill] sm:$0xff]  ;;  %v4869_v36 = vmin.f32 %v4837_v6, 6.0  ;;  %v4744_v15 = vmul.f32 %v4696_v59, %v16272_v23 }
 0x822   :  { %4891 = vst.msk [vmem:[#allocation2 + $0xb1] sm:$0xff] %vm32_vm0, %v4859_v17  ;;  %v4385_v17 = vadd.f32 %v4353_v18, %v4161_v55  ;;  %v4943_v18 = vmul.f32 %v4911_v3, %v16488_v58  ;;  %v4830_v55 = vmax.f32 %v4798_v47, 0.0  ;;  %v4362_v29 = vmul.f32 %v16544_v31, %v16271_v4 }
 0x823   :  { %16535 = vst [vmem:[#allocation203_spill] sm:$0xff] %v12466_v33  ;;  %v4552_v33 = vmul.f32 %v16540_v8, %v16270_v45  ;;  %v4359_v8 = vmul.f32 %v16543_v11, %v16271_v4  ;;  %v4737_v3 = vmul.f32 %v4668_v5, %v16272_v23  ;;  %v5070_v51 = vadd.f32 %v5038_v40, %v4942_v46  ;;  %v16545_v11 = vld [vmem:[#allocation65_spill] sm:$0xff]  ;;  %v16548_v40 = vld [vmem:[#allocation144_spill] sm:$0xff] }
 0x824   :  { %4898 = vst.msk [vmem:[#allocation2 + $0x109] sm:$0xff] %vm32_vm0, %v4866_v10  ;;  %v5102_v10 = vld [vmem:[#allocation2 + $0x2] sm:$0xff]  ;;  %v4577_v7 = vadd.f32 %v4545_v20, %v4385_v17  ;;  %v4862_v42 = vmin.f32 %v4830_v55, 6.0  ;;  %v4167_v52 = vmul.f32 %v16545_v11, %v16481_v44  ;;  %v5071_v26 = vadd.f32 %v5039_v57, %v4943_v18 }
 0x825   :  { %16538 = vst [vmem:[#allocation99_spill] sm:$0xff] %v12475_v24  ;;  %v5103_v24 = vld [vmem:[#allocation2 + $0xa] sm:$0xff]  ;;  %v5134_v1 = vmul.f32 %v5102_v10, %v16486_v48  ;;  %v4584_v47 = vadd.f32 %v4552_v33, %v4392_v39  ;;  %v16546_v20 = vld [vmem:[#allocation61_spill] sm:$0xff]  ;;  %v4173_v55 = vmul.f32 %v16547_v14, %v16481_v44  ;;  %v4548_v6 = vmul.f32 %v16548_v40, %v16270_v45  ;;  %v4912_v33 = vld [vmem:[#allocation2 + $0x18] sm:$0xff] }
 0x826   :  { %v5135_v31 = vmul.f32 %v5103_v24, %v16486_v48  ;;  %4894 = vst.msk [vmem:[#allocation2 + $0xd9] sm:$0xff] %vm32_vm0, %v4862_v42  ;;  %v4769_v17 = vadd.f32 %v4737_v3, %v4577_v7  ;;  %v4170_v10 = vmul.f32 %v16546_v20, %v16481_v44  ;;  %v4913_v39 = vld [vmem:[#allocation2 + $0x20] sm:$0xff]  ;;  %v4388_v18 = vadd.f32 %v4356_v0, %v4164_v38  ;;  %v16549_v24 = vld [vmem:[#allocation76_spill] sm:$0xff] }
 0x827   :  { %4901 = vst.msk [vmem:[#allocation2 + $0x129] sm:$0xff] %vm32_vm0, %v4869_v36  ;;  %v4776_v46 = vadd.f32 %v4744_v15, %v4584_v47  ;;  %v4395_v57 = vadd.f32 %v4363_v61, %v4171_v62  ;;  %v4555_v42 = vmul.f32 %v16549_v24, %v16270_v45  ;;  %v4391_v5 = vadd.f32 %v4359_v8, %v4167_v52  ;;  %v5008_v20 = vld [vmem:[#allocation2 + $0x19] sm:$0xff]  ;;  %v4680_v52 = vpop.permute.xlu1 %4679 }
 0x828   :  { %v4801_v7 = vadd.f32 %v12145_v53, %v4769_v17  ;;  %v4394_v3 = vadd.f32 %v4362_v29, %v4170_v10  ;;  %v5166_v59 = vadd.f32 %v5134_v1, %v5070_v51  ;;  %v5167_v11 = vadd.f32 %v5135_v31, %v5071_v26  ;;  %v16550_v38 = vld [vmem:[#allocation112_spill] sm:$0xff]  ;;  %v16552_v51 = vld [vmem:[#allocation86_spill] sm:$0xff]  ;;  %v4708_v31 = vpop.permute.xlu2 %4707  ;;  %16565 = vst [vmem:[#allocation180_spill] sm:$0xff] %v12578_v54 }
 0x829   :  { %v4808_v44 = vadd.f32 %v12145_v53, %v4776_v46  ;;  %v5230_v14 = vmul.f32 %v4912_v33, %v16495_v41  ;;  %v5231_v40 = vmul.f32 %v4913_v39, %v16495_v41  ;;  %v4365_v62 = vmul.f32 %v16550_v38, %v16271_v4  ;;  %v16551_v61 = vld [vmem:[#allocation84_spill] sm:$0xff]  ;;  %16572 = vst [vmem:[#allocation46_spill] sm:$0xff] %v12619_v22 }
 0x82a   :  { %v4833_v36 = vmax.f32 %v4801_v7, 0.0  ;;  %v4580_v0 = vadd.f32 %v4548_v6, %v4388_v18  ;;  %v4551_v47 = vmul.f32 %v16551_v61, %v16270_v45  ;;  %v4587_v8 = vadd.f32 %v4555_v42, %v4395_v57  ;;  %v5703_v17 = vld [vmem:[#allocation2 + $0x15a] sm:$0xff]  ;;  %16573 = vst [vmem:[#allocation37_spill] sm:$0xff] %v12623_v25 }
 0x82b   :  { %v4840_v15 = vmax.f32 %v4808_v44, 0.0  ;;  %v4554_v29 = vmul.f32 %v16552_v51, %v16270_v45  ;;  %v4740_v1 = vmul.f32 %v4680_v52, %v16272_v23  ;;  %v4944_v10 = vmul.f32 %v4912_v33, %v16488_v58  ;;  %v5104_v24 = vld [vmem:[#allocation2 + $0x1a] sm:$0xff]  ;;  %v16559_v51 = vld [vmem:[#allocation90_spill] sm:$0xff]  ;;  %16574 = vst [vmem:[#allocation132_spill] sm:$0xff] %v12627_v27 }
 0x82c   :  { %v4865_v26 = vmin.f32 %v4833_v36, 6.0  ;;  %v5040_v46 = vmul.f32 %v5008_v20, %v16489_v56  ;;  %v4747_v6 = vmul.f32 %v4708_v31, %v16272_v23  ;;  %v4945_v18 = vmul.f32 %v4913_v39, %v16488_v58  ;;  %v16554_v39 = vld [vmem:[#allocation87_spill] sm:$0xff]  ;;  %16577 = vst [vmem:[#allocation164_spill] sm:$0xff] %v12679_v30 }
 0x82d   :  { %v4872_v4 = vmin.f32 %v4840_v15, 6.0  ;;  %v5262_v7 = vadd.f32 %v5230_v14, %v5166_v59  ;;  %v5263_v57 = vadd.f32 %v5231_v40, %v5167_v11  ;;  %v4772_v42 = vadd.f32 %v4740_v1, %v4580_v0  ;;  %v12537_v11 = vld [vmem:[#allocation2 + $0x30] sm:$0xff]  ;;  %v12539_v14 = vld [vmem:[#allocation2 + $0x38] sm:$0xff]  ;;  %v12552_v1 = vld [vmem:[#allocation2 + $0x80] sm:$0xff] }
 0x82e   :  { %4897 = vst.msk [vmem:[#allocation2 + $0xf9] sm:$0xff] %vm32_vm0, %v4865_v26  ;;  %v4397_v44 = vadd.f32 %v4365_v62, %v4173_v55  ;;  %v4583_v36 = vadd.f32 %v4551_v47, %v4391_v5  ;;  %v4779_v38 = vadd.f32 %v4747_v6, %v4587_v8  ;;  %v12529_v33 = vmul.f32 %v5703_v17, %v16526_v63  ;;  %v12541_v55 = vld [vmem:[#allocation2 + $0x31] sm:$0xff]  ;;  %v12548_v0 = vld [vmem:[#allocation2 + $0x79] sm:$0xff] }
 0x82f   :  { %4904 = vst.msk [vmem:[#allocation2 + $0x151] sm:$0xff] %vm32_vm0, %v4872_v4  ;;  %v5326_v61 = vmul.f32 %v5008_v20, %v16490_v60  ;;  %v12532_v15 = vadd.f32 %v4554_v29, %v4394_v3  ;;  %v4557_v52 = vmul.f32 %v16554_v39, %v16270_v45  ;;  %v4804_v59 = vadd.f32 %v12145_v53, %v4772_v42  ;;  %v12546_v3 = vld [vmem:[#allocation2 + $0x78] sm:$0xff]  ;;  %v4692_v17 = vpop.permute.xlu1 %4691 }
 0x830   :  { %16553 = vst [vmem:[#allocation204_spill] sm:$0xff] %v12529_v33  ;;  %v5072_v5 = vadd.f32 %v5040_v46, %v4944_v10  ;;  %v5136_v40 = vmul.f32 %v5104_v24, %v16486_v48  ;;  %v5422_v62 = vmul.f32 %v5104_v24, %v16492_v35  ;;  %v4811_v20 = vadd.f32 %v12145_v53, %v4779_v38  ;;  %v16558_v45 = vld [vmem:[#allocation92_spill] sm:$0xff] }
 0x831   :  { %16555 = vst [vmem:[#allocation129_spill] sm:$0xff] %v12537_v11  ;;  %v5073_v47 = vadd.f32 %v16558_v45, %v4945_v18  ;;  %v5358_v8 = vadd.f32 %v5326_v61, %v5262_v7  ;;  %v5359_v29 = vadd.f32 %v16559_v51, %v5263_v57  ;;  %v4836_v26 = vmax.f32 %v4804_v59, 0.0  ;;  %v5011_v4 = vld [vmem:[#allocation2 + $0x39] sm:$0xff] }
 0x832   :  { %16556 = vst [vmem:[#allocation56_spill] sm:$0xff] %v12539_v14  ;;  %v4843_v31 = vmax.f32 %v4811_v20, 0.0  ;;  %v4946_v10 = vmul.f32 %v12537_v11, %v16488_v58  ;;  %v4947_v46 = vmul.f32 %v12539_v14, %v16488_v58  ;;  %v5042_v6 = vmul.f32 %v12541_v55, %v16489_v56  ;;  %v12565_v42 = vld [vmem:[#allocation2 + $0x3a] sm:$0xff]  ;;  %v5013_v20 = vld [vmem:[#allocation2 + $0x51] sm:$0xff] }
 0x833   :  { %16557 = vst [vmem:[#allocation130_spill] sm:$0xff] %v12546_v3  ;;  %v4868_v24 = vmin.f32 %v4836_v26, 6.0  ;;  %v4743_v18 = vmul.f32 %v4692_v17, %v16272_v23  ;;  %v4952_v7 = vmul.f32 %v12546_v3, %v16488_v58  ;;  %v5048_v57 = vmul.f32 %v12548_v0, %v16489_v56  ;;  %v16562_v45 = vld [vmem:[#allocation89_spill] sm:$0xff]  ;;  %v12576_v63 = vld [vmem:[#allocation2 + $0x32] sm:$0xff] }
 0x834   :  { %16560 = vst [vmem:[#allocation161_spill] sm:$0xff] %v12552_v1  ;;  %v5168_v38 = vadd.f32 %v5136_v40, %v5072_v5  ;;  %v12567_v61 = vadd.f32 %v4557_v52, %v4397_v44  ;;  %v4875_v39 = vmin.f32 %v4843_v31, 6.0  ;;  %v4953_v59 = vmul.f32 %v12552_v1, %v16488_v58  ;;  %v16566_v44 = vld [vmem:[#allocation122_spill] sm:$0xff]  ;;  %v12592_v31 = vld [vmem:[#allocation2 + $0x50] sm:$0xff] }
 0x835   :  { %16561 = vst [vmem:[#allocation60_spill] sm:$0xff] %v12565_v42  ;;  %v5169_v51 = vadd.f32 %v16562_v45, %v5073_v47  ;;  %v12572_v26 = vadd.f32 %v5422_v62, %v5358_v8  ;;  %v4775_v17 = vadd.f32 %v4743_v18, %v4583_v36  ;;  %v5043_v33 = vmul.f32 %v5011_v4, %v16489_v56  ;;  %v12584_v5 = vld [vmem:[#allocation2 + $0x48] sm:$0xff]  ;;  %v12595_v45 = vld [vmem:[#allocation2 + $0x52] sm:$0xff] }
 0x836   :  { %4900 = vst.msk [vmem:[#allocation2 + $0x121] sm:$0xff] %vm32_vm0, %v4868_v24  ;;  %v12581_v52 = vadd.f32 %v16566_v44, %v5359_v29  ;;  %v5012_v40 = vld [vmem:[#allocation2 + $0x49] sm:$0xff]  ;;  %v5074_v47 = vadd.f32 %v5042_v6, %v4946_v10  ;;  %v5139_v62 = vmul.f32 %v12565_v42, %v16486_v48  ;;  %v12589_v36 = vmul.f32 %v5011_v4, %v16490_v60 }
 0x837   :  { %16563 = vst [vmem:[#allocation162_spill] sm:$0xff] %v12572_v26  ;;  %v4807_v8 = vadd.f32 %v12145_v53, %v4775_v17  ;;  %v5045_v24 = vmul.f32 %v5013_v20, %v16489_v56  ;;  %v5075_v29 = vadd.f32 %v5043_v33, %v4947_v46  ;;  %v5080_v18 = vadd.f32 %v5048_v57, %v4952_v7  ;;  %v4704_v7 = vpop.permute.xlu1 %4703  ;;  %v5019_v57 = vld [vmem:[#allocation2 + $0x99] sm:$0xff] }
 0x838   :  { %16564 = vst [vmem:[#allocation68_spill] sm:$0xff] %v12576_v63  ;;  %v5138_v10 = vmul.f32 %v12576_v63, %v16486_v48  ;;  %v5144_v6 = vmul.f32 %v12578_v54, %v16486_v48  ;;  %v5232_v4 = vmul.f32 %v12537_v11, %v16495_v41  ;;  %v4948_v44 = vmul.f32 %v12584_v5, %v16488_v58  ;;  %v12617_v11 = vld [vmem:[#allocation2 + $0x4a] sm:$0xff] }
 0x839   :  { %16567 = vst [vmem:[#allocation69_spill] sm:$0xff] %v12581_v52  ;;  %v4839_v17 = vmax.f32 %v4807_v8, 0.0  ;;  %v5044_v33 = vmul.f32 %v5012_v40, %v16489_v56  ;;  %v5233_v46 = vmul.f32 %v12539_v14, %v16495_v41  ;;  %v12614_v52 = vmul.f32 %v5013_v20, %v16490_v60 }
 0x83a   :  { %4907 = vst.msk [vmem:[#allocation2 + $0x171] sm:$0xff] %vm32_vm0, %v4875_v39  ;;  %v5081_v39 = vadd.f32 %v12231_v13, %v4953_v59  ;;  %v4949_v13 = vmul.f32 %v12592_v31, %v16488_v58  ;;  %v5141_v59 = vmul.f32 %v12595_v45, %v16486_v48  ;;  %v5170_v2 = vadd.f32 %v5138_v10, %v5074_v47 }
 0x83b   :  { %16568 = vst [vmem:[#allocation181_spill] sm:$0xff] %v12584_v5  ;;  %v4871_v8 = vmin.f32 %v4839_v17, 6.0  ;;  %v4746_v26 = vmul.f32 %v4704_v7, %v16272_v23  ;;  %v5171_v14 = vadd.f32 %v5139_v62, %v5075_v29  ;;  %v12621_v12 = vadd.f32 %v5144_v6, %v5080_v18  ;;  %v12642_v18 = vld [vmem:[#allocation2 + $0xc0] sm:$0xff]  ;;  %v12644_v6 = vld [vmem:[#allocation2 + $0xc8] sm:$0xff] }
 0x83c   :  { %16569 = vst [vmem:[#allocation101_spill] sm:$0xff] %v12592_v31  ;;  %v12630_v47 = vadd.f32 %v12235_v16, %v5081_v39  ;;  %v12634_v20 = vmul.f32 %v12546_v3, %v16495_v41  ;;  %v12638_v10 = vmul.f32 %v12552_v1, %v16495_v41  ;;  %v5264_v62 = vadd.f32 %v5232_v4, %v5168_v38  ;;  %v12646_v17 = vld [vmem:[#allocation2 + $0xc1] sm:$0xff] }
 0x83d   :  { %16570 = vst [vmem:[#allocation52_spill] sm:$0xff] %v12595_v45  ;;  %v4778_v29 = vadd.f32 %v4746_v26, %v12532_v15  ;;  %v12649_v16 = vmul.f32 %v5019_v57, %v16489_v56  ;;  %v5076_v39 = vadd.f32 %v5044_v33, %v4948_v44  ;;  %v5265_v7 = vadd.f32 %v5233_v46, %v5169_v51  ;;  %v12681_v45 = vld [vmem:[#allocation2 + $0x91] sm:$0xff] }
 0x83e   :  { %16571 = vst [vmem:[#allocation102_spill] sm:$0xff] %v12617_v11  ;;  %v5077_v3 = vadd.f32 %v5045_v24, %v4949_v13  ;;  %v5140_v1 = vmul.f32 %v12617_v11, %v16486_v48  ;;  %v5234_v38 = vmul.f32 %v12584_v5, %v16495_v41  ;;  %v5235_v15 = vmul.f32 %v12592_v31, %v16495_v41 }
 0x83f   :  { %4903 = vst.msk [vmem:[#allocation2 + $0x141] sm:$0xff] %vm32_vm0, %v4871_v8  ;;  %v4810_v26 = vadd.f32 %v12145_v53, %v4778_v29  ;;  %v4951_v4 = vmul.f32 %v12623_v25, %v16488_v58  ;;  %v5047_v8 = vmul.f32 %v12625_v50, %v16489_v56  ;;  %v12664_v51 = vmul.f32 %v12619_v22, %v16486_v48  ;;  %v12674_v29 = vld [vmem:[#allocation2 + $0x6a] sm:$0xff]  ;;  %v4716_v54 = vpop.permute.xlu1 %4715 }
 0x840   :  { %16575 = vst [vmem:[#allocation3_spill] sm:$0xff] %v12642_v18  ;;  %v4958_v24 = vmul.f32 %v12642_v18, %v16488_v58  ;;  %v4959_v44 = vmul.f32 %v12644_v6, %v16488_v58  ;;  %v5054_v33 = vmul.f32 %v12646_v17, %v16489_v56  ;;  %v5142_v46 = vmul.f32 %v12627_v27, %v16486_v48 }
 0x841   :  { %16576 = vst [vmem:[#allocation133_spill] sm:$0xff] %v12644_v6  ;;  %v4842_v13 = vmax.f32 %v4810_v26, 0.0  ;;  %v5172_v31 = vadd.f32 %v5140_v1, %v5076_v39  ;;  %v5328_v5 = vmul.f32 %v12541_v55, %v16490_v60  ;;  %v5330_v22 = vmul.f32 %v5012_v40, %v16490_v60  ;;  %v12690_v39 = vld [vmem:[#allocation2 + $0x98] sm:$0xff]  ;;  %v12692_v40 = vld [vmem:[#allocation2 + $0xc2] sm:$0xff] }
 0x842   :  { %v5173_v11 = vadd.f32 %v5141_v59, %v5077_v3  ;;  %v5266_v42 = vadd.f32 %v5234_v38, %v5170_v2  ;;  %v12683_v63 = vadd.f32 %v5235_v15, %v5171_v14  ;;  %v12687_v26 = vmul.f32 %v12548_v0, %v16490_v60  ;;  %16578 = vst [vmem:[#allocation165_spill] sm:$0xff] %v12690_v39  ;;  %v16580_v3 = vld [vmem:[#allocation147_spill] sm:$0xff] }
 0x843   :  { %v4874_v27 = vmin.f32 %v4842_v13, 6.0  ;;  %v4749_v1 = vmul.f32 %v4716_v54, %v16272_v23  ;;  %v5079_v55 = vadd.f32 %v5047_v8, %v4951_v4  ;;  %16579 = vst [vmem:[#allocation71_spill] sm:$0xff] %v12692_v40  ;;  %v12695_v35 = vmul.f32 %v5019_v57, %v16490_v60  ;;  %v16581_v15 = vld [vmem:[#allocation115_spill] sm:$0xff]  ;;  %v12728_v13 = vld [vmem:[#allocation2 + $0x108] sm:$0xff] }
 0x844   :  { %v5086_v43 = vadd.f32 %v5054_v33, %v4958_v24  ;;  %v5087_v2 = vadd.f32 %v12270_v37, %v4959_v44  ;;  %v5143_v14 = vmul.f32 %v12674_v29, %v16486_v48  ;;  %v5174_v0 = vadd.f32 %v5142_v46, %v16580_v3  ;;  %v12719_v8 = vld [vmem:[#allocation2 + $0xb0] sm:$0xff]  ;;  %16586 = vst [vmem:[#allocation205_spill] sm:$0xff] %v12728_v13 }
 0x845   :  { %4906 = vst.msk [vmem:[#allocation2 + $0x169] sm:$0xff] %vm32_vm0, %v4874_v27  ;;  %v4781_v23 = vadd.f32 %v4749_v1, %v12567_v61  ;;  %v4954_v54 = vmul.f32 %v12679_v30, %v16488_v58  ;;  %v5050_v59 = vmul.f32 %v12681_v45, %v16489_v56  ;;  %v5237_v57 = vmul.f32 %v12623_v25, %v16495_v41  ;;  %v12721_v24 = vld [vmem:[#allocation2 + $0xb1] sm:$0xff]  ;;  %v12730_v1 = vld [vmem:[#allocation2 + $0x109] sm:$0xff] }
 0x846   :  { %v4955_v37 = vmul.f32 %v12690_v39, %v16488_v58  ;;  %v5150_v38 = vmul.f32 %v12692_v40, %v16486_v48  ;;  %v12714_v4 = vadd.f32 %v16581_v15, %v5172_v31  ;;  %v12716_v27 = vadd.f32 %v5328_v5, %v5264_v62  ;;  %16583 = vst [vmem:[#allocation72_spill] sm:$0xff] %v12719_v8 }
 0x847   :  { %v4813_v61 = vadd.f32 %v12145_v53, %v4781_v23  ;;  %v5175_v44 = vadd.f32 %v5143_v14, %v5079_v55  ;;  %v12724_v33 = vadd.f32 %v12589_v36, %v5265_v7  ;;  %v12726_v46 = vadd.f32 %v5330_v22, %v5266_v42  ;;  %v12745_v22 = vld [vmem:[#allocation2 + $0x110] sm:$0xff] }
 0x848   :  { %16582 = vst [vmem:[#allocation183_spill] sm:$0xff] %v12716_v27  ;;  %v12732_v31 = vadd.f32 %v5150_v38, %v5086_v43  ;;  %v12735_v5 = vadd.f32 %v12274_v49, %v5087_v2  ;;  %v12739_v53 = vmul.f32 %v12642_v18, %v16495_v41  ;;  %v12743_v62 = vmul.f32 %v12644_v6, %v16495_v41  ;;  %v12747_v7 = vld [vmem:[#allocation2 + $0x92] sm:$0xff]  ;;  %v5025_v2 = vld [vmem:[#allocation2 + $0xe1] sm:$0xff]  ;;  %v12755_v23 = vld [vmem:[#allocation2 + $0xaa] sm:$0xff] }
 0x849   :  { %16584 = vst [vmem:[#allocation184_spill] sm:$0xff] %v12724_v33  ;;  %v4845_v36 = vmax.f32 %v4813_v61, 0.0  ;;  %v5082_v42 = vadd.f32 %v5050_v59, %v4954_v54  ;;  %v5269_v55 = vadd.f32 %v5237_v57, %v5173_v11  ;;  %v5270_v43 = vadd.f32 %v12634_v20, %v5174_v0  ;;  %v12757_v38 = vld [vmem:[#allocation2 + $0xe2] sm:$0xff]  ;;  %v12769_v57 = vld [vmem:[#allocation2 + $0xb2] sm:$0xff] }
 0x84a   :  { %16585 = vst [vmem:[#allocation104_spill] sm:$0xff] %v12726_v46  ;;  %v4957_v49 = vmul.f32 %v12719_v8, %v16488_v58  ;;  %v5053_v14 = vmul.f32 %v12721_v24, %v16489_v56  ;;  %v5083_v3 = vadd.f32 %v12649_v16, %v4955_v37  ;;  %v5240_v54 = vmul.f32 %v12679_v30, %v16495_v41  ;;  %v12781_v6 = vld [vmem:[#allocation2 + $0xd9] sm:$0xff] }
 0x84b   :  { %16587 = vst [vmem:[#allocation105_spill] sm:$0xff] %v12745_v22  ;;  %v4877_v59 = vmin.f32 %v4845_v36, 6.0  ;;  %v4964_v11 = vmul.f32 %v12728_v13, %v16488_v58  ;;  %v5060_v20 = vmul.f32 %v12730_v1, %v16489_v56  ;;  %v5241_v0 = vmul.f32 %v12690_v39, %v16495_v41  ;;  %v12779_v36 = vld [vmem:[#allocation2 + $0xd8] sm:$0xff] }
 0x84c   :  { %16588 = vst [vmem:[#allocation206_spill] sm:$0xff] %v12755_v23  ;;  %v4965_v16 = vmul.f32 %v12745_v22, %v16488_v58  ;;  %v5146_v37 = vmul.f32 %v12747_v7, %v16486_v48  ;;  %v12774_v15 = vadd.f32 %v12638_v10, %v5175_v44  ;;  %v5333_v61 = vmul.f32 %v12625_v50, %v16490_v60  ;;  %v12792_v44 = vld [vmem:[#allocation2 + $0xe0] sm:$0xff] }
 0x84d   :  { %16589 = vst [vmem:[#allocation36_spill] sm:$0xff] %v12757_v38  ;;  %v5057_v18 = vmul.f32 %v5025_v2, %v16489_v56  ;;  %v5148_v39 = vmul.f32 %v12755_v23, %v16486_v48  ;;  %v5153_v30 = vmul.f32 %v12757_v38, %v16486_v48  ;;  %v12790_v10 = vmul.f32 %v12681_v45, %v16490_v60 }
 0x84e   :  { %16590 = vst [vmem:[#allocation135_spill] sm:$0xff] %v12769_v57  ;;  %v5085_v50 = vadd.f32 %v5053_v14, %v4957_v49  ;;  %v5178_v25 = vadd.f32 %v5146_v37, %v5082_v42  ;;  %v5179_v46 = vadd.f32 %v12664_v51, %v5083_v3  ;;  %v12799_v33 = vmul.f32 %v12646_v17, %v16490_v60  ;;  %v16594_v3 = vld [vmem:[#allocation125_spill] sm:$0xff] }
 0x84f   :  { %4909 = vst.msk [vmem:[#allocation2 + $0x189] sm:$0xff] %vm32_vm0, %v4877_v59  ;;  %v12794_v59 = vld [vmem:[#allocation2 + $0x10a] sm:$0xff]  ;;  %v5092_v27 = vadd.f32 %v5060_v20, %v4964_v11  ;;  %v5149_v38 = vmul.f32 %v12769_v57, %v16486_v48  ;;  %v12804_v40 = vadd.f32 %v5240_v54, %v12621_v12  ;;  %v12807_v45 = vadd.f32 %v5241_v0, %v12630_v47  ;;  %v12824_v11 = vld [vmem:[#allocation2 + $0xf8] sm:$0xff] }
 0x850   :  { %16591 = vst [vmem:[#allocation55_spill] sm:$0xff] %v12779_v36  ;;  %v4960_v49 = vmul.f32 %v12779_v36, %v16488_v58  ;;  %v5056_v51 = vmul.f32 %v12781_v6, %v16489_v56  ;;  %v5093_v42 = vadd.f32 %v12309_v34, %v4965_v16  ;;  %v5243_v17 = vmul.f32 %v12719_v8, %v16495_v41  ;;  %v12826_v20 = vld [vmem:[#allocation2 + $0xf9] sm:$0xff]  ;;  %v16596_v34 = vld [vmem:[#allocation95_spill] sm:$0xff] }
 0x851   :  { %16592 = vst [vmem:[#allocation136_spill] sm:$0xff] %v12792_v44  ;;  %v4961_v14 = vmul.f32 %v12792_v44, %v16488_v58  ;;  %v5156_v12 = vmul.f32 %v12794_v59, %v16486_v48  ;;  %v5180_v47 = vadd.f32 %v5148_v39, %v16594_v3  ;;  %v12822_v54 = vmul.f32 %v5025_v2, %v16490_v60  ;;  %v16598_v8 = vld [vmem:[#allocation93_spill] sm:$0xff] }
 0x852   :  { %16593 = vst [vmem:[#allocation166_spill] sm:$0xff] %v12794_v59  ;;  %v5181_v0 = vadd.f32 %v5149_v38, %v5085_v50  ;;  %v5274_v16 = vadd.f32 %v16596_v34, %v5178_v25  ;;  %v12831_v37 = vadd.f32 %v12614_v52, %v12683_v63  ;;  %v12835_v57 = vadd.f32 %v16598_v8, %v12714_v4  ;;  %v12837_v59 = vld [vmem:[#allocation2 + $0xda] sm:$0xff]  ;;  %v12850_v38 = vld [vmem:[#allocation2 + $0x150] sm:$0xff] }
 0x853   :  { %16595 = vst [vmem:[#allocation167_spill] sm:$0xff] %v12824_v11  ;;  %v12839_v39 = vadd.f32 %v5156_v12, %v5092_v27  ;;  %v12843_v2 = vmul.f32 %v12728_v13, %v16495_v41  ;;  %v12845_v3 = vadd.f32 %v5333_v61, %v5269_v55  ;;  %v12848_v25 = vadd.f32 %v12687_v26, %v5270_v43  ;;  %v5031_v63 = vld [vmem:[#allocation2 + $0x129] sm:$0xff]  ;;  %v12852_v52 = vld [vmem:[#allocation2 + $0x151] sm:$0xff]  ;;  %v12888_v34 = vld [vmem:[#allocation2 + $0x120] sm:$0xff] }
 0x854   :  { %16597 = vst [vmem:[#allocation74_spill] sm:$0xff] %v12831_v37  ;;  %v5088_v4 = vadd.f32 %v5056_v51, %v4960_v49  ;;  %v12855_v8 = vadd.f32 %v12318_v9, %v5093_v42  ;;  %v12859_v27 = vmul.f32 %v12745_v22, %v16495_v41  ;;  %v5275_v50 = vadd.f32 %v5243_v17, %v5179_v46  ;;  %v12861_v12 = vld [vmem:[#allocation2 + $0x158] sm:$0xff]  ;;  %v12869_v49 = vld [vmem:[#allocation2 + $0x12a] sm:$0xff]  ;;  %v12892_v13 = vld [vmem:[#allocation2 + $0x121] sm:$0xff] }
 0x855   :  { %16599 = vst [vmem:[#allocation186_spill] sm:$0xff] %v12835_v57  ;;  %v4963_v26 = vmul.f32 %v12824_v11, %v16488_v58  ;;  %v5059_v55 = vmul.f32 %v12826_v20, %v16489_v56  ;;  %v5089_v43 = vadd.f32 %v5057_v18, %v4961_v14  ;;  %v12867_v61 = vld [vmem:[#allocation2 + $0xf2] sm:$0xff]  ;;  %v12872_v9 = vadd.f32 %v12739_v53, %v5180_v47 }
 0x856   :  { %16600 = vst [vmem:[#allocation75_spill] sm:$0xff] %v12837_v59  ;;  %v5152_v51 = vmul.f32 %v12837_v59, %v16486_v48  ;;  %v5246_v46 = vmul.f32 %v12779_v36, %v16495_v41  ;;  %v5247_v42 = vmul.f32 %v12792_v44, %v16495_v41  ;;  %v5277_v17 = vadd.f32 %v12743_v62, %v5181_v0  ;;  %v12894_v44 = vld [vmem:[#allocation2 + $0xfa] sm:$0xff]  ;;  %v12908_v37 = vld [vmem:[#allocation2 + $0x152] sm:$0xff] }
 0x857   :  { %16601 = vst [vmem:[#allocation187_spill] sm:$0xff] %v12845_v3  ;;  %v4970_v18 = vmul.f32 %v12850_v38, %v16488_v58  ;;  %v5063_v14 = vmul.f32 %v5031_v63, %v16489_v56  ;;  %v5066_v53 = vmul.f32 %v12852_v52, %v16489_v56  ;;  %v5339_v47 = vmul.f32 %v12721_v24, %v16490_v60 }
 0x858   :  { %16602 = vst [vmem:[#allocation107_spill] sm:$0xff] %v12848_v25  ;;  %v4971_v22 = vmul.f32 %v12861_v12, %v16488_v58  ;;  %v5154_v62 = vmul.f32 %v12867_v61, %v16486_v48  ;;  %v12900_v0 = vmul.f32 %v12869_v49, %v16486_v48  ;;  %v5184_v36 = vadd.f32 %v5152_v51, %v5088_v4 }
 0x859   :  { %16603 = vst [vmem:[#allocation26_spill] sm:$0xff] %v12850_v38  ;;  %v5091_v25 = vadd.f32 %v5059_v55, %v4963_v26  ;;  %v5185_v3 = vadd.f32 %v5153_v30, %v5089_v43  ;;  %v5342_v24 = vmul.f32 %v12781_v6, %v16490_v60  ;;  %v12906_v57 = vmul.f32 %v12730_v1, %v16490_v60  ;;  %v12917_v30 = vld [vmem:[#allocation2 + $0x128] sm:$0xff] }
 0x85a   :  { %16604 = vst [vmem:[#allocation108_spill] sm:$0xff] %v12861_v12  ;;  %v5249_v59 = vmul.f32 %v12824_v11, %v16495_v41  ;;  %v12915_v4 = vmul.f32 %v5031_v63, %v16490_v60  ;;  %v4966_v6 = vmul.f32 %v12888_v34, %v16488_v58  ;;  %v5062_v1 = vmul.f32 %v12892_v13, %v16489_v56  ;;  %v16611_v63 = vld [vmem:[#allocation117_spill] sm:$0xff] }
 0x85b   :  { %16605 = vst [vmem:[#allocation33_spill] sm:$0xff] %v12867_v61  ;;  %v5278_v61 = vadd.f32 %v5246_v46, %v12732_v31  ;;  %v5098_v26 = vadd.f32 %v5066_v53, %v4970_v18  ;;  %v5155_v55 = vmul.f32 %v12894_v44, %v16486_v48  ;;  %v5099_v43 = vadd.f32 %v12350_v21, %v4971_v22  ;;  %v16609_v31 = vld [vmem:[#allocation149_spill] sm:$0xff] }
 0x85c   :  { %16606 = vst [vmem:[#allocation35_spill] sm:$0xff] %v12869_v49  ;;  %v5279_v49 = vadd.f32 %v5247_v42, %v12735_v5  ;;  %v5186_v51 = vadd.f32 %v5154_v62, %v16609_v31  ;;  %v16610_v5 = vld [vmem:[#allocation96_spill] sm:$0xff]  ;;  %v12930_v42 = vadd.f32 %v16611_v63, %v12774_v15  ;;  %v5162_v11 = vmul.f32 %v12908_v37, %v16486_v48  ;;  %v12944_v22 = vld [vmem:[#allocation2 + $0x122] sm:$0xff] }
 0x85d   :  { %16607 = vst [vmem:[#allocation138_spill] sm:$0xff] %v12888_v34  ;;  %v5280_v46 = vadd.f32 %v16610_v5, %v5184_v36  ;;  %v5187_v23 = vadd.f32 %v5155_v55, %v5091_v25  ;;  %v12936_v18 = vadd.f32 %v12790_v10, %v12804_v40  ;;  %v12940_v53 = vadd.f32 %v12695_v35, %v12807_v45  ;;  %v16612_v36 = vld [vmem:[#allocation118_spill] sm:$0xff]  ;;  %v12955_v40 = vld [vmem:[#allocation2 + $0x140] sm:$0xff] }
 0x85e   :  { %16608 = vst [vmem:[#allocation113_spill] sm:$0xff] %v12917_v30  ;;  %v4967_v21 = vmul.f32 %v12917_v30, %v16488_v58  ;;  %v12948_v15 = vmul.f32 %v12850_v38, %v16495_v41  ;;  %v12951_v62 = vadd.f32 %v16612_v36, %v5274_v16  ;;  %v12953_v25 = vadd.f32 %v5339_v47, %v5275_v50  ;;  %v5033_v10 = vld [vmem:[#allocation2 + $0x141] sm:$0xff] }
 0x85f   :  { %16613 = vst [vmem:[#allocation139_spill] sm:$0xff] %v12955_v40  ;;  %v5094_v55 = vadd.f32 %v5062_v1, %v4966_v6  ;;  %v12957_v35 = vadd.f32 %v5162_v11, %v5098_v26  ;;  %v12961_v45 = vmul.f32 %v12861_v12, %v16495_v41  ;;  %v5281_v31 = vadd.f32 %v5249_v59, %v5185_v3  ;;  %v12963_v5 = vld [vmem:[#allocation2 + $0x13a] sm:$0xff]  ;;  %v5037_v11 = vld [vmem:[#allocation2 + $0x171] sm:$0xff] }
 0x860   :  { %v12966_v63 = vadd.f32 %v12353_v28, %v5099_v43  ;;  %v5252_v16 = vmul.f32 %v12888_v34, %v16495_v41  ;;  %v5282_v50 = vadd.f32 %v12843_v2, %v5186_v51  ;;  %v5345_v47 = vmul.f32 %v12826_v20, %v16490_v60  ;;  %v12973_v6 = vld [vmem:[#allocation2 + $0x172] sm:$0xff] }
 0x861   :  { %v5158_v1 = vmul.f32 %v12944_v22, %v16486_v48  ;;  %v5253_v59 = vmul.f32 %v12917_v30, %v16495_v41  ;;  %v5283_v28 = vadd.f32 %v12859_v27, %v5187_v23  ;;  %v5352_v3 = vmul.f32 %v12852_v52, %v16490_v60  ;;  %v16614_v12 = vld [vmem:[#allocation120_spill] sm:$0xff]  ;;  %v12996_v52 = vld [vmem:[#allocation2 + $0x168] sm:$0xff] }
 0x862   :  { %v4969_v2 = vmul.f32 %v12955_v40, %v16488_v58  ;;  %v5065_v26 = vmul.f32 %v5033_v10, %v16489_v56  ;;  %v5095_v20 = vadd.f32 %v5063_v14, %v4967_v21  ;;  %v12987_v43 = vadd.f32 %v12799_v33, %v12872_v9  ;;  %16615 = vst [vmem:[#allocation168_spill] sm:$0xff] %v12996_v52  ;;  %v5036_v27 = vld [vmem:[#allocation2 + $0x169] sm:$0xff] }
 0x863   :  { %v5160_v51 = vmul.f32 %v12963_v5, %v16486_v48  ;;  %v5190_v36 = vadd.f32 %v5158_v1, %v5094_v55  ;;  %v12992_v38 = vadd.f32 %v16614_v12, %v5277_v17  ;;  %v12994_v23 = vadd.f32 %v5342_v24, %v5278_v61  ;;  %v13007_v21 = vld [vmem:[#allocation2 + $0x142] sm:$0xff] }
 0x864   :  { %v5069_v30 = vmul.f32 %v5037_v11, %v16489_v56  ;;  %v13001_v14 = vmul.f32 %v12973_v6, %v16486_v48  ;;  %v5284_v33 = vadd.f32 %v5252_v16, %v12839_v39  ;;  %v13005_v9 = vadd.f32 %v12822_v54, %v5279_v49  ;;  %v16616_v24 = vld [vmem:[#allocation150_spill] sm:$0xff] }
 0x865   :  { %v5285_v12 = vadd.f32 %v5253_v59, %v12855_v8  ;;  %v5348_v61 = vmul.f32 %v12892_v13, %v16490_v60  ;;  %v13013_v17 = vmul.f32 %v5037_v11, %v16490_v60  ;;  %v13016_v55 = vadd.f32 %v16616_v24, %v5280_v46  ;;  %v13028_v11 = vld [vmem:[#allocation2 + $0x170] sm:$0xff]  ;;  %v16618_v59 = vld [vmem:[#allocation121_spill] sm:$0xff] }
 0x866   :  { %v5097_v1 = vadd.f32 %v5065_v26, %v4969_v2  ;;  %v5191_v34 = vadd.f32 %v12900_v0, %v5095_v20  ;;  %v5255_v54 = vmul.f32 %v12955_v40, %v16495_v41  ;;  %v13021_v39 = vadd.f32 %v5345_v47, %v5281_v31  ;;  %16617 = vst [vmem:[#allocation169_spill] sm:$0xff] %v13028_v11  ;;  %v5132_v24 = vld [vmem:[#allocation2 + $0x16a] sm:$0xff] }
 0x867   :  { %v4972_v8 = vmul.f32 %v12996_v52, %v16488_v58  ;;  %v5068_v49 = vmul.f32 %v5036_v27, %v16489_v56  ;;  %v5192_v13 = vadd.f32 %v5160_v51, %v12327_v32  ;;  %v5286_v16 = vadd.f32 %v12322_v19, %v5190_v36  ;;  %v16621_v56 = vld [vmem:[#allocation31_spill] sm:$0xff]  ;;  %v16622_v32 = vld [vmem:[#allocation68_spill] sm:$0xff]  ;;  %v16624_v51 = vld [vmem:[#allocation102_spill] sm:$0xff] }
 0x868   :  { %v5161_v46 = vmul.f32 %v13007_v21, %v16486_v48  ;;  %v13033_v0 = vadd.f32 %v12906_v57, %v5282_v50  ;;  %v13036_v31 = vadd.f32 %v16618_v59, %v5283_v28  ;;  %v13038_v47 = vadd.f32 %v5348_v61, %v5284_v33  ;;  %v16623_v19 = vld [vmem:[#allocation60_spill] sm:$0xff] }
 0x869   :  { %v13041_v2 = vadd.f32 %v12915_v4, %v5285_v12  ;;  %v5424_v26 = vmul.f32 %v16622_v32, %v16621_v56  ;;  %v5425_v20 = vmul.f32 %v16623_v19, %v16621_v56  ;;  %v5426_v36 = vmul.f32 %v16624_v51, %v16621_v56  ;;  %v16625_v33 = vld [vmem:[#allocation52_spill] sm:$0xff] }
 0x86a   :  { %16619 = vst [vmem:[#allocation77_spill] sm:$0xff] %v13038_v47  ;;  %v5193_v57 = vadd.f32 %v5161_v46, %v5097_v1  ;;  %v5287_v50 = vadd.f32 %v5255_v54, %v5191_v34  ;;  %v5351_v28 = vmul.f32 %v5033_v10, %v16490_v60  ;;  %v5427_v61 = vmul.f32 %v16625_v33, %v16621_v56  ;;  %v16626_v32 = vld [vmem:[#allocation128_spill] sm:$0xff]  ;;  %v16631_v33 = vld [vmem:[#allocation206_spill] sm:$0xff] }
 0x86b   :  { %16620 = vst [vmem:[#allocation189_spill] sm:$0xff] %v13041_v2  ;;  %v4973_v4 = vmul.f32 %v13028_v11, %v16488_v58  ;;  %v5100_v12 = vadd.f32 %v5068_v49, %v4972_v8  ;;  %v5288_v59 = vadd.f32 %v12948_v15, %v5192_v13  ;;  %v13056_v40 = vadd.f32 %v16626_v32, %v5286_v16  ;;  %v16628_v10 = vld [vmem:[#allocation132_spill] sm:$0xff]  ;;  %v16630_v13 = vld [vmem:[#allocation46_spill] sm:$0xff] }
 0x86c   :  { %v5258_v19 = vmul.f32 %v12996_v52, %v16495_v41  ;;  %v5259_v34 = vmul.f32 %v13028_v11, %v16495_v41  ;;  %v5428_v1 = vmul.f32 %v16628_v10, %v16621_v56  ;;  %v5429_v54 = vmul.f32 %v12674_v29, %v16621_v56  ;;  %v16629_v8 = vld [vmem:[#allocation180_spill] sm:$0xff]  ;;  %v16632_v10 = vld [vmem:[#allocation135_spill] sm:$0xff]  ;;  %v13078_v52 = vld [vmem:[#allocation2 + $0x188] sm:$0xff] }
 0x86d   :  { %16627 = vst [vmem:[#allocation30_spill] sm:$0xff] %v13056_v40  ;;  %v5164_v58 = vmul.f32 %v5132_v24, %v16486_v48  ;;  %v5430_v15 = vmul.f32 %v16629_v8, %v16621_v56  ;;  %v5432_v49 = vmul.f32 %v12747_v7, %v16621_v56  ;;  %v5433_v16 = vmul.f32 %v16630_v13, %v16621_v56  ;;  %v16634_v40 = vld [vmem:[#allocation71_spill] sm:$0xff] }
 0x86e   :  { %v5289_v46 = vadd.f32 %v12961_v45, %v5193_v57  ;;  %v5383_v51 = vadd.f32 %v5351_v28, %v5287_v50  ;;  %v5434_v32 = vmul.f32 %v16631_v33, %v16621_v56  ;;  %v5435_v29 = vmul.f32 %v16632_v10, %v16621_v56  ;;  %16633 = vst [vmem:[#allocation190_spill] sm:$0xff] %v13078_v52  ;;  %v16635_v45 = vld [vmem:[#allocation75_spill] sm:$0xff]  ;;  %v16636_v50 = vld [vmem:[#allocation36_spill] sm:$0xff]  ;;  %v16641_v10 = vld [vmem:[#allocation173_spill] sm:$0xff] }
 0x86f   :  { %v5101_v11 = vadd.f32 %v5069_v30, %v4973_v4  ;;  %v5196_v48 = vadd.f32 %v5164_v58, %v5100_v12  ;;  %v5384_v8 = vadd.f32 %v5352_v3, %v5288_v59  ;;  %v5436_v7 = vmul.f32 %v16634_v40, %v16621_v56  ;;  %v16637_v30 = vld [vmem:[#allocation33_spill] sm:$0xff]  ;;  %v16638_v40 = vld [vmem:[#allocation166_spill] sm:$0xff] }
 0x870   :  { %v5290_v2 = vadd.f32 %v5258_v19, %v12957_v35  ;;  %v5291_v13 = vadd.f32 %v5259_v34, %v12966_v63  ;;  %v5438_v57 = vmul.f32 %v16635_v45, %v16621_v56  ;;  %v5439_v28 = vmul.f32 %v16636_v50, %v16621_v56  ;;  %v16639_v63 = vld [vmem:[#allocation123_spill] sm:$0xff] }
 0x871   :  { %v5354_v33 = vmul.f32 %v5036_v27, %v16490_v60  ;;  %v5440_v4 = vmul.f32 %v16637_v30, %v16621_v56  ;;  %v5441_v3 = vmul.f32 %v12894_v44, %v16621_v56  ;;  %v5442_v12 = vmul.f32 %v16638_v40, %v16621_v56  ;;  %v16640_v34 = vld [vmem:[#allocation35_spill] sm:$0xff] }
 0x872   :  { %v5261_v35 = vmul.f32 %v13078_v52, %v16495_v41  ;;  %v5385_v59 = vadd.f32 %v16639_v63, %v5289_v46  ;;  %v5444_v19 = vmul.f32 %v12944_v22, %v16621_v56  ;;  %v5445_v27 = vmul.f32 %v16640_v34, %v16621_v56  ;;  %v13108_v30 = vld [vmem:[#allocation2 + $0x189] sm:$0xff] }
 0x873   :  { %v5197_v58 = vadd.f32 %v13001_v14, %v5101_v11  ;;  %v5292_v45 = vadd.f32 %v16641_v10, %v5196_v48  ;;  %v5446_v44 = vmul.f32 %v12963_v5, %v16621_v56  ;;  %v5447_v50 = vmul.f32 %v13007_v21, %v16621_v56  ;;  %16642 = vst [vmem:[#allocation109_spill] sm:$0xff] %v13108_v30  ;;  %v13114_v63 = vld [vmem:[#allocation2 + $0x182] sm:$0xff]  ;;  %v13116_v14 = vld [vmem:[#allocation2 + $0x18a] sm:$0xff]  ;;  %v16646_v21 = vld [vmem:[#allocation184_spill] sm:$0xff] }
 0x874   :  { %v5386_v41 = vadd.f32 %v5354_v33, %v5290_v2  ;;  %v5387_v46 = vadd.f32 %v13013_v17, %v5291_v13  ;;  %v5448_v22 = vmul.f32 %v12908_v37, %v16621_v56  ;;  %v5450_v40 = vmul.f32 %v5132_v24, %v16621_v56  ;;  %16643 = vst [vmem:[#allocation16_spill] sm:$0xff] %v13114_v63  ;;  %v16645_v11 = vld [vmem:[#allocation183_spill] sm:$0xff]  ;;  %v16647_v2 = vld [vmem:[#allocation104_spill] sm:$0xff]  ;;  %v16648_v37 = vld [vmem:[#allocation74_spill] sm:$0xff] }
 0x875   :  { %16644 = vst [vmem:[#allocation4_spill] sm:$0xff] %v13116_v14  ;;  %v5451_v5 = vmul.f32 %v12973_v6, %v16621_v56  ;;  %v13121_v48 = vadd.f32 %v5424_v26, %v16645_v11  ;;  %v13124_v34 = vadd.f32 %v5425_v20, %v16646_v21  ;;  %v13127_v17 = vadd.f32 %v5426_v36, %v16647_v2  ;;  %v16649_v24 = vld [vmem:[#allocation186_spill] sm:$0xff]  ;;  %v16650_v52 = vld [vmem:[#allocation187_spill] sm:$0xff]  ;;  %v16651_v26 = vld [vmem:[#allocation124_spill] sm:$0xff] }
 0x876   :  { %v5293_v13 = vadd.f32 %v5261_v35, %v5197_v58  ;;  %v13130_v33 = vadd.f32 %v5427_v61, %v16648_v37  ;;  %v13133_v10 = vadd.f32 %v5428_v1, %v16649_v24  ;;  %v13136_v47 = vadd.f32 %v5429_v54, %v16650_v52  ;;  %v16652_v20 = vld [vmem:[#allocation107_spill] sm:$0xff]  ;;  %v16653_v36 = vld [vmem:[#allocation152_spill] sm:$0xff]  ;;  %v16673_v2 = vld [vmem:[#allocation161_spill] sm:$0xff] }
 0x877   :  { %v5357_v6 = vmul.f32 %v13108_v30, %v16490_v60  ;;  %v5388_v11 = vadd.f32 %v16651_v26, %v5292_v45  ;;  %v13142_v21 = vadd.f32 %v5430_v15, %v16652_v20  ;;  %v13146_v35 = vadd.f32 %v16653_v36, %v12930_v42  ;;  %v16654_v58 = vld [vmem:[#allocation131_spill] sm:$0xff]  ;;  %v16674_v37 = vld [vmem:[#allocation164_spill] sm:$0xff] }
 0x878   :  { %v5452_v61 = vmul.f32 %v13114_v63, %v16621_v56  ;;  %v5453_v1 = vmul.f32 %v13116_v14, %v16621_v56  ;;  %v13153_v52 = vadd.f32 %v5432_v49, %v12936_v18  ;;  %v13156_v60 = vadd.f32 %v5433_v16, %v12940_v53  ;;  %v16655_v49 = vld [vmem:[#allocation156_spill] sm:$0xff]  ;;  %v16656_v16 = vld [vmem:[#allocation77_spill] sm:$0xff]  ;;  %v16677_v36 = vld [vmem:[#allocation3_spill] sm:$0xff] }
 0x879   :  { %v13159_v54 = vadd.f32 %v5434_v32, %v12951_v62  ;;  %v13162_v15 = vadd.f32 %v5435_v29, %v12953_v25  ;;  %v13165_v42 = vadd.f32 %v5436_v7, %v12987_v43  ;;  %v13169_v45 = vadd.f32 %v16654_v58, %v12992_v38  ;;  %v5517_v58 = vld [vmem:[#allocation2 + $0x1a0] sm:$0xff] }
 0x87a   :  { %v5389_v56 = vadd.f32 %v5357_v6, %v5293_v13  ;;  %v13172_v18 = vadd.f32 %v5438_v57, %v12994_v23  ;;  %v13175_v53 = vadd.f32 %v5439_v28, %v13005_v9  ;;  %v13178_v62 = vadd.f32 %v5440_v4, %v13016_v55  ;;  %v16657_v23 = vld [vmem:[#allocation189_spill] sm:$0xff]  ;;  %v16658_v9 = vld [vmem:[#allocation30_spill] sm:$0xff]  ;;  %v16660_v57 = vld [vmem:[#allocation176_spill] sm:$0xff] }
 0x87b   :  { %v13181_v25 = vadd.f32 %v5441_v3, %v13021_v39  ;;  %v13184_v43 = vadd.f32 %v5442_v12, %v13033_v0  ;;  %v13188_v38 = vadd.f32 %v16655_v49, %v13036_v31  ;;  %v13191_v32 = vadd.f32 %v5444_v19, %v16656_v16  ;;  %v16666_v12 = vld [vmem:[#allocation50_spill] sm:$0xff]  ;;  %v16667_v19 = vld [vmem:[#allocation129_spill] sm:$0xff]  ;;  %v16679_v16 = vld [vmem:[#allocation55_spill] sm:$0xff] }
 0x87c   :  { %v13194_v29 = vadd.f32 %v5445_v27, %v16657_v23  ;;  %v13197_v7 = vadd.f32 %v5446_v44, %v16658_v9  ;;  %v13199_v55 = vadd.f32 %v5447_v50, %v5383_v51  ;;  %v13201_v39 = vadd.f32 %v5448_v22, %v5384_v8  ;;  %v16668_v44 = vld [vmem:[#allocation56_spill] sm:$0xff]  ;;  %v16669_v8 = vld [vmem:[#allocation181_spill] sm:$0xff] }
 0x87d   :  { %v13204_v0 = vadd.f32 %v16660_v57, %v5385_v59  ;;  %v13206_v28 = vadd.f32 %v5450_v40, %v5386_v41  ;;  %v13208_v31 = vadd.f32 %v5451_v5, %v5387_v46  ;;  %v13210_v4 = vadd.f32 %v5452_v61, %v5388_v11  ;;  %v16670_v59 = vld [vmem:[#allocation101_spill] sm:$0xff]  ;;  %v16672_v40 = vld [vmem:[#allocation130_spill] sm:$0xff]  ;;  %v16676_v11 = vld [vmem:[#allocation72_spill] sm:$0xff] }
 0x87e   :  { %16659 = vst [vmem:[#allocation141_spill] sm:$0xff] %v13201_v39  ;;  %v13212_v3 = vadd.f32 %v5453_v1, %v5389_v56  ;;  %v5518_v27 = vmul.f32 %v16667_v19, %v16666_v12  ;;  %v5519_v51 = vmul.f32 %v16668_v44, %v16666_v12  ;;  %v5520_v50 = vmul.f32 %v16669_v8, %v16666_v12  ;;  %v16671_v41 = vld [vmem:[#allocation37_spill] sm:$0xff]  ;;  %v5516_v1 = vld [vmem:[#allocation2 + $0x198] sm:$0xff]  ;;  %v16681_v19 = vld [vmem:[#allocation167_spill] sm:$0xff] }
 0x87f   :  { %16661 = vst [vmem:[#allocation170_spill] sm:$0xff] %v13204_v0  ;;  %v5521_v22 = vmul.f32 %v16670_v59, %v16666_v12  ;;  %v5523_v46 = vmul.f32 %v16671_v41, %v16666_v12  ;;  %v5524_v5 = vmul.f32 %v16672_v40, %v16666_v12  ;;  %v5525_v13 = vmul.f32 %v16673_v2, %v16666_v12  ;;  %v16675_v6 = vld [vmem:[#allocation165_spill] sm:$0xff]  ;;  %v16680_v9 = vld [vmem:[#allocation136_spill] sm:$0xff]  ;;  %v16684_v2 = vld [vmem:[#allocation138_spill] sm:$0xff] }
 0x880   :  { %16662 = vst [vmem:[#allocation79_spill] sm:$0xff] %v13206_v28  ;;  %v5526_v24 = vmul.f32 %v16674_v37, %v16666_v12  ;;  %v5527_v26 = vmul.f32 %v16675_v6, %v16666_v12  ;;  %v5529_v20 = vmul.f32 %v16676_v11, %v16666_v12  ;;  %v5530_v61 = vmul.f32 %v16677_v36, %v16666_v12  ;;  %v16678_v56 = vld [vmem:[#allocation133_spill] sm:$0xff]  ;;  %v16686_v36 = vld [vmem:[#allocation139_spill] sm:$0xff] }
 0x881   :  { %16663 = vst [vmem:[#allocation192_spill] sm:$0xff] %v13208_v31  ;;  %v5531_v49 = vmul.f32 %v16678_v56, %v16666_v12  ;;  %v5532_v23 = vmul.f32 %v16679_v16, %v16666_v12  ;;  %v5533_v57 = vmul.f32 %v16680_v9, %v16666_v12  ;;  %v5535_v44 = vmul.f32 %v16681_v19, %v16666_v12  ;;  %v16682_v8 = vld [vmem:[#allocation205_spill] sm:$0xff]  ;;  %v16687_v16 = vld [vmem:[#allocation26_spill] sm:$0xff]  ;;  %v16688_v19 = vld [vmem:[#allocation108_spill] sm:$0xff] }
 0x882   :  { %16664 = vst [vmem:[#allocation28_spill] sm:$0xff] %v13210_v4  ;;  %v5536_v59 = vmul.f32 %v16682_v8, %v16666_v12  ;;  %v16683_v41 = vld [vmem:[#allocation105_spill] sm:$0xff]  ;;  %v5538_v37 = vmul.f32 %v16684_v2, %v16666_v12  ;;  %v5541_v56 = vmul.f32 %v16686_v36, %v16666_v12  ;;  %v5542_v9 = vmul.f32 %v16687_v16, %v16666_v12  ;;  %v16689_v8 = vld [vmem:[#allocation168_spill] sm:$0xff]  ;;  %v16691_v2 = vld [vmem:[#allocation190_spill] sm:$0xff] }
 0x883   :  { %16665 = vst [vmem:[#allocation111_spill] sm:$0xff] %v13212_v3  ;;  %v5537_v40 = vmul.f32 %v16683_v41, %v16666_v12  ;;  %v16685_v6 = vld [vmem:[#allocation113_spill] sm:$0xff]  ;;  %v5543_v14 = vmul.f32 %v16688_v19, %v16666_v12  ;;  %v5544_v63 = vmul.f32 %v16689_v8, %v16666_v12  ;;  %v5547_v3 = vmul.f32 %v16691_v2, %v16666_v12  ;;  %v16692_v36 = vld [vmem:[#allocation162_spill] sm:$0xff] }
 0x884   :  { %v5539_v11 = vmul.f32 %v16685_v6, %v16666_v12  ;;  %v16690_v41 = vld [vmem:[#allocation169_spill] sm:$0xff]  ;;  %v5548_v6 = vmul.f32 %v5516_v1, %v16666_v12  ;;  %v5549_v4 = vmul.f32 %v5517_v58, %v16666_v12  ;;  %v5550_v31 = vadd.f32 %v5518_v27, %v16692_v36  ;;  %v5593_v36 = vld [vmem:[#allocation2 + $0xb1] sm:$0xff] }
 0x885   :  { %v5545_v30 = vmul.f32 %v16690_v41, %v16666_v12  ;;  %v16693_v28 = vld [vmem:[#allocation69_spill] sm:$0xff]  ;;  %v5552_v0 = vadd.f32 %v5520_v50, %v13121_v48  ;;  %v5553_v19 = vadd.f32 %v5521_v22, %v13124_v34  ;;  %v13273_v41 = vadd.f32 %v5523_v46, %v13130_v33  ;;  %v5582_v12 = vld [vmem:[#allocation2 + $0x31] sm:$0xff]  ;;  %v16695_v34 = vld [vmem:[#allocation174_spill] sm:$0xff] }
 0x886   :  { %v5551_v16 = vadd.f32 %v5519_v51, %v16693_v28  ;;  %v16694_v8 = vld [vmem:[#allocation153_spill] sm:$0xff]  ;;  %v13276_v2 = vadd.f32 %v5524_v5, %v13133_v10  ;;  %v13279_v1 = vadd.f32 %v5525_v13, %v13136_v47  ;;  %v13282_v27 = vadd.f32 %v5526_v24, %v13142_v21  ;;  %v5584_v10 = vld [vmem:[#allocation2 + $0x49] sm:$0xff] }
 0x887   :  { %v5554_v39 = vadd.f32 %v16694_v8, %v13127_v17  ;;  %v13285_v48 = vadd.f32 %v5527_v26, %v13146_v35  ;;  %v13289_v28 = vadd.f32 %v16695_v34, %v13153_v52  ;;  %v13292_v17 = vadd.f32 %v5529_v20, %v13156_v60  ;;  %v5583_v33 = vld [vmem:[#allocation2 + $0x39] sm:$0xff]  ;;  %v16696_v52 = vld [vmem:[#allocation175_spill] sm:$0xff] }
 0x888   :  { %v13295_v51 = vadd.f32 %v5530_v61, %v13159_v54  ;;  %v13298_v47 = vadd.f32 %v5531_v49, %v13162_v15  ;;  %v13301_v21 = vadd.f32 %v5532_v23, %v13165_v42  ;;  %v13304_v35 = vadd.f32 %v5533_v57, %v13169_v45  ;;  %v16697_v54 = vld [vmem:[#allocation32_spill] sm:$0xff]  ;;  %v5587_v49 = vld [vmem:[#allocation2 + $0x69] sm:$0xff]  ;;  %v16699_v57 = vld [vmem:[#allocation141_spill] sm:$0xff] }
 0x889   :  { %v13308_v50 = vadd.f32 %v16696_v52, %v13172_v18  ;;  %v13311_v60 = vadd.f32 %v5535_v44, %v13175_v53  ;;  %v13314_v22 = vadd.f32 %v5536_v59, %v13178_v62  ;;  %v5614_v46 = vmul.f32 %v5582_v12, %v16697_v54  ;;  %v5678_v18 = vld [vmem:[#allocation2 + $0x32] sm:$0xff]  ;;  %v5679_v20 = vld [vmem:[#allocation2 + $0x3a] sm:$0xff]  ;;  %v5682_v52 = vld [vmem:[#allocation2 + $0x62] sm:$0xff] }
 0x88a   :  { %v13318_v15 = vadd.f32 %v5537_v40, %v13181_v25  ;;  %v13321_v42 = vadd.f32 %v5538_v37, %v13184_v43  ;;  %v5615_v45 = vmul.f32 %v5583_v33, %v16697_v54  ;;  %v5616_v5 = vmul.f32 %v5584_v10, %v16697_v54  ;;  %v16698_v53 = vld [vmem:[#allocation200_spill] sm:$0xff]  ;;  %v5680_v43 = vld [vmem:[#allocation2 + $0x4a] sm:$0xff]  ;;  %v5594_v33 = vld [vmem:[#allocation2 + $0xc1] sm:$0xff] }
 0x88b   :  { %v13326_v13 = vadd.f32 %v5539_v11, %v13188_v38  ;;  %v13330_v62 = vadd.f32 %v16698_v53, %v13191_v32  ;;  %v13333_v24 = vadd.f32 %v5541_v56, %v13194_v29  ;;  %v5585_v25 = vld [vmem:[#allocation2 + $0x51] sm:$0xff]  ;;  %v5646_v26 = vadd.f32 %v5614_v46, %v5550_v31  ;;  %v16700_v32 = vld [vmem:[#allocation170_spill] sm:$0xff]  ;;  %v5588_v37 = vld [vmem:[#allocation2 + $0x79] sm:$0xff] }
 0x88c   :  { %v13336_v61 = vadd.f32 %v5542_v9, %v13197_v7  ;;  %v13339_v58 = vadd.f32 %v5543_v14, %v13199_v55  ;;  %v5647_v38 = vadd.f32 %v5615_v45, %v5551_v16  ;;  %v5648_v23 = vadd.f32 %v5616_v5, %v5552_v0  ;;  %v16701_v29 = vld [vmem:[#allocation79_spill] sm:$0xff]  ;;  %v16702_v40 = vld [vmem:[#allocation158_spill] sm:$0xff]  ;;  %v16704_v56 = vld [vmem:[#allocation192_spill] sm:$0xff] }
 0x88d   :  { %v13342_v44 = vadd.f32 %v5544_v63, %v16699_v57  ;;  %v13345_v59 = vadd.f32 %v5545_v30, %v16700_v32  ;;  %v13349_v31 = vadd.f32 %v16702_v40, %v16701_v29  ;;  %v16703_v11 = vld [vmem:[#allocation34_spill] sm:$0xff]  ;;  %v13353_v9 = vadd.f32 %v5547_v3, %v16704_v56  ;;  %v5590_v14 = vld [vmem:[#allocation2 + $0x91] sm:$0xff]  ;;  %v5591_v55 = vld [vmem:[#allocation2 + $0x99] sm:$0xff] }
 0x88e   :  { %v5710_v7 = vmul.f32 %v5678_v18, %v16703_v11  ;;  %v5617_v0 = vmul.f32 %v5585_v25, %v16697_v54  ;;  %v5711_v63 = vmul.f32 %v5679_v20, %v16703_v11  ;;  %v5712_v30 = vmul.f32 %v5680_v43, %v16703_v11  ;;  %v16705_v16 = vld [vmem:[#allocation28_spill] sm:$0xff]  ;;  %v16706_v12 = vld [vmem:[#allocation111_spill] sm:$0xff]  ;;  %v5597_v43 = vld [vmem:[#allocation2 + $0xe1] sm:$0xff] }
 0x88f   :  { %v13359_v8 = vadd.f32 %v5548_v6, %v16705_v16  ;;  %v13362_v34 = vadd.f32 %v5549_v4, %v16706_v12  ;;  %v5619_v10 = vmul.f32 %v5587_v49, %v16697_v54  ;;  %v5681_v3 = vld [vmem:[#allocation2 + $0x52] sm:$0xff]  ;;  %v5683_v25 = vld [vmem:[#allocation2 + $0x6a] sm:$0xff]  ;;  %v5620_v6 = vmul.f32 %v5588_v37, %v16697_v54 }
 0x890   :  { %v5742_v46 = vadd.f32 %v5710_v7, %v5646_v26  ;;  %v5596_v45 = vld [vmem:[#allocation2 + $0xd9] sm:$0xff]  ;;  %v5649_v5 = vadd.f32 %v5617_v0, %v5553_v19  ;;  %v16708_v18 = vld [vmem:[#allocation155_spill] sm:$0xff]  ;;  %v5743_v20 = vadd.f32 %v5711_v63, %v5647_v38  ;;  %v5744_v57 = vadd.f32 %v5712_v30, %v5648_v23  ;;  %v5602_v23 = vld [vmem:[#allocation2 + $0x121] sm:$0xff] }
 0x891   :  { %16707 = vst [vmem:[#allocation58_spill] sm:$0xff] %v13362_v34  ;;  %v5650_v53 = vadd.f32 %v16708_v18, %v5554_v39  ;;  %v5622_v32 = vmul.f32 %v5590_v14, %v16697_v54  ;;  %v5623_v4 = vmul.f32 %v5591_v55, %v16697_v54  ;;  %v5625_v29 = vmul.f32 %v5593_v36, %v16697_v54  ;;  %v5599_v49 = vld [vmem:[#allocation2 + $0xf9] sm:$0xff]  ;;  %v5600_v40 = vld [vmem:[#allocation2 + $0x109] sm:$0xff]  ;;  %v5605_v0 = vld [vmem:[#allocation2 + $0x141] sm:$0xff] }
 0x892   :  { %v5626_v26 = vmul.f32 %v5594_v33, %v16697_v54  ;;  %v5651_v19 = vadd.f32 %v5619_v10, %v13273_v41  ;;  %v5684_v7 = vld [vmem:[#allocation2 + $0x7a] sm:$0xff]  ;;  %v5713_v39 = vmul.f32 %v5681_v3, %v16703_v11  ;;  %v5714_v38 = vmul.f32 %v5682_v52, %v16703_v11  ;;  %v5603_v56 = vld [vmem:[#allocation2 + $0x129] sm:$0xff]  ;;  %v5606_v33 = vld [vmem:[#allocation2 + $0x151] sm:$0xff] }
 0x893   :  { %v13375_v37 = vmul.f32 %v5596_v45, %v16697_v54  ;;  %v5652_v14 = vadd.f32 %v5620_v6, %v13276_v2  ;;  %v5715_v55 = vmul.f32 %v5683_v25, %v16703_v11  ;;  %v13382_v36 = vld [vmem:[%s15572_s4] ss:$0 sm:$0xff]  ;;  %v13388_v10 = vmul.f32 %v5597_v43, %v16697_v54  ;;  %v5609_v45 = vld [vmem:[#allocation2 + $0x171] sm:$0xff] }
 0x894   :  { %v5774_v41 = vadd.f32 %v13382_v36, %v5742_v46  ;;  %v5745_v63 = vadd.f32 %v5713_v39, %v5649_v5  ;;  %v5746_v30 = vadd.f32 %v5714_v38, %v5650_v53  ;;  %v5775_v16 = vadd.f32 %v13382_v36, %v5743_v20  ;;  %v5608_v46 = vld [vmem:[#allocation2 + $0x169] sm:$0xff]  ;;  %v5686_v20 = vld [vmem:[#allocation2 + $0x92] sm:$0xff] }
 0x895   :  { %v5776_v12 = vadd.f32 %v13382_v36, %v5744_v57  ;;  %v13391_v2 = vmul.f32 %v5599_v49, %v16697_v54  ;;  %v13394_v3 = vmul.f32 %v5600_v40, %v16697_v54  ;;  %v5716_v52 = vmul.f32 %v5684_v7, %v16703_v11  ;;  %v16709_v53 = vld [vmem:[#allocation126_spill] sm:$0xff]  ;;  %v5687_v7 = vld [vmem:[#allocation2 + $0x9a] sm:$0xff] }
 0x896   :  { %v13398_v5 = vmul.f32 %v5602_v23, %v16697_v54  ;;  %v13401_v18 = vmul.f32 %v5603_v56, %v16697_v54  ;;  %v5653_v25 = vadd.f32 %v16709_v53, %v13279_v1  ;;  %v5747_v57 = vadd.f32 %v5715_v55, %v5651_v19 }
 0x897   :  { %v13406_v43 = vmul.f32 %v5605_v0, %v16697_v54  ;;  %v5654_v6 = vadd.f32 %v5622_v32, %v13282_v27  ;;  %v5748_v49 = vadd.f32 %v5716_v52, %v5652_v14  ;;  %v5806_v40 = vmax.f32 %v5774_v41, 0.0  ;;  %v16710_v14 = vld [vmem:[#allocation134_spill] sm:$0xff]  ;;  %v16711_v0 = vld [vmem:[#allocation179_spill] sm:$0xff] }
 0x898   :  { %v5777_v39 = vadd.f32 %v13382_v36, %v5745_v63  ;;  %v5778_v38 = vadd.f32 %v13382_v36, %v5746_v30  ;;  %v5807_v23 = vmax.f32 %v5775_v16, 0.0  ;;  %v5808_v56 = vmax.f32 %v5776_v12, 0.0  ;;  %v5688_v41 = vld [vmem:[#allocation2 + $0xaa] sm:$0xff]  ;;  %v5689_v16 = vld [vmem:[#allocation2 + $0xb2] sm:$0xff] }
 0x899   :  { %v13412_v34 = vmul.f32 %v5606_v33, %v16697_v54  ;;  %v13415_v1 = vmul.f32 %v5608_v46, %v16697_v54  ;;  %v13418_v19 = vmul.f32 %v5609_v45, %v16697_v54  ;;  %v5718_v27 = vmul.f32 %v5686_v20, %v16703_v11 }
 0x89a   :  { %v5655_v32 = vadd.f32 %v5623_v4, %v13285_v48  ;;  %v5656_v55 = vadd.f32 %v16710_v14, %v13289_v28  ;;  %v5749_v63 = vadd.f32 %v16711_v0, %v5653_v25  ;;  %v5779_v30 = vadd.f32 %v13382_v36, %v5747_v57  ;;  %v16714_v28 = vld [vmem:[#allocation109_spill] sm:$0xff] }
 0x89b   :  { %v5719_v12 = vmul.f32 %v5687_v7, %v16703_v11  ;;  %v5750_v33 = vadd.f32 %v5718_v27, %v5654_v6  ;;  %v5780_v52 = vadd.f32 %v13382_v36, %v5748_v49  ;;  %v13428_v46 = vmin.f32 %v5806_v40, 6.0  ;;  %v5612_v7 = vld [vmem:[#allocation2 + $0x199] sm:$0xff]  ;;  %v5690_v49 = vld [vmem:[#allocation2 + $0xc2] sm:$0xff] }
 0x89c   :  { %v5809_v45 = vmax.f32 %v5777_v39, 0.0  ;;  %v5810_v53 = vmax.f32 %v5778_v38, 0.0  ;;  %v13430_v20 = vmin.f32 %v5807_v23, 6.0  ;;  %v13432_v48 = vmin.f32 %v5808_v56, 6.0 }
 0x89d   :  { %16712 = vst [vmem:[#allocation143_spill] sm:$0xff] %v13428_v46  ;;  %v13436_v4 = vmul.f32 %v16714_v28, %v16697_v54  ;;  %v5657_v25 = vadd.f32 %v5625_v29, %v13292_v17  ;;  %v5658_v57 = vadd.f32 %v5626_v26, %v13295_v51  ;;  %v5720_v6 = vmul.f32 %v5688_v41, %v16703_v11 }
 0x89e   :  { %16713 = vst [vmem:[#allocation9_spill] sm:$0xff] %v13430_v20  ;;  %v5721_v40 = vmul.f32 %v5689_v16, %v16703_v11  ;;  %v5751_v39 = vadd.f32 %v5719_v12, %v5655_v32  ;;  %v5781_v38 = vadd.f32 %v13382_v36, %v5749_v63  ;;  %v5811_v23 = vmax.f32 %v5779_v30, 0.0  ;;  %v5692_v16 = vld [vmem:[#allocation2 + $0xda] sm:$0xff] }
 0x89f   :  { %v5752_v56 = vadd.f32 %v5720_v6, %v5656_v55  ;;  %v5782_v27 = vadd.f32 %v13382_v36, %v5750_v33  ;;  %v5812_v14 = vmax.f32 %v5780_v52, 0.0  ;;  %v5870_v0 = vsel %vm32_vm0, %v13428_v46, 0.0  ;;  %v16715_v55 = vld [vmem:[#allocation201_spill] sm:$0xff] }
 0x8a0   :  { %v13446_v17 = vmin.f32 %v5809_v45, 6.0  ;;  %v13448_v51 = vmin.f32 %v5810_v53, 6.0  ;;  %v5871_v29 = vsel %vm32_vm0, %v13430_v20, 0.0  ;;  %v5873_v26 = vsel %vm32_vm0, %v13432_v48, 0.0  ;;  %v5693_v46 = vld [vmem:[#allocation2 + $0xe2] sm:$0xff] }
 0x8a1   :  { %v13455_v32 = vmul.f32 %v5612_v7, %v16697_v54  ;;  %v5659_v41 = vadd.f32 %v16715_v55, %v13298_v47  ;;  %v5722_v63 = vmul.f32 %v5690_v49, %v16703_v11  ;;  %v5872_v30 = vadd.f32 %v5871_v29, %v5870_v0  ;;  %v16717_v0 = vld [vmem:[#allocation127_spill] sm:$0xff]  ;;  %v5695_v55 = vld [vmem:[#allocation2 + $0xfa] sm:$0xff] }
 0x8a2   :  { %v5753_v12 = vadd.f32 %v5721_v40, %v5657_v25  ;;  %v5783_v33 = vadd.f32 %v13382_v36, %v5751_v39  ;;  %v5813_v52 = vmax.f32 %v5781_v38, 0.0  ;;  %v13461_v45 = vmin.f32 %v5811_v23, 6.0  ;;  %v5694_v38 = vld [vmem:[#allocation2 + $0xf2] sm:$0xff] }
 0x8a3   :  { %v5660_v53 = vadd.f32 %v13375_v37, %v13301_v21  ;;  %v5754_v28 = vadd.f32 %v5722_v63, %v5658_v57  ;;  %v5784_v6 = vadd.f32 %v13382_v36, %v5752_v56  ;;  %v5874_v7 = vadd.f32 %v5873_v26, %v5872_v30  ;;  %v16716_v21 = vld [vmem:[#allocation177_spill] sm:$0xff] }
 0x8a4   :  { %v5814_v20 = vmax.f32 %v5782_v27, 0.0  ;;  %v13466_v47 = vmin.f32 %v5812_v14, 6.0  ;;  %v5875_v49 = vsel %vm32_vm0, %v13446_v17, 0.0  ;;  %v5877_v25 = vsel %vm32_vm0, %v13448_v51, 0.0 }
 0x8a5   :  { %v5661_v40 = vadd.f32 %v13388_v10, %v13304_v35  ;;  %v5724_v39 = vmul.f32 %v5692_v16, %v16703_v11  ;;  %v5755_v37 = vadd.f32 %v16716_v21, %v5659_v41  ;;  %v5876_v57 = vadd.f32 %v5875_v49, %v5874_v7  ;;  %v5696_v7 = vld [vmem:[#allocation2 + $0x10a] sm:$0xff] }
 0x8a6   :  { %v5785_v23 = vadd.f32 %v13382_v36, %v5753_v12  ;;  %v5815_v56 = vmax.f32 %v5783_v33, 0.0  ;;  %v13477_v27 = vmin.f32 %v5813_v52, 6.0  ;;  %v5879_v14 = vsel %vm32_vm0, %v13461_v45, 0.0 }
 0x8a7   :  { %v5662_v29 = vadd.f32 %v16717_v0, %v13308_v50  ;;  %v5725_v26 = vmul.f32 %v5693_v46, %v16703_v11  ;;  %v5756_v35 = vadd.f32 %v5724_v39, %v5660_v53  ;;  %v5878_v10 = vadd.f32 %v5877_v25, %v5876_v57  ;;  %v16718_v57 = vld [vmem:[#allocation159_spill] sm:$0xff] }
 0x8a8   :  { %v5786_v41 = vadd.f32 %v13382_v36, %v5754_v28  ;;  %v5816_v63 = vmax.f32 %v5784_v6, 0.0  ;;  %v13485_v30 = vmin.f32 %v5814_v20, 6.0  ;;  %v5881_v16 = vsel %vm32_vm0, %v13466_v47, 0.0 }
 0x8a9   :  { %v5663_v12 = vadd.f32 %v13391_v2, %v13311_v60  ;;  %v5726_v33 = vmul.f32 %v5694_v38, %v16703_v11  ;;  %v5757_v52 = vadd.f32 %v5725_v26, %v5661_v40  ;;  %v5880_v50 = vadd.f32 %v5879_v14, %v5878_v10  ;;  %v5613_v2 = vld [vmem:[#allocation2 + $0x1a1] sm:$0xff] }
 0x8aa   :  { %v5787_v46 = vadd.f32 %v13382_v36, %v5755_v37  ;;  %v5817_v53 = vmax.f32 %v5785_v23, 0.0  ;;  %v13493_v49 = vmin.f32 %v5815_v56, 6.0  ;;  %v5883_v20 = vsel %vm32_vm0, %v13477_v27, 0.0 }
 0x8ab   :  { %v5664_v28 = vadd.f32 %v13394_v3, %v13314_v22  ;;  %v5727_v6 = vmul.f32 %v5695_v55, %v16703_v11  ;;  %v5758_v25 = vadd.f32 %v5726_v33, %v5662_v29  ;;  %v5882_v60 = vadd.f32 %v5881_v16, %v5880_v50  ;;  %v5698_v3 = vld [vmem:[#allocation2 + $0x122] sm:$0xff] }
 0x8ac   :  { %v5788_v40 = vadd.f32 %v13382_v36, %v5756_v35  ;;  %v5818_v39 = vmax.f32 %v5786_v41, 0.0  ;;  %v13501_v21 = vmin.f32 %v5816_v63, 6.0  ;;  %v5885_v37 = vsel %vm32_vm0, %v13485_v30, 0.0  ;;  %v5699_v41 = vld [vmem:[#allocation2 + $0x12a] sm:$0xff] }
 0x8ad   :  { %v5665_v38 = vadd.f32 %v16718_v57, %v13318_v15  ;;  %v5728_v23 = vmul.f32 %v5696_v7, %v16703_v11  ;;  %v5759_v56 = vadd.f32 %v5727_v6, %v5663_v12  ;;  %v5884_v22 = vadd.f32 %v5883_v20, %v5882_v60  ;;  %v16719_v50 = vld [vmem:[#allocation178_spill] sm:$0xff] }
 0x8ae   :  { %v5789_v14 = vadd.f32 %v13382_v36, %v5757_v52  ;;  %v5819_v0 = vmax.f32 %v5787_v46, 0.0  ;;  %v13509_v29 = vmin.f32 %v5817_v53, 6.0  ;;  %v5887_v26 = vsel %vm32_vm0, %v13493_v49, 0.0  ;;  %v16720_v6 = vld [vmem:[#allocation98_spill] sm:$0xff] }
 0x8af   :  { %v13514_v35 = vmul.f32 %v5613_v2, %v16697_v54  ;;  %v5666_v10 = vadd.f32 %v13398_v5, %v13321_v42  ;;  %v5760_v15 = vadd.f32 %v5728_v23, %v5664_v28  ;;  %v5886_v55 = vadd.f32 %v5885_v37, %v5884_v22  ;;  %v5700_v42 = vld [vmem:[#allocation2 + $0x13a] sm:$0xff]  ;;  %v5701_v2 = vld [vmem:[#allocation2 + $0x142] sm:$0xff]  ;;  %v5702_v22 = vld [vmem:[#allocation2 + $0x152] sm:$0xff] }
 0x8b0   :  { %v5790_v63 = vadd.f32 %v13382_v36, %v5758_v25  ;;  %v5820_v16 = vmax.f32 %v5788_v40, 0.0  ;;  %v13519_v12 = vmin.f32 %v5818_v39, 6.0  ;;  %v5889_v33 = vsel %vm32_vm0, %v13501_v21, 0.0 }
 0x8b1   :  { %v5667_v52 = vadd.f32 %v13401_v18, %v13326_v13  ;;  %v5730_v54 = vmul.f32 %v5698_v3, %v16703_v11  ;;  %v5761_v7 = vadd.f32 %v16719_v50, %v5665_v38  ;;  %v5888_v46 = vadd.f32 %v5887_v26, %v5886_v55 }
 0x8b2   :  { %v5791_v5 = vadd.f32 %v13382_v36, %v5759_v56  ;;  %v5821_v53 = vmax.f32 %v5789_v14, 0.0  ;;  %v13528_v20 = vmin.f32 %v5819_v0, 6.0  ;;  %v5891_v28 = vsel %vm32_vm0, %v13509_v29, 0.0 }
 0x8b3   :  { %v5668_v25 = vadd.f32 %v16720_v6, %v13330_v62  ;;  %v5731_v60 = vmul.f32 %v5699_v41, %v16703_v11  ;;  %v5762_v13 = vadd.f32 %v5730_v54, %v5666_v10  ;;  %v5890_v18 = vadd.f32 %v5889_v33, %v5888_v46  ;;  %v16721_v33 = vld [vmem:[#allocation203_spill] sm:$0xff] }
 0x8b4   :  { %v5792_v40 = vadd.f32 %v13382_v36, %v5760_v15  ;;  %v5822_v39 = vmax.f32 %v5790_v63, 0.0  ;;  %v13536_v37 = vmin.f32 %v5820_v16, 6.0  ;;  %v5893_v57 = vsel %vm32_vm0, %v13519_v12, 0.0 }
 0x8b5   :  { %v5669_v38 = vadd.f32 %v13406_v43, %v13333_v24  ;;  %v5732_v23 = vmul.f32 %v5700_v42, %v16703_v11  ;;  %v5763_v56 = vadd.f32 %v5731_v60, %v5667_v52  ;;  %v5892_v62 = vadd.f32 %v5891_v28, %v5890_v18 }
 0x8b6   :  { %v5793_v3 = vadd.f32 %v13382_v36, %v5761_v7  ;;  %v5823_v14 = vmax.f32 %v5791_v5, 0.0  ;;  %v13544_v0 = vmin.f32 %v5821_v53, 6.0  ;;  %v5895_v26 = vsel %vm32_vm0, %v13528_v20, 0.0 }
 0x8b7   :  { %v5670_v10 = vadd.f32 %v13412_v34, %v13336_v61  ;;  %v5733_v15 = vmul.f32 %v5701_v2, %v16703_v11  ;;  %v5764_v55 = vadd.f32 %v5732_v23, %v5668_v25  ;;  %v5894_v24 = vadd.f32 %v5893_v57, %v5892_v62  ;;  %v5704_v61 = vld [vmem:[#allocation2 + $0x16a] sm:$0xff]  ;;  %v5705_v25 = vld [vmem:[#allocation2 + $0x172] sm:$0xff] }
 0x8b8   :  { %v5794_v43 = vadd.f32 %v13382_v36, %v5762_v13  ;;  %v5824_v41 = vmax.f32 %v5792_v40, 0.0  ;;  %v13552_v63 = vmin.f32 %v5822_v39, 6.0  ;;  %v5897_v16 = vsel %vm32_vm0, %v13536_v37, 0.0  ;;  %v16722_v40 = vld [vmem:[#allocation99_spill] sm:$0xff] }
 0x8b9   :  { %v5671_v52 = vadd.f32 %v16721_v33, %v13339_v58  ;;  %v5734_v54 = vmul.f32 %v5702_v22, %v16703_v11  ;;  %v5765_v50 = vadd.f32 %v5733_v15, %v5669_v38  ;;  %v5896_v7 = vadd.f32 %v5895_v26, %v5894_v24 }
 0x8ba   :  { %v5795_v34 = vadd.f32 %v13382_v36, %v5763_v56  ;;  %v5825_v46 = vmax.f32 %v5793_v3, 0.0  ;;  %v13560_v42 = vmin.f32 %v5823_v14, 6.0  ;;  %v5899_v5 = vsel %vm32_vm0, %v13544_v0, 0.0  ;;  %v5708_v14 = vld [vmem:[#allocation2 + $0x19a] sm:$0xff] }
 0x8bb   :  { %v5672_v53 = vadd.f32 %v13415_v1, %v13342_v44  ;;  %v5673_v28 = vadd.f32 %v13418_v19, %v13345_v59  ;;  %v5766_v58 = vadd.f32 %v5734_v54, %v5670_v10  ;;  %v5898_v6 = vadd.f32 %v5897_v16, %v5896_v7  ;;  %v16723_v44 = vld [vmem:[#allocation204_spill] sm:$0xff]  ;;  %v5709_v16 = vld [vmem:[#allocation2 + $0x1a2] sm:$0xff] }
 0x8bc   :  { %v5796_v60 = vadd.f32 %v13382_v36, %v5764_v55  ;;  %v5826_v13 = vmax.f32 %v5794_v43, 0.0  ;;  %v13569_v18 = vmin.f32 %v5824_v41, 6.0  ;;  %v5901_v2 = vsel %vm32_vm0, %v13552_v63, 0.0  ;;  %v16724_v43 = vld [vmem:[#allocation16_spill] sm:$0xff] }
 0x8bd   :  { %v5674_v39 = vadd.f32 %v16722_v40, %v13349_v31  ;;  %v5736_v57 = vmul.f32 %v5704_v61, %v16703_v11  ;;  %v5767_v1 = vadd.f32 %v16723_v44, %v5671_v52  ;;  %v5900_v38 = vadd.f32 %v5899_v5, %v5898_v6  ;;  %v16725_v7 = vld [vmem:[#allocation4_spill] sm:$0xff] }
 0x8be   :  { %v5797_v59 = vadd.f32 %v13382_v36, %v5765_v50  ;;  %v5827_v19 = vmax.f32 %v5795_v34, 0.0  ;;  %v13578_v23 = vmin.f32 %v5825_v46, 6.0  ;;  %v5903_v56 = vsel %vm32_vm0, %v13560_v42, 0.0 }
 0x8bf   :  { %v5675_v62 = vadd.f32 %v13436_v4, %v13353_v9  ;;  %v5737_v22 = vmul.f32 %v5705_v25, %v16703_v11  ;;  %v5768_v3 = vadd.f32 %v5736_v57, %v5672_v53  ;;  %v5902_v31 = vadd.f32 %v5901_v2, %v5900_v38 }
 0x8c0   :  { %v5798_v26 = vadd.f32 %v13382_v36, %v5766_v58  ;;  %v5828_v10 = vmax.f32 %v5796_v60, 0.0  ;;  %v13586_v15 = vmin.f32 %v5826_v13, 6.0  ;;  %v5905_v55 = vsel %vm32_vm0, %v13569_v18, 0.0  ;;  %v16726_v58 = vld [vmem:[#allocation58_spill] sm:$0xff] }
 0x8c1   :  { %v5676_v24 = vadd.f32 %v13455_v32, %v13359_v8  ;;  %v5738_v41 = vmul.f32 %v16724_v43, %v16703_v11  ;;  %v5769_v9 = vadd.f32 %v5737_v22, %v5673_v28  ;;  %v5904_v4 = vadd.f32 %v5903_v56, %v5902_v31 }
 0x8c2   :  { %v5799_v33 = vadd.f32 %v13382_v36, %v5767_v1  ;;  %v5829_v52 = vmax.f32 %v5797_v59, 0.0  ;;  %v13595_v54 = vmin.f32 %v5827_v19, 6.0  ;;  %v5907_v50 = vsel %vm32_vm0, %v13578_v23, 0.0 }
 0x8c3   :  { %v5739_v61 = vmul.f32 %v16725_v7, %v16703_v11  ;;  %v5740_v34 = vmul.f32 %v5708_v14, %v16703_v11  ;;  %v5770_v8 = vadd.f32 %v5738_v41, %v5674_v39  ;;  %v5906_v32 = vadd.f32 %v5905_v55, %v5904_v4 }
 0x8c4   :  { %v5800_v46 = vadd.f32 %v13382_v36, %v5768_v3  ;;  %v5830_v5 = vmax.f32 %v5798_v26, 0.0  ;;  %v13603_v53 = vmin.f32 %v5828_v10, 6.0  ;;  %v5909_v28 = vsel %vm32_vm0, %v13586_v15, 0.0 }
 0x8c5   :  { %v5677_v6 = vadd.f32 %v13514_v35, %v16726_v58  ;;  %v5741_v25 = vmul.f32 %v5709_v16, %v16703_v11  ;;  %v5771_v60 = vadd.f32 %v5739_v61, %v5675_v62  ;;  %v5908_v13 = vadd.f32 %v5907_v50, %v5906_v32 }
 0x8c6   :  { %v5801_v2 = vadd.f32 %v13382_v36, %v5769_v9  ;;  %v5831_v40 = vmax.f32 %v5799_v33, 0.0  ;;  %v13611_v39 = vmin.f32 %v5829_v52, 6.0  ;;  %v5911_v57 = vsel %vm32_vm0, %v13595_v54, 0.0 }
 0x8c7   :  { %v5772_v44 = vadd.f32 %v5740_v34, %v5676_v24  ;;  %v5910_v1 = vadd.f32 %v5909_v28, %v5908_v13  ;;  %v5802_v38 = vadd.f32 %v13382_v36, %v5770_v8  ;;  %v5832_v59 = vmax.f32 %v5800_v46, 0.0 }
 0x8c8   :  { %v13616_v19 = vmin.f32 %v5830_v5, 6.0  ;;  %v5913_v11 = vsel %vm32_vm0, %v13603_v53, 0.0  ;;  %v5773_v35 = vadd.f32 %v5741_v25, %v5677_v6  ;;  %v5803_v62 = vadd.f32 %v13382_v36, %v5771_v60 }
 0x8c9   :  { %v5912_v56 = vadd.f32 %v5911_v57, %v5910_v1  ;;  %v5833_v22 = vmax.f32 %v5801_v2, 0.0  ;;  %v13621_v3 = vmin.f32 %v5831_v40, 6.0  ;;  %v5915_v31 = vsel %vm32_vm0, %v13611_v39, 0.0 }
 0x8ca   :  { %v5804_v26 = vadd.f32 %v13382_v36, %v5772_v44  ;;  %v5834_v10 = vmax.f32 %v5802_v38, 0.0  ;;  %v13626_v55 = vmin.f32 %v5832_v59, 6.0  ;;  %v5917_v24 = vsel %vm32_vm0, %v13616_v19, 0.0 }
 0x8cb   :  { %v5914_v14 = vadd.f32 %v5913_v11, %v5912_v56  ;;  %v5805_v41 = vadd.f32 %v13382_v36, %v5773_v35  ;;  %v5835_v9 = vmax.f32 %v5803_v62, 0.0  ;;  %v13631_v4 = vmin.f32 %v5833_v22, 6.0  ;;  %v16727_v56 = vld [vmem:[#allocation7_spill] sm:$0xff] }
 0x8cc   :  { %v5919_v16 = vsel %vm32_vm0, %v13621_v3, 0.0  ;;  %v5836_v52 = vmax.f32 %v5804_v26, 0.0  ;;  %v13635_v50 = vmin.f32 %v5834_v10, 6.0  ;;  %v5921_v7 = vsel %vm32_vm0, %v13626_v55, 0.0  ;;  %v16731_v26 = vld [vmem:[#allocation20_spill] sm:$0xff] }
 0x8cd   :  { %v5916_v43 = vadd.f32 %v5915_v31, %v5914_v14  ;;  %v5837_v34 = vmax.f32 %v5805_v41, 0.0  ;;  %v13639_v8 = vmin.f32 %v5835_v9, 6.0  ;;  %v5923_v36 = vsel %vm32_vm0, %v13631_v4, 0.0  ;;  %v16735_v41 = vld [vmem:[#allocation38_spill] sm:$0xff] }
 0x8ce   :  { %v13643_v46 = vmin.f32 %v5836_v52, 6.0  ;;  %v5925_v5 = vsel %vm32_vm0, %v13635_v50, 0.0  ;;  %v16728_v22 = vmov 4   ;;  %v16729_v31 = vmov 6   ;;  %v16739_v52 = vld [vmem:[#allocation19_spill] sm:$0xff] }
 0x8cf   :  { %v5918_v33 = vadd.f32 %v5917_v24, %v5916_v43  ;;  %v13647_v58 = vmin.f32 %v5837_v34, 6.0  ;;  %v5927_v6 = vsel %vm32_vm0, %v13639_v8, 0.0  ;;  %v16730_v14 = vmov 3   ;;  %v16733_v24 = vld [vmem:[#allocation47_spill] sm:$0xff]  ;;  %v16742_v34 = vld [vmem:[#allocation42_spill] sm:$0xff] }
 0x8d0   :  { %v5929_v60 = vsel %vm32_vm0, %v13643_v46, 0.0  ;;  %v16732_v10 = vmov 7   ;;  %v16734_v43 = vmov 5   ;;  %v16736_v9 = vmov 1  }
 0x8d1   :  { %v5920_v61 = vadd.f32 %v5919_v16, %v5918_v33  ;;  %v5931_v2 = vsel %vm32_vm0, %v13647_v58, 0.0  ;;  %v16737_v16 = vmov 0   ;;  %v16738_v33 = vld [vmem:[#allocation14_spill] sm:$0xff] }
 0x8d3   :  { %v5922_v32 = vadd.f32 %v5921_v7, %v5920_v61  ;;  %v16740_v7 = vld [vmem:[#allocation39_spill] sm:$0xff]  ;;  %v16741_v61 = vld [vmem:[#allocation40_spill] sm:$0xff] }
 0x8d5   :  { %v5924_v28 = vadd.f32 %v5923_v36, %v5922_v32  ;;  %v16743_v36 = vld [vmem:[#allocation43_spill] sm:$0xff]  ;;  %v16744_v32 = vld [vmem:[#allocation5_spill] sm:$0xff] }
 0x8d7   :  { %v5926_v25 = vadd.f32 %v5925_v5, %v5924_v28 }
 0x8d9   :  { %v5928_v13 = vadd.f32 %v5927_v6, %v5926_v25 }
 0x8db   :  { %v5930_v40 = vadd.f32 %v5929_v60, %v5928_v13 }
 0x8dd   :  { %v5932_v57 = vadd.f32 %v5931_v2, %v5930_v40 }
 0x8df   :  { %v5933_v44 = vrot.slane %v5932_v57, 4 }
 0x8e1   :  { %v5934_v1 = vadd.f32 %v5933_v44, %v5932_v57 }
 0x8e3   :  { %v5935_v38 = vrot.slane %v5934_v1, 2 }
 0x8e5   :  { %v5936_v59 = vadd.f32 %v5935_v38, %v5934_v1  ;;  %v7989_v38 = vld [vmem:[%s15575_s5] sm:$0xff] }
 0x8e7   :  { %v5937_v11 = vrot.slane %v5936_v59, 1 }
 0x8e9   :  { %v5938_v35 = vadd.f32 %v5937_v11, %v5936_v59 }
 0x8eb   :  { %v5939_v62 = vmul.f32 %v5938_v35, %v16727_v56 }
 0x8ed   :  { %5957 = vperm.xlu1 %7935, %v5939_v62   ;;  %5948 = vperm.xlu0 %7932, %v5939_v62  }
 0x8ee   :  { %5942 = vperm.xlu2 %7933, %v5939_v62  }
 0x8f5   :  { %7937 = vset.pattern.permute.xlu1 %v16728_v22  ;;  %7934 = vset.pattern.permute.xlu0 %v16729_v31 }
 0x8f6   :  { %7936 = vset.pattern.permute.xlu2 %v16730_v14  ;;  %5975 = vperm.xlu1 %7937, %v5939_v62  }
 0x8f7   :  { %3436 = vperm.xlu0 %7934, %v16731_v26   ;;  %5966 = vperm.xlu2 %7936, %v5939_v62  }
 0x8fe   :  { %7939 = vset.pattern.permute.xlu1 %v16732_v10 }
 0x8ff   :  { %3456 = vperm.xlu0 %7934, %v16733_v24   ;;  %7938 = vset.pattern.permute.xlu2 %v16734_v43 }
 0x900   :  { %6002 = vperm.xlu1 %7939, %v5939_v62   ;;  %5984 = vperm.xlu2 %7938, %v5939_v62  }
 0x907   :  { %3468 = vperm.xlu0 %7934, %v16735_v41  }
 0x908   :  { %7941 = vset.pattern.permute.xlu1 %v16736_v9  ;;  %7940 = vset.pattern.permute.xlu2 %v16737_v16 }
 0x90f   :  { %3480 = vperm.xlu0 %7934, %v16738_v33  }
 0x917   :  { %3492 = vperm.xlu0 %7934, %v16739_v52  }
 0x91f   :  { %3504 = vperm.xlu0 %7934, %v16740_v7  }
 0x927   :  { %3516 = vperm.xlu0 %7934, %v16741_v61  }
 0x92f   :  { %3528 = vperm.xlu0 %7934, %v16742_v34  }
 0x937   :  { %3540 = vperm.xlu0 %7934, %v16743_v36  }
 0x93f   :  { %3552 = vperm.xlu0 %7934, %v16744_v32  }
 0x947   :  { %5993 = vperm.xlu0 %7934, %v5939_v62  }
 0x948   :  { %v5943_v57 = vpop.permute.xlu2 %5942 }
 0x949   :  { %v5945_v62 = vmul.f32 %v7989_v38, %v5943_v57 }
 0x94f   :  { %7942 = vset.pattern.permute.xlu0 %v16737_v16 }
 0x951   :  { %v5967_v11 = vpop.permute.xlu2 %5966 }
 0x95a   :  { %v5985_v10 = vpop.permute.xlu2 %5984 }
 0x95b   :  { %v5987_v32 = vmul.f32 %v7989_v38, %v5985_v10 }
 0x95f   :  { %v5949_v5 = vpop.permute.xlu0 %5948  ;;  %v5958_v1 = vpop.permute.xlu1 %5957 }
 0x960   :  { %v5951_v59 = vmul.f32 %v7989_v38, %v5949_v5 }
 0x962   :  { %v5953_v56 = vrot.slane %v5951_v59, 1 }
 0x969   :  { %v13674_v28 = vpop.permute.xlu0 %3436 }
 0x96a   :  { %16745 = vst [vmem:[#allocation171_spill] sm:$0xff] %v13674_v28 }
 0x971   :  { %v13676_v6 = vpop.permute.xlu0 %3456 }
 0x972   :  { %16746 = vst [vmem:[#allocation57_spill] sm:$0xff] %v13676_v6 }
 0x979   :  { %v13678_v25 = vpop.permute.xlu0 %3468 }
 0x97a   :  { %16747 = vst [vmem:[#allocation82_spill] sm:$0xff] %v13678_v25  ;;  %v5955_v25 = vadd.f32 %v5953_v56, %v5945_v62 }
 0x981   :  { %v13680_v60 = vpop.permute.xlu0 %3480 }
 0x982   :  { %16748 = vst [vmem:[#allocation194_spill] sm:$0xff] %v13680_v60  ;;  %v5960_v60 = vmul.f32 %v7989_v38, %v5958_v1 }
 0x984   :  { %v5962_v6 = vrot.slane %v5960_v60, 2 }
 0x989   :  { %v13682_v13 = vpop.permute.xlu0 %3492 }
 0x98a   :  { %16749 = vst [vmem:[#allocation6_spill] sm:$0xff] %v13682_v13  ;;  %v5976_v13 = vpop.permute.xlu1 %5975 }
 0x991   :  { %v13684_v2 = vpop.permute.xlu0 %3504 }
 0x992   :  { %16750 = vst [vmem:[#allocation114_spill] sm:$0xff] %v13684_v2  ;;  %v5969_v2 = vmul.f32 %v7989_v38, %v5967_v11  ;;  %v6003_v5 = vpop.permute.xlu1 %6002 }
 0x993   :  { %v6005_v59 = vmul.f32 %v7989_v38, %v6003_v5 }
 0x994   :  { %v5971_v31 = vrot.slane %v5969_v2, 3 }
 0x995   :  { %v6007_v56 = vrot.slane %v6005_v59, 7 }
 0x999   :  { %v13686_v40 = vpop.permute.xlu0 %3516 }
 0x99a   :  { %16751 = vst [vmem:[#allocation78_spill] sm:$0xff] %v13686_v40  ;;  %v5978_v40 = vmul.f32 %v7989_v38, %v5976_v13 }
 0x99c   :  { %v5980_v43 = vrot.slane %v5978_v40, 4 }
 0x9a1   :  { %v13688_v44 = vpop.permute.xlu0 %3528 }
 0x9a2   :  { %16752 = vst [vmem:[#allocation146_spill] sm:$0xff] %v13688_v44  ;;  %v5964_v44 = vadd.f32 %v5962_v6, %v5955_v25 }
 0x9a4   :  { %v5973_v36 = vadd.f32 %v5971_v31, %v5964_v44  ;;  %v7990_v31 = vld [vmem:[%s15576_s6] sm:$0x3] }
 0x9a6   :  { %v5982_v34 = vadd.f32 %v5980_v43, %v5973_v36  ;;  %v16755_v43 = vld [vmem:[#allocation44_spill] sm:$0xff] }
 0x9a7   :  { %v16756_v36 = vrot.slane %v16755_v43, 1 }
 0x9a9   :  { %v13693_v35 = vpop.permute.xlu0 %3540 }
 0x9aa   :  { %16753 = vst [vmem:[#allocation62_spill] sm:$0xff] %v13693_v35  ;;  %v5989_v35 = vrot.slane %v5987_v32, 5 }
 0x9ac   :  { %v5991_v1 = vadd.f32 %v5989_v35, %v5982_v34 }
 0x9b1   :  { %v13695_v28 = vpop.permute.xlu0 %3552 }
 0x9b2   :  { %16754 = vst [vmem:[#allocation172_spill] sm:$0xff] %v13695_v28 }
 0x9b9   :  { %v5994_v61 = vpop.permute.xlu0 %5993 }
 0x9ba   :  { %v5996_v57 = vmul.f32 %v7989_v38, %v5994_v61 }
 0x9bc   :  { %v5998_v7 = vrot.slane %v5996_v57, 6 }
 0x9be   :  { %v6000_v11 = vadd.f32 %v5998_v7, %v5991_v1 }
 0x9c0   :  { %v6009_v60 = vadd.f32 %v6007_v56, %v6000_v11 }
 0x9c2   :  { %v6010_v13 = vmax.f32 %v6009_v60, 0.0  ;;  %v16758_v60 = vld [vmem:[#allocation9_spill] sm:$0xff] }
 0x9c4   :  { %6019 = vperm.xlu1 %7941, %v6010_v13   ;;  %6013 = vperm.xlu2 %7940, %v6010_v13  }
 0x9cc   :  { %7943 = vset.pattern.permute.xlu1 %v16737_v16 }
 0xa1e   :  { %v6014_v6 = vpop.permute.xlu2 %6013 }
 0xa1f   :  { %v6016_v10 = vmul.f32 %v7990_v31, %v6014_v6  ;;  %v16760_v6 = vld [vmem:[#allocation143_spill] sm:$0xff] }
 0xa36   :  { %v6020_v25 = vpop.permute.xlu1 %6019 }
 0xa37   :  { %v6022_v61 = vmul.f32 %v6020_v25, %v16756_v36 }
 0xa39   :  { %v6023_v34 = vadd.f32 %v6022_v61, %v6016_v10 }
 0xa3b   :  { %v7810_v32 = vmul.f32 -1.442695, %v6023_v34 }
 0xa3d   :  { %7974 = vpow2.f32 %v7810_v32 }
 0xa43   :  { %v7975_v7 = vpop.eup %7974 }
 0xa44   :  { %v6027_v2 = vadd.f32 1.0, %v7975_v7 }
 0xa46   :  { %7976 = vrcp.f32 %v6027_v2  ;;  %v6039_v16 = vand.u32 2147483648, %v6027_v2  ;;  %v6037_v62 = vand.u32 2147483647, %v6027_v2  ;;  %vm6033_vm10 = vweird.f32 %v6027_v2 }
 0xa48   :  { %v6040_v59 = vor.u32 1.1754944e-38, %v6039_v16  ;;  %vm6038_vm12 = vcmp.eq.f32.partialorder %v6037_v62, 8.507059e+37 }
 0xa4c   :  { %v7977_v40 = vpop.eup %7976 }
 0xa4d   :  { %v6029_v44 = vmul.f32 %v7977_v40, %v6027_v2  ;;  %vm6034_vm9 = vweird.f32 %v7977_v40 }
 0xa4e   :  { %vm6035_vm11 = vmor %vm6033_vm10, %vm6034_vm9 }
 0xa4f   :  { %v6030_v38 = vsub.f32 1.0, %v6029_v44 }
 0xa51   :  { %v6031_v35 = vmul.f32 %v7977_v40, %v6030_v38 }
 0xa53   :  { %v6032_v5 = vadd.f32 %v7977_v40, %v6031_v35 }
 0xa55   :  { %v6036_v57 = vsel %vm6035_vm11, %v7977_v40, %v6032_v5 }
 0xa56   :  { %v6041_v1 = vsel %vm6038_vm12, %v6040_v59, %v6036_v57 }
 0xa57   :  { %v6043_v56 = vperm.slane %v6041_v1, 0 }
 0xa59   :  { %v13704_v11 = vmul.f32 %v6043_v56, %v13432_v48  ;;  %v13707_v13 = vmul.f32 %v6043_v56, %v16758_v60  ;;  %v13710_v25 = vmul.f32 %v6043_v56, %v16760_v6  ;;  %v13716_v31 = vmul.f32 %v6043_v56, %v13448_v51 }
 0xa5a   :  { %v13719_v10 = vmul.f32 %v6043_v56, %v13466_v47  ;;  %v13722_v48 = vmul.f32 %v6043_v56, %v13446_v17  ;;  %v13728_v43 = vmul.f32 %v6043_v56, %v13477_v27  ;;  %v13731_v36 = vmul.f32 %v6043_v56, %v13493_v49 }
 0xa5b   :  { %16757 = vst [vmem:[#allocation196_spill] sm:$0xff] %v13704_v11  ;;  %6088 = vperm.xlu1 %7943, %v13704_v11   ;;  %6083 = vperm.xlu0 %7942, %v13707_v13   ;;  %v13734_v51 = vmul.f32 %v6043_v56, %v13461_v45  ;;  %v13740_v17 = vmul.f32 %v6043_v56, %v13501_v21 }
 0xa5c   :  { %16759 = vst [vmem:[#allocation45_spill] sm:$0xff] %v13707_v13  ;;  %6078 = vperm.xlu2 %7940, %v13710_v25   ;;  %v13743_v47 = vmul.f32 %v6043_v56, %v13519_v12  ;;  %v13746_v27 = vmul.f32 %v6043_v56, %v13485_v30  ;;  %v13752_v45 = vmul.f32 %v6043_v56, %v13528_v20 }
 0xa5d   :  { %16761 = vst [vmem:[#allocation22_spill] sm:$0xff] %v13719_v10  ;;  %v13755_v49 = vmul.f32 %v6043_v56, %v13544_v0  ;;  %v13758_v21 = vmul.f32 %v6043_v56, %v13509_v29  ;;  %v13764_v30 = vmul.f32 %v6043_v56, %v13552_v63  ;;  %v13767_v12 = vmul.f32 %v6043_v56, %v13569_v18 }
 0xa5e   :  { %16762 = vst [vmem:[#allocation21_spill] sm:$0xff] %v13722_v48  ;;  %v13770_v20 = vmul.f32 %v6043_v56, %v13536_v37  ;;  %v13776_v29 = vmul.f32 %v6043_v56, %v13578_v23  ;;  %v13779_v0 = vmul.f32 %v6043_v56, %v13595_v54  ;;  %v13782_v63 = vmul.f32 %v6043_v56, %v13560_v42 }
 0xa5f   :  { %16763 = vst [vmem:[#allocation23_spill] sm:$0xff] %v13731_v36  ;;  %v13788_v37 = vmul.f32 %v6043_v56, %v13603_v53  ;;  %v13791_v18 = vmul.f32 %v6043_v56, %v13616_v19  ;;  %v13794_v23 = vmul.f32 %v6043_v56, %v13586_v15  ;;  %v13800_v42 = vmul.f32 %v6043_v56, %v13621_v3 }
 0xa60   :  { %16764 = vst [vmem:[#allocation29_spill] sm:$0xff] %v13734_v51  ;;  %v13803_v54 = vmul.f32 %v6043_v56, %v13631_v4  ;;  %v13806_v53 = vmul.f32 %v6043_v56, %v13611_v39  ;;  %v13812_v15 = vmul.f32 %v6043_v56, %v13635_v50  ;;  %v13815_v19 = vmul.f32 %v6043_v56, %v13643_v46 }
 0xa61   :  { %16765 = vst [vmem:[#allocation24_spill] sm:$0xff] %v13740_v17  ;;  %v13818_v3 = vmul.f32 %v6043_v56, %v13626_v55  ;;  %v13824_v39 = vmul.f32 %v6043_v56, %v13647_v58  ;;  %v13827_v4 = vmul.f32 %v6043_v56, %v13639_v8  ;;  %v16797_v56 = vmov 2  }
 0xa62   :  { %16766 = vst [vmem:[#allocation116_spill] sm:$0xff] %v13743_v47 }
 0xa63   :  { %6098 = vperm.xlu1 %7943, %v13716_v31   ;;  %6108 = vperm.xlu0 %7942, %v13719_v10   ;;  %16767 = vst [vmem:[#allocation63_spill] sm:$0xff] %v13746_v27 }
 0xa64   :  { %6093 = vperm.xlu2 %7940, %v13722_v48   ;;  %16768 = vst [vmem:[#allocation110_spill] sm:$0xff] %v13752_v45 }
 0xa65   :  { %16769 = vst [vmem:[#allocation70_spill] sm:$0xff] %v13755_v49 }
 0xa66   :  { %16770 = vst [vmem:[#allocation73_spill] sm:$0xff] %v13758_v21 }
 0xa67   :  { %16771 = vst [vmem:[#allocation64_spill] sm:$0xff] %v13764_v30 }
 0xa68   :  { %16772 = vst [vmem:[#allocation81_spill] sm:$0xff] %v13767_v12 }
 0xa69   :  { %16773 = vst [vmem:[#allocation119_spill] sm:$0xff] %v13770_v20 }
 0xa6a   :  { %16774 = vst [vmem:[#allocation67_spill] sm:$0xff] %v13779_v0 }
 0xa6b   :  { %6113 = vperm.xlu1 %7943, %v13728_v43   ;;  %6123 = vperm.xlu0 %7942, %v13731_v36   ;;  %16775 = vst [vmem:[#allocation65_spill] sm:$0xff] %v13782_v63 }
 0xa6c   :  { %6103 = vperm.xlu2 %7940, %v13734_v51   ;;  %16776 = vst [vmem:[#allocation61_spill] sm:$0xff] %v13791_v18 }
 0xa6d   :  { %16777 = vst [vmem:[#allocation66_spill] sm:$0xff] %v13803_v54 }
 0xa6e   :  { %16778 = vst [vmem:[#allocation144_spill] sm:$0xff] %v13815_v19 }
 0xa73   :  { %6128 = vperm.xlu1 %7943, %v13740_v17   ;;  %6138 = vperm.xlu0 %7942, %v13743_v47  }
 0xa74   :  { %6118 = vperm.xlu2 %7940, %v13746_v27  }
 0xa7b   :  { %6143 = vperm.xlu1 %7943, %v13752_v45   ;;  %6153 = vperm.xlu0 %7942, %v13755_v49  }
 0xa7c   :  { %6133 = vperm.xlu2 %7940, %v13758_v21  }
 0xa83   :  { %6158 = vperm.xlu1 %7943, %v13764_v30   ;;  %6168 = vperm.xlu0 %7942, %v13767_v12  }
 0xa84   :  { %6148 = vperm.xlu2 %7940, %v13770_v20  }
 0xa8b   :  { %6173 = vperm.xlu1 %7943, %v13776_v29   ;;  %6183 = vperm.xlu0 %7942, %v13779_v0  }
 0xa8c   :  { %6163 = vperm.xlu2 %7940, %v13782_v63  }
 0xa93   :  { %6188 = vperm.xlu1 %7943, %v13788_v37   ;;  %6198 = vperm.xlu0 %7942, %v13791_v18  }
 0xa94   :  { %6178 = vperm.xlu2 %7940, %v13794_v23  }
 0xa9b   :  { %6203 = vperm.xlu1 %7943, %v13800_v42   ;;  %6213 = vperm.xlu0 %7942, %v13803_v54  }
 0xa9c   :  { %6193 = vperm.xlu2 %7940, %v13806_v53  }
 0xaa3   :  { %6218 = vperm.xlu1 %7943, %v13812_v15   ;;  %6228 = vperm.xlu0 %7942, %v13815_v19  }
 0xaa4   :  { %6208 = vperm.xlu2 %7940, %v13818_v3  }
 0xaab   :  { %6233 = vperm.xlu1 %7943, %v13824_v39   ;;  %7945 = vset.pattern.permute.xlu0 %v16736_v9 }
 0xaac   :  { %6223 = vperm.xlu2 %7940, %v13827_v4   ;;  %6305 = vperm.xlu0 %7945, %v13707_v13  }
 0xab3   :  { %7946 = vset.pattern.permute.xlu1 %v16736_v9 }
 0xab4   :  { %7944 = vset.pattern.permute.xlu2 %v16736_v9  ;;  %6309 = vperm.xlu1 %7946, %v13704_v11  }
 0xab5   :  { %6325 = vperm.xlu0 %7945, %v13719_v10   ;;  %6301 = vperm.xlu2 %7944, %v13710_v25  }
 0xab6   :  { %v13838_v55 = vpop.permute.xlu2 %6078 }
 0xab7   :  { %16779 = vst [vmem:[#allocation76_spill] sm:$0xff] %v13838_v55 }
 0xabc   :  { %6317 = vperm.xlu1 %7946, %v13716_v31  }
 0xabd   :  { %6337 = vperm.xlu0 %7945, %v13731_v36   ;;  %6313 = vperm.xlu2 %7944, %v13722_v48  }
 0xabe   :  { %v13843_v50 = vpop.permute.xlu2 %6093 }
 0xabf   :  { %16780 = vst [vmem:[#allocation112_spill] sm:$0xff] %v13843_v50 }
 0xac4   :  { %6329 = vperm.xlu1 %7946, %v13728_v43  }
 0xac5   :  { %6349 = vperm.xlu0 %7945, %v13743_v47   ;;  %6321 = vperm.xlu2 %7944, %v13734_v51  }
 0xac6   :  { %v13848_v8 = vpop.permute.xlu2 %6103 }
 0xac7   :  { %16781 = vst [vmem:[#allocation84_spill] sm:$0xff] %v13848_v8 }
 0xacc   :  { %6341 = vperm.xlu1 %7946, %v13740_v17  }
 0xacd   :  { %6361 = vperm.xlu0 %7945, %v13755_v49   ;;  %6333 = vperm.xlu2 %7944, %v13746_v27   ;;  %v13853_v46 = vpop.permute.xlu1 %6088  ;;  %v13855_v58 = vpop.permute.xlu0 %6083 }
 0xace   :  { %16782 = vst [vmem:[#allocation86_spill] sm:$0xff] %v13853_v46  ;;  %v13857_v9 = vpop.permute.xlu2 %6118 }
 0xacf   :  { %16783 = vst [vmem:[#allocation87_spill] sm:$0xff] %v13855_v58 }
 0xad0   :  { %16784 = vst [vmem:[#allocation92_spill] sm:$0xff] %v13857_v9 }
 0xad4   :  { %6353 = vperm.xlu1 %7946, %v13752_v45  }
 0xad5   :  { %6373 = vperm.xlu0 %7945, %v13767_v12   ;;  %6345 = vperm.xlu2 %7944, %v13758_v21   ;;  %v13862_v61 = vpop.permute.xlu1 %6098  ;;  %v13864_v34 = vpop.permute.xlu0 %6108 }
 0xad6   :  { %16785 = vst [vmem:[#allocation90_spill] sm:$0xff] %v13862_v61  ;;  %v13866_v32 = vpop.permute.xlu2 %6133 }
 0xad7   :  { %16786 = vst [vmem:[#allocation89_spill] sm:$0xff] %v13864_v34 }
 0xad8   :  { %16787 = vst [vmem:[#allocation122_spill] sm:$0xff] %v13866_v32 }
 0xadc   :  { %6365 = vperm.xlu1 %7946, %v13764_v30  }
 0xadd   :  { %6385 = vperm.xlu0 %7945, %v13779_v0   ;;  %6357 = vperm.xlu2 %7944, %v13770_v20   ;;  %v13871_v7 = vpop.permute.xlu1 %6113  ;;  %v13873_v2 = vpop.permute.xlu0 %6123 }
 0xade   :  { %16788 = vst [vmem:[#allocation147_spill] sm:$0xff] %v13871_v7  ;;  %v13875_v40 = vpop.permute.xlu2 %6148 }
 0xadf   :  { %16789 = vst [vmem:[#allocation115_spill] sm:$0xff] %v13873_v2 }
 0xae0   :  { %16790 = vst [vmem:[#allocation125_spill] sm:$0xff] %v13875_v40 }
 0xae4   :  { %6377 = vperm.xlu1 %7946, %v13776_v29  }
 0xae5   :  { %6397 = vperm.xlu0 %7945, %v13791_v18   ;;  %6369 = vperm.xlu2 %7944, %v13782_v63   ;;  %v13880_v44 = vpop.permute.xlu1 %6128  ;;  %v13882_v38 = vpop.permute.xlu0 %6138 }
 0xae6   :  { %16791 = vst [vmem:[#allocation95_spill] sm:$0xff] %v13880_v44  ;;  %v13884_v16 = vpop.permute.xlu2 %6163 }
 0xae7   :  { %16792 = vst [vmem:[#allocation93_spill] sm:$0xff] %v13882_v38 }
 0xaec   :  { %6389 = vperm.xlu1 %7946, %v13788_v37  }
 0xaed   :  { %6409 = vperm.xlu0 %7945, %v13803_v54   ;;  %6381 = vperm.xlu2 %7944, %v13794_v23   ;;  %v13889_v35 = vpop.permute.xlu1 %6143  ;;  %v13891_v62 = vpop.permute.xlu0 %6153 }
 0xaee   :  { %16793 = vst [vmem:[#allocation149_spill] sm:$0xff] %v13889_v35  ;;  %v13893_v5 = vpop.permute.xlu2 %6178 }
 0xaef   :  { %16794 = vst [vmem:[#allocation96_spill] sm:$0xff] %v13891_v62 }
 0xaf4   :  { %6401 = vperm.xlu1 %7946, %v13800_v42  }
 0xaf5   :  { %6421 = vperm.xlu0 %7945, %v13815_v19   ;;  %6393 = vperm.xlu2 %7944, %v13806_v53   ;;  %v13898_v59 = vpop.permute.xlu1 %6158  ;;  %v13900_v57 = vpop.permute.xlu0 %6168 }
 0xaf6   :  { %16795 = vst [vmem:[#allocation117_spill] sm:$0xff] %v13898_v59  ;;  %v13902_v1 = vpop.permute.xlu2 %6193 }
 0xaf7   :  { %16796 = vst [vmem:[#allocation118_spill] sm:$0xff] %v13900_v57 }
 0xafc   :  { %6413 = vperm.xlu1 %7946, %v13812_v15  }
 0xafd   :  { %7948 = vset.pattern.permute.xlu0 %v16797_v56  ;;  %6405 = vperm.xlu2 %7944, %v13818_v3   ;;  %v13907_v60 = vpop.permute.xlu1 %6173  ;;  %v13909_v6 = vpop.permute.xlu0 %6183 }
 0xafe   :  { %16798 = vst [vmem:[#allocation120_spill] sm:$0xff] %v13909_v6  ;;  %6497 = vperm.xlu0 %7948, %v13707_v13   ;;  %v13912_v28 = vpop.permute.xlu2 %6208 }
 0xb04   :  { %6425 = vperm.xlu1 %7946, %v13824_v39  }
 0xb05   :  { %6417 = vperm.xlu2 %7944, %v13827_v4   ;;  %v13916_v57 = vpop.permute.xlu1 %6188  ;;  %v13918_v62 = vpop.permute.xlu0 %6198 }
 0xb06   :  { %16799 = vst [vmem:[#allocation150_spill] sm:$0xff] %v13918_v62  ;;  %6517 = vperm.xlu0 %7948, %v13719_v10   ;;  %v13921_v38 = vpop.permute.xlu2 %6223 }
 0xb07   :  { %16800 = vst [vmem:[#allocation121_spill] sm:$0xff] %v13921_v38  ;;  %v16862_v38 = vld [vmem:[#allocation40_spill] sm:$0xff] }
 0xb0c   :  { %7949 = vset.pattern.permute.xlu1 %v16797_v56 }
 0xb0d   :  { %7947 = vset.pattern.permute.xlu2 %v16797_v56  ;;  %6501 = vperm.xlu1 %7949, %v13704_v11   ;;  %v13926_v6 = vpop.permute.xlu1 %6203  ;;  %v13928_v2 = vpop.permute.xlu0 %6213 }
 0xb0e   :  { %16801 = vst [vmem:[#allocation31_spill] sm:$0xff] %v13926_v6  ;;  %6529 = vperm.xlu0 %7948, %v13731_v36   ;;  %6493 = vperm.xlu2 %7947, %v13710_v25  }
 0xb0f   :  { %16802 = vst [vmem:[#allocation68_spill] sm:$0xff] %v13928_v2  ;;  %v13932_v34 = vpop.permute.xlu2 %6301 }
 0xb10   :  { %16803 = vst [vmem:[#allocation60_spill] sm:$0xff] %v13932_v34  ;;  %v16858_v34 = vld [vmem:[#allocation39_spill] sm:$0xff] }
 0xb15   :  { %6509 = vperm.xlu1 %7949, %v13716_v31   ;;  %v13935_v62 = vpop.permute.xlu1 %6218  ;;  %v13937_v58 = vpop.permute.xlu0 %6228 }
 0xb16   :  { %16804 = vst [vmem:[#allocation102_spill] sm:$0xff] %v13935_v62  ;;  %6541 = vperm.xlu0 %7948, %v13743_v47   ;;  %6505 = vperm.xlu2 %7947, %v13722_v48  }
 0xb17   :  { %16805 = vst [vmem:[#allocation52_spill] sm:$0xff] %v13937_v58  ;;  %v13941_v56 = vpop.permute.xlu2 %6313 }
 0xb18   :  { %16806 = vst [vmem:[#allocation128_spill] sm:$0xff] %v13941_v56 }
 0xb1d   :  { %6521 = vperm.xlu1 %7949, %v13728_v43   ;;  %v13944_v2 = vpop.permute.xlu1 %6233 }
 0xb1e   :  { %16807 = vst [vmem:[#allocation132_spill] sm:$0xff] %v13944_v2  ;;  %6553 = vperm.xlu0 %7948, %v13755_v49   ;;  %6513 = vperm.xlu2 %7947, %v13734_v51   ;;  %v13948_v59 = vpop.permute.xlu0 %6305 }
 0xb1f   :  { %16808 = vst [vmem:[#allocation180_spill] sm:$0xff] %v13948_v59  ;;  %v13950_v35 = vpop.permute.xlu2 %6321 }
 0xb20   :  { %16809 = vst [vmem:[#allocation46_spill] sm:$0xff] %v13950_v35 }
 0xb25   :  { %6533 = vperm.xlu1 %7949, %v13740_v17  }
 0xb26   :  { %6565 = vperm.xlu0 %7948, %v13767_v12   ;;  %6525 = vperm.xlu2 %7947, %v13746_v27   ;;  %v13955_v58 = vpop.permute.xlu1 %6309 }
 0xb27   :  { %16810 = vst [vmem:[#allocation206_spill] sm:$0xff] %v13955_v58  ;;  %v13957_v44 = vpop.permute.xlu0 %6325  ;;  %v13959_v40 = vpop.permute.xlu2 %6333 }
 0xb28   :  { %16811 = vst [vmem:[#allocation135_spill] sm:$0xff] %v13957_v44 }
 0xb29   :  { %16812 = vst [vmem:[#allocation71_spill] sm:$0xff] %v13959_v40 }
 0xb2d   :  { %6545 = vperm.xlu1 %7949, %v13752_v45  }
 0xb2e   :  { %6577 = vperm.xlu0 %7948, %v13779_v0   ;;  %6537 = vperm.xlu2 %7947, %v13758_v21   ;;  %v13964_v59 = vpop.permute.xlu1 %6317 }
 0xb2f   :  { %16813 = vst [vmem:[#allocation75_spill] sm:$0xff] %v13964_v59  ;;  %v13966_v7 = vpop.permute.xlu0 %6337  ;;  %v13968_v32 = vpop.permute.xlu2 %6345 }
 0xb30   :  { %16814 = vst [vmem:[#allocation36_spill] sm:$0xff] %v13966_v7 }
 0xb31   :  { %16815 = vst [vmem:[#allocation33_spill] sm:$0xff] %v13968_v32 }
 0xb35   :  { %6557 = vperm.xlu1 %7949, %v13764_v30  }
 0xb36   :  { %6589 = vperm.xlu0 %7948, %v13791_v18   ;;  %6549 = vperm.xlu2 %7947, %v13770_v20   ;;  %v13973_v44 = vpop.permute.xlu1 %6329 }
 0xb37   :  { %16816 = vst [vmem:[#allocation166_spill] sm:$0xff] %v13973_v44  ;;  %v13975_v61 = vpop.permute.xlu0 %6349  ;;  %v13977_v9 = vpop.permute.xlu2 %6357 }
 0xb38   :  { %16817 = vst [vmem:[#allocation123_spill] sm:$0xff] %v13975_v61 }
 0xb39   :  { %16818 = vst [vmem:[#allocation35_spill] sm:$0xff] %v13977_v9 }
 0xb3d   :  { %6569 = vperm.xlu1 %7949, %v13776_v29  }
 0xb3e   :  { %6601 = vperm.xlu0 %7948, %v13803_v54   ;;  %6561 = vperm.xlu2 %7947, %v13782_v63   ;;  %v13982_v7 = vpop.permute.xlu1 %6341 }
 0xb3f   :  { %16819 = vst [vmem:[#allocation173_spill] sm:$0xff] %v13982_v7  ;;  %v13984_v32 = vpop.permute.xlu0 %6361  ;;  %v13986_v59 = vpop.permute.xlu2 %6369 }
 0xb40   :  { %16820 = vst [vmem:[#allocation183_spill] sm:$0xff] %v13984_v32 }
 0xb45   :  { %6581 = vperm.xlu1 %7949, %v13788_v37  }
 0xb46   :  { %6613 = vperm.xlu0 %7948, %v13815_v19   ;;  %6573 = vperm.xlu2 %7947, %v13794_v23   ;;  %v13991_v61 = vpop.permute.xlu1 %6353 }
 0xb47   :  { %16821 = vst [vmem:[#allocation184_spill] sm:$0xff] %v13991_v61  ;;  %v13993_v9 = vpop.permute.xlu0 %6373  ;;  %v13995_v44 = vpop.permute.xlu2 %6381 }
 0xb48   :  { %16822 = vst [vmem:[#allocation104_spill] sm:$0xff] %v13993_v9 }
 0xb4d   :  { %6593 = vperm.xlu1 %7949, %v13800_v42  }
 0xb4e   :  { %7951 = vset.pattern.permute.xlu0 %v16730_v14  ;;  %6585 = vperm.xlu2 %7947, %v13806_v53   ;;  %v14000_v32 = vpop.permute.xlu1 %6365 }
 0xb4f   :  { %16823 = vst [vmem:[#allocation74_spill] sm:$0xff] %v14000_v32  ;;  %6689 = vperm.xlu0 %7951, %v13707_v13   ;;  %v14003_v7 = vpop.permute.xlu0 %6385  ;;  %v14005_v46 = vpop.permute.xlu2 %6393 }
 0xb50   :  { %16824 = vst [vmem:[#allocation186_spill] sm:$0xff] %v14003_v7 }
 0xb55   :  { %6605 = vperm.xlu1 %7949, %v13812_v15  }
 0xb56   :  { %6597 = vperm.xlu2 %7947, %v13818_v3   ;;  %v14009_v9 = vpop.permute.xlu1 %6377 }
 0xb57   :  { %6709 = vperm.xlu0 %7951, %v13719_v10   ;;  %v14012_v61 = vpop.permute.xlu0 %6397  ;;  %v14014_v40 = vpop.permute.xlu2 %6405 }
 0xb58   :  { %16825 = vst [vmem:[#allocation187_spill] sm:$0xff] %v14012_v61 }
 0xb5d   :  { %6617 = vperm.xlu1 %7949, %v13824_v39  }
 0xb5e   :  { %6609 = vperm.xlu2 %7947, %v13827_v4   ;;  %v14018_v32 = vpop.permute.xlu1 %6389 }
 0xb5f   :  { %6721 = vperm.xlu0 %7951, %v13731_v36   ;;  %v14021_v7 = vpop.permute.xlu0 %6409  ;;  %v14023_v58 = vpop.permute.xlu2 %6417 }
 0xb60   :  { %16826 = vst [vmem:[#allocation124_spill] sm:$0xff] %v14021_v7 }
 0xb65   :  { %7952 = vset.pattern.permute.xlu1 %v16730_v14 }
 0xb66   :  { %7950 = vset.pattern.permute.xlu2 %v16730_v14  ;;  %6693 = vperm.xlu1 %7952, %v13704_v11   ;;  %v14028_v61 = vpop.permute.xlu1 %6401 }
 0xb67   :  { %16827 = vst [vmem:[#allocation107_spill] sm:$0xff] %v14028_v61  ;;  %6733 = vperm.xlu0 %7951, %v13743_v47   ;;  %v14031_v2 = vpop.permute.xlu0 %6421  ;;  %6685 = vperm.xlu2 %7950, %v13710_v25  }
 0xb68   :  { %16828 = vst [vmem:[#allocation152_spill] sm:$0xff] %v14031_v2  ;;  %v14034_v8 = vpop.permute.xlu2 %6493 }
 0xb69   :  { %16829 = vst [vmem:[#allocation131_spill] sm:$0xff] %v14034_v8 }
 0xb6e   :  { %6701 = vperm.xlu1 %7952, %v13716_v31   ;;  %v14037_v7 = vpop.permute.xlu1 %6413 }
 0xb6f   :  { %16830 = vst [vmem:[#allocation156_spill] sm:$0xff] %v14037_v7  ;;  %6745 = vperm.xlu0 %7951, %v13755_v49   ;;  %6697 = vperm.xlu2 %7950, %v13722_v48  }
 0xb70   :  { %v14041_v14 = vpop.permute.xlu0 %6497  ;;  %v14043_v35 = vpop.permute.xlu2 %6505 }
 0xb71   :  { %16831 = vst [vmem:[#allocation77_spill] sm:$0xff] %v14041_v14 }
 0xb72   :  { %16832 = vst [vmem:[#allocation189_spill] sm:$0xff] %v14043_v35 }
 0xb76   :  { %6713 = vperm.xlu1 %7952, %v13728_v43   ;;  %v14046_v62 = vpop.permute.xlu1 %6425 }
 0xb77   :  { %16833 = vst [vmem:[#allocation30_spill] sm:$0xff] %v14046_v62  ;;  %6757 = vperm.xlu0 %7951, %v13767_v12   ;;  %6705 = vperm.xlu2 %7950, %v13734_v51  }
 0xb78   :  { %v14050_v2 = vpop.permute.xlu0 %6517  ;;  %v14052_v50 = vpop.permute.xlu2 %6513 }
 0xb79   :  { %16834 = vst [vmem:[#allocation176_spill] sm:$0xff] %v14050_v2 }
 0xb7a   :  { %16835 = vst [vmem:[#allocation50_spill] sm:$0xff] %v14052_v50 }
 0xb7e   :  { %6725 = vperm.xlu1 %7952, %v13740_v17  }
 0xb7f   :  { %6769 = vperm.xlu0 %7951, %v13779_v0   ;;  %6717 = vperm.xlu2 %7950, %v13746_v27   ;;  %v14057_v14 = vpop.permute.xlu1 %6501 }
 0xb80   :  { %16836 = vst [vmem:[#allocation129_spill] sm:$0xff] %v14057_v14  ;;  %v14059_v35 = vpop.permute.xlu0 %6529  ;;  %v14061_v7 = vpop.permute.xlu2 %6525 }
 0xb81   :  { %16837 = vst [vmem:[#allocation56_spill] sm:$0xff] %v14059_v35 }
 0xb82   :  { %16838 = vst [vmem:[#allocation181_spill] sm:$0xff] %v14061_v7 }
 0xb86   :  { %6737 = vperm.xlu1 %7952, %v13752_v45  }
 0xb87   :  { %6781 = vperm.xlu0 %7951, %v13791_v18   ;;  %6729 = vperm.xlu2 %7950, %v13758_v21   ;;  %v14066_v2 = vpop.permute.xlu1 %6509 }
 0xb88   :  { %16839 = vst [vmem:[#allocation101_spill] sm:$0xff] %v14066_v2  ;;  %v14068_v50 = vpop.permute.xlu0 %6541  ;;  %v14070_v62 = vpop.permute.xlu2 %6537 }
 0xb89   :  { %16840 = vst [vmem:[#allocation37_spill] sm:$0xff] %v14068_v50 }
 0xb8a   :  { %16841 = vst [vmem:[#allocation130_spill] sm:$0xff] %v14070_v62 }
 0xb8e   :  { %6749 = vperm.xlu1 %7952, %v13764_v30  }
 0xb8f   :  { %6793 = vperm.xlu0 %7951, %v13803_v54   ;;  %6741 = vperm.xlu2 %7950, %v13770_v20   ;;  %v14075_v35 = vpop.permute.xlu1 %6521 }
 0xb90   :  { %16842 = vst [vmem:[#allocation161_spill] sm:$0xff] %v14075_v35  ;;  %v14077_v7 = vpop.permute.xlu0 %6553  ;;  %v14079_v14 = vpop.permute.xlu2 %6549 }
 0xb91   :  { %16843 = vst [vmem:[#allocation164_spill] sm:$0xff] %v14077_v7 }
 0xb92   :  { %16844 = vst [vmem:[#allocation165_spill] sm:$0xff] %v14079_v14 }
 0xb96   :  { %6761 = vperm.xlu1 %7952, %v13776_v29  }
 0xb97   :  { %6805 = vperm.xlu0 %7951, %v13815_v19   ;;  %6753 = vperm.xlu2 %7950, %v13782_v63   ;;  %v14084_v50 = vpop.permute.xlu1 %6533 }
 0xb98   :  { %16845 = vst [vmem:[#allocation72_spill] sm:$0xff] %v14084_v50  ;;  %v14086_v62 = vpop.permute.xlu0 %6565  ;;  %v14088_v2 = vpop.permute.xlu2 %6561 }
 0xb99   :  { %16846 = vst [vmem:[#allocation3_spill] sm:$0xff] %v14086_v62 }
 0xb9e   :  { %6773 = vperm.xlu1 %7952, %v13788_v37  }
 0xb9f   :  { %7953 = vset.pattern.permute.xlu0 %v16728_v22  ;;  %6765 = vperm.xlu2 %7950, %v13794_v23   ;;  %v14093_v7 = vpop.permute.xlu1 %6545 }
 0xba0   :  { %16847 = vst [vmem:[#allocation133_spill] sm:$0xff] %v14093_v7  ;;  %3050 = vperm.xlu0 %7953, %v16731_v26   ;;  %v14096_v14 = vpop.permute.xlu0 %6577  ;;  %v14098_v35 = vpop.permute.xlu2 %6573 }
 0xba1   :  { %16848 = vst [vmem:[#allocation55_spill] sm:$0xff] %v14096_v14 }
 0xba6   :  { %6785 = vperm.xlu1 %7952, %v13800_v42  }
 0xba7   :  { %6777 = vperm.xlu2 %7950, %v13806_v53   ;;  %v14102_v62 = vpop.permute.xlu1 %6557 }
 0xba8   :  { %16849 = vst [vmem:[#allocation136_spill] sm:$0xff] %v14102_v62  ;;  %3070 = vperm.xlu0 %7953, %v16733_v24   ;;  %v14105_v50 = vpop.permute.xlu0 %6589  ;;  %v14107_v56 = vpop.permute.xlu2 %6585 }
 0xba9   :  { %16850 = vst [vmem:[#allocation167_spill] sm:$0xff] %v14105_v50 }
 0xbae   :  { %6797 = vperm.xlu1 %7952, %v13812_v15  }
 0xbaf   :  { %6789 = vperm.xlu2 %7950, %v13818_v3   ;;  %v14111_v7 = vpop.permute.xlu1 %6569 }
 0xbb0   :  { %3082 = vperm.xlu0 %7953, %v16735_v41   ;;  %v14114_v14 = vpop.permute.xlu0 %6601  ;;  %v14116_v8 = vpop.permute.xlu2 %6597 }
 0xbb1   :  { %16851 = vst [vmem:[#allocation205_spill] sm:$0xff] %v14114_v14 }
 0xbb6   :  { %6809 = vperm.xlu1 %7952, %v13824_v39  }
 0xbb7   :  { %6801 = vperm.xlu2 %7950, %v13827_v4   ;;  %v14120_v62 = vpop.permute.xlu1 %6581 }
 0xbb8   :  { %3094 = vperm.xlu0 %7953, %v16738_v33   ;;  %v14123_v50 = vpop.permute.xlu0 %6613  ;;  %v14125_v6 = vpop.permute.xlu2 %6609 }
 0xbb9   :  { %16852 = vst [vmem:[#allocation105_spill] sm:$0xff] %v14123_v50 }
 0xbba   :  { %16853 = vst [vmem:[#allocation138_spill] sm:$0xff] %v14125_v6 }
 0xbbe   :  { %7955 = vset.pattern.permute.xlu1 %v16728_v22 }
 0xbbf   :  { %7954 = vset.pattern.permute.xlu2 %v16728_v22  ;;  %6885 = vperm.xlu1 %7955, %v13704_v11   ;;  %v14130_v14 = vpop.permute.xlu1 %6593 }
 0xbc0   :  { %16854 = vst [vmem:[#allocation113_spill] sm:$0xff] %v14130_v14  ;;  %3106 = vperm.xlu0 %7953, %v16739_v52   ;;  %6877 = vperm.xlu2 %7954, %v13710_v25  }
 0xbc1   :  { %v14134_v55 = vpop.permute.xlu0 %6689  ;;  %v14136_v61 = vpop.permute.xlu2 %6685 }
 0xbc2   :  { %16855 = vst [vmem:[#allocation139_spill] sm:$0xff] %v14134_v55 }
 0xbc3   :  { %16856 = vst [vmem:[#allocation26_spill] sm:$0xff] %v14136_v61 }
 0xbc7   :  { %6893 = vperm.xlu1 %7955, %v13716_v31   ;;  %v14139_v50 = vpop.permute.xlu1 %6605 }
 0xbc8   :  { %16857 = vst [vmem:[#allocation108_spill] sm:$0xff] %v14139_v50  ;;  %3118 = vperm.xlu0 %7953, %v16858_v34   ;;  %6889 = vperm.xlu2 %7954, %v13722_v48   ;;  %v16865_v50 = vld [vmem:[#allocation42_spill] sm:$0xff] }
 0xbc9   :  { %v14143_v22 = vpop.permute.xlu0 %6709  ;;  %v14145_v6 = vpop.permute.xlu2 %6697 }
 0xbca   :  { %16859 = vst [vmem:[#allocation168_spill] sm:$0xff] %v14143_v22 }
 0xbcb   :  { %16860 = vst [vmem:[#allocation169_spill] sm:$0xff] %v14145_v6 }
 0xbcf   :  { %6905 = vperm.xlu1 %7955, %v13728_v43   ;;  %v14148_v14 = vpop.permute.xlu1 %6617 }
 0xbd0   :  { %16861 = vst [vmem:[#allocation190_spill] sm:$0xff] %v14148_v14  ;;  %3130 = vperm.xlu0 %7953, %v16862_v38   ;;  %6897 = vperm.xlu2 %7954, %v13734_v51   ;;  %v16869_v14 = vld [vmem:[#allocation43_spill] sm:$0xff] }
 0xbd1   :  { %v14152_v55 = vpop.permute.xlu0 %6721  ;;  %v14154_v61 = vpop.permute.xlu2 %6705 }
 0xbd2   :  { %16863 = vst [vmem:[#allocation162_spill] sm:$0xff] %v14152_v55 }
 0xbd3   :  { %16864 = vst [vmem:[#allocation69_spill] sm:$0xff] %v14154_v61 }
 0xbd7   :  { %6917 = vperm.xlu1 %7955, %v13740_v17  }
 0xbd8   :  { %3142 = vperm.xlu0 %7953, %v16865_v50   ;;  %6909 = vperm.xlu2 %7954, %v13746_v27   ;;  %v14159_v22 = vpop.permute.xlu1 %6693  ;;  %v16873_v50 = vld [vmem:[#allocation5_spill] sm:$0xff] }
 0xbd9   :  { %16866 = vst [vmem:[#allocation153_spill] sm:$0xff] %v14159_v22  ;;  %v14161_v6 = vpop.permute.xlu0 %6733  ;;  %v14163_v34 = vpop.permute.xlu2 %6717 }
 0xbda   :  { %16867 = vst [vmem:[#allocation174_spill] sm:$0xff] %v14161_v6 }
 0xbdb   :  { %16868 = vst [vmem:[#allocation175_spill] sm:$0xff] %v14163_v34 }
 0xbdf   :  { %6929 = vperm.xlu1 %7955, %v13752_v45  }
 0xbe0   :  { %3154 = vperm.xlu0 %7953, %v16869_v14   ;;  %6921 = vperm.xlu2 %7954, %v13758_v21   ;;  %v14168_v55 = vpop.permute.xlu1 %6701 }
 0xbe1   :  { %16870 = vst [vmem:[#allocation32_spill] sm:$0xff] %v14168_v55  ;;  %v14170_v61 = vpop.permute.xlu0 %6745  ;;  %v14172_v38 = vpop.permute.xlu2 %6729 }
 0xbe2   :  { %16871 = vst [vmem:[#allocation200_spill] sm:$0xff] %v14170_v61 }
 0xbe3   :  { %16872 = vst [vmem:[#allocation141_spill] sm:$0xff] %v14172_v38 }
 0xbe7   :  { %6941 = vperm.xlu1 %7955, %v13764_v30  }
 0xbe8   :  { %3166 = vperm.xlu0 %7953, %v16873_v50   ;;  %6933 = vperm.xlu2 %7954, %v13770_v20   ;;  %v14177_v6 = vpop.permute.xlu1 %6713 }
 0xbe9   :  { %16874 = vst [vmem:[#allocation170_spill] sm:$0xff] %v14177_v6  ;;  %v14179_v34 = vpop.permute.xlu0 %6757  ;;  %v14181_v22 = vpop.permute.xlu2 %6741 }
 0xbea   :  { %16875 = vst [vmem:[#allocation79_spill] sm:$0xff] %v14179_v34 }
 0xbeb   :  { %16876 = vst [vmem:[#allocation158_spill] sm:$0xff] %v14181_v22 }
 0xbef   :  { %6953 = vperm.xlu1 %7955, %v13776_v29  }
 0xbf0   :  { %6881 = vperm.xlu0 %7953, %v13707_v13   ;;  %6945 = vperm.xlu2 %7954, %v13782_v63   ;;  %v14186_v61 = vpop.permute.xlu1 %6725 }
 0xbf1   :  { %16877 = vst [vmem:[#allocation34_spill] sm:$0xff] %v14186_v61  ;;  %v14188_v38 = vpop.permute.xlu0 %6769  ;;  %v14190_v55 = vpop.permute.xlu2 %6753 }
 0xbf2   :  { %16878 = vst [vmem:[#allocation192_spill] sm:$0xff] %v14188_v38 }
 0xbf7   :  { %6965 = vperm.xlu1 %7955, %v13788_v37  }
 0xbf8   :  { %6901 = vperm.xlu0 %7953, %v13719_v10   ;;  %6957 = vperm.xlu2 %7954, %v13794_v23   ;;  %v14195_v34 = vpop.permute.xlu1 %6737 }
 0xbf9   :  { %16879 = vst [vmem:[#allocation28_spill] sm:$0xff] %v14195_v34  ;;  %v14197_v22 = vpop.permute.xlu0 %6781  ;;  %v14199_v6 = vpop.permute.xlu2 %6765 }
 0xbfa   :  { %16880 = vst [vmem:[#allocation111_spill] sm:$0xff] %v14197_v22 }
 0xbff   :  { %6977 = vperm.xlu1 %7955, %v13800_v42  }
 0xc00   :  { %6913 = vperm.xlu0 %7953, %v13731_v36   ;;  %6969 = vperm.xlu2 %7954, %v13806_v53   ;;  %v14204_v38 = vpop.permute.xlu1 %6749 }
 0xc01   :  { %16881 = vst [vmem:[#allocation155_spill] sm:$0xff] %v14204_v38  ;;  %v14206_v61 = vpop.permute.xlu0 %6793  ;;  %v14208_v13 = vpop.permute.xlu2 %6777 }
 0xc02   :  { %16882 = vst [vmem:[#allocation126_spill] sm:$0xff] %v14206_v61 }
 0xc07   :  { %6989 = vperm.xlu1 %7955, %v13812_v15  }
 0xc08   :  { %6925 = vperm.xlu0 %7953, %v13743_v47   ;;  %6981 = vperm.xlu2 %7954, %v13818_v3   ;;  %v14213_v22 = vpop.permute.xlu1 %6761  ;;  %v16885_v47 = vmov 5  }
 0xc09   :  { %v14215_v34 = vpop.permute.xlu0 %6805  ;;  %v14217_v10 = vpop.permute.xlu2 %6789 }
 0xc0a   :  { %16883 = vst [vmem:[#allocation134_spill] sm:$0xff] %v14215_v34 }
 0xc0f   :  { %7001 = vperm.xlu1 %7955, %v13824_v39  }
 0xc10   :  { %6937 = vperm.xlu0 %7953, %v13755_v49   ;;  %6993 = vperm.xlu2 %7954, %v13827_v4   ;;  %v14222_v61 = vpop.permute.xlu1 %6773 }
 0xc11   :  { %v14224_v38 = vpop.permute.xlu2 %6801 }
 0xc12   :  { %v14226_v36 = vpop.permute.xlu0 %3050 }
 0xc13   :  { %16884 = vst [vmem:[#allocation179_spill] sm:$0xff] %v14226_v36 }
 0xc17   :  { %7958 = vset.pattern.permute.xlu1 %v16885_v47 }
 0xc18   :  { %6949 = vperm.xlu0 %7953, %v13767_v12   ;;  %7957 = vset.pattern.permute.xlu2 %v16885_v47  ;;  %v14231_v34 = vpop.permute.xlu1 %6785 }
 0xc19   :  { %7077 = vperm.xlu1 %7958, %v13704_v11   ;;  %7069 = vperm.xlu2 %7957, %v13710_v25  }
 0xc1a   :  { %v14235_v49 = vpop.permute.xlu0 %3070  ;;  %v14237_v50 = vpop.permute.xlu2 %6877 }
 0xc1b   :  { %16886 = vst [vmem:[#allocation109_spill] sm:$0xff] %v14235_v49 }
 0xc20   :  { %6961 = vperm.xlu0 %7953, %v13779_v0   ;;  %v14240_v14 = vpop.permute.xlu1 %6797 }
 0xc21   :  { %7085 = vperm.xlu1 %7958, %v13716_v31   ;;  %7081 = vperm.xlu2 %7957, %v13722_v48  }
 0xc22   :  { %v14244_v36 = vpop.permute.xlu0 %3082  ;;  %v14246_v12 = vpop.permute.xlu2 %6889 }
 0xc23   :  { %16887 = vst [vmem:[#allocation201_spill] sm:$0xff] %v14244_v36 }
 0xc28   :  { %6973 = vperm.xlu0 %7953, %v13791_v18   ;;  %v14249_v11 = vpop.permute.xlu1 %6809 }
 0xc29   :  { %7097 = vperm.xlu1 %7958, %v13728_v43   ;;  %7089 = vperm.xlu2 %7957, %v13734_v51  }
 0xc2a   :  { %v14253_v49 = vpop.permute.xlu0 %3094  ;;  %v14255_v0 = vpop.permute.xlu2 %6897 }
 0xc2b   :  { %16888 = vst [vmem:[#allocation177_spill] sm:$0xff] %v14253_v49 }
 0xc30   :  { %6985 = vperm.xlu0 %7953, %v13803_v54  }
 0xc31   :  { %7109 = vperm.xlu1 %7958, %v13740_v17   ;;  %7101 = vperm.xlu2 %7957, %v13746_v27   ;;  %v14260_v36 = vpop.permute.xlu1 %6885  ;;  %v16897_v27 = vld [vmem:[#allocation17_spill] sm:$0xff]  ;;  %v16898_v17 = vld [vmem:[#allocation15_spill] sm:$0xff] }
 0xc32   :  { %v14262_v48 = vpop.permute.xlu0 %3106  ;;  %v14264_v18 = vpop.permute.xlu2 %6909 }
 0xc33   :  { %16889 = vst [vmem:[#allocation127_spill] sm:$0xff] %v14262_v48 }
 0xc38   :  { %6997 = vperm.xlu0 %7953, %v13815_v19  }
 0xc39   :  { %7121 = vperm.xlu1 %7958, %v13752_v45   ;;  %7113 = vperm.xlu2 %7957, %v13758_v21   ;;  %v14269_v49 = vpop.permute.xlu1 %6893  ;;  %v16895_v21 = vld [vmem:[#allocation207_spill] sm:$0xff] }
 0xc3a   :  { %16890 = vst [vmem:[#allocation159_spill] sm:$0xff] %v14269_v49  ;;  %v14271_v51 = vpop.permute.xlu0 %3118  ;;  %v14273_v54 = vpop.permute.xlu2 %6921  ;;  %v6445_v49 = vmul.f32 %v13986_v59, %v16895_v21 }
 0xc3b   :  { %16891 = vst [vmem:[#allocation178_spill] sm:$0xff] %v14271_v51  ;;  %v16896_v51 = vld [vmem:[#allocation10_spill] sm:$0xff] }
 0xc3c   :  { %16892 = vst [vmem:[#allocation98_spill] sm:$0xff] %v14273_v54  ;;  %v6253_v54 = vmul.f32 %v13884_v16, %v16896_v51  ;;  %v6448_v16 = vmul.f32 %v13995_v44, %v16895_v21  ;;  %v6451_v44 = vmul.f32 %v14005_v46, %v16895_v21  ;;  %v6447_v46 = vmul.f32 %v14009_v9, %v16895_v21 }
 0xc3d   :  { %v6262_v9 = vmul.f32 %v13912_v28, %v16896_v51 }
 0xc40   :  { %7956 = vset.pattern.permute.xlu0 %v16885_v47  ;;  %v6637_v47 = vmul.f32 %v14088_v2, %v16897_v27 }
 0xc41   :  { %7133 = vperm.xlu1 %7958, %v13764_v30   ;;  %3243 = vperm.xlu0 %7956, %v16731_v26   ;;  %v14278_v48 = vpop.permute.xlu1 %6905  ;;  %v6477_v30 = vadd.f32 %v6445_v49, %v6253_v54  ;;  %v6829_v26 = vmul.f32 %v14190_v55, %v16898_v17  ;;  %v16900_v49 = vld [vmem:[#allocation48_spill] sm:$0xff]  ;;  %v6640_v55 = vmul.f32 %v14098_v35, %v16897_v27 }
 0xc42   :  { %16893 = vst [vmem:[#allocation203_spill] sm:$0xff] %v14278_v48  ;;  %7125 = vperm.xlu2 %7957, %v13770_v20   ;;  %v14281_v19 = vpop.permute.xlu0 %3130  ;;  %v14283_v45 = vpop.permute.xlu2 %6933 }
 0xc43   :  { %16894 = vst [vmem:[#allocation99_spill] sm:$0xff] %v14281_v19  ;;  %v6669_v48 = vadd.f32 %v6637_v47, %v6477_v30  ;;  %v6256_v30 = vmul.f32 %v13893_v5, %v16896_v51 }
 0xc45   :  { %v6861_v2 = vadd.f32 %v6829_v26, %v6669_v48 }
 0xc49   :  { %7145 = vperm.xlu1 %7958, %v13776_v29   ;;  %3263 = vperm.xlu0 %7956, %v16733_v24   ;;  %v14295_v19 = vpop.permute.xlu1 %6917  ;;  %v6480_v24 = vadd.f32 %v6448_v16, %v6256_v30 }
 0xc4a   :  { %7137 = vperm.xlu2 %7957, %v13782_v63   ;;  %v14298_v59 = vpop.permute.xlu0 %3142  ;;  %v6946_v20 = vpop.permute.xlu2 %6945  ;;  %v6832_v63 = vmul.f32 %v14199_v6, %v16898_v17  ;;  %v6643_v6 = vmul.f32 %v14107_v56, %v16897_v27 }
 0xc4b   :  { %16899 = vst [vmem:[#allocation204_spill] sm:$0xff] %v14298_v59  ;;  %v7021_v54 = vmul.f32 %v6946_v20, %v16900_v49  ;;  %v6672_v59 = vadd.f32 %v6640_v55, %v6480_v24  ;;  %v6259_v24 = vmul.f32 %v13902_v1, %v16896_v51 }
 0xc4d   :  { %v14307_v47 = vadd.f32 %v7021_v54, %v6861_v2  ;;  %v6864_v35 = vadd.f32 %v6832_v63, %v6672_v59  ;;  %v6483_v2 = vadd.f32 %v6451_v44, %v6259_v24  ;;  %v6835_v54 = vmul.f32 %v14208_v13, %v16898_v17 }
 0xc4e   :  { %v6454_v59 = vmul.f32 %v14014_v40, %v16895_v21  ;;  %v6639_v44 = vmul.f32 %v14111_v7, %v16897_v27  ;;  %v6831_v40 = vmul.f32 %v14213_v22, %v16898_v17 }
 0xc4f   :  { %v6675_v30 = vadd.f32 %v6643_v6, %v6483_v2  ;;  %v6838_v2 = vmul.f32 %v14217_v10, %v16898_v17  ;;  %v6457_v10 = vmul.f32 %v14023_v58, %v16895_v21 }
 0xc50   :  { %v6486_v6 = vadd.f32 %v6454_v59, %v6262_v9  ;;  %v16905_v9 = vld [vmem:[#allocation138_spill] sm:$0xff] }
 0xc51   :  { %7157 = vperm.xlu1 %7958, %v13788_v37   ;;  %3275 = vperm.xlu0 %7956, %v16735_v41   ;;  %v14313_v26 = vpop.permute.xlu1 %6929  ;;  %v6867_v55 = vadd.f32 %v6835_v54, %v6675_v30 }
 0xc52   :  { %7149 = vperm.xlu2 %7957, %v13794_v23   ;;  %v14316_v48 = vpop.permute.xlu0 %3154  ;;  %v6958_v20 = vpop.permute.xlu2 %6957 }
 0xc53   :  { %16901 = vst [vmem:[#allocation16_spill] sm:$0xff] %v14316_v48  ;;  %v7024_v5 = vmul.f32 %v6958_v20, %v16900_v49  ;;  %v6255_v20 = vmul.f32 %v13907_v60, %v16896_v51 }
 0xc55   :  { %v14325_v16 = vadd.f32 %v7024_v5, %v6864_v35  ;;  %v6646_v35 = vmul.f32 %v14116_v8, %v16897_v27  ;;  %v6479_v24 = vadd.f32 %v6447_v46, %v6255_v20  ;;  %v6450_v8 = vmul.f32 %v14018_v32, %v16895_v21  ;;  %v16904_v20 = vld [vmem:[#allocation121_spill] sm:$0xff] }
 0xc56   :  { %v6642_v32 = vmul.f32 %v14120_v62, %v16897_v27 }
 0xc57   :  { %v6671_v60 = vadd.f32 %v6639_v44, %v6479_v24  ;;  %v6678_v54 = vadd.f32 %v6646_v35, %v6486_v6  ;;  %v6265_v44 = vmul.f32 %v16904_v20, %v16896_v51  ;;  %v6649_v35 = vmul.f32 %v16905_v9, %v16897_v27  ;;  %v16911_v20 = vld [vmem:[#allocation31_spill] sm:$0xff] }
 0xc58   :  { %v16912_v9 = vld [vmem:[#allocation131_spill] sm:$0xff] }
 0xc59   :  { %7169 = vperm.xlu1 %7958, %v13800_v42   ;;  %3287 = vperm.xlu0 %7956, %v16738_v33   ;;  %v14331_v63 = vpop.permute.xlu1 %6941  ;;  %v6863_v7 = vadd.f32 %v6831_v40, %v6671_v60  ;;  %v6834_v40 = vmul.f32 %v14222_v61, %v16898_v17  ;;  %v6489_v6 = vadd.f32 %v6457_v10, %v6265_v44  ;;  %v16906_v60 = vld [vmem:[#allocation39_spill] sm:$0xff] }
 0xc5a   :  { %7161 = vperm.xlu2 %7957, %v13806_v53   ;;  %v14336_v1 = vpop.permute.xlu0 %3166  ;;  %v6970_v56 = vpop.permute.xlu2 %6969  ;;  %v6261_v44 = vmul.f32 %v16911_v20, %v16896_v51  ;;  %v7004_v20 = vmul.f32 %v14237_v50, %v16900_v49 }
 0xc5b   :  { %16902 = vst [vmem:[#allocation4_spill] sm:$0xff] %v14336_v1  ;;  %v7027_v13 = vmul.f32 %v6970_v56, %v16900_v49  ;;  %v6870_v56 = vadd.f32 %v6838_v2, %v6678_v54  ;;  %v6681_v62 = vadd.f32 %v6649_v35, %v6489_v6  ;;  %v6620_v35 = vmul.f32 %v16912_v9, %v16897_v27  ;;  %v16915_v9 = vld [vmem:[#allocation128_spill] sm:$0xff] }
 0xc5d   :  { %v14349_v5 = vadd.f32 %v7027_v13, %v6867_v55  ;;  %v6258_v55 = vmul.f32 %v13916_v57, %v16896_v51  ;;  %v6841_v57 = vmul.f32 %v14224_v38, %v16898_v17 }
 0xc5f   :  { %v6482_v58 = vadd.f32 %v6450_v8, %v6258_v55  ;;  %v6873_v55 = vadd.f32 %v6841_v57, %v6681_v62  ;;  %v6837_v62 = vmul.f32 %v14231_v34, %v16898_v17  ;;  %v16919_v34 = vld [vmem:[#allocation196_spill] sm:$0xff] }
 0xc61   :  { %7181 = vperm.xlu1 %7958, %v13812_v15   ;;  %3299 = vperm.xlu0 %7956, %v16739_v52   ;;  %v6954_v28 = vpop.permute.xlu1 %6953  ;;  %v6674_v2 = vadd.f32 %v6642_v32, %v6482_v58  ;;  %v16913_v58 = vld [vmem:[#allocation113_spill] sm:$0xff] }
 0xc62   :  { %7173 = vperm.xlu2 %7957, %v13818_v3   ;;  %v7023_v30 = vmul.f32 %v6954_v28, %v16900_v49  ;;  %v14361_v22 = vpop.permute.xlu0 %6881  ;;  %v6982_v46 = vpop.permute.xlu2 %6981  ;;  %v16907_v28 = vld [vmem:[#allocation60_spill] sm:$0xff] }
 0xc63   :  { %16903 = vst [vmem:[#allocation58_spill] sm:$0xff] %v14361_v22  ;;  %v7030_v59 = vmul.f32 %v6982_v46, %v16900_v49  ;;  %v6866_v46 = vadd.f32 %v6834_v40, %v6674_v2  ;;  %v6645_v40 = vmul.f32 %v16913_v58, %v16897_v27  ;;  %v6431_v58 = vmul.f32 %v16915_v9, %v16895_v21 }
 0xc64   :  { %v14370_v13 = vadd.f32 %v7023_v30, %v6863_v7  ;;  %v6428_v7 = vmul.f32 %v16907_v28, %v16895_v21  ;;  %v16908_v30 = vld [vmem:[#allocation107_spill] sm:$0xff] }
 0xc65   :  { %v14376_v24 = vadd.f32 %v7030_v59, %v6870_v56  ;;  %v6453_v8 = vmul.f32 %v16908_v30, %v16895_v21  ;;  %v16910_v56 = vld [vmem:[#allocation76_spill] sm:$0xff]  ;;  %v16914_v30 = vld [vmem:[#allocation26_spill] sm:$0xff] }
 0xc66   :  { %v6236_v59 = vmul.f32 %v16910_v56, %v16896_v51  ;;  %v6812_v57 = vmul.f32 %v16914_v30, %v16898_v17  ;;  %v16923_v30 = vld [vmem:[#allocation189_spill] sm:$0xff] }
 0xc67   :  { %v6485_v28 = vadd.f32 %v6453_v8, %v6261_v44  ;;  %v6623_v9 = vmul.f32 %v16923_v30, %v16897_v27 }
 0xc69   :  { %7193 = vperm.xlu1 %7958, %v13824_v39   ;;  %3311 = vperm.xlu0 %7956, %v16906_v60   ;;  %v6966_v54 = vpop.permute.xlu1 %6965  ;;  %v6677_v56 = vadd.f32 %v6645_v40, %v6485_v28 }
 0xc6a   :  { %7185 = vperm.xlu2 %7957, %v13827_v4   ;;  %v7026_v61 = vmul.f32 %v6966_v54, %v16900_v49  ;;  %v14390_v10 = vpop.permute.xlu0 %6901  ;;  %v6994_v38 = vpop.permute.xlu2 %6993  ;;  %v6460_v54 = vadd.f32 %v6428_v7, %v6236_v59  ;;  %v16918_v7 = vld [vmem:[#allocation40_spill] sm:$0xff] }
 0xc6b   :  { %16909 = vst [vmem:[#allocation7_spill] sm:$0xff] %v14390_v10  ;;  %v7033_v32 = vmul.f32 %v6994_v38, %v16900_v49 }
 0xc6c   :  { %v14401_v6 = vadd.f32 %v7026_v61, %v6866_v46  ;;  %v6652_v38 = vadd.f32 %v6620_v35, %v6460_v54  ;;  %v16916_v46 = vld [vmem:[#allocation156_spill] sm:$0xff]  ;;  %v16922_v54 = vld [vmem:[#allocation102_spill] sm:$0xff] }
 0xc6d   :  { %v14403_v2 = vadd.f32 %v7033_v32, %v6873_v55  ;;  %v6456_v61 = vmul.f32 %v16916_v46, %v16895_v21  ;;  %v16917_v55 = vmov 6   ;;  %v6869_v32 = vadd.f32 %v6837_v62, %v6677_v56  ;;  %v16921_v35 = vld [vmem:[#allocation112_spill] sm:$0xff] }
 0xc6e   :  { %v6844_v59 = vadd.f32 %v6812_v57, %v6652_v38  ;;  %v6239_v40 = vmul.f32 %v16921_v35, %v16896_v51  ;;  %v6264_v28 = vmul.f32 %v16922_v54, %v16896_v51  ;;  %v16924_v62 = vld [vmem:[#allocation108_spill] sm:$0xff]  ;;  %v16926_v35 = vld [vmem:[#allocation169_spill] sm:$0xff]  ;;  %v6840_v54 = vmul.f32 %v14240_v14, %v16898_v17 }
 0xc6f   :  { %v6648_v38 = vmul.f32 %v16924_v62, %v16897_v27  ;;  %v7007_v62 = vmul.f32 %v14246_v12, %v16900_v49 }
 0xc70   :  { %v7036_v56 = vadd.f32 %v7004_v20, %v6844_v59  ;;  %v6463_v48 = vadd.f32 %v6431_v58, %v6239_v40  ;;  %v16927_v20 = vld [vmem:[#allocation46_spill] sm:$0xff] }
 0xc71   :  { %7961 = vset.pattern.permute.xlu1 %v16917_v55  ;;  %3323 = vperm.xlu0 %7956, %v16918_v7   ;;  %v6978_v8 = vpop.permute.xlu1 %6977  ;;  %v6488_v7 = vadd.f32 %v6456_v61, %v6264_v28  ;;  %v6433_v59 = vmul.f32 %v16927_v20, %v16895_v21  ;;  %v16929_v61 = vld [vmem:[#allocation30_spill] sm:$0xff] }
 0xc72   :  { %7959 = vset.pattern.permute.xlu2 %v16917_v55  ;;  %7269 = vperm.xlu1 %7961, %v16919_v34   ;;  %v7029_v44 = vmul.f32 %v6978_v8, %v16900_v49  ;;  %v14420_v50 = vpop.permute.xlu0 %6913  ;;  %v16925_v8 = vld [vmem:[#allocation54_spill] sm:$0xff]  ;;  %v6655_v60 = vadd.f32 %v6623_v9, %v6463_v48 }
 0xc73   :  { %16920 = vst [vmem:[#allocation44_spill] sm:$0xff] %v14420_v50  ;;  %7261 = vperm.xlu2 %7959, %v13710_v25   ;;  %v7070_v57 = vpop.permute.xlu2 %7069  ;;  %v6815_v50 = vmul.f32 %v16926_v35, %v16898_v17  ;;  %v6680_v10 = vadd.f32 %v6648_v38, %v6488_v7  ;;  %v16932_v7 = vld [vmem:[#allocation132_spill] sm:$0xff] }
 0xc74   :  { %v14431_v46 = vadd.f32 %v7029_v44, %v6869_v32  ;;  %v7196_v1 = vmul.f32 %v7070_v57, %v16925_v8  ;;  %v16928_v32 = vld [vmem:[#allocation42_spill] sm:$0xff]  ;;  %v6459_v44 = vmul.f32 %v16929_v61, %v16895_v21  ;;  %v6267_v9 = vmul.f32 %v16932_v7, %v16896_v51 }
 0xc75   :  { %v6847_v40 = vadd.f32 %v6815_v50, %v6655_v60  ;;  %v6872_v28 = vadd.f32 %v6840_v54, %v6680_v10  ;;  %v16933_v57 = vld [vmem:[#allocation50_spill] sm:$0xff]  ;;  %v6843_v7 = vmul.f32 %v14249_v11, %v16898_v17 }
 0xc76   :  { %v14438_v30 = vadd.f32 %v7196_v1, %v7036_v56  ;;  %v16931_v1 = vld [vmem:[#allocation84_spill] sm:$0xff]  ;;  %v6625_v38 = vmul.f32 %v16933_v57, %v16897_v27  ;;  %v16934_v56 = vld [vmem:[#allocation21_spill] sm:$0xff]  ;;  %v16935_v60 = vld [vmem:[#allocation190_spill] sm:$0xff]  ;;  %v6491_v61 = vadd.f32 %v6459_v44, %v6267_v9 }
 0xc77   :  { %v6241_v12 = vmul.f32 %v16931_v1, %v16896_v51  ;;  %v6651_v10 = vmul.f32 %v16935_v60, %v16897_v27  ;;  %v7039_v50 = vadd.f32 %v7007_v62, %v6847_v40  ;;  %v16936_v1 = vld [vmem:[#allocation69_spill] sm:$0xff]  ;;  %v7009_v60 = vmul.f32 %v14255_v0, %v16900_v49  ;;  %v16937_v62 = vld [vmem:[#allocation206_spill] sm:$0xff]  ;;  %v16939_v44 = vld [vmem:[#allocation71_spill] sm:$0xff] }
 0xc78   :  { %v6430_v40 = vmul.f32 %v16937_v62, %v16895_v21 }
 0xc79   :  { %3335 = vperm.xlu0 %7956, %v16928_v32   ;;  %v6990_v58 = vpop.permute.xlu1 %6989  ;;  %v6817_v32 = vmul.f32 %v16936_v1, %v16898_v17  ;;  %v6683_v52 = vadd.f32 %v6651_v10, %v6491_v61  ;;  %v16942_v10 = vld [vmem:[#allocation92_spill] sm:$0xff]  ;;  %v16944_v61 = vld [vmem:[#allocation29_spill] sm:$0xff] }
 0xc7a   :  { %7277 = vperm.xlu1 %7961, %v13716_v31   ;;  %v7032_v14 = vmul.f32 %v6990_v58, %v16900_v49  ;;  %v14449_v48 = vpop.permute.xlu0 %6925  ;;  %v6465_v58 = vadd.f32 %v6433_v59, %v6241_v12 }
 0xc7b   :  { %16930 = vst [vmem:[#allocation9_spill] sm:$0xff] %v14449_v48  ;;  %7273 = vperm.xlu2 %7959, %v16934_v56   ;;  %v7082_v35 = vpop.permute.xlu2 %7081  ;;  %v6875_v9 = vadd.f32 %v6843_v7, %v6683_v52  ;;  %v16945_v52 = vld [vmem:[#allocation181_spill] sm:$0xff] }
 0xc7c   :  { %v14460_v54 = vadd.f32 %v7032_v14, %v6872_v28  ;;  %v7199_v20 = vmul.f32 %v7082_v35, %v16925_v8  ;;  %v6657_v48 = vadd.f32 %v6625_v38, %v6465_v58  ;;  %v16938_v28 = vld [vmem:[#allocation43_spill] sm:$0xff]  ;;  %v6436_v14 = vmul.f32 %v16939_v44, %v16895_v21  ;;  %v16941_v35 = vld [vmem:[#allocation86_spill] sm:$0xff] }
 0xc7d   :  { %v6238_v0 = vmul.f32 %v16941_v35, %v16896_v51  ;;  %v16946_v35 = vld [vmem:[#allocation153_spill] sm:$0xff] }
 0xc7e   :  { %v14467_v57 = vadd.f32 %v7199_v20, %v7039_v50  ;;  %v6849_v12 = vadd.f32 %v6817_v32, %v6657_v48  ;;  %v6244_v50 = vmul.f32 %v16942_v10, %v16896_v51  ;;  %v16943_v20 = vld [vmem:[#allocation129_spill] sm:$0xff]  ;;  %v6628_v32 = vmul.f32 %v16945_v52, %v16897_v27  ;;  %v16947_v10 = vld [vmem:[#allocation175_spill] sm:$0xff] }
 0xc7f   :  { %v6622_v58 = vmul.f32 %v16943_v20, %v16897_v27  ;;  %v7006_v52 = vmul.f32 %v14260_v36, %v16900_v49 }
 0xc80   :  { %v7041_v48 = vadd.f32 %v7009_v60, %v6849_v12  ;;  %v6468_v44 = vadd.f32 %v6436_v14, %v6244_v50  ;;  %v7012_v60 = vmul.f32 %v14264_v18, %v16900_v49  ;;  %v16948_v12 = vld [vmem:[#allocation75_spill] sm:$0xff]  ;;  %v16949_v14 = vld [vmem:[#allocation33_spill] sm:$0xff] }
 0xc81   :  { %3347 = vperm.xlu0 %7956, %v16938_v28   ;;  %v7002_v59 = vpop.permute.xlu1 %7001  ;;  %v6814_v28 = vmul.f32 %v16946_v35, %v16898_v17 }
 0xc82   :  { %7289 = vperm.xlu1 %7961, %v13728_v43   ;;  %v7035_v11 = vmul.f32 %v7002_v59, %v16900_v49  ;;  %v14478_v38 = vpop.permute.xlu0 %6937  ;;  %v6462_v59 = vadd.f32 %v6430_v40, %v6238_v0  ;;  %v6660_v33 = vadd.f32 %v6628_v32, %v6468_v44  ;;  %v6432_v40 = vmul.f32 %v16948_v12, %v16895_v21  ;;  %v16953_v32 = vld [vmem:[#allocation90_spill] sm:$0xff] }
 0xc83   :  { %16940 = vst [vmem:[#allocation143_spill] sm:$0xff] %v14478_v38  ;;  %7281 = vperm.xlu2 %7959, %v16944_v61   ;;  %v7090_v1 = vpop.permute.xlu2 %7089  ;;  %v6820_v38 = vmul.f32 %v16947_v10, %v16898_v17  ;;  %v6240_v36 = vmul.f32 %v16953_v32, %v16896_v51  ;;  %v16956_v44 = vld [vmem:[#allocation130_spill] sm:$0xff]  ;;  %v16957_v10 = vld [vmem:[#allocation63_spill] sm:$0xff] }
 0xc84   :  { %v14489_v7 = vadd.f32 %v7035_v11, %v6875_v9  ;;  %v7201_v62 = vmul.f32 %v7090_v1, %v16925_v8  ;;  %v6654_v22 = vadd.f32 %v6622_v58, %v6462_v59  ;;  %v6439_v9 = vmul.f32 %v16949_v14, %v16895_v21  ;;  %v16950_v11 = vld [vmem:[#allocation5_spill] sm:$0xff]  ;;  %v16951_v1 = vld [vmem:[#allocation24_spill] sm:$0xff] }
 0xc85   :  { %v6852_v50 = vadd.f32 %v6820_v38, %v6660_v33  ;;  %v6631_v35 = vmul.f32 %v16956_v44, %v16897_v27  ;;  %v6464_v32 = vadd.f32 %v6432_v40, %v6240_v36  ;;  %v16962_v40 = vld [vmem:[#allocation45_spill] sm:$0xff] }
 0xc86   :  { %v14496_v20 = vadd.f32 %v7201_v62, %v7041_v48  ;;  %v6846_v0 = vadd.f32 %v6814_v28, %v6654_v22  ;;  %v16954_v48 = vld [vmem:[#allocation122_spill] sm:$0xff]  ;;  %v16955_v62 = vld [vmem:[#allocation101_spill] sm:$0xff] }
 0xc87   :  { %v6247_v18 = vmul.f32 %v16954_v48, %v16896_v51  ;;  %v6624_v59 = vmul.f32 %v16955_v62, %v16897_v27  ;;  %v7044_v38 = vadd.f32 %v7012_v60, %v6852_v50  ;;  %v16958_v48 = vld [vmem:[#allocation32_spill] sm:$0xff]  ;;  %v16959_v62 = vld [vmem:[#allocation141_spill] sm:$0xff] }
 0xc88   :  { %v7038_v28 = vadd.f32 %v7006_v52, %v6846_v0  ;;  %v6823_v41 = vmul.f32 %v16959_v62, %v16898_v17  ;;  %v16960_v52 = vld [vmem:[#allocation159_spill] sm:$0xff]  ;;  %v16961_v0 = vld [vmem:[#allocation98_spill] sm:$0xff] }
 0xc89   :  { %3359 = vperm.xlu0 %7956, %v16950_v11   ;;  %v6471_v11 = vadd.f32 %v6439_v9, %v6247_v18  ;;  %v7008_v60 = vmul.f32 %v16960_v52, %v16900_v49  ;;  %v7015_v50 = vmul.f32 %v16961_v0, %v16900_v49  ;;  %v16963_v9 = vld [vmem:[#allocation166_spill] sm:$0xff] }
 0xc8a   :  { %7301 = vperm.xlu1 %7961, %v16951_v1   ;;  %v14508_v58 = vpop.permute.xlu0 %6949  ;;  %v6435_v36 = vmul.f32 %v16963_v9, %v16895_v21  ;;  %v16971_v9 = vld [vmem:[#allocation165_spill] sm:$0xff] }
 0xc8b   :  { %16952 = vst [vmem:[#allocation10_spill] sm:$0xff] %v14508_v58  ;;  %7293 = vperm.xlu2 %7959, %v16957_v10   ;;  %v7078_v22 = vpop.permute.xlu1 %7077  ;;  %v7102_v33 = vpop.permute.xlu2 %7101  ;;  %v6816_v58 = vmul.f32 %v16958_v48, %v16898_v17  ;;  %v6656_v10 = vadd.f32 %v6624_v59, %v6464_v32  ;;  %v6663_v55 = vadd.f32 %v6631_v35, %v6471_v11  ;;  %v16966_v59 = vld [vmem:[#allocation147_spill] sm:$0xff]  ;;  %v16969_v32 = vld [vmem:[#allocation73_spill] sm:$0xff] }
 0xc8c   :  { %v7198_v12 = vmul.f32 %v7078_v22, %v16925_v8  ;;  %v7204_v14 = vmul.f32 %v7102_v33, %v16925_v8  ;;  %v16964_v33 = vld [vmem:[#allocation110_spill] sm:$0xff]  ;;  %v6243_v11 = vmul.f32 %v16966_v59, %v16896_v51  ;;  %v16967_v35 = vld [vmem:[#allocation35_spill] sm:$0xff]  ;;  %v6634_v59 = vmul.f32 %v16971_v9, %v16897_v27 }
 0xc8d   :  { %v6848_v18 = vadd.f32 %v6816_v58, %v6656_v10  ;;  %v6855_v22 = vadd.f32 %v6823_v41, %v6663_v55  ;;  %v16970_v10 = vld [vmem:[#allocation125_spill] sm:$0xff]  ;;  %v7018_v9 = vmul.f32 %v14283_v45, %v16900_v49 }
 0xc8e   :  { %v14525_v1 = vadd.f32 %v7198_v12, %v7038_v28  ;;  %v14527_v44 = vadd.f32 %v7204_v14, %v7044_v38  ;;  %v6442_v38 = vmul.f32 %v16967_v35, %v16895_v21  ;;  %v16968_v12 = vld [vmem:[#allocation161_spill] sm:$0xff]  ;;  %v6250_v0 = vmul.f32 %v16970_v10, %v16896_v51 }
 0xc8f   :  { %v6627_v14 = vmul.f32 %v16968_v12, %v16897_v27  ;;  %v7040_v52 = vadd.f32 %v7008_v60, %v6848_v18  ;;  %v7047_v58 = vadd.f32 %v7015_v50, %v6855_v22  ;;  %v6467_v35 = vadd.f32 %v6435_v36, %v6243_v11  ;;  %v16973_v50 = vld [vmem:[#allocation158_spill] sm:$0xff] }
 0xc90   :  { %v6474_v60 = vadd.f32 %v6442_v38, %v6250_v0  ;;  %v6826_v18 = vmul.f32 %v16973_v50, %v16898_v17  ;;  %v16975_v36 = vld [vmem:[#allocation22_spill] sm:$0xff]  ;;  %v16980_v0 = vld [vmem:[#allocation95_spill] sm:$0xff] }
 0xc91   :  { %7073 = vperm.xlu0 %7956, %v16962_v40   ;;  %v6659_v22 = vadd.f32 %v6627_v14, %v6467_v35  ;;  %v16981_v35 = vld [vmem:[#allocation72_spill] sm:$0xff] }
 0xc92   :  { %7313 = vperm.xlu1 %7961, %v16964_v33   ;;  %v14537_v28 = vpop.permute.xlu0 %6961  ;;  %v6666_v10 = vadd.f32 %v6634_v59, %v6474_v60  ;;  %v6246_v59 = vmul.f32 %v16980_v0, %v16896_v51  ;;  %v6630_v45 = vmul.f32 %v16981_v35, %v16897_v27  ;;  %v7014_v0 = vmul.f32 %v14295_v19, %v16900_v49  ;;  %v16983_v35 = vld [vmem:[#allocation23_spill] sm:$0xff] }
 0xc93   :  { %16965 = vst [vmem:[#allocation17_spill] sm:$0xff] %v14537_v28  ;;  %7305 = vperm.xlu2 %7959, %v16969_v32   ;;  %v7086_v48 = vpop.permute.xlu1 %7085  ;;  %v7114_v62 = vpop.permute.xlu2 %7113  ;;  %v16972_v28 = vld [vmem:[#allocation170_spill] sm:$0xff] }
 0xc94   :  { %v7200_v41 = vmul.f32 %v7086_v48, %v16925_v8  ;;  %v7207_v55 = vmul.f32 %v7114_v62, %v16925_v8  ;;  %v6819_v12 = vmul.f32 %v16972_v28, %v16898_v17  ;;  %v16974_v48 = vld [vmem:[#allocation203_spill] sm:$0xff]  ;;  %v16976_v28 = vld [vmem:[#allocation173_spill] sm:$0xff] }
 0xc95   :  { %v7011_v62 = vmul.f32 %v16974_v48, %v16900_v49  ;;  %v6438_v11 = vmul.f32 %v16976_v28, %v16895_v21 }
 0xc96   :  { %v14554_v33 = vadd.f32 %v7200_v41, %v7040_v52  ;;  %v14556_v32 = vadd.f32 %v7207_v55, %v7047_v58  ;;  %v6851_v52 = vadd.f32 %v6819_v12, %v6659_v22  ;;  %v16977_v58 = vld [vmem:[#allocation64_spill] sm:$0xff]  ;;  %v6858_v41 = vadd.f32 %v6826_v18, %v6666_v10  ;;  %v16979_v55 = vld [vmem:[#allocation119_spill] sm:$0xff] }
 0xc97   :  { %v6470_v22 = vadd.f32 %v6438_v11, %v6246_v59 }
 0xc98   :  { %v7043_v60 = vadd.f32 %v7011_v62, %v6851_v52  ;;  %v7050_v28 = vadd.f32 %v7018_v9, %v6858_v41  ;;  %v16984_v62 = vld [vmem:[#allocation184_spill] sm:$0xff]  ;;  %v16986_v41 = vld [vmem:[#allocation65_spill] sm:$0xff] }
 0xc99   :  { %7093 = vperm.xlu0 %7956, %v16975_v36   ;;  %v6441_v52 = vmul.f32 %v16984_v62, %v16895_v21 }
 0xc9a   :  { %7325 = vperm.xlu1 %7961, %v16977_v58   ;;  %v14568_v38 = vpop.permute.xlu0 %6973  ;;  %v6662_v58 = vadd.f32 %v6630_v45, %v6470_v22  ;;  %v16988_v45 = vld [vmem:[#allocation133_spill] sm:$0xff] }
 0xc9b   :  { %16978 = vst [vmem:[#allocation15_spill] sm:$0xff] %v14568_v38  ;;  %7317 = vperm.xlu2 %7959, %v16979_v55   ;;  %v7098_v14 = vpop.permute.xlu1 %7097  ;;  %v16982_v38 = vld [vmem:[#allocation34_spill] sm:$0xff] }
 0xc9c   :  { %v7203_v50 = vmul.f32 %v7098_v14, %v16925_v8  ;;  %v7126_v48 = vpop.permute.xlu2 %7125  ;;  %v6822_v18 = vmul.f32 %v16982_v38, %v16898_v17  ;;  %v16987_v14 = vld [vmem:[#allocation149_spill] sm:$0xff] }
 0xc9d   :  { %v7210_v12 = vmul.f32 %v7126_v48, %v16925_v8  ;;  %v6249_v59 = vmul.f32 %v16987_v14, %v16896_v51  ;;  %v7017_v14 = vmul.f32 %v14313_v26, %v16900_v49 }
 0xc9e   :  { %v14579_v10 = vadd.f32 %v7203_v50, %v7043_v60  ;;  %v6854_v9 = vadd.f32 %v6822_v18, %v6662_v58  ;;  %v6633_v60 = vmul.f32 %v16988_v45, %v16897_v27  ;;  %v16990_v45 = vld [vmem:[#allocation116_spill] sm:$0xff] }
 0xc9f   :  { %v14581_v55 = vadd.f32 %v7210_v12, %v7050_v28  ;;  %v6473_v58 = vadd.f32 %v6441_v52, %v6249_v59  ;;  %v16989_v12 = vld [vmem:[#allocation28_spill] sm:$0xff] }
 0xca0   :  { %v7046_v19 = vadd.f32 %v7014_v0, %v6854_v9  ;;  %v6825_v22 = vmul.f32 %v16989_v12, %v16898_v17  ;;  %v16991_v0 = vld [vmem:[#allocation74_spill] sm:$0xff]  ;;  %v16995_v12 = vld [vmem:[#allocation155_spill] sm:$0xff] }
 0xca1   :  { %7105 = vperm.xlu0 %7956, %v16983_v35   ;;  %v6444_v9 = vmul.f32 %v16991_v0, %v16895_v21 }
 0xca2   :  { %7337 = vperm.xlu1 %7961, %v13776_v29   ;;  %v14589_v11 = vpop.permute.xlu0 %6985 }
 0xca3   :  { %16985 = vst [vmem:[#allocation48_spill] sm:$0xff] %v14589_v11  ;;  %7329 = vperm.xlu2 %7959, %v16986_v41   ;;  %v7110_v38 = vpop.permute.xlu1 %7109  ;;  %v6665_v11 = vadd.f32 %v6633_v60, %v6473_v58  ;;  %v16994_v60 = vld [vmem:[#allocation136_spill] sm:$0xff] }
 0xca4   :  { %v7206_v50 = vmul.f32 %v7110_v38, %v16925_v8  ;;  %v7138_v48 = vpop.permute.xlu2 %7137 }
 0xca5   :  { %v7213_v28 = vmul.f32 %v7138_v48, %v16925_v8  ;;  %v6857_v38 = vadd.f32 %v6825_v22, %v6665_v11  ;;  %v6828_v22 = vmul.f32 %v16995_v12, %v16898_v17 }
 0xca6   :  { %v14600_v18 = vadd.f32 %v7206_v50, %v7046_v19  ;;  %v6636_v50 = vmul.f32 %v16994_v60, %v16897_v27  ;;  %v16996_v60 = vld [vmem:[#allocation70_spill] sm:$0xff] }
 0xca7   :  { %v14603_v62 = vadd.f32 %v7213_v28, %v14307_v47  ;;  %v16993_v47 = vld [vmem:[#allocation117_spill] sm:$0xff]  ;;  %v7049_v26 = vadd.f32 %v7017_v14, %v6857_v38 }
 0xca8   :  { %v6252_v19 = vmul.f32 %v16993_v47, %v16896_v51  ;;  %v7020_v47 = vmul.f32 %v14331_v63, %v16900_v49 }
 0xca9   :  { %7117 = vperm.xlu0 %7956, %v16990_v45  }
 0xcaa   :  { %7349 = vperm.xlu1 %7961, %v13788_v37   ;;  %v14611_v52 = vpop.permute.xlu0 %6997  ;;  %v6476_v11 = vadd.f32 %v6444_v9, %v6252_v19 }
 0xcab   :  { %16992 = vst [vmem:[#allocation121_spill] sm:$0xff] %v14611_v52  ;;  %7341 = vperm.xlu2 %7959, %v13794_v23   ;;  %v7122_v59 = vpop.permute.xlu1 %7121 }
 0xcac   :  { %v7209_v48 = vmul.f32 %v7122_v59, %v16925_v8  ;;  %v7150_v28 = vpop.permute.xlu2 %7149  ;;  %v6668_v21 = vadd.f32 %v6636_v50, %v6476_v11 }
 0xcad   :  { %v7216_v58 = vmul.f32 %v7150_v28, %v16925_v8 }
 0xcae   :  { %v14622_v0 = vadd.f32 %v7209_v48, %v7049_v26  ;;  %v6860_v14 = vadd.f32 %v6828_v22, %v6668_v21  ;;  %v16997_v48 = vld [vmem:[#allocation81_spill] sm:$0xff] }
 0xcaf   :  { %v14625_v52 = vadd.f32 %v7216_v58, %v14325_v16 }
 0xcb0   :  { %v7052_v59 = vadd.f32 %v7020_v47, %v6860_v14  ;;  %v16998_v47 = vld [vmem:[#allocation67_spill] sm:$0xff] }
 0xcb1   :  { %7129 = vperm.xlu0 %7956, %v16996_v60  }
 0xcb2   :  { %7361 = vperm.xlu1 %7961, %v13800_v42  }
 0xcb3   :  { %7353 = vperm.xlu2 %7959, %v13806_v53   ;;  %v7134_v9 = vpop.permute.xlu1 %7133  ;;  %v14632_v38 = vpop.permute.xlu0 %3243 }
 0xcb4   :  { %v7212_v19 = vmul.f32 %v7134_v9, %v16925_v8  ;;  %v7162_v26 = vpop.permute.xlu2 %7161 }
 0xcb5   :  { %v7219_v16 = vmul.f32 %v7162_v26, %v16925_v8 }
 0xcb6   :  { %v14636_v50 = vadd.f32 %v7212_v19, %v7052_v59 }
 0xcb7   :  { %v14639_v63 = vadd.f32 %v7219_v16, %v14349_v5  ;;  %v17000_v16 = vld [vmem:[#allocation61_spill] sm:$0xff] }
 0xcb9   :  { %7141 = vperm.xlu0 %7956, %v16997_v48  }
 0xcba   :  { %7373 = vperm.xlu1 %7961, %v13812_v15  }
 0xcbb   :  { %7365 = vperm.xlu2 %7959, %v13818_v3   ;;  %v7146_v21 = vpop.permute.xlu1 %7145  ;;  %v14644_v28 = vpop.permute.xlu0 %3263 }
 0xcbc   :  { %v7215_v58 = vmul.f32 %v7146_v21, %v16925_v8  ;;  %v7174_v11 = vpop.permute.xlu2 %7173  ;;  %v17001_v21 = vmov 7  }
 0xcbd   :  { %v7222_v12 = vmul.f32 %v7174_v11, %v16925_v8 }
 0xcbe   :  { %v14649_v22 = vadd.f32 %v7215_v58, %v14370_v13 }
 0xcbf   :  { %v14652_v5 = vadd.f32 %v7222_v12, %v14376_v24 }
 0xcc1   :  { %7153 = vperm.xlu0 %7956, %v16998_v47  }
 0xcc2   :  { %7385 = vperm.xlu1 %7961, %v13824_v39  }
 0xcc3   :  { %7377 = vperm.xlu2 %7959, %v13827_v4   ;;  %v7158_v14 = vpop.permute.xlu1 %7157  ;;  %v14657_v9 = vpop.permute.xlu0 %3275 }
 0xcc4   :  { %16999 = vst [vmem:[#allocation138_spill] sm:$0xff] %v14657_v9  ;;  %v7218_v59 = vmul.f32 %v7158_v14, %v16925_v8  ;;  %v7186_v19 = vpop.permute.xlu2 %7185 }
 0xcc5   :  { %v7225_v26 = vmul.f32 %v7186_v19, %v16925_v8 }
 0xcc6   :  { %v14662_v13 = vadd.f32 %v7218_v59, %v14401_v6 }
 0xcc7   :  { %v14665_v24 = vadd.f32 %v7225_v26, %v14403_v2  ;;  %v17002_v2 = vld [vmem:[#allocation8_spill] sm:$0xff]  ;;  %v17003_v26 = vld [vmem:[#allocation66_spill] sm:$0xff] }
 0xcc9   :  { %7165 = vperm.xlu0 %7956, %v17000_v16  }
 0xcca   :  { %7964 = vset.pattern.permute.xlu1 %v17001_v21 }
 0xccb   :  { %7963 = vset.pattern.permute.xlu2 %v17001_v21  ;;  %7461 = vperm.xlu1 %7964, %v16919_v34   ;;  %v7170_v58 = vpop.permute.xlu1 %7169  ;;  %v14671_v11 = vpop.permute.xlu0 %3287 }
 0xccc   :  { %v7221_v12 = vmul.f32 %v7170_v58, %v16925_v8  ;;  %7453 = vperm.xlu2 %7963, %v13710_v25  }
 0xccd   :  { %v7262_v6 = vpop.permute.xlu2 %7261 }
 0xcce   :  { %v14676_v14 = vadd.f32 %v7221_v12, %v14431_v46  ;;  %v7388_v59 = vmul.f32 %v7262_v6, %v17002_v2  ;;  %v17005_v6 = vld [vmem:[#allocation144_spill] sm:$0xff] }
 0xcd0   :  { %v14680_v19 = vadd.f32 %v7388_v59, %v14438_v30 }
 0xcd1   :  { %7177 = vperm.xlu0 %7956, %v17003_v26  }
 0xcd3   :  { %7469 = vperm.xlu1 %7964, %v13716_v31   ;;  %v7182_v34 = vpop.permute.xlu1 %7181  ;;  %v14684_v9 = vpop.permute.xlu0 %3299 }
 0xcd4   :  { %17004 = vst [vmem:[#allocation60_spill] sm:$0xff] %v14684_v9  ;;  %v7224_v58 = vmul.f32 %v7182_v34, %v16925_v8  ;;  %7465 = vperm.xlu2 %7963, %v16934_v56  }
 0xcd5   :  { %v7274_v25 = vpop.permute.xlu2 %7273 }
 0xcd6   :  { %v14689_v46 = vadd.f32 %v7224_v58, %v14460_v54  ;;  %v7391_v12 = vmul.f32 %v7274_v25, %v17002_v2  ;;  %v17007_v25 = vmov 6  }
 0xcd8   :  { %v14693_v30 = vadd.f32 %v7391_v12, %v14467_v57 }
 0xcd9   :  { %7189 = vperm.xlu0 %7956, %v17005_v6  }
 0xcdb   :  { %7481 = vperm.xlu1 %7964, %v13728_v43   ;;  %v7194_v31 = vpop.permute.xlu1 %7193  ;;  %v14697_v59 = vpop.permute.xlu0 %3311  ;;  %v17008_v43 = vld [vmem:[#allocation24_spill] sm:$0xff] }
 0xcdc   :  { %17006 = vst [vmem:[#allocation107_spill] sm:$0xff] %v14697_v59  ;;  %v7227_v34 = vmul.f32 %v7194_v31, %v16925_v8  ;;  %7473 = vperm.xlu2 %7963, %v16944_v61   ;;  %v17010_v31 = vld [vmem:[#allocation63_spill] sm:$0xff] }
 0xcdd   :  { %v7282_v56 = vpop.permute.xlu2 %7281 }
 0xcde   :  { %v14702_v54 = vadd.f32 %v7227_v34, %v14489_v7  ;;  %v7393_v58 = vmul.f32 %v7282_v56, %v17002_v2 }
 0xce0   :  { %v14706_v57 = vadd.f32 %v7393_v58, %v14496_v20  ;;  %v17011_v58 = vld [vmem:[#allocation110_spill] sm:$0xff] }
 0xce1   :  { %7960 = vset.pattern.permute.xlu0 %v17007_v25 }
 0xce2   :  { %7265 = vperm.xlu0 %7960, %v16962_v40  }
 0xce3   :  { %7493 = vperm.xlu1 %7964, %v17008_v43   ;;  %v14711_v12 = vpop.permute.xlu0 %3323  ;;  %v17013_v43 = vld [vmem:[#allocation73_spill] sm:$0xff] }
 0xce4   :  { %17009 = vst [vmem:[#allocation76_spill] sm:$0xff] %v14711_v12  ;;  %7485 = vperm.xlu2 %7963, %v17010_v31   ;;  %v7270_v61 = vpop.permute.xlu1 %7269 }
 0xce5   :  { %v7390_v59 = vmul.f32 %v7270_v61, %v17002_v2  ;;  %v7294_v7 = vpop.permute.xlu2 %7293 }
 0xce6   :  { %v7396_v34 = vmul.f32 %v7294_v7, %v17002_v2 }
 0xce7   :  { %v14717_v56 = vadd.f32 %v7390_v59, %v14525_v1  ;;  %v17014_v59 = vld [vmem:[#allocation64_spill] sm:$0xff] }
 0xce8   :  { %v14720_v20 = vadd.f32 %v7396_v34, %v14527_v44 }
 0xcea   :  { %7285 = vperm.xlu0 %7960, %v16975_v36  }
 0xceb   :  { %7505 = vperm.xlu1 %7964, %v17011_v58   ;;  %v14724_v25 = vpop.permute.xlu0 %3335  ;;  %v17016_v58 = vld [vmem:[#allocation119_spill] sm:$0xff] }
 0xcec   :  { %17012 = vst [vmem:[#allocation31_spill] sm:$0xff] %v14724_v25  ;;  %7497 = vperm.xlu2 %7963, %v17013_v43   ;;  %v7278_v31 = vpop.permute.xlu1 %7277 }
 0xced   :  { %v7392_v61 = vmul.f32 %v7278_v31, %v17002_v2  ;;  %v7306_v12 = vpop.permute.xlu2 %7305 }
 0xcee   :  { %v7399_v7 = vmul.f32 %v7306_v12, %v17002_v2 }
 0xcef   :  { %v14730_v1 = vadd.f32 %v7392_v61, %v14554_v33 }
 0xcf0   :  { %v14733_v44 = vadd.f32 %v7399_v7, %v14556_v32 }
 0xcf2   :  { %7297 = vperm.xlu0 %7960, %v16983_v35  }
 0xcf3   :  { %7517 = vperm.xlu1 %7964, %v17014_v59   ;;  %v14737_v34 = vpop.permute.xlu0 %3347 }
 0xcf4   :  { %17015 = vst [vmem:[#allocation131_spill] sm:$0xff] %v14737_v34  ;;  %7509 = vperm.xlu2 %7963, %v17016_v58   ;;  %v7290_v43 = vpop.permute.xlu1 %7289 }
 0xcf5   :  { %v7395_v31 = vmul.f32 %v7290_v43, %v17002_v2  ;;  %v7318_v25 = vpop.permute.xlu2 %7317 }
 0xcf6   :  { %v7402_v12 = vmul.f32 %v7318_v25, %v17002_v2 }
 0xcf7   :  { %v14743_v33 = vadd.f32 %v7395_v31, %v14579_v10 }
 0xcf8   :  { %v14746_v32 = vadd.f32 %v7402_v12, %v14581_v55 }
 0xcfa   :  { %7309 = vperm.xlu0 %7960, %v16990_v45  }
 0xcfb   :  { %7529 = vperm.xlu1 %7964, %v13776_v29   ;;  %v14750_v61 = vpop.permute.xlu0 %3359 }
 0xcfc   :  { %17017 = vst [vmem:[#allocation113_spill] sm:$0xff] %v14750_v61  ;;  %7521 = vperm.xlu2 %7963, %v16986_v41   ;;  %v7302_v7 = vpop.permute.xlu1 %7301 }
 0xcfd   :  { %v7398_v59 = vmul.f32 %v7302_v7, %v17002_v2  ;;  %v7330_v58 = vpop.permute.xlu2 %7329 }
 0xcfe   :  { %v7405_v25 = vmul.f32 %v7330_v58, %v17002_v2 }
 0xcff   :  { %v14756_v10 = vadd.f32 %v7398_v59, %v14600_v18 }
 0xd00   :  { %v14759_v55 = vadd.f32 %v7405_v25, %v14603_v62 }
 0xd02   :  { %7321 = vperm.xlu0 %7960, %v16996_v60  }
 0xd03   :  { %7541 = vperm.xlu1 %7964, %v13788_v37   ;;  %v14763_v29 = vpop.permute.xlu0 %7073 }
 0xd04   :  { %7533 = vperm.xlu2 %7963, %v13794_v23   ;;  %v7314_v41 = vpop.permute.xlu1 %7313 }
 0xd05   :  { %v7401_v43 = vmul.f32 %v7314_v41, %v17002_v2  ;;  %v7342_v31 = vpop.permute.xlu2 %7341 }
 0xd06   :  { %v7408_v12 = vmul.f32 %v7342_v31, %v17002_v2 }
 0xd07   :  { %v14769_v18 = vadd.f32 %v7401_v43, %v14622_v0 }
 0xd08   :  { %v14772_v62 = vadd.f32 %v7408_v12, %v14625_v52 }
 0xd0a   :  { %7333 = vperm.xlu0 %7960, %v16997_v48  }
 0xd0b   :  { %7553 = vperm.xlu1 %7964, %v13800_v42   ;;  %v14776_v37 = vpop.permute.xlu0 %7093 }
 0xd0c   :  { %7545 = vperm.xlu2 %7963, %v13806_v53   ;;  %v7326_v23 = vpop.permute.xlu1 %7325 }
 0xd0d   :  { %v7404_v7 = vmul.f32 %v7326_v23, %v17002_v2  ;;  %v7354_v59 = vpop.permute.xlu2 %7353 }
 0xd0e   :  { %v7411_v58 = vmul.f32 %v7354_v59, %v17002_v2 }
 0xd0f   :  { %v14782_v0 = vadd.f32 %v7404_v7, %v14636_v50 }
 0xd10   :  { %v14785_v52 = vadd.f32 %v7411_v58, %v14639_v63 }
 0xd12   :  { %7345 = vperm.xlu0 %7960, %v16998_v47  }
 0xd13   :  { %7565 = vperm.xlu1 %7964, %v13812_v15   ;;  %v14789_v42 = vpop.permute.xlu0 %7105 }
 0xd14   :  { %7557 = vperm.xlu2 %7963, %v13818_v3   ;;  %v7338_v53 = vpop.permute.xlu1 %7337 }
 0xd15   :  { %v7407_v25 = vmul.f32 %v7338_v53, %v17002_v2  ;;  %v7366_v41 = vpop.permute.xlu2 %7365  ;;  %v17018_v53 = vld [vmem:[#allocation59_spill] sm:$0xff] }
 0xd16   :  { %v7414_v43 = vmul.f32 %v7366_v41, %v17002_v2 }
 0xd17   :  { %v14795_v50 = vadd.f32 %v7407_v25, %v14649_v22 }
 0xd18   :  { %v14798_v63 = vadd.f32 %v7414_v43, %v14652_v5 }
 0xd1a   :  { %7357 = vperm.xlu0 %7960, %v17000_v16  }
 0xd1b   :  { %7577 = vperm.xlu1 %7964, %v13824_v39   ;;  %v14802_v15 = vpop.permute.xlu0 %7117 }
 0xd1c   :  { %7569 = vperm.xlu2 %7963, %v13827_v4   ;;  %v7350_v3 = vpop.permute.xlu1 %7349 }
 0xd1d   :  { %v7410_v31 = vmul.f32 %v7350_v3, %v17002_v2  ;;  %v7378_v12 = vpop.permute.xlu2 %7377 }
 0xd1e   :  { %v7417_v23 = vmul.f32 %v7378_v12, %v17002_v2 }
 0xd1f   :  { %v14808_v22 = vadd.f32 %v7410_v31, %v14662_v13  ;;  %v7811_v13 = vld [vmem:[%s15570_s0 + $0x100] sm:$0xff] }
 0xd20   :  { %v14811_v5 = vadd.f32 %v7417_v23, %v14665_v24  ;;  %v14829_v24 = vld [vmem:[%s15577_s8] ss:$0 sm:$0xff] }
 0xd22   :  { %7369 = vperm.xlu0 %7960, %v17003_v26  }
 0xd23   :  { %v14814_v7 = vpop.permute.xlu0 %7129 }
 0xd24   :  { %v7362_v39 = vpop.permute.xlu1 %7361 }
 0xd25   :  { %v7413_v59 = vmul.f32 %v7362_v39, %v17002_v2 }
 0xd26   :  { %v7454_v4 = vpop.permute.xlu2 %7453 }
 0xd27   :  { %v14818_v58 = vadd.f32 %v7413_v59, %v14676_v14  ;;  %v7580_v25 = vmul.f32 %v7454_v4, %v17018_v53  ;;  %v7814_v4 = vld [vmem:[%s15570_s0 + $0x118] sm:$0xff] }
 0xd29   :  { %v7612_v41 = vadd.f32 %v7580_v25, %v14680_v19 }
 0xd2a   :  { %7381 = vperm.xlu0 %7960, %v17005_v6  }
 0xd2b   :  { %v7644_v43 = vadd.f32 %v14829_v24, %v7612_v41  ;;  %v14832_v3 = vpop.permute.xlu0 %7141  ;;  %v17019_v41 = vld [vmem:[#allocation20_spill] sm:$0xff] }
 0xd2c   :  { %v7374_v14 = vpop.permute.xlu1 %7373 }
 0xd2d   :  { %v7708_v31 = vadd.f32 %v7811_v13, %v7644_v43  ;;  %v7416_v12 = vmul.f32 %v7374_v14, %v17002_v2 }
 0xd2e   :  { %v7466_v19 = vpop.permute.xlu2 %7465 }
 0xd2f   :  { %7843 = vst.msk [vmem:[%s15579_s9 + $0x100] sm:$0xff] %vm3916_vm8, %v7708_v31  ;;  %v14840_v23 = vadd.f32 %v7416_v12, %v14689_v46  ;;  %v7583_v39 = vmul.f32 %v7466_v19, %v17018_v53  ;;  %v7816_v19 = vld [vmem:[%s15570_s0 + $0x128] sm:$0xff] }
 0xd31   :  { %v7615_v59 = vadd.f32 %v7583_v39, %v14693_v30 }
 0xd32   :  { %7962 = vset.pattern.permute.xlu0 %v17001_v21 }
 0xd33   :  { %v7647_v25 = vadd.f32 %v14829_v24, %v7615_v59  ;;  %3629 = vperm.xlu0 %7962, %v17019_v41   ;;  %v14850_v13 = vpop.permute.xlu0 %7153  ;;  %v17020_v59 = vld [vmem:[#allocation47_spill] sm:$0xff] }
 0xd34   :  { %v7386_v43 = vpop.permute.xlu1 %7385 }
 0xd35   :  { %v7711_v14 = vadd.f32 %v7814_v4, %v7647_v25  ;;  %v7419_v46 = vmul.f32 %v7386_v43, %v17002_v2 }
 0xd36   :  { %v7474_v31 = vpop.permute.xlu2 %7473 }
 0xd37   :  { %7846 = vst.msk [vmem:[%s15579_s9 + $0x118] sm:$0xff] %vm3916_vm8, %v7711_v14  ;;  %v14858_v30 = vadd.f32 %v7419_v46, %v14702_v54  ;;  %v7585_v21 = vmul.f32 %v7474_v31, %v17018_v53  ;;  %v7813_v46 = vld [vmem:[%s15570_s0 + $0x110] sm:$0xff] }
 0xd39   :  { %v7617_v12 = vadd.f32 %v7585_v21, %v14706_v57 }
 0xd3b   :  { %v7649_v39 = vadd.f32 %v14829_v24, %v7617_v12  ;;  %3649 = vperm.xlu0 %7962, %v17020_v59   ;;  %v14867_v4 = vpop.permute.xlu0 %7165  ;;  %v7819_v12 = vld [vmem:[%s15570_s0 + $0x140] sm:$0xff] }
 0xd3d   :  { %v7713_v25 = vadd.f32 %v7816_v19, %v7649_v39  ;;  %v7462_v41 = vpop.permute.xlu1 %7461  ;;  %v17021_v39 = vld [vmem:[#allocation38_spill] sm:$0xff] }
 0xd3e   :  { %v7582_v43 = vmul.f32 %v7462_v41, %v17018_v53  ;;  %v7486_v54 = vpop.permute.xlu2 %7485 }
 0xd3f   :  { %7848 = vst.msk [vmem:[%s15579_s9 + $0x128] sm:$0xff] %vm3916_vm8, %v7713_v25  ;;  %v7588_v57 = vmul.f32 %v7486_v54, %v17018_v53 }
 0xd40   :  { %v7614_v14 = vadd.f32 %v7582_v43, %v14717_v56 }
 0xd41   :  { %v7620_v31 = vadd.f32 %v7588_v57, %v14720_v20 }
 0xd42   :  { %v7646_v21 = vadd.f32 %v14829_v24, %v7614_v14  ;;  %v17022_v14 = vld [vmem:[#allocation207_spill] sm:$0xff] }
 0xd43   :  { %v7652_v19 = vadd.f32 %v14829_v24, %v7620_v31  ;;  %3661 = vperm.xlu0 %7962, %v17021_v39   ;;  %v14886_v59 = vpop.permute.xlu0 %7177  ;;  %v7822_v39 = vld [vmem:[%s15570_s0 + $0x158] sm:$0xff] }
 0xd44   :  { %v7710_v25 = vadd.f32 %v7813_v46, %v7646_v21  ;;  %v17023_v46 = vld [vmem:[#allocation180_spill] sm:$0xff]  ;;  %v7815_v21 = vld [vmem:[%s15570_s0 + $0x120] sm:$0xff] }
 0xd45   :  { %v7716_v56 = vadd.f32 %v7819_v12, %v7652_v19  ;;  %v7470_v41 = vpop.permute.xlu1 %7469  ;;  %v6429_v31 = vmul.f32 %v17023_v46, %v17022_v14 }
 0xd46   :  { %7845 = vst.msk [vmem:[%s15579_s9 + $0x110] sm:$0xff] %vm3916_vm8, %v7710_v25  ;;  %v7584_v20 = vmul.f32 %v7470_v41, %v17018_v53  ;;  %v7498_v43 = vpop.permute.xlu2 %7497  ;;  %v17024_v25 = vld [vmem:[#allocation87_spill] sm:$0xff] }
 0xd47   :  { %7851 = vst.msk [vmem:[%s15579_s9 + $0x140] sm:$0xff] %vm3916_vm8, %v7716_v56  ;;  %v7591_v54 = vmul.f32 %v7498_v43, %v17018_v53  ;;  %v6237_v56 = vmul.f32 %v17024_v25, %v16896_v51  ;;  %v17026_v43 = vld [vmem:[#allocation14_spill] sm:$0xff] }
 0xd48   :  { %v7616_v57 = vadd.f32 %v7584_v20, %v14730_v1  ;;  %v17025_v1 = vld [vmem:[#allocation77_spill] sm:$0xff] }
 0xd49   :  { %v7623_v12 = vadd.f32 %v7591_v54, %v14733_v44  ;;  %v6621_v41 = vmul.f32 %v17025_v1, %v16897_v27  ;;  %v6461_v44 = vadd.f32 %v6429_v31, %v6237_v56  ;;  %v17027_v54 = vld [vmem:[#allocation139_spill] sm:$0xff]  ;;  %v7818_v56 = vld [vmem:[%s15570_s0 + $0x138] sm:$0xff] }
 0xd4a   :  { %v7648_v19 = vadd.f32 %v14829_v24, %v7616_v57  ;;  %v6813_v57 = vmul.f32 %v17027_v54, %v16898_v17  ;;  %v7825_v54 = vld [vmem:[%s15570_s0 + $0x170] sm:$0xff] }
 0xd4b   :  { %v7655_v20 = vadd.f32 %v14829_v24, %v7623_v12  ;;  %3673 = vperm.xlu0 %7962, %v17026_v43   ;;  %v14915_v46 = vpop.permute.xlu0 %7189  ;;  %v6653_v12 = vadd.f32 %v6621_v41, %v6461_v44  ;;  %v17028_v43 = vld [vmem:[#allocation58_spill] sm:$0xff] }
 0xd4c   :  { %v7712_v61 = vadd.f32 %v7815_v21, %v7648_v19  ;;  %v7005_v26 = vmul.f32 %v17028_v43, %v16900_v49  ;;  %v17029_v21 = vld [vmem:[#allocation135_spill] sm:$0xff] }
 0xd4d   :  { %v7719_v34 = vadd.f32 %v7822_v39, %v7655_v20  ;;  %v7482_v6 = vpop.permute.xlu1 %7481  ;;  %v6434_v19 = vmul.f32 %v17029_v21, %v17022_v14  ;;  %v17030_v20 = vld [vmem:[#allocation89_spill] sm:$0xff] }
 0xd4e   :  { %7847 = vst.msk [vmem:[%s15579_s9 + $0x120] sm:$0xff] %vm3916_vm8, %v7712_v61  ;;  %v7587_v25 = vmul.f32 %v7482_v6, %v17018_v53  ;;  %v7510_v1 = vpop.permute.xlu2 %7509  ;;  %v6845_v61 = vadd.f32 %v6813_v57, %v6653_v12  ;;  %v7197_v6 = vmul.f32 %v14763_v29, %v16925_v8 }
 0xd4f   :  { %7854 = vst.msk [vmem:[%s15579_s9 + $0x158] sm:$0xff] %vm3916_vm8, %v7719_v34  ;;  %v7594_v31 = vmul.f32 %v7510_v1, %v17018_v53  ;;  %v6242_v34 = vmul.f32 %v17030_v20, %v16896_v51  ;;  %v17032_v1 = vld [vmem:[#allocation19_spill] sm:$0xff] }
 0xd50   :  { %v7619_v39 = vadd.f32 %v7587_v25, %v14743_v33  ;;  %v17031_v33 = vld [vmem:[#allocation176_spill] sm:$0xff]  ;;  %v7037_v25 = vadd.f32 %v7005_v26, %v6845_v61 }
 0xd51   :  { %v7626_v41 = vadd.f32 %v7594_v31, %v14746_v32  ;;  %v6626_v57 = vmul.f32 %v17031_v33, %v16897_v27  ;;  %v6466_v12 = vadd.f32 %v6434_v19, %v6242_v34  ;;  %v17033_v31 = vld [vmem:[#allocation168_spill] sm:$0xff]  ;;  %v17034_v19 = vld [vmem:[#allocation7_spill] sm:$0xff] }
 0xd52   :  { %v7651_v44 = vadd.f32 %v14829_v24, %v7619_v39  ;;  %v6818_v21 = vmul.f32 %v17033_v31, %v16898_v17  ;;  %v7229_v20 = vadd.f32 %v7197_v6, %v7037_v25  ;;  %v7821_v25 = vld [vmem:[%s15570_s0 + $0x150] sm:$0xff] }
 0xd53   :  { %v7658_v29 = vadd.f32 %v14829_v24, %v7626_v41  ;;  %3685 = vperm.xlu0 %7962, %v17032_v1   ;;  %v6658_v41 = vadd.f32 %v6626_v57, %v6466_v12  ;;  %v7202_v57 = vmul.f32 %v14776_v37, %v16925_v8 }
 0xd54   :  { %v7715_v43 = vadd.f32 %v7818_v56, %v7651_v44  ;;  %v7266_v32 = vpop.permute.xlu0 %7265  ;;  %v7010_v56 = vmul.f32 %v17034_v19, %v16900_v49  ;;  %v17035_v44 = vld [vmem:[#allocation36_spill] sm:$0xff] }
 0xd55   :  { %v7722_v39 = vadd.f32 %v7825_v54, %v7658_v29  ;;  %v7389_v9 = vmul.f32 %v7266_v32, %v17002_v2  ;;  %v7494_v16 = vpop.permute.xlu1 %7493  ;;  %v6437_v54 = vmul.f32 %v17035_v44, %v17022_v14 }
 0xd56   :  { %7850 = vst.msk [vmem:[%s15579_s9 + $0x138] sm:$0xff] %vm3916_vm8, %v7715_v43  ;;  %v7590_v26 = vmul.f32 %v7494_v16, %v17018_v53  ;;  %v7522_v61 = vpop.permute.xlu2 %7521  ;;  %v6850_v16 = vadd.f32 %v6818_v21, %v6658_v41  ;;  %v7828_v43 = vld [vmem:[%s15570_s0 + $0x188] sm:$0xff]  ;;  %v17038_v21 = vld [vmem:[#allocation39_spill] sm:$0xff] }
 0xd57   :  { %7857 = vst.msk [vmem:[%s15579_s9 + $0x170] sm:$0xff] %vm3916_vm8, %v7722_v39  ;;  %v14964_v6 = vadd.f32 %v7389_v9, %v7229_v20  ;;  %v7597_v34 = vmul.f32 %v7522_v61, %v17018_v53  ;;  %v17036_v9 = vld [vmem:[#allocation115_spill] sm:$0xff] }
 0xd58   :  { %v7622_v33 = vadd.f32 %v7590_v26, %v14756_v10  ;;  %v6245_v1 = vmul.f32 %v17036_v9, %v16896_v51  ;;  %v17037_v10 = vld [vmem:[#allocation56_spill] sm:$0xff]  ;;  %v7042_v31 = vadd.f32 %v7010_v56, %v6850_v16  ;;  %v17039_v26 = vld [vmem:[#allocation162_spill] sm:$0xff]  ;;  %v17041_v9 = vld [vmem:[#allocation123_spill] sm:$0xff] }
 0xd59   :  { %v7629_v29 = vadd.f32 %v7597_v34, %v14759_v55  ;;  %v6629_v32 = vmul.f32 %v17037_v10, %v16897_v27  ;;  %v6821_v61 = vmul.f32 %v17039_v26, %v16898_v17  ;;  %v7205_v10 = vmul.f32 %v14789_v42, %v16925_v8 }
 0xd5a   :  { %v7654_v12 = vadd.f32 %v14829_v24, %v7622_v33  ;;  %v6469_v20 = vadd.f32 %v6437_v54, %v6245_v1  ;;  %v7234_v41 = vadd.f32 %v7202_v57, %v7042_v31  ;;  %v17040_v54 = vld [vmem:[#allocation44_spill] sm:$0xff]  ;;  %v6440_v1 = vmul.f32 %v17041_v9, %v17022_v14 }
 0xd5b   :  { %v7661_v37 = vadd.f32 %v14829_v24, %v7629_v29  ;;  %3697 = vperm.xlu0 %7962, %v17038_v21  }
 0xd5c   :  { %v7718_v39 = vadd.f32 %v7821_v25, %v7654_v12  ;;  %v7286_v55 = vpop.permute.xlu0 %7285  ;;  %v6661_v16 = vadd.f32 %v6629_v32, %v6469_v20  ;;  %v7013_v25 = vmul.f32 %v17040_v54, %v16900_v49  ;;  %v7824_v32 = vld [vmem:[%s15570_s0 + $0x168] sm:$0xff] }
 0xd5d   :  { %v7725_v19 = vadd.f32 %v7828_v43, %v7661_v37  ;;  %v7394_v34 = vmul.f32 %v7286_v55, %v17002_v2  ;;  %v7506_v44 = vpop.permute.xlu1 %7505  ;;  %v17042_v37 = vld [vmem:[#allocation93_spill] sm:$0xff] }
 0xd5e   :  { %7853 = vst.msk [vmem:[%s15579_s9 + $0x150] sm:$0xff] %vm3916_vm8, %v7718_v39  ;;  %v7593_v56 = vmul.f32 %v7506_v44, %v17018_v53  ;;  %v7534_v33 = vpop.permute.xlu2 %7533  ;;  %v6853_v43 = vadd.f32 %v6821_v61, %v6661_v16  ;;  %v6248_v21 = vmul.f32 %v17042_v37, %v16896_v51  ;;  %v7831_v39 = vld [vmem:[%s15570_s0 + $0x1a0] sm:$0xff]  ;;  %v17044_v61 = vld [vmem:[#allocation40_spill] sm:$0xff] }
 0xd5f   :  { %7860 = vst.msk [vmem:[%s15579_s9 + $0x188] sm:$0xff] %vm3916_vm8, %v7725_v19  ;;  %v15000_v57 = vadd.f32 %v7394_v34, %v7234_v41  ;;  %v7600_v29 = vmul.f32 %v7534_v33, %v17018_v53  ;;  %v17045_v34 = vld [vmem:[#allocation174_spill] sm:$0xff] }
 0xd60   :  { %v7625_v12 = vadd.f32 %v7593_v56, %v14769_v18  ;;  %v17043_v18 = vld [vmem:[#allocation37_spill] sm:$0xff]  ;;  %v7045_v26 = vadd.f32 %v7013_v25, %v6853_v43  ;;  %v6472_v41 = vadd.f32 %v6440_v1, %v6248_v21  ;;  %v6824_v44 = vmul.f32 %v17045_v34, %v16898_v17 }
 0xd61   :  { %v7632_v31 = vadd.f32 %v7600_v29, %v14772_v62  ;;  %v6632_v55 = vmul.f32 %v17043_v18, %v16897_v27  ;;  %v17046_v1 = vld [vmem:[#allocation9_spill] sm:$0xff] }
 0xd62   :  { %v7657_v20 = vadd.f32 %v14829_v24, %v7625_v12  ;;  %v7237_v56 = vadd.f32 %v7205_v10, %v7045_v26  ;;  %v7016_v12 = vmul.f32 %v17046_v1, %v16900_v49 }
 0xd63   :  { %v7664_v42 = vadd.f32 %v14829_v24, %v7632_v31  ;;  %3709 = vperm.xlu0 %7962, %v17044_v61   ;;  %v6664_v9 = vadd.f32 %v6632_v55, %v6472_v41  ;;  %v17048_v55 = vld [vmem:[#allocation96_spill] sm:$0xff] }
 0xd64   :  { %v7721_v19 = vadd.f32 %v7824_v32, %v7657_v20  ;;  %v7298_v62 = vpop.permute.xlu0 %7297  ;;  %v17047_v32 = vld [vmem:[#allocation183_spill] sm:$0xff]  ;;  %v7208_v20 = vmul.f32 %v14802_v15, %v16925_v8  ;;  %v6251_v26 = vmul.f32 %v17048_v55, %v16896_v51  ;;  %v7834_v61 = vld [vmem:[%s15570_s0 + $0x1b8] sm:$0xff]  ;;  %v7211_v55 = vmul.f32 %v14814_v7, %v16925_v8 }
 0xd65   :  { %v7728_v33 = vadd.f32 %v7831_v39, %v7664_v42  ;;  %v7397_v16 = vmul.f32 %v7298_v62, %v17002_v2  ;;  %v7518_v54 = vpop.permute.xlu1 %7517  ;;  %v6443_v31 = vmul.f32 %v17047_v32, %v17022_v14  ;;  %v6856_v21 = vadd.f32 %v6824_v44, %v6664_v9  ;;  %v7827_v39 = vld [vmem:[%s15570_s0 + $0x180] sm:$0xff]  ;;  %v17050_v62 = vld [vmem:[#allocation42_spill] sm:$0xff] }
 0xd66   :  { %7856 = vst.msk [vmem:[%s15579_s9 + $0x168] sm:$0xff] %vm3916_vm8, %v7721_v19  ;;  %v7596_v25 = vmul.f32 %v7518_v54, %v17018_v53  ;;  %v7546_v29 = vpop.permute.xlu2 %7545 }
 0xd67   :  { %7863 = vst.msk [vmem:[%s15579_s9 + $0x1a0] sm:$0xff] %vm3916_vm8, %v7728_v33  ;;  %v15036_v43 = vadd.f32 %v7397_v16, %v7237_v56  ;;  %v7603_v10 = vmul.f32 %v7546_v29, %v17018_v53  ;;  %v7048_v19 = vadd.f32 %v7016_v12, %v6856_v21  ;;  %v6475_v34 = vadd.f32 %v6443_v31, %v6251_v26  ;;  %v17051_v56 = vld [vmem:[#allocation200_spill] sm:$0xff] }
 0xd68   :  { %v7628_v37 = vadd.f32 %v7596_v25, %v14782_v0  ;;  %v17049_v0 = vld [vmem:[#allocation164_spill] sm:$0xff]  ;;  %v6827_v33 = vmul.f32 %v17051_v56, %v16898_v17  ;;  %v17057_v56 = vld [vmem:[#allocation79_spill] sm:$0xff] }
 0xd69   :  { %v7635_v18 = vadd.f32 %v7603_v10, %v14785_v52  ;;  %v6635_v41 = vmul.f32 %v17049_v0, %v16897_v27  ;;  %v7240_v16 = vadd.f32 %v7208_v20, %v7048_v19  ;;  %v17052_v10 = vld [vmem:[#allocation143_spill] sm:$0xff]  ;;  %v17053_v21 = vld [vmem:[#allocation104_spill] sm:$0xff] }
 0xd6a   :  { %v7660_v42 = vadd.f32 %v14829_v24, %v7628_v37  ;;  %v7019_v32 = vmul.f32 %v17052_v10, %v16900_v49  ;;  %v6446_v20 = vmul.f32 %v17053_v21, %v17022_v14  ;;  %v7830_v26 = vld [vmem:[%s15570_s0 + $0x198] sm:$0xff]  ;;  %v7837_v19 = vld [vmem:[%s15570_s0 + $0x1d0] sm:$0xff]  ;;  %v17058_v10 = vld [vmem:[#allocation10_spill] sm:$0xff] }
 0xd6b   :  { %v7667_v15 = vadd.f32 %v14829_v24, %v7635_v18  ;;  %3721 = vperm.xlu0 %7962, %v17050_v62   ;;  %v6667_v12 = vadd.f32 %v6635_v41, %v6475_v34  ;;  %v17056_v34 = vld [vmem:[#allocation43_spill] sm:$0xff] }
 0xd6c   :  { %v7724_v44 = vadd.f32 %v7827_v39, %v7660_v42  ;;  %v7310_v52 = vpop.permute.xlu0 %7309 }
 0xd6d   :  { %v7731_v54 = vadd.f32 %v7834_v61, %v7667_v15  ;;  %v7400_v25 = vmul.f32 %v7310_v52, %v17002_v2  ;;  %v7530_v29 = vpop.permute.xlu1 %7529  ;;  %v6859_v18 = vadd.f32 %v6827_v33, %v6667_v12  ;;  %v17054_v61 = vld [vmem:[#allocation118_spill] sm:$0xff]  ;;  %v6830_v33 = vmul.f32 %v17057_v56, %v16898_v17 }
 0xd6e   :  { %7859 = vst.msk [vmem:[%s15579_s9 + $0x180] sm:$0xff] %vm3916_vm8, %v7724_v44  ;;  %v7599_v9 = vmul.f32 %v7530_v29, %v17018_v53  ;;  %v7558_v1 = vpop.permute.xlu2 %7557  ;;  %v6254_v0 = vmul.f32 %v17054_v61, %v16896_v51 }
 0xd6f   :  { %7866 = vst.msk [vmem:[%s15579_s9 + $0x1b8] sm:$0xff] %vm3916_vm8, %v7731_v54  ;;  %v15072_v31 = vadd.f32 %v7400_v25, %v7240_v16  ;;  %v7606_v37 = vmul.f32 %v7558_v1, %v17018_v53  ;;  %v7051_v62 = vadd.f32 %v7019_v32, %v6859_v18  ;;  %v7022_v32 = vmul.f32 %v17058_v10, %v16900_v49 }
 0xd70   :  { %v7631_v39 = vadd.f32 %v7599_v9, %v14795_v50  ;;  %v17055_v50 = vld [vmem:[#allocation3_spill] sm:$0xff]  ;;  %v6478_v44 = vadd.f32 %v6446_v20, %v6254_v0  ;;  %v17059_v20 = vld [vmem:[#allocation186_spill] sm:$0xff]  ;;  %v17060_v0 = vld [vmem:[#allocation120_spill] sm:$0xff] }
 0xd71   :  { %v7638_v42 = vadd.f32 %v7606_v37, %v14798_v63  ;;  %v6638_v15 = vmul.f32 %v17055_v50, %v16897_v27  ;;  %v7243_v16 = vadd.f32 %v7211_v55, %v7051_v62  ;;  %v7840_v50 = vld [vmem:[%s15570_s0 + $0x1e8] sm:$0xff] }
 0xd72   :  { %v7663_v41 = vadd.f32 %v14829_v24, %v7631_v39  ;;  %v6449_v39 = vmul.f32 %v17059_v20, %v17022_v14 }
 0xd73   :  { %v7670_v7 = vadd.f32 %v14829_v24, %v7638_v42  ;;  %3733 = vperm.xlu0 %7962, %v17056_v34   ;;  %v6670_v12 = vadd.f32 %v6638_v15, %v6478_v44  ;;  %v7833_v42 = vld [vmem:[%s15570_s0 + $0x1b0] sm:$0xff] }
 0xd74   :  { %v7727_v52 = vadd.f32 %v7830_v26, %v7663_v41  ;;  %v7322_v63 = vpop.permute.xlu0 %7321  ;;  %v7214_v26 = vmul.f32 %v14832_v3, %v16925_v8  ;;  %v6257_v41 = vmul.f32 %v17060_v0, %v16896_v51 }
 0xd75   :  { %v7734_v54 = vadd.f32 %v7837_v19, %v7670_v7  ;;  %v7403_v25 = vmul.f32 %v7322_v63, %v17002_v2  ;;  %v7542_v29 = vpop.permute.xlu1 %7541  ;;  %v6862_v55 = vadd.f32 %v6830_v33, %v6670_v12  ;;  %v17062_v7 = vld [vmem:[#allocation5_spill] sm:$0xff] }
 0xd76   :  { %7862 = vst.msk [vmem:[%s15579_s9 + $0x198] sm:$0xff] %vm3916_vm8, %v7727_v52  ;;  %v7602_v9 = vmul.f32 %v7542_v29, %v17018_v53  ;;  %v7570_v1 = vpop.permute.xlu2 %7569  ;;  %v6481_v34 = vadd.f32 %v6449_v39, %v6257_v41  ;;  %v17063_v52 = vld [vmem:[#allocation192_spill] sm:$0xff]  ;;  %v7217_v39 = vmul.f32 %v14850_v13, %v16925_v8  ;;  %v17068_v13 = vld [vmem:[#allocation111_spill] sm:$0xff] }
 0xd77   :  { %7869 = vst.msk [vmem:[%s15579_s9 + $0x1d0] sm:$0xff] %vm3916_vm8, %v7734_v54  ;;  %v15108_v37 = vadd.f32 %v7403_v25, %v7243_v16  ;;  %v7609_v21 = vmul.f32 %v7570_v1, %v17018_v53  ;;  %v7054_v62 = vadd.f32 %v7022_v32, %v6862_v55  ;;  %v6833_v63 = vmul.f32 %v17063_v52, %v16898_v17  ;;  %v17065_v32 = vld [vmem:[#allocation187_spill] sm:$0xff] }
 0xd78   :  { %v7634_v18 = vadd.f32 %v7602_v9, %v14808_v22  ;;  %v17061_v22 = vld [vmem:[#allocation55_spill] sm:$0xff]  ;;  %v17064_v9 = vld [vmem:[#allocation17_spill] sm:$0xff] }
 0xd79   :  { %v7641_v61 = vadd.f32 %v7609_v21, %v14811_v5  ;;  %v6641_v15 = vmul.f32 %v17061_v22, %v16897_v27  ;;  %v7246_v56 = vadd.f32 %v7214_v26, %v7054_v62  ;;  %v7025_v1 = vmul.f32 %v17064_v9, %v16900_v49  ;;  %v17066_v26 = vld [vmem:[#allocation150_spill] sm:$0xff] }
 0xd7a   :  { %v7666_v19 = vadd.f32 %v14829_v24, %v7634_v18  ;;  %v6452_v21 = vmul.f32 %v17065_v32, %v17022_v14  ;;  %v7836_v18 = vld [vmem:[%s15570_s0 + $0x1c8] sm:$0xff]  ;;  %v6836_v22 = vmul.f32 %v17068_v13, %v16898_v17 }
 0xd7b   :  { %v7673_v3 = vadd.f32 %v14829_v24, %v7641_v61  ;;  %3745 = vperm.xlu0 %7962, %v17062_v7   ;;  %v6673_v29 = vadd.f32 %v6641_v15, %v6481_v34  ;;  %v17067_v61 = vld [vmem:[#allocation167_spill] sm:$0xff] }
 0xd7c   :  { %v7730_v44 = vadd.f32 %v7833_v42, %v7666_v19  ;;  %v7334_v5 = vpop.permute.xlu0 %7333  ;;  %v6260_v42 = vmul.f32 %v17066_v26, %v16896_v51  ;;  %v6644_v0 = vmul.f32 %v17067_v61, %v16897_v27 }
 0xd7d   :  { %v7737_v33 = vadd.f32 %v7840_v50, %v7673_v3  ;;  %v7406_v16 = vmul.f32 %v7334_v5, %v17002_v2  ;;  %v7554_v54 = vpop.permute.xlu1 %7553  ;;  %v6865_v20 = vadd.f32 %v6833_v63, %v6673_v29  ;;  %v17070_v63 = vld [vmem:[#allocation124_spill] sm:$0xff] }
 0xd7e   :  { %7865 = vst.msk [vmem:[%s15579_s9 + $0x1b0] sm:$0xff] %vm3916_vm8, %v7730_v44  ;;  %v7605_v25 = vmul.f32 %v7554_v54, %v17018_v53  ;;  %v6484_v50 = vadd.f32 %v6452_v21, %v6260_v42  ;;  %v7839_v54 = vld [vmem:[%s15570_s0 + $0x1e0] sm:$0xff]  ;;  %v17071_v29 = vld [vmem:[#allocation68_spill] sm:$0xff] }
 0xd7f   :  { %7872 = vst.msk [vmem:[%s15579_s9 + $0x1e8] sm:$0xff] %vm3916_vm8, %v7737_v33  ;;  %v15144_v12 = vadd.f32 %v7406_v16, %v7246_v56  ;;  %v6455_v56 = vmul.f32 %v17070_v63, %v17022_v14  ;;  %v7220_v16 = vmul.f32 %v14867_v4, %v16925_v8  ;;  %v6263_v9 = vmul.f32 %v17071_v29, %v16896_v51  ;;  %v17073_v4 = vld [vmem:[#allocation126_spill] sm:$0xff]  ;;  %v17079_v63 = vld [vmem:[#allocation25_spill] sm:$0xff] }
 0xd80   :  { %v7637_v10 = vadd.f32 %v7605_v25, %v14818_v58  ;;  %v7057_v58 = vadd.f32 %v7025_v1, %v6865_v20  ;;  %v6676_v34 = vadd.f32 %v6644_v0, %v6484_v50  ;;  %v17072_v1 = vld [vmem:[#allocation205_spill] sm:$0xff] }
 0xd81   :  { %v6487_v20 = vadd.f32 %v6455_v56, %v6263_v9 }
 0xd82   :  { %v7669_v55 = vadd.f32 %v14829_v24, %v7637_v10  ;;  %v7249_v15 = vadd.f32 %v7217_v39, %v7057_v58  ;;  %v6868_v33 = vadd.f32 %v6836_v22, %v6676_v34  ;;  %v6647_v10 = vmul.f32 %v17072_v1, %v16897_v27  ;;  %v17077_v34 = vld [vmem:[#allocation52_spill] sm:$0xff] }
 0xd83   :  { %7457 = vperm.xlu0 %7962, %v16962_v40   ;;  %v17069_v40 = vld [vmem:[#allocation15_spill] sm:$0xff]  ;;  %v6839_v39 = vmul.f32 %v17073_v4, %v16898_v17  ;;  %v7223_v22 = vmul.f32 %v14886_v59, %v16925_v8  ;;  %v2403_v59 = vmul.f32 %v16896_v51, %v17079_v63 }
 0xd84   :  { %v7733_v41 = vadd.f32 %v7836_v18, %v7669_v55  ;;  %v7346_v19 = vpop.permute.xlu0 %7345  ;;  %v7028_v44 = vmul.f32 %v17069_v40, %v16900_v49  ;;  %v6679_v61 = vadd.f32 %v6647_v10, %v6487_v20  ;;  %v6266_v40 = vmul.f32 %v17077_v34, %v16896_v51 }
 0xd85   :  { %v7409_v62 = vmul.f32 %v7346_v19, %v17002_v2  ;;  %v7566_v3 = vpop.permute.xlu1 %7565  ;;  %v17075_v19 = vld [vmem:[#allocation152_spill] sm:$0xff] }
 0xd86   :  { %7868 = vst.msk [vmem:[%s15579_s9 + $0x1c8] sm:$0xff] %vm3916_vm8, %v7733_v41  ;;  %v7608_v7 = vmul.f32 %v7566_v3, %v17018_v53  ;;  %v6458_v50 = vmul.f32 %v17075_v19, %v17022_v14  ;;  %v6871_v13 = vadd.f32 %v6839_v39, %v6679_v61  ;;  %v7226_v39 = vmul.f32 %v14915_v46, %v16925_v8  ;;  %v17084_v61 = vld [vmem:[#allocation27_spill] sm:$0xff] }
 0xd87   :  { %v15170_v5 = vadd.f32 %v7409_v62, %v7249_v15  ;;  %v7842_v15 = vld [vmem:[%s15570_s0 + $0x1f8] sm:$0xff]  ;;  %v17076_v62 = vld [vmem:[#allocation182_spill] sm:$0xff]  ;;  %v17086_v19 = vld [vmem:[#allocation179_spill] sm:$0xff] }
 0xd88   :  { %v7640_v52 = vadd.f32 %v7608_v7, %v14840_v23  ;;  %v7060_v23 = vadd.f32 %v7028_v44, %v6868_v33  ;;  %v2596_v3 = vmul.f32 %v17022_v14, %v17076_v62 }
 0xd8a   :  { %v7672_v25 = vadd.f32 %v14829_v24, %v7640_v52  ;;  %v7252_v18 = vadd.f32 %v7220_v16, %v7060_v23  ;;  %v6490_v16 = vadd.f32 %v6458_v50, %v6266_v40  ;;  %v2628_v1 = vadd.f32 %v2596_v3, %v2403_v59  ;;  %v17089_v59 = vld [vmem:[#allocation11_spill] sm:$0xff] }
 0xd8b   :  { %7477 = vperm.xlu0 %7962, %v16975_v36   ;;  %v17074_v36 = vld [vmem:[#allocation48_spill] sm:$0xff]  ;;  %v3175_v50 = vmul.f32 %v16900_v49, %v17086_v19  ;;  %v3368_v3 = vmul.f32 %v16925_v8, %v14632_v38  ;;  %v17091_v38 = vld [vmem:[#allocation171_spill] sm:$0xff] }
 0xd8c   :  { %v7736_v32 = vadd.f32 %v7839_v54, %v7672_v25  ;;  %v7358_v21 = vpop.permute.xlu0 %7357  ;;  %v7031_v0 = vmul.f32 %v17074_v36, %v16900_v49  ;;  %v17080_v54 = vld [vmem:[#allocation134_spill] sm:$0xff]  ;;  %v2408_v36 = vmul.f32 %v16896_v51, %v17084_v61 }
 0xd8d   :  { %v7412_v55 = vmul.f32 %v7358_v21, %v17002_v2  ;;  %v7578_v26 = vpop.permute.xlu1 %7577  ;;  %v6842_v25 = vmul.f32 %v17080_v54, %v16898_v17  ;;  %v17082_v21 = vld [vmem:[#allocation80_spill] sm:$0xff]  ;;  %v3561_v54 = vmul.f32 %v17002_v2, %v17091_v38 }
 0xd8e   :  { %7871 = vst.msk [vmem:[%s15579_s9 + $0x1e0] sm:$0xff] %vm3916_vm8, %v7736_v32  ;;  %v7611_v42 = vmul.f32 %v7578_v26, %v17018_v53  ;;  %v7063_v52 = vadd.f32 %v7031_v0, %v6871_v13  ;;  %v2789_v20 = vmul.f32 %v16897_v27, %v17082_v21  ;;  %v17085_v0 = vld [vmem:[#allocation137_spill] sm:$0xff] }
 0xd8f   :  { %v15196_v58 = vadd.f32 %v7412_v55, %v7252_v18  ;;  %v17083_v55 = vld [vmem:[#allocation185_spill] sm:$0xff] }
 0xd90   :  { %v7643_v41 = vadd.f32 %v7611_v42, %v14858_v30  ;;  %v17078_v30 = vld [vmem:[#allocation105_spill] sm:$0xff]  ;;  %v7255_v29 = vadd.f32 %v7223_v22, %v7063_v52  ;;  %v2821_v18 = vadd.f32 %v2789_v20, %v2628_v1  ;;  %v2601_v26 = vmul.f32 %v17022_v14, %v17083_v55 }
 0xd91   :  { %v6650_v44 = vmul.f32 %v17078_v30, %v16897_v27  ;;  %v17088_v30 = vld [vmem:[#allocation188_spill] sm:$0xff]  ;;  %v17093_v20 = vld [vmem:[#allocation85_spill] sm:$0xff] }
 0xd92   :  { %v7675_v7 = vadd.f32 %v14829_v24, %v7643_v41  ;;  %v2982_v41 = vmul.f32 %v16898_v17, %v17085_v0 }
 0xd93   :  { %7489 = vperm.xlu0 %7962, %v16983_v35   ;;  %v6682_v10 = vadd.f32 %v6650_v44, %v6490_v16  ;;  %v17081_v35 = vld [vmem:[#allocation121_spill] sm:$0xff]  ;;  %v2604_v44 = vmul.f32 %v17022_v14, %v17088_v30 }
 0xd94   :  { %v7739_v56 = vadd.f32 %v7842_v15, %v7675_v7  ;;  %v7370_v33 = vpop.permute.xlu0 %7369  ;;  %v7034_v23 = vmul.f32 %v17081_v35, %v16900_v49  ;;  %v2633_v15 = vadd.f32 %v2601_v26, %v2408_v36  ;;  %v3014_v62 = vadd.f32 %v2982_v41, %v2821_v18  ;;  %v17094_v18 = vld [vmem:[#allocation191_spill] sm:$0xff]  ;;  %v3853_v26 = vld [vmem:[%s15570_s0 + $0x8] sm:$0xff] }
 0xd95   :  { %v7415_v9 = vmul.f32 %v7370_v33, %v17002_v2  ;;  %v6874_v4 = vadd.f32 %v6842_v25, %v6682_v10  ;;  %v17090_v33 = vld [vmem:[#allocation140_spill] sm:$0xff]  ;;  %v17092_v25 = vld [vmem:[#allocation109_spill] sm:$0xff]  ;;  %v3373_v35 = vmul.f32 %v16925_v8, %v14644_v28  ;;  %v2607_v55 = vmul.f32 %v17022_v14, %v17094_v18  ;;  %v17096_v41 = vld [vmem:[#allocation142_spill] sm:$0xff] }
 0xd96   :  { %7874 = vst.msk [vmem:[%s15579_s9 + $0x1f8] sm:$0xff] %vm3916_vm8, %v7739_v56  ;;  %v3207_v40 = vadd.f32 %v3175_v50, %v3014_v62  ;;  %v2411_v56 = vmul.f32 %v16896_v51, %v17089_v59  ;;  %v2987_v16 = vmul.f32 %v16898_v17, %v17090_v33  ;;  %v17095_v28 = vld [vmem:[#allocation12_spill] sm:$0xff]  ;;  %v2990_v19 = vmul.f32 %v16898_v17, %v17096_v41  ;;  %v17097_v50 = vld [vmem:[#allocation57_spill] sm:$0xff] }
 0xd97   :  { %v15225_v32 = vadd.f32 %v7415_v9, %v7255_v29  ;;  %v7066_v42 = vadd.f32 %v7034_v23, %v6874_v4  ;;  %v3180_v29 = vmul.f32 %v16900_v49, %v17092_v25  ;;  %v2414_v0 = vmul.f32 %v16896_v51, %v17095_v28 }
 0xd98   :  { %v3400_v63 = vadd.f32 %v3368_v3, %v3207_v40  ;;  %v2636_v9 = vadd.f32 %v2604_v44, %v2411_v56  ;;  %v17100_v44 = vld [vmem:[#allocation88_spill] sm:$0xff]  ;;  %v17101_v56 = vld [vmem:[#allocation193_spill] sm:$0xff] }
 0xd99   :  { %v7258_v22 = vadd.f32 %v7226_v39, %v7066_v42  ;;  %v2639_v62 = vadd.f32 %v2607_v55, %v2414_v0  ;;  %v2610_v33 = vmul.f32 %v17022_v14, %v17101_v56  ;;  %v3379_v55 = vmul.f32 %v16925_v8, %v14671_v11  ;;  %v17107_v0 = vld [vmem:[#allocation195_spill] sm:$0xff]  ;;  %v3861_v11 = vld [vmem:[%s15570_s0 + $0x48] sm:$0xff] }
 0xd9a   :  { %v3593_v23 = vadd.f32 %v3561_v54, %v3400_v63  ;;  %v2613_v41 = vmul.f32 %v17022_v14, %v17107_v0 }
 0xd9b   :  { %7501 = vperm.xlu0 %7962, %v16990_v45   ;;  %v17087_v45 = vld [vmem:[#allocation83_spill] sm:$0xff] }
 0xd9c   :  { %v7382_v13 = vpop.permute.xlu0 %7381  ;;  %v2794_v34 = vmul.f32 %v16897_v27, %v17087_v45 }
 0xd9d   :  { %v7418_v46 = vmul.f32 %v7382_v13, %v17002_v2  ;;  %v3566_v13 = vmul.f32 %v17002_v2, %v17097_v50 }
 0xd9e   :  { %v2826_v52 = vadd.f32 %v2794_v34, %v2633_v15  ;;  %v17099_v34 = vld [vmem:[#allocation138_spill] sm:$0xff] }
 0xd9f   :  { %v15243_v7 = vadd.f32 %v7418_v46, %v7258_v22  ;;  %v17098_v22 = vld [vmem:[#allocation201_spill] sm:$0xff]  ;;  %v3376_v40 = vmul.f32 %v16925_v8, %v17099_v34 }
 0xda0   :  { %v3019_v10 = vadd.f32 %v2987_v16, %v2826_v52  ;;  %v3183_v46 = vmul.f32 %v16900_v49, %v17098_v22  ;;  %v2800_v52 = vmul.f32 %v16897_v27, %v17100_v44  ;;  %v3858_v16 = vld [vmem:[%s15570_s0 + $0x30] sm:$0xff]  ;;  %v17108_v22 = vld [vmem:[#allocation41_spill] sm:$0xff] }
 0xda2   :  { %v3212_v4 = vadd.f32 %v3180_v29, %v3019_v10  ;;  %v2832_v38 = vadd.f32 %v2800_v52, %v2639_v62  ;;  %v17102_v29 = vld [vmem:[#allocation53_spill] sm:$0xff]  ;;  %v17110_v62 = vld [vmem:[#allocation148_spill] sm:$0xff] }
 0xda3   :  { %7513 = vperm.xlu0 %7962, %v16996_v60   ;;  %v2797_v60 = vmul.f32 %v16897_v27, %v17093_v20 }
 0xda4   :  { %v3405_v61 = vadd.f32 %v3373_v35, %v3212_v4  ;;  %v17104_v35 = vld [vmem:[#allocation82_spill] sm:$0xff] }
 0xda5   :  { %v3630_v1 = vpop.permute.xlu0 %3629  ;;  %v2829_v42 = vadd.f32 %v2797_v60, %v2636_v9  ;;  %v2417_v9 = vmul.f32 %v16896_v51, %v17102_v29 }
 0xda6   :  { %v3754_v21 = vmul.f32 %v17018_v53, %v3630_v1  ;;  %v17103_v1 = vld [vmem:[#allocation145_spill] sm:$0xff] }
 0xda7   :  { %v3022_v45 = vadd.f32 %v2990_v19, %v2829_v42  ;;  %v2993_v10 = vmul.f32 %v16898_v17, %v17103_v1  ;;  %v2642_v4 = vadd.f32 %v2610_v33, %v2417_v9  ;;  %v17106_v42 = vld [vmem:[#allocation91_spill] sm:$0xff]  ;;  %v17115_v9 = vld [vmem:[#allocation197_spill] sm:$0xff] }
 0xda8   :  { %v3786_v39 = vadd.f32 %v3754_v21, %v3593_v23  ;;  %v3569_v23 = vmul.f32 %v17002_v2, %v17104_v35  ;;  %v17105_v21 = vld [vmem:[#allocation177_spill] sm:$0xff]  ;;  %v2616_v1 = vmul.f32 %v17022_v14, %v17115_v9 }
 0xda9   :  { %v3215_v63 = vadd.f32 %v3183_v46, %v3022_v45  ;;  %v3186_v20 = vmul.f32 %v16900_v49, %v17105_v21  ;;  %v3025_v18 = vadd.f32 %v2993_v10, %v2832_v38  ;;  %v2420_v46 = vmul.f32 %v16896_v51, %v17108_v22  ;;  %v17111_v45 = vld [vmem:[#allocation194_spill] sm:$0xff]  ;;  %v3864_v10 = vld [vmem:[%s15570_s0 + $0x60] sm:$0xff] }
 0xdaa   :  { %v3821_v36 = vadd.f32 %v14829_v24, %v3786_v39  ;;  %v3572_v34 = vmul.f32 %v17002_v2, %v17111_v45  ;;  %v17114_v38 = vld [vmem:[#allocation94_spill] sm:$0xff]  ;;  %v3867_v45 = vld [vmem:[%s15570_s0 + $0x78] sm:$0xff] }
 0xdab   :  { %7525 = vperm.xlu0 %7962, %v16997_v48   ;;  %v3598_v48 = vadd.f32 %v3566_v13, %v3405_v61  ;;  %v3408_v54 = vadd.f32 %v3376_v40, %v3215_v63  ;;  %v2803_v61 = vmul.f32 %v16897_v27, %v17106_v42  ;;  %v17112_v40 = vld [vmem:[#allocation127_spill] sm:$0xff]  ;;  %v2645_v44 = vadd.f32 %v2613_v41, %v2420_v46 }
 0xdac   :  { %v3885_v15 = vadd.f32 %v3853_v26, %v3821_v36  ;;  %v3218_v36 = vadd.f32 %v3186_v20, %v3025_v18  ;;  %v17116_v20 = vld [vmem:[#allocation49_spill] sm:$0xff]  ;;  %v17121_v41 = vld [vmem:[#allocation107_spill] sm:$0xff] }
 0xdad   :  { %v3650_v3 = vpop.permute.xlu0 %3649  ;;  %v2835_v19 = vadd.f32 %v2803_v61, %v2642_v4  ;;  %v17117_v4 = vld [vmem:[#allocation66_spill] sm:$0xff] }
 0xdae   :  { %3918 = vst.msk [vmem:[%s15579_s9 + $0x8] sm:$0xff] %vm3916_vm8, %v3885_v15  ;;  %v3759_v30 = vmul.f32 %v17018_v53, %v3650_v3  ;;  %v3411_v50 = vadd.f32 %v3379_v55, %v3218_v36  ;;  %v17109_v15 = vld [vmem:[#allocation61_spill] sm:$0xff]  ;;  %v2996_v3 = vmul.f32 %v16898_v17, %v17110_v62  ;;  %v17119_v55 = vld [vmem:[#allocation6_spill] sm:$0xff] }
 0xdaf   :  { %v17123_v62 = vld [vmem:[#allocation198_spill] sm:$0xff] }
 0xdb0   :  { %v3791_v59 = vadd.f32 %v3759_v30, %v3598_v48  ;;  %v3189_v48 = vmul.f32 %v16900_v49, %v17112_v40  ;;  %v3028_v63 = vadd.f32 %v2996_v3, %v2835_v19  ;;  %v3604_v33 = vadd.f32 %v3572_v34, %v3411_v50 }
 0xdb1   :  { %v2619_v3 = vmul.f32 %v17022_v14, %v17123_v62  ;;  %v17136_v62 = vld [vmem:[#allocation31_spill] sm:$0xff] }
 0xdb2   :  { %v3826_v25 = vadd.f32 %v14829_v24, %v3791_v59  ;;  %v17113_v59 = vld [vmem:[#allocation60_spill] sm:$0xff] }
 0xdb3   :  { %7537 = vperm.xlu0 %7962, %v16998_v47   ;;  %v3601_v47 = vadd.f32 %v3569_v23, %v3408_v54  ;;  %v3382_v56 = vmul.f32 %v16925_v8, %v17113_v59  ;;  %v2806_v54 = vmul.f32 %v16897_v27, %v17114_v38 }
 0xdb4   :  { %v3890_v60 = vadd.f32 %v3858_v16, %v3826_v25  ;;  %v3221_v25 = vadd.f32 %v3189_v48, %v3028_v63  ;;  %v17126_v63 = vld [vmem:[#allocation154_spill] sm:$0xff] }
 0xdb5   :  { %v3662_v39 = vpop.permute.xlu0 %3661  ;;  %v2838_v35 = vadd.f32 %v2806_v54, %v2645_v44  ;;  %v3002_v59 = vmul.f32 %v16898_v17, %v17126_v63 }
 0xdb6   :  { %3923 = vst.msk [vmem:[%s15579_s9 + $0x30] sm:$0xff] %vm3916_vm8, %v3890_v60  ;;  %v3762_v26 = vmul.f32 %v17018_v53, %v3662_v39  ;;  %v3414_v23 = vadd.f32 %v3382_v56, %v3221_v25  ;;  %v2423_v60 = vmul.f32 %v16896_v51, %v17116_v20  ;;  %v17118_v39 = vld [vmem:[#allocation151_spill] sm:$0xff]  ;;  %v17127_v56 = vld [vmem:[#allocation114_spill] sm:$0xff] }
 0xdb7   :  { %v2999_v18 = vmul.f32 %v16898_v17, %v17118_v39  ;;  %v17131_v39 = vld [vmem:[#allocation199_spill] sm:$0xff] }
 0xdb8   :  { %v3794_v28 = vadd.f32 %v3762_v26, %v3601_v47  ;;  %v3575_v47 = vmul.f32 %v17002_v2, %v17119_v55  ;;  %v17120_v26 = vld [vmem:[#allocation178_spill] sm:$0xff]  ;;  %v2648_v36 = vadd.f32 %v2616_v1, %v2423_v60  ;;  %v17129_v1 = vld [vmem:[#allocation76_spill] sm:$0xff]  ;;  %v3870_v55 = vld [vmem:[%s15570_s0 + $0x90] sm:$0xff] }
 0xdb9   :  { %v3192_v42 = vmul.f32 %v16900_v49, %v17120_v26  ;;  %v3031_v0 = vadd.f32 %v2999_v18, %v2838_v35  ;;  %v2622_v18 = vmul.f32 %v17022_v14, %v17131_v39 }
 0xdba   :  { %v3829_v13 = vadd.f32 %v14829_v24, %v3794_v28  ;;  %v3607_v19 = vadd.f32 %v3575_v47, %v3414_v23 }
 0xdbb   :  { %7549 = vperm.xlu0 %7962, %v17109_v15   ;;  %v3224_v46 = vadd.f32 %v3192_v42, %v3031_v0 }
 0xdbc   :  { %v3893_v30 = vadd.f32 %v3861_v11, %v3829_v13  ;;  %v3385_v11 = vmul.f32 %v16925_v8, %v17121_v41  ;;  %v17122_v13 = vld [vmem:[#allocation97_spill] sm:$0xff]  ;;  %v17134_v41 = vld [vmem:[#allocation78_spill] sm:$0xff] }
 0xdbd   :  { %v3674_v52 = vpop.permute.xlu0 %3673  ;;  %v2809_v22 = vmul.f32 %v16897_v27, %v17122_v13 }
 0xdbe   :  { %3926 = vst.msk [vmem:[%s15579_s9 + $0x48] sm:$0xff] %vm3916_vm8, %v3893_v30  ;;  %v3765_v16 = vmul.f32 %v17018_v53, %v3674_v52  ;;  %v3417_v40 = vadd.f32 %v3385_v11, %v3224_v46  ;;  %v17124_v30 = vld [vmem:[#allocation18_spill] sm:$0xff]  ;;  %v17125_v52 = vld [vmem:[#allocation144_spill] sm:$0xff]  ;;  %v3581_v11 = vmul.f32 %v17002_v2, %v17134_v41 }
 0xdbf   :  { %v2841_v34 = vadd.f32 %v2809_v22, %v2648_v36  ;;  %v2426_v44 = vmul.f32 %v16896_v51, %v17124_v30 }
 0xdc0   :  { %v3797_v29 = vadd.f32 %v3765_v16, %v3604_v33  ;;  %v3578_v33 = vmul.f32 %v17002_v2, %v17127_v56  ;;  %v17128_v16 = vld [vmem:[#allocation99_spill] sm:$0xff] }
 0xdc1   :  { %v3195_v38 = vmul.f32 %v16900_v49, %v17128_v16  ;;  %v2651_v25 = vadd.f32 %v2619_v3, %v2426_v44  ;;  %v3034_v9 = vadd.f32 %v3002_v59, %v2841_v34  ;;  %v3391_v3 = vmul.f32 %v16925_v8, %v17136_v62  ;;  %v3873_v59 = vld [vmem:[%s15570_s0 + $0xa8] sm:$0xff] }
 0xdc2   :  { %v3832_v21 = vadd.f32 %v14829_v24, %v3797_v29  ;;  %v3610_v35 = vadd.f32 %v3578_v33, %v3417_v40  ;;  %v17137_v40 = vld [vmem:[#allocation103_spill] sm:$0xff] }
 0xdc3   :  { %7561 = vperm.xlu0 %7962, %v17117_v4   ;;  %v3227_v60 = vadd.f32 %v3195_v38, %v3034_v9  ;;  %v17139_v38 = vld [vmem:[#allocation13_spill] sm:$0xff]  ;;  %v17141_v9 = vld [vmem:[#allocation146_spill] sm:$0xff] }
 0xdc4   :  { %v3896_v61 = vadd.f32 %v3864_v10, %v3832_v21  ;;  %v3388_v10 = vmul.f32 %v16925_v8, %v17129_v1  ;;  %v17130_v21 = vld [vmem:[#allocation100_spill] sm:$0xff]  ;;  %v3584_v1 = vmul.f32 %v17002_v2, %v17141_v9 }
 0xdc5   :  { %v3686_v28 = vpop.permute.xlu0 %3685  ;;  %v2812_v20 = vmul.f32 %v16897_v27, %v17130_v21 }
 0xdc6   :  { %3929 = vst.msk [vmem:[%s15579_s9 + $0x60] sm:$0xff] %vm3916_vm8, %v3896_v61  ;;  %v3768_v50 = vmul.f32 %v17018_v53, %v3686_v28  ;;  %v3420_v26 = vadd.f32 %v3388_v10, %v3227_v60  ;;  %v17132_v61 = vld [vmem:[#allocation51_spill] sm:$0xff]  ;;  %v17133_v28 = vld [vmem:[#allocation157_spill] sm:$0xff]  ;;  %v17142_v10 = vld [vmem:[#allocation16_spill] sm:$0xff] }
 0xdc7   :  { %v2844_v47 = vadd.f32 %v2812_v20, %v2651_v25  ;;  %v2429_v36 = vmul.f32 %v16896_v51, %v17132_v61  ;;  %v3005_v0 = vmul.f32 %v16898_v17, %v17133_v28  ;;  %v17140_v25 = vld [vmem:[#allocation160_spill] sm:$0xff]  ;;  %v17143_v60 = vld [vmem:[#allocation131_spill] sm:$0xff] }
 0xdc8   :  { %v3800_v15 = vadd.f32 %v3768_v50, %v3607_v19  ;;  %v17135_v19 = vld [vmem:[#allocation204_spill] sm:$0xff] }
 0xdc9   :  { %v3198_v50 = vmul.f32 %v16900_v49, %v17135_v19  ;;  %v2654_v22 = vadd.f32 %v2622_v18, %v2429_v36  ;;  %v17144_v18 = vld [vmem:[#allocation106_spill] sm:$0xff] }
 0xdca   :  { %v3835_v48 = vadd.f32 %v14829_v24, %v3800_v15  ;;  %v3037_v15 = vadd.f32 %v3005_v0, %v2844_v47  ;;  %v17145_v0 = vld [vmem:[#allocation163_spill] sm:$0xff] }
 0xdcb   :  { %7573 = vperm.xlu0 %7962, %v17125_v52   ;;  %v17138_v52 = vld [vmem:[#allocation202_spill] sm:$0xff]  ;;  %v3011_v41 = vmul.f32 %v16898_v17, %v17145_v0 }
 0xdcc   :  { %v3899_v54 = vadd.f32 %v3867_v45, %v3835_v48  ;;  %v3613_v45 = vadd.f32 %v3581_v11, %v3420_v26  ;;  %v2815_v48 = vmul.f32 %v16897_v27, %v17137_v40  ;;  %v3230_v30 = vadd.f32 %v3198_v50, %v3037_v15  ;;  %v17146_v11 = vld [vmem:[#allocation62_spill] sm:$0xff]  ;;  %v17147_v50 = vld [vmem:[#allocation4_spill] sm:$0xff]  ;;  %v17148_v15 = vld [vmem:[#allocation113_spill] sm:$0xff] }
 0xdcd   :  { %v3698_v29 = vpop.permute.xlu0 %3697  ;;  %v2625_v63 = vmul.f32 %v17022_v14, %v17138_v52  ;;  %v3201_v14 = vmul.f32 %v16900_v49, %v17142_v10  ;;  %v3587_v19 = vmul.f32 %v17002_v2, %v17146_v11  ;;  %v3397_v62 = vmul.f32 %v16925_v8, %v17148_v15 }
 0xdce   :  { %3932 = vst.msk [vmem:[%s15579_s9 + $0x78] sm:$0xff] %vm3916_vm8, %v3899_v54  ;;  %v3771_v23 = vmul.f32 %v17018_v53, %v3698_v29  ;;  %v2847_v56 = vadd.f32 %v2815_v48, %v2654_v22  ;;  %v3423_v33 = vadd.f32 %v3391_v3, %v3230_v30  ;;  %v2432_v54 = vmul.f32 %v16896_v51, %v17139_v38  ;;  %v17149_v30 = vld [vmem:[#allocation172_spill] sm:$0xff] }
 0xdcf   :  { %v3008_v29 = vmul.f32 %v16898_v17, %v17140_v25 }
 0xdd0   :  { %v3803_v4 = vadd.f32 %v3771_v23, %v3610_v35  ;;  %v2657_v23 = vadd.f32 %v2625_v63, %v2432_v54  ;;  %v3616_v51 = vadd.f32 %v3584_v1, %v3423_v33  ;;  %v3882_v33 = vld [vmem:[%s15570_s0 + $0xf0] sm:$0xff] }
 0xdd1   :  { %v3040_v20 = vadd.f32 %v3008_v29, %v2847_v56  ;;  %v7812_v29 = vld [vmem:[%s15570_s0 + $0x108] sm:$0xff] }
 0xdd2   :  { %v3838_v42 = vadd.f32 %v14829_v24, %v3803_v4  ;;  %v3394_v4 = vmul.f32 %v16925_v8, %v17143_v60  ;;  %v3590_v8 = vmul.f32 %v17002_v2, %v17149_v30 }
 0xdd3   :  { %v3233_v47 = vadd.f32 %v3201_v14, %v3040_v20 }
 0xdd4   :  { %v3902_v13 = vadd.f32 %v3870_v55, %v3838_v42  ;;  %v2818_v55 = vmul.f32 %v16897_v27, %v17144_v18  ;;  %v3876_v42 = vld [vmem:[%s15570_s0 + $0xc0] sm:$0xff] }
 0xdd5   :  { %v3710_v46 = vpop.permute.xlu0 %3709  ;;  %v3426_v36 = vadd.f32 %v3394_v4, %v3233_v47 }
 0xdd6   :  { %3935 = vst.msk [vmem:[%s15579_s9 + $0x90] sm:$0xff] %vm3916_vm8, %v3902_v13  ;;  %v3774_v34 = vmul.f32 %v17018_v53, %v3710_v46  ;;  %v2850_v61 = vadd.f32 %v2818_v55, %v2657_v23  ;;  %v3204_v13 = vmul.f32 %v16900_v49, %v17147_v50  ;;  %v3879_v49 = vld [vmem:[%s15570_s0 + $0xd8] sm:$0xff] }
 0xdd7   :  { %v3619_v3 = vadd.f32 %v3587_v19, %v3426_v36 }
 0xdd8   :  { %v3806_v44 = vadd.f32 %v3774_v34, %v3613_v45  ;;  %v3043_v46 = vadd.f32 %v3011_v41, %v2850_v61 }
 0xdda   :  { %v3841_v16 = vadd.f32 %v14829_v24, %v3806_v44  ;;  %v3236_v45 = vadd.f32 %v3204_v13, %v3043_v46 }
 0xddc   :  { %v3905_v35 = vadd.f32 %v3873_v59, %v3841_v16  ;;  %v3429_v40 = vadd.f32 %v3397_v62, %v3236_v45 }
 0xddd   :  { %v3722_v21 = vpop.permute.xlu0 %3721 }
 0xdde   :  { %3938 = vst.msk [vmem:[%s15579_s9 + $0xa8] sm:$0xff] %vm3916_vm8, %v3905_v35  ;;  %v3777_v39 = vmul.f32 %v17018_v53, %v3722_v21  ;;  %v3622_v63 = vadd.f32 %v3590_v8, %v3429_v40 }
 0xde0   :  { %v3809_v26 = vadd.f32 %v3777_v39, %v3616_v51 }
 0xde2   :  { %v3844_v28 = vadd.f32 %v14829_v24, %v3809_v26 }
 0xde4   :  { %v3908_v27 = vadd.f32 %v3876_v42, %v3844_v28 }
 0xde5   :  { %v3734_v22 = vpop.permute.xlu0 %3733 }
 0xde6   :  { %3941 = vst.msk [vmem:[%s15579_s9 + $0xc0] sm:$0xff] %vm3916_vm8, %v3908_v27  ;;  %v3780_v17 = vmul.f32 %v17018_v53, %v3734_v22 }
 0xde8   :  { %v3812_v34 = vadd.f32 %v3780_v17, %v3619_v3 }
 0xdea   :  { %v3847_v48 = vadd.f32 %v14829_v24, %v3812_v34  ;;  %v15463_v24 = vld [vmem:[%s15577_s8] ss:$0 sm:$0xff] }
 0xdec   :  { %v3911_v44 = vadd.f32 %v3879_v49, %v3847_v48 }
 0xded   :  { %v3746_v52 = vpop.permute.xlu0 %3745 }
 0xdee   :  { %3944 = vst.msk [vmem:[%s15579_s9 + $0xd8] sm:$0xff] %vm3916_vm8, %v3911_v44  ;;  %v3783_v59 = vmul.f32 %v17018_v53, %v3746_v52 }
 0xdf0   :  { %v3815_v56 = vadd.f32 %v3783_v59, %v3622_v63 }
 0xdf2   :  { %v3850_v2 = vadd.f32 %v15463_v24, %v3815_v56 }
 0xdf4   :  { %v3914_v16 = vadd.f32 %v3882_v33, %v3850_v2 }
 0xdf5   :  { %v7458_v38 = vpop.permute.xlu0 %7457 }
 0xdf6   :  { %3947 = vst.msk [vmem:[%s15579_s9 + $0xf0] sm:$0xff] %vm3916_vm8, %v3914_v16  ;;  %v7581_v54 = vmul.f32 %v7458_v38, %v17018_v53 }
 0xdf8   :  { %v7613_v25 = vadd.f32 %v7581_v54, %v14964_v6  ;;  %v7817_v6 = vld [vmem:[%s15570_s0 + $0x130] sm:$0xff] }
 0xdfa   :  { %v7645_v9 = vadd.f32 %v15463_v24, %v7613_v25 }
 0xdfc   :  { %v7709_v1 = vadd.f32 %v7812_v29, %v7645_v9 }
 0xdfd   :  { %v7478_v10 = vpop.permute.xlu0 %7477 }
 0xdfe   :  { %7844 = vst.msk [vmem:[%s15579_s9 + $0x108] sm:$0xff] %vm3916_vm8, %v7709_v1  ;;  %v7586_v14 = vmul.f32 %v7478_v10, %v17018_v53 }
 0xe00   :  { %v7618_v35 = vadd.f32 %v7586_v14, %v15000_v57  ;;  %v7820_v57 = vld [vmem:[%s15570_s0 + $0x148] sm:$0xff] }
 0xe02   :  { %v7650_v23 = vadd.f32 %v15463_v24, %v7618_v35 }
 0xe04   :  { %v7714_v21 = vadd.f32 %v7817_v6, %v7650_v23 }
 0xe05   :  { %v7490_v20 = vpop.permute.xlu0 %7489 }
 0xe06   :  { %7849 = vst.msk [vmem:[%s15579_s9 + $0x130] sm:$0xff] %vm3916_vm8, %v7714_v21  ;;  %v7589_v60 = vmul.f32 %v7490_v20, %v17018_v53 }
 0xe08   :  { %v7621_v4 = vadd.f32 %v7589_v60, %v15036_v43  ;;  %v7823_v43 = vld [vmem:[%s15570_s0 + $0x160] sm:$0xff] }
 0xe0a   :  { %v7653_v51 = vadd.f32 %v15463_v24, %v7621_v4 }
 0xe0c   :  { %v7717_v39 = vadd.f32 %v7820_v57, %v7653_v51 }
 0xe0d   :  { %v7502_v18 = vpop.permute.xlu0 %7501 }
 0xe0e   :  { %7852 = vst.msk [vmem:[%s15579_s9 + $0x148] sm:$0xff] %vm3916_vm8, %v7717_v39  ;;  %v7592_v55 = vmul.f32 %v7502_v18, %v17018_v53 }
 0xe10   :  { %v7624_v47 = vadd.f32 %v7592_v55, %v15072_v31  ;;  %v7826_v31 = vld [vmem:[%s15570_s0 + $0x178] sm:$0xff] }
 0xe12   :  { %v7656_v26 = vadd.f32 %v15463_v24, %v7624_v47 }
 0xe14   :  { %v7720_v42 = vadd.f32 %v7823_v43, %v7656_v26 }
 0xe15   :  { %v7514_v61 = vpop.permute.xlu0 %7513 }
 0xe16   :  { %7855 = vst.msk [vmem:[%s15579_s9 + $0x160] sm:$0xff] %vm3916_vm8, %v7720_v42  ;;  %v7595_v36 = vmul.f32 %v7514_v61, %v17018_v53 }
 0xe18   :  { %v7627_v28 = vadd.f32 %v7595_v36, %v15108_v37  ;;  %v7829_v37 = vld [vmem:[%s15570_s0 + $0x190] sm:$0xff] }
 0xe1a   :  { %v7659_v0 = vadd.f32 %v15463_v24, %v7627_v28 }
 0xe1c   :  { %v7723_v41 = vadd.f32 %v7826_v31, %v7659_v0 }
 0xe1d   :  { %v7526_v11 = vpop.permute.xlu0 %7525 }
 0xe1e   :  { %7858 = vst.msk [vmem:[%s15579_s9 + $0x178] sm:$0xff] %vm3916_vm8, %v7723_v41  ;;  %v7598_v19 = vmul.f32 %v7526_v11, %v17018_v53 }
 0xe20   :  { %v7630_v50 = vadd.f32 %v7598_v19, %v15144_v12  ;;  %v7832_v12 = vld [vmem:[%s15570_s0 + $0x1a8] sm:$0xff] }
 0xe22   :  { %v7662_v13 = vadd.f32 %v15463_v24, %v7630_v50 }
 0xe24   :  { %v7726_v27 = vadd.f32 %v7829_v37, %v7662_v13 }
 0xe25   :  { %v7538_v22 = vpop.permute.xlu0 %7537 }
 0xe26   :  { %7861 = vst.msk [vmem:[%s15579_s9 + $0x190] sm:$0xff] %vm3916_vm8, %v7726_v27  ;;  %v7601_v46 = vmul.f32 %v7538_v22, %v17018_v53 }
 0xe28   :  { %v7633_v15 = vadd.f32 %v7601_v46, %v15170_v5  ;;  %v7835_v5 = vld [vmem:[%s15570_s0 + $0x1c0] sm:$0xff] }
 0xe2a   :  { %v7665_v62 = vadd.f32 %v15463_v24, %v7633_v15 }
 0xe2c   :  { %v7729_v3 = vadd.f32 %v7832_v12, %v7665_v62 }
 0xe2d   :  { %v7550_v17 = vpop.permute.xlu0 %7549 }
 0xe2e   :  { %7864 = vst.msk [vmem:[%s15579_s9 + $0x1a8] sm:$0xff] %vm3916_vm8, %v7729_v3  ;;  %v7604_v45 = vmul.f32 %v7550_v17, %v17018_v53 }
 0xe30   :  { %v7636_v34 = vadd.f32 %v7604_v45, %v15196_v58  ;;  %v7838_v58 = vld [vmem:[%s15570_s0 + $0x1d8] sm:$0xff] }
 0xe32   :  { %v7668_v49 = vadd.f32 %v15463_v24, %v7636_v34 }
 0xe34   :  { %v7732_v40 = vadd.f32 %v7835_v5, %v7668_v49 }
 0xe35   :  { %v7562_v48 = vpop.permute.xlu0 %7561 }
 0xe36   :  { %7867 = vst.msk [vmem:[%s15579_s9 + $0x1c0] sm:$0xff] %vm3916_vm8, %v7732_v40  ;;  %v7607_v30 = vmul.f32 %v7562_v48, %v17018_v53 }
 0xe38   :  { %v7639_v8 = vadd.f32 %v7607_v30, %v15225_v32  ;;  %v7841_v32 = vld [vmem:[%s15570_s0 + $0x1f0] sm:$0xff] }
 0xe3a   :  { %v7671_v44 = vadd.f32 %v15463_v24, %v7639_v8 }
 0xe3c   :  { %v7735_v52 = vadd.f32 %v7838_v58, %v7671_v44 }
 0xe3d   :  { %v7574_v63 = vpop.permute.xlu0 %7573 }
 0xe3e   :  { %7870 = vst.msk [vmem:[%s15579_s9 + $0x1d8] sm:$0xff] %vm3916_vm8, %v7735_v52  ;;  %v7610_v59 = vmul.f32 %v7574_v63, %v17018_v53 }
 0xe40   :  { %v7642_v56 = vadd.f32 %v7610_v59, %v15243_v7 }
 0xe42   :  { %v7674_v33 = vadd.f32 %v15463_v24, %v7642_v56 }
 0xe44   :  { %v7738_v2 = vadd.f32 %v7841_v32, %v7674_v33 }
 0xe46   :  { %7873 = vst.msk [vmem:[%s15579_s9 + $0x1f0] sm:$0xff] %vm3916_vm8, %v7738_v2 }

</bundles_post_ra>
